<compile_context>
chip_gen: v6e
topology: v6e:2x2x1
jax: 0.10.0
libtpu: 0.0.40
codegen_flags: <defaults>
</compile_context>

<pallas_src>
import functools

import numpy as np
import jax
import jax.numpy as jnp
from jax.experimental import pallas as pl
from jax.experimental.pallas import tpu as pltpu

TRANS_IN = 128
CONV_DIMS = [64, 128, 256, 512]
IMG = 16  # norm_face is [B, 1, 16, 16]


# ----------------------------------------------------------------------------
# Host-side precompute of the conv-as-two-matmuls operators
# ----------------------------------------------------------------------------
def _conv_out(h):
    return (h + 2 - 3) // 2 + 1  # kernel 3, stride 2, pad 1


def _row_gather(batch, h, taps):
    """R[t][b*Ho+oh, b*H+ih] = 1 iff ih == 2*oh - 1 + taps[t] (in range)."""
    ho = _conv_out(h)
    r = np.zeros((len(taps), batch * ho, batch * h), np.float32)
    for ti, di in enumerate(taps):
        for b in range(batch):
            for oh in range(ho):
                ih = 2 * oh - 1 + di
                if 0 <= ih < h:
                    r[ti, b * ho + oh, b * h + ih] = 1.0
    return r


def _col_weight(w_spatial, cin, cout, conv_w, taps):
    """M[t][iw*cin+ci, ow*cout+co] = conv_w[di, dj, ci, co] with dj = iw-(2*ow-1)."""
    wo = _conv_out(w_spatial)
    m = np.zeros((len(taps), w_spatial * cin, wo * cout), np.float32)
    for ti, di in enumerate(taps):
        for ow in range(wo):
            for dj in range(3):
                iw = 2 * ow - 1 + dj
                if 0 <= iw < w_spatial:
                    m[ti, iw * cin:(iw + 1) * cin,
                      ow * cout:(ow + 1) * cout] = conv_w[di, dj]
    return m


def _gap_rows(batch, ho):
    """Gv[b, b*Ho+oh] = 1/Ho  (per-batch mean over output rows)."""
    g = np.zeros((batch, batch * ho), np.float32)
    for b in range(batch):
        g[b, b * ho:(b + 1) * ho] = 1.0 / ho
    return g


# ----------------------------------------------------------------------------
# The single fused Pallas kernel
# ----------------------------------------------------------------------------
def _fused_forward_kernel(
        x0_ref,
        r0, m0, cb0, gv0, gwp0, pb0,
        r1, m1, cb1, gv1, gwp1, pb1,
        r2, m2_hbm, cb2, gv2, gwp2, pb2,
        r3, m3_hbm, cb3, gwp3, pb3,
        fw, fb, hw, hb,
        out_ref,
        m2_vmem, m3_vmem, dma_sems):
    bf16, f32 = jnp.bfloat16, jnp.float32

    # Prefetch the two largest fused conv-weight tensors (stages 2 & 3) so their
    # HBM->VMEM DMA overlaps with stage-0/1 compute.
    cp2 = pltpu.make_async_copy(m2_hbm, m2_vmem, dma_sems.at[0])
    cp3 = pltpu.make_async_copy(m3_hbm, m3_vmem, dma_sems.at[1])
    cp2.start()
    cp3.start()

    def dot_f32(a, b):
        return jnp.dot(a, b, preferred_element_type=f32)

    def conv_stage(x_bf, r_ref, m_ref, cb_ref):
        # 3x3 / stride-2 / pad-1 conv in the packed [B*H, W*Cin] layout:
        #   conv = relu( sum_di (R_di @ X) @ M_di + bias_tiled )
        acc = None
        for t in range(r_ref.shape[0]):
            y = dot_f32(r_ref[t], x_bf).astype(bf16)   # exact 0/1 row selection
            part = dot_f32(y, m_ref[t])
            acc = part if acc is None else acc + part
        return jnp.maximum(acc + cb_ref[...], 0.0)

    def gap_proj(conv_bf, gv_ref, gwp_ref, pb_ref):
        # GAP over rows (tiny matmul) then GAP-over-cols fused into the projection.
        rowpool = dot_f32(gv_ref[...], conv_bf).astype(bf16)     # [B, Wo*C]
        return jnp.maximum(dot_f32(rowpool, gwp_ref[...]) + pb_ref[...], 0.0)

    # ---- stage 0: [B*16, 16] -> [B*8, 8*64] --------------------------------
    x0 = x0_ref[...]
    c0 = conv_stage(x0, r0, m0, cb0)
    x1 = c0.astype(bf16)
    feat0 = gap_proj(x1, gv0, gwp0, pb0)                         # [B, 128]

    # ---- stage 1: -> [B*4, 4*128] -------------------------------------------
    c1 = conv_stage(x1, r1, m1, cb1)
    x2 = c1.astype(bf16)
    feat1 = gap_proj(x2, gv1, gwp1, pb1)

    # ---- stage 2 (weights arrive via prefetched DMA) -> [B*2, 2*256] ---------
    cp2.wait()
    c2 = conv_stage(x2, r2, m2_vmem, cb2)
    x3 = c2.astype(bf16)
    feat2 = gap_proj(x3, gv2, gwp2, pb2)

    # ---- stage 3 -> [B, 512]; spatial is 1x1, so GAP is the identity ---------
    cp3.wait()
    c3 = conv_stage(x3, r3, m3_vmem, cb3)
    pooled3 = c3.astype(bf16)
    feat3 = jnp.maximum(dot_f32(pooled3, gwp3[...]) + pb3[...], 0.0)

    # ---- feature_n + all 5 heads fused into one block-diagonal matmul --------
    feature_n = dot_f32(pooled3, fw[...]) + fb[...]              # [B, 128]
    feats = jnp.concatenate([feat0, feat1, feat2, feat3, feature_n], axis=1)
    heads = dot_f32(feats.astype(bf16), hw[...]) + hb[...]       # [B, 16]
    out_ref[...] = heads.astype(out_ref.dtype)


# ----------------------------------------------------------------------------
# Wrapper glue
# ----------------------------------------------------------------------------
_INPUT_KEYS = [
    "x0",
    "r0", "m0", "cb0", "gv0", "gwp0", "pb0",
    "r1", "m1", "cb1", "gv1", "gwp1", "pb1",
    "r2", "m2", "cb2", "gv2", "gwp2", "pb2",
    "r3", "m3", "cb3", "gwp3", "pb3",
    "feat_w", "feat_b", "head_w", "head_b",
]
_ANY_KEYS = {"m2", "m3"}  # kept in HBM, prefetched in-kernel


def _full_spec(shape):
    zeros = (0,) * len(shape)
    return pl.BlockSpec(tuple(shape), lambda zeros=zeros: zeros)


def init_params(key):
    params = {}
    keys = iter(jax.random.split(key, 32))
    cin = 1
    for i, cout in enumerate(CONV_DIMS):
        params[f"conv{i}_w"] = 0.05 * jax.random.normal(next(keys), (3, 3, cin, cout), jnp.float32)
        params[f"conv{i}_b"] = 0.01 * jax.random.normal(next(keys), (cout,), jnp.float32)
        params[f"proj{i}_w"] = 0.05 * jax.random.normal(next(keys), (cout, TRANS_IN), jnp.float32)
        params[f"proj{i}_b"] = 0.01 * jax.random.normal(next(keys), (TRANS_IN,), jnp.float32)
        cin = cout
    params["feat_w"] = 0.05 * jax.random.normal(next(keys), (CONV_DIMS[-1], TRANS_IN), jnp.float32)
    params["feat_b"] = 0.01 * jax.random.normal(next(keys), (TRANS_IN,), jnp.float32)
    params["mlp_dir_w"] = 0.05 * jax.random.normal(next(keys), (TRANS_IN, 2), jnp.float32)
    params["mlp_dir_b"] = jnp.zeros((2,), jnp.float32)
    for i in range(len(CONV_DIMS)):
        params[f"mlp{i}_w"] = 0.05 * jax.random.normal(next(keys), (TRANS_IN, 2), jnp.float32)
        params[f"mlp{i}_b"] = jnp.zeros((2,), jnp.float32)
    return params


def pack_params(params, batch):
    """Build all kernel operands (bf16 weights, fused conv/GAP/head matrices)."""
    bf16, f32 = jnp.bfloat16, jnp.float32
    spatial = [IMG]
    for _ in CONV_DIMS:
        spatial.append(_conv_out(spatial[-1]))      # [16, 8, 4, 2, 1]

    packed = {}
    cin = 1
    for i, cout in enumerate(CONV_DIMS):
        h, ho = spatial[i], spatial[i + 1]
        wo = ho
        taps = [di for di in range(3)
                if any(0 <= 2 * oh - 1 + di < h for oh in range(ho))]
        conv_w = np.asarray(params[f"conv{i}_w"])                # [3,3,cin,cout]
        packed[f"r{i}"] = jnp.asarray(_row_gather(batch, h, taps), bf16)
        packed[f"m{i}"] = jnp.asarray(_col_weight(h, cin, cout, conv_w, taps), bf16)
        packed[f"cb{i}"] = jnp.asarray(
            np.tile(np.asarray(params[f"conv{i}_b"]).reshape(1, cout), (1, wo)), f32)
        if ho > 1:
            packed[f"gv{i}"] = jnp.asarray(_gap_rows(batch, ho), bf16)
        packed[f"gwp{i}"] = jnp.asarray(
            np.tile(np.asarray(params[f"proj{i}_w"]) / wo, (wo, 1)), bf16)
        packed[f"pb{i}"] = jnp.asarray(params[f"proj{i}_b"]).reshape(1, -1).astype(f32)
        cin = cout

    packed["feat_w"] = params["feat_w"].astype(bf16)
    packed["feat_b"] = params["feat_b"].reshape(1, -1).astype(f32)

    # Block-diagonal fused head: cols 0..7 = aux heads, cols 8..9 = gaze.
    hw = np.zeros((5 * TRANS_IN, 16), np.float32)
    hb = np.zeros((1, 16), np.float32)
    for i in range(len(CONV_DIMS)):
        hw[i * TRANS_IN:(i + 1) * TRANS_IN, 2 * i:2 * i + 2] = np.asarray(params[f"mlp{i}_w"])
        hb[0, 2 * i:2 * i + 2] = np.asarray(params[f"mlp{i}_b"])
    hw[4 * TRANS_IN:5 * TRANS_IN, 8:10] = np.asarray(params["mlp_dir_w"])
    hb[0, 8:10] = np.asarray(params["mlp_dir_b"])
    packed["head_w"] = jnp.asarray(hw, bf16)
    packed["head_b"] = jnp.asarray(hb, f32)
    return packed


@jax.jit
def _forward_impl(packed, norm_face_nchw):
    batch = norm_face_nchw.shape[0]
    # C == 1, so NCHW -> packed [B*H, W*C] layout is a pure reshape.
    x0 = norm_face_nchw.reshape(batch * IMG, IMG).astype(jnp.bfloat16)
    inputs = [x0] + [packed[k] for k in _INPUT_KEYS[1:]]
    in_specs = [
        pl.BlockSpec(memory_space=pl.ANY) if k in _ANY_KEYS else _full_spec(v.shape)
        for k, v in zip(_INPUT_KEYS, inputs)
    ]
    return pl.pallas_call(
        _fused_forward_kernel,
        out_shape=jax.ShapeDtypeStruct((batch, 16), jnp.float32),
        in_specs=in_specs,
        out_specs=_full_spec((batch, 16)),
        scratch_shapes=[
            pltpu.VMEM(tuple(packed["m2"].shape), jnp.bfloat16),
            pltpu.VMEM(tuple(packed["m3"].shape), jnp.bfloat16),
            pltpu.SemaphoreType.DMA((2,)),
        ],
        compiler_params=pltpu.CompilerParams(vmem_limit_bytes=32 * 1024 * 1024),
    )(*inputs)


def forward(packed, norm_face_nchw, train=True):
    """Mirrors Model.forward: returns (gaze, None, None, loss_gaze_n)."""
    batch = norm_face_nchw.shape[0]
    packed_batch = packed["gv0"].shape[0]
    if packed_batch != batch:
        raise ValueError(
            f"pack_params was built for batch={packed_batch}, got batch={batch}")
    out = _forward_impl(packed, norm_face_nchw)        # [B, 16]
    gaze = out[:, 8:10]
    loss_gaze_n = [out[:, 2 * i:2 * i + 2] for i in range(len(CONV_DIMS))] if train else []
    return gaze, None, None, loss_gaze_n


# ----------------------------------------------------------------------------
# Pure-JAX f32 reference of the same synthesized backbone (correctness check)
# ----------------------------------------------------------------------------
def _reference_forward(params, norm_face_nchw):
    x = norm_face_nchw.astype(jnp.float32)
    feats = []
    for i in range(len(CONV_DIMS)):
        x = jax.lax.conv_general_dilated(
            x, params[f"conv{i}_w"], window_strides=(2, 2),
            padding=((1, 1), (1, 1)),
            dimension_numbers=("NCHW", "HWIO", "NCHW"))
        x = jnp.maximum(x + params[f"conv{i}_b"].reshape(1, -1, 1, 1), 0.0)
        pooled = x.mean(axis=(2, 3))
        feats.append(jnp.maximum(pooled @ params[f"proj{i}_w"] + params[f"proj{i}_b"], 0.0))
    pooled_last = x.mean(axis=(2, 3))
    feature_n = pooled_last @ params["feat_w"] + params["feat_b"]
    gaze = feature_n @ params["mlp_dir_w"] + params["mlp_dir_b"]
    losses = [feats[i] @ params[f"mlp{i}_w"] + params[f"mlp{i}_b"]
              for i in range(len(CONV_DIMS))]
    return gaze, losses


# ----------------------------------------------------------------------------
if __name__ == "__main__":
    key = jax.random.PRNGKey(0)
    k_param, k_x = jax.random.split(key)
    params = init_params(k_param)

    # x_in['norm_face']: [batch=2, channels=1, H=16, W=16] (NCHW, PyTorch style)
    norm_face = jax.random.normal(k_x, (2, 1, IMG, IMG), dtype=jnp.float32)
    packed = pack_params(params, batch=norm_face.shape[0])

    gaze, _, _, loss_gaze_n = forward(packed, norm_face, train=True)
    jax.block_until_ready(gaze)
    for p in loss_gaze_n:
        jax.block_until_ready(p)

    assert gaze.shape == (2, 2)
    assert len(loss_gaze_n) == len(CONV_DIMS)
    assert all(p.shape == (2, 2) for p in loss_gaze_n)
    assert bool(jnp.all(jnp.isfinite(gaze)))

    # Numerical check against the f32 reference (bf16 kernel -> loose tolerance).
    ref_gaze, ref_losses = _reference_forward(params, norm_face)
    np.testing.assert_allclose(np.asarray(gaze), np.asarray(ref_gaze),
                               rtol=0.15, atol=2e-3)
    for got, want in zip(loss_gaze_n, ref_losses):
        np.testing.assert_allclose(np.asarray(got), np.asarray(want),
                                   rtol=0.15, atol=2e-3)

    print("KERNEL_OK")
</pallas_src>

<mosaic_0001>
module attributes {stable_mosaic.version = 11 : i64} {
  func.func @_fused_forward_kernel(%arg0: memref<32x16xbf16, #tpu.memory_space<vmem>>, %arg1: memref<3x16x32xbf16, #tpu.memory_space<vmem>>, %arg2: memref<3x16x512xbf16, #tpu.memory_space<vmem>>, %arg3: memref<1x512xf32, #tpu.memory_space<vmem>>, %arg4: memref<2x16xbf16, #tpu.memory_space<vmem>>, %arg5: memref<512x128xbf16, #tpu.memory_space<vmem>>, %arg6: memref<1x128xf32, #tpu.memory_space<vmem>>, %arg7: memref<3x8x16xbf16, #tpu.memory_space<vmem>>, %arg8: memref<3x512x512xbf16, #tpu.memory_space<vmem>>, %arg9: memref<1x512xf32, #tpu.memory_space<vmem>>, %arg10: memref<2x8xbf16, #tpu.memory_space<vmem>>, %arg11: memref<512x128xbf16, #tpu.memory_space<vmem>>, %arg12: memref<1x128xf32, #tpu.memory_space<vmem>>, %arg13: memref<3x4x8xbf16, #tpu.memory_space<vmem>>, %arg14: memref<3x512x512xbf16, #tpu.memory_space<any>>, %arg15: memref<1x512xf32, #tpu.memory_space<vmem>>, %arg16: memref<2x4xbf16, #tpu.memory_space<vmem>>, %arg17: memref<512x128xbf16, #tpu.memory_space<vmem>>, %arg18: memref<1x128xf32, #tpu.memory_space<vmem>>, %arg19: memref<2x2x4xbf16, #tpu.memory_space<vmem>>, %arg20: memref<2x512x512xbf16, #tpu.memory_space<any>>, %arg21: memref<1x512xf32, #tpu.memory_space<vmem>>, %arg22: memref<512x128xbf16, #tpu.memory_space<vmem>>, %arg23: memref<1x128xf32, #tpu.memory_space<vmem>>, %arg24: memref<512x128xbf16, #tpu.memory_space<vmem>>, %arg25: memref<1x128xf32, #tpu.memory_space<vmem>>, %arg26: memref<640x16xbf16, #tpu.memory_space<vmem>>, %arg27: memref<1x16xf32, #tpu.memory_space<vmem>>, %arg28: memref<2x16xf32, #tpu.memory_space<vmem>>, %arg29: memref<3x512x512xbf16, #tpu.memory_space<vmem>>, %arg30: memref<2x512x512xbf16, #tpu.memory_space<vmem>>, %arg31: memref<2x!tpu.dma_semaphore, #tpu.memory_space<semaphore_mem>>) attributes {dimension_semantics = [], scalar_prefetch = 0 : i64, scratch_operands = 3 : i64, tpu.core_type = #tpu.core_type<tc>} {
    %c0_i32 = arith.constant 0 : i32
    %0 = tpu.memref_slice %arg31[%c0_i32] : memref<2x!tpu.dma_semaphore, #tpu.memory_space<semaphore_mem>> -> memref<1x!tpu.dma_semaphore, #tpu.memory_space<semaphore_mem>>
    %1 = tpu.memref_squeeze %0 : memref<1x!tpu.dma_semaphore, #tpu.memory_space<semaphore_mem>> -> memref<!tpu.dma_semaphore, #tpu.memory_space<semaphore_mem>>
    tpu.enqueue_dma source(%arg14 : memref<3x512x512xbf16, #tpu.memory_space<any>>) target(%arg29 : memref<3x512x512xbf16, #tpu.memory_space<vmem>>) target_semaphore(%1 : memref<!tpu.dma_semaphore, #tpu.memory_space<semaphore_mem>>)
    %c1_i32 = arith.constant 1 : i32
    %2 = tpu.memref_slice %arg31[%c1_i32] : memref<2x!tpu.dma_semaphore, #tpu.memory_space<semaphore_mem>> -> memref<1x!tpu.dma_semaphore, #tpu.memory_space<semaphore_mem>>
    %3 = tpu.memref_squeeze %2 : memref<1x!tpu.dma_semaphore, #tpu.memory_space<semaphore_mem>> -> memref<!tpu.dma_semaphore, #tpu.memory_space<semaphore_mem>>
    tpu.enqueue_dma source(%arg20 : memref<2x512x512xbf16, #tpu.memory_space<any>>) target(%arg30 : memref<2x512x512xbf16, #tpu.memory_space<vmem>>) target_semaphore(%3 : memref<!tpu.dma_semaphore, #tpu.memory_space<semaphore_mem>>)
    %c0 = arith.constant 0 : index
    %c0_0 = arith.constant 0 : index
    %4 = vector.load %arg0[%c0, %c0_0] : memref<32x16xbf16, #tpu.memory_space<vmem>>, vector<32x16xbf16>
    %c0_1 = arith.constant 0 : index
    %c0_2 = arith.constant 0 : index
    %c0_3 = arith.constant 0 : index
    %5 = vector.load %arg1[%c0_1, %c0_2, %c0_3] : memref<3x16x32xbf16, #tpu.memory_space<vmem>>, vector<1x16x32xbf16>
    %6 = vector.shape_cast %5 : vector<1x16x32xbf16> to vector<16x32xbf16>
    %cst = arith.constant dense<0.000000e+00> : vector<16x16xf32>
    %7 = tpu.matmul %6, %4, %cst {dimension_numbers = #tpu.dot_dimension_numbers<[1], [0], [0], [1], [0, 0, 1, 1], [], []>} : vector<16x32xbf16>, vector<32x16xbf16>, vector<16x16xf32> -> vector<16x16xf32>
    %8 = arith.truncf %7 : vector<16x16xf32> to vector<16x16xbf16>
    %c0_4 = arith.constant 0 : index
    %c0_5 = arith.constant 0 : index
    %c0_6 = arith.constant 0 : index
    %9 = vector.load %arg2[%c0_4, %c0_5, %c0_6] : memref<3x16x512xbf16, #tpu.memory_space<vmem>>, vector<1x16x512xbf16>
    %10 = vector.shape_cast %9 : vector<1x16x512xbf16> to vector<16x512xbf16>
    %cst_7 = arith.constant dense<0.000000e+00> : vector<16x512xf32>
    %11 = tpu.matmul %8, %10, %cst_7 {dimension_numbers = #tpu.dot_dimension_numbers<[1], [0], [0], [1], [0, 0, 1, 1], [], []>} : vector<16x16xbf16>, vector<16x512xbf16>, vector<16x512xf32> -> vector<16x512xf32>
    %c1 = arith.constant 1 : index
    %c0_8 = arith.constant 0 : index
    %c0_9 = arith.constant 0 : index
    %12 = vector.load %arg1[%c1, %c0_8, %c0_9] : memref<3x16x32xbf16, #tpu.memory_space<vmem>>, vector<1x16x32xbf16>
    %13 = vector.shape_cast %12 : vector<1x16x32xbf16> to vector<16x32xbf16>
    %cst_10 = arith.constant dense<0.000000e+00> : vector<16x16xf32>
    %14 = tpu.matmul %13, %4, %cst_10 {dimension_numbers = #tpu.dot_dimension_numbers<[1], [0], [0], [1], [0, 0, 1, 1], [], []>} : vector<16x32xbf16>, vector<32x16xbf16>, vector<16x16xf32> -> vector<16x16xf32>
    %15 = arith.truncf %14 : vector<16x16xf32> to vector<16x16xbf16>
    %c1_11 = arith.constant 1 : index
    %c0_12 = arith.constant 0 : index
    %c0_13 = arith.constant 0 : index
    %16 = vector.load %arg2[%c1_11, %c0_12, %c0_13] : memref<3x16x512xbf16, #tpu.memory_space<vmem>>, vector<1x16x512xbf16>
    %17 = vector.shape_cast %16 : vector<1x16x512xbf16> to vector<16x512xbf16>
    %cst_14 = arith.constant dense<0.000000e+00> : vector<16x512xf32>
    %18 = tpu.matmul %15, %17, %cst_14 {dimension_numbers = #tpu.dot_dimension_numbers<[1], [0], [0], [1], [0, 0, 1, 1], [], []>} : vector<16x16xbf16>, vector<16x512xbf16>, vector<16x512xf32> -> vector<16x512xf32>
    %19 = arith.addf %11, %18 : vector<16x512xf32>
    %c2 = arith.constant 2 : index
    %c0_15 = arith.constant 0 : index
    %c0_16 = arith.constant 0 : index
    %20 = vector.load %arg1[%c2, %c0_15, %c0_16] : memref<3x16x32xbf16, #tpu.memory_space<vmem>>, vector<1x16x32xbf16>
    %21 = vector.shape_cast %20 : vector<1x16x32xbf16> to vector<16x32xbf16>
    %cst_17 = arith.constant dense<0.000000e+00> : vector<16x16xf32>
    %22 = tpu.matmul %21, %4, %cst_17 {dimension_numbers = #tpu.dot_dimension_numbers<[1], [0], [0], [1], [0, 0, 1, 1], [], []>} : vector<16x32xbf16>, vector<32x16xbf16>, vector<16x16xf32> -> vector<16x16xf32>
    %23 = arith.truncf %22 : vector<16x16xf32> to vector<16x16xbf16>
    %c2_18 = arith.constant 2 : index
    %c0_19 = arith.constant 0 : index
    %c0_20 = arith.constant 0 : index
    %24 = vector.load %arg2[%c2_18, %c0_19, %c0_20] : memref<3x16x512xbf16, #tpu.memory_space<vmem>>, vector<1x16x512xbf16>
    %25 = vector.shape_cast %24 : vector<1x16x512xbf16> to vector<16x512xbf16>
    %cst_21 = arith.constant dense<0.000000e+00> : vector<16x512xf32>
    %26 = tpu.matmul %23, %25, %cst_21 {dimension_numbers = #tpu.dot_dimension_numbers<[1], [0], [0], [1], [0, 0, 1, 1], [], []>} : vector<16x16xbf16>, vector<16x512xbf16>, vector<16x512xf32> -> vector<16x512xf32>
    %27 = arith.addf %19, %26 : vector<16x512xf32>
    %c0_22 = arith.constant 0 : index
    %c0_23 = arith.constant 0 : index
    %28 = vector.load %arg3[%c0_22, %c0_23] : memref<1x512xf32, #tpu.memory_space<vmem>>, vector<1x512xf32>
    %29 = vector.broadcast %28 : vector<1x512xf32> to vector<16x512xf32>
    %30 = arith.addf %27, %29 : vector<16x512xf32>
    %cst_24 = arith.constant 0.000000e+00 : f32
    %31 = vector.broadcast %cst_24 : f32 to vector<16x512xf32>
    %32 = arith.maximumf %30, %31 : vector<16x512xf32>
    %33 = arith.truncf %32 : vector<16x512xf32> to vector<16x512xbf16>
    %c0_25 = arith.constant 0 : index
    %c0_26 = arith.constant 0 : index
    %34 = vector.load %arg4[%c0_25, %c0_26] : memref<2x16xbf16, #tpu.memory_space<vmem>>, vector<2x16xbf16>
    %cst_27 = arith.constant dense<0.000000e+00> : vector<2x512xf32>
    %35 = tpu.matmul %34, %33, %cst_27 {dimension_numbers = #tpu.dot_dimension_numbers<[1], [0], [0], [1], [0, 0, 1, 1], [], []>} : vector<2x16xbf16>, vector<16x512xbf16>, vector<2x512xf32> -> vector<2x512xf32>
    %36 = arith.truncf %35 : vector<2x512xf32> to vector<2x512xbf16>
    %c0_28 = arith.constant 0 : index
    %c0_29 = arith.constant 0 : index
    %37 = vector.load %arg5[%c0_28, %c0_29] : memref<512x128xbf16, #tpu.memory_space<vmem>>, vector<512x128xbf16>
    %cst_30 = arith.constant dense<0.000000e+00> : vector<2x128xf32>
    %38 = tpu.matmul %36, %37, %cst_30 {dimension_numbers = #tpu.dot_dimension_numbers<[1], [0], [0], [1], [0, 0, 1, 1], [], []>} : vector<2x512xbf16>, vector<512x128xbf16>, vector<2x128xf32> -> vector<2x128xf32>
    %c0_31 = arith.constant 0 : index
    %c0_32 = arith.constant 0 : index
    %39 = vector.load %arg6[%c0_31, %c0_32] : memref<1x128xf32, #tpu.memory_space<vmem>>, vector<1x128xf32>
    %40 = vector.broadcast %39 : vector<1x128xf32> to vector<2x128xf32>
    %41 = arith.addf %38, %40 : vector<2x128xf32>
    %cst_33 = arith.constant 0.000000e+00 : f32
    %42 = vector.broadcast %cst_33 : f32 to vector<2x128xf32>
    %43 = arith.maximumf %41, %42 : vector<2x128xf32>
    %c0_34 = arith.constant 0 : index
    %c0_35 = arith.constant 0 : index
    %c0_36 = arith.constant 0 : index
    %44 = vector.load %arg7[%c0_34, %c0_35, %c0_36] : memref<3x8x16xbf16, #tpu.memory_space<vmem>>, vector<1x8x16xbf16>
    %45 = vector.shape_cast %44 : vector<1x8x16xbf16> to vector<8x16xbf16>
    %cst_37 = arith.constant dense<0.000000e+00> : vector<8x512xf32>
    %46 = tpu.matmul %45, %33, %cst_37 {dimension_numbers = #tpu.dot_dimension_numbers<[1], [0], [0], [1], [0, 0, 1, 1], [], []>} : vector<8x16xbf16>, vector<16x512xbf16>, vector<8x512xf32> -> vector<8x512xf32>
    %47 = arith.truncf %46 : vector<8x512xf32> to vector<8x512xbf16>
    %c0_38 = arith.constant 0 : index
    %c0_39 = arith.constant 0 : index
    %c0_40 = arith.constant 0 : index
    %48 = vector.load %arg8[%c0_38, %c0_39, %c0_40] : memref<3x512x512xbf16, #tpu.memory_space<vmem>>, vector<1x512x512xbf16>
    %49 = vector.shape_cast %48 : vector<1x512x512xbf16> to vector<512x512xbf16>
    %cst_41 = arith.constant dense<0.000000e+00> : vector<8x512xf32>
    %50 = tpu.matmul %47, %49, %cst_41 {dimension_numbers = #tpu.dot_dimension_numbers<[1], [0], [0], [1], [0, 0, 1, 1], [], []>} : vector<8x512xbf16>, vector<512x512xbf16>, vector<8x512xf32> -> vector<8x512xf32>
    %c1_42 = arith.constant 1 : index
    %c0_43 = arith.constant 0 : index
    %c0_44 = arith.constant 0 : index
    %51 = vector.load %arg7[%c1_42, %c0_43, %c0_44] : memref<3x8x16xbf16, #tpu.memory_space<vmem>>, vector<1x8x16xbf16>
    %52 = vector.shape_cast %51 : vector<1x8x16xbf16> to vector<8x16xbf16>
    %cst_45 = arith.constant dense<0.000000e+00> : vector<8x512xf32>
    %53 = tpu.matmul %52, %33, %cst_45 {dimension_numbers = #tpu.dot_dimension_numbers<[1], [0], [0], [1], [0, 0, 1, 1], [], []>} : vector<8x16xbf16>, vector<16x512xbf16>, vector<8x512xf32> -> vector<8x512xf32>
    %54 = arith.truncf %53 : vector<8x512xf32> to vector<8x512xbf16>
    %c1_46 = arith.constant 1 : index
    %c0_47 = arith.constant 0 : index
    %c0_48 = arith.constant 0 : index
    %55 = vector.load %arg8[%c1_46, %c0_47, %c0_48] : memref<3x512x512xbf16, #tpu.memory_space<vmem>>, vector<1x512x512xbf16>
    %56 = vector.shape_cast %55 : vector<1x512x512xbf16> to vector<512x512xbf16>
    %cst_49 = arith.constant dense<0.000000e+00> : vector<8x512xf32>
    %57 = tpu.matmul %54, %56, %cst_49 {dimension_numbers = #tpu.dot_dimension_numbers<[1], [0], [0], [1], [0, 0, 1, 1], [], []>} : vector<8x512xbf16>, vector<512x512xbf16>, vector<8x512xf32> -> vector<8x512xf32>
    %58 = arith.addf %50, %57 : vector<8x512xf32>
    %c2_50 = arith.constant 2 : index
    %c0_51 = arith.constant 0 : index
    %c0_52 = arith.constant 0 : index
    %59 = vector.load %arg7[%c2_50, %c0_51, %c0_52] : memref<3x8x16xbf16, #tpu.memory_space<vmem>>, vector<1x8x16xbf16>
    %60 = vector.shape_cast %59 : vector<1x8x16xbf16> to vector<8x16xbf16>
    %cst_53 = arith.constant dense<0.000000e+00> : vector<8x512xf32>
    %61 = tpu.matmul %60, %33, %cst_53 {dimension_numbers = #tpu.dot_dimension_numbers<[1], [0], [0], [1], [0, 0, 1, 1], [], []>} : vector<8x16xbf16>, vector<16x512xbf16>, vector<8x512xf32> -> vector<8x512xf32>
    %62 = arith.truncf %61 : vector<8x512xf32> to vector<8x512xbf16>
    %c2_54 = arith.constant 2 : index
    %c0_55 = arith.constant 0 : index
    %c0_56 = arith.constant 0 : index
    %63 = vector.load %arg8[%c2_54, %c0_55, %c0_56] : memref<3x512x512xbf16, #tpu.memory_space<vmem>>, vector<1x512x512xbf16>
    %64 = vector.shape_cast %63 : vector<1x512x512xbf16> to vector<512x512xbf16>
    %cst_57 = arith.constant dense<0.000000e+00> : vector<8x512xf32>
    %65 = tpu.matmul %62, %64, %cst_57 {dimension_numbers = #tpu.dot_dimension_numbers<[1], [0], [0], [1], [0, 0, 1, 1], [], []>} : vector<8x512xbf16>, vector<512x512xbf16>, vector<8x512xf32> -> vector<8x512xf32>
    %66 = arith.addf %58, %65 : vector<8x512xf32>
    %c0_58 = arith.constant 0 : index
    %c0_59 = arith.constant 0 : index
    %67 = vector.load %arg9[%c0_58, %c0_59] : memref<1x512xf32, #tpu.memory_space<vmem>>, vector<1x512xf32>
    %68 = vector.broadcast %67 : vector<1x512xf32> to vector<8x512xf32>
    %69 = arith.addf %66, %68 : vector<8x512xf32>
    %cst_60 = arith.constant 0.000000e+00 : f32
    %70 = vector.broadcast %cst_60 : f32 to vector<8x512xf32>
    %71 = arith.maximumf %69, %70 : vector<8x512xf32>
    %72 = arith.truncf %71 : vector<8x512xf32> to vector<8x512xbf16>
    %c0_61 = arith.constant 0 : index
    %c0_62 = arith.constant 0 : index
    %73 = vector.load %arg10[%c0_61, %c0_62] : memref<2x8xbf16, #tpu.memory_space<vmem>>, vector<2x8xbf16>
    %cst_63 = arith.constant dense<0.000000e+00> : vector<2x512xf32>
    %74 = tpu.matmul %73, %72, %cst_63 {dimension_numbers = #tpu.dot_dimension_numbers<[1], [0], [0], [1], [0, 0, 1, 1], [], []>} : vector<2x8xbf16>, vector<8x512xbf16>, vector<2x512xf32> -> vector<2x512xf32>
    %75 = arith.truncf %74 : vector<2x512xf32> to vector<2x512xbf16>
    %c0_64 = arith.constant 0 : index
    %c0_65 = arith.constant 0 : index
    %76 = vector.load %arg11[%c0_64, %c0_65] : memref<512x128xbf16, #tpu.memory_space<vmem>>, vector<512x128xbf16>
    %cst_66 = arith.constant dense<0.000000e+00> : vector<2x128xf32>
    %77 = tpu.matmul %75, %76, %cst_66 {dimension_numbers = #tpu.dot_dimension_numbers<[1], [0], [0], [1], [0, 0, 1, 1], [], []>} : vector<2x512xbf16>, vector<512x128xbf16>, vector<2x128xf32> -> vector<2x128xf32>
    %c0_67 = arith.constant 0 : index
    %c0_68 = arith.constant 0 : index
    %78 = vector.load %arg12[%c0_67, %c0_68] : memref<1x128xf32, #tpu.memory_space<vmem>>, vector<1x128xf32>
    %79 = vector.broadcast %78 : vector<1x128xf32> to vector<2x128xf32>
    %80 = arith.addf %77, %79 : vector<2x128xf32>
    %cst_69 = arith.constant 0.000000e+00 : f32
    %81 = vector.broadcast %cst_69 : f32 to vector<2x128xf32>
    %82 = arith.maximumf %80, %81 : vector<2x128xf32>
    %c0_i32_70 = arith.constant 0 : i32
    %83 = tpu.memref_slice %arg31[%c0_i32_70] : memref<2x!tpu.dma_semaphore, #tpu.memory_space<semaphore_mem>> -> memref<1x!tpu.dma_semaphore, #tpu.memory_space<semaphore_mem>>
    %84 = tpu.memref_squeeze %83 : memref<1x!tpu.dma_semaphore, #tpu.memory_space<semaphore_mem>> -> memref<!tpu.dma_semaphore, #tpu.memory_space<semaphore_mem>>
    tpu.wait_dma2 semaphore(%84 : memref<!tpu.dma_semaphore, #tpu.memory_space<semaphore_mem>>) src(%arg14 : memref<3x512x512xbf16, #tpu.memory_space<any>>) dst(%arg29 : memref<3x512x512xbf16, #tpu.memory_space<vmem>>)
    %c0_71 = arith.constant 0 : index
    %c0_72 = arith.constant 0 : index
    %c0_73 = arith.constant 0 : index
    %85 = vector.load %arg13[%c0_71, %c0_72, %c0_73] : memref<3x4x8xbf16, #tpu.memory_space<vmem>>, vector<1x4x8xbf16>
    %86 = vector.shape_cast %85 : vector<1x4x8xbf16> to vector<4x8xbf16>
    %cst_74 = arith.constant dense<0.000000e+00> : vector<4x512xf32>
    %87 = tpu.matmul %86, %72, %cst_74 {dimension_numbers = #tpu.dot_dimension_numbers<[1], [0], [0], [1], [0, 0, 1, 1], [], []>} : vector<4x8xbf16>, vector<8x512xbf16>, vector<4x512xf32> -> vector<4x512xf32>
    %88 = arith.truncf %87 : vector<4x512xf32> to vector<4x512xbf16>
    %c0_75 = arith.constant 0 : index
    %c0_76 = arith.constant 0 : index
    %c0_77 = arith.constant 0 : index
    %89 = vector.load %arg29[%c0_75, %c0_76, %c0_77] : memref<3x512x512xbf16, #tpu.memory_space<vmem>>, vector<1x512x512xbf16>
    %90 = vector.shape_cast %89 : vector<1x512x512xbf16> to vector<512x512xbf16>
    %cst_78 = arith.constant dense<0.000000e+00> : vector<4x512xf32>
    %91 = tpu.matmul %88, %90, %cst_78 {dimension_numbers = #tpu.dot_dimension_numbers<[1], [0], [0], [1], [0, 0, 1, 1], [], []>} : vector<4x512xbf16>, vector<512x512xbf16>, vector<4x512xf32> -> vector<4x512xf32>
    %c1_79 = arith.constant 1 : index
    %c0_80 = arith.constant 0 : index
    %c0_81 = arith.constant 0 : index
    %92 = vector.load %arg13[%c1_79, %c0_80, %c0_81] : memref<3x4x8xbf16, #tpu.memory_space<vmem>>, vector<1x4x8xbf16>
    %93 = vector.shape_cast %92 : vector<1x4x8xbf16> to vector<4x8xbf16>
    %cst_82 = arith.constant dense<0.000000e+00> : vector<4x512xf32>
    %94 = tpu.matmul %93, %72, %cst_82 {dimension_numbers = #tpu.dot_dimension_numbers<[1], [0], [0], [1], [0, 0, 1, 1], [], []>} : vector<4x8xbf16>, vector<8x512xbf16>, vector<4x512xf32> -> vector<4x512xf32>
    %95 = arith.truncf %94 : vector<4x512xf32> to vector<4x512xbf16>
    %c1_83 = arith.constant 1 : index
    %c0_84 = arith.constant 0 : index
    %c0_85 = arith.constant 0 : index
    %96 = vector.load %arg29[%c1_83, %c0_84, %c0_85] : memref<3x512x512xbf16, #tpu.memory_space<vmem>>, vector<1x512x512xbf16>
    %97 = vector.shape_cast %96 : vector<1x512x512xbf16> to vector<512x512xbf16>
    %cst_86 = arith.constant dense<0.000000e+00> : vector<4x512xf32>
    %98 = tpu.matmul %95, %97, %cst_86 {dimension_numbers = #tpu.dot_dimension_numbers<[1], [0], [0], [1], [0, 0, 1, 1], [], []>} : vector<4x512xbf16>, vector<512x512xbf16>, vector<4x512xf32> -> vector<4x512xf32>
    %99 = arith.addf %91, %98 : vector<4x512xf32>
    %c2_87 = arith.constant 2 : index
    %c0_88 = arith.constant 0 : index
    %c0_89 = arith.constant 0 : index
    %100 = vector.load %arg13[%c2_87, %c0_88, %c0_89] : memref<3x4x8xbf16, #tpu.memory_space<vmem>>, vector<1x4x8xbf16>
    %101 = vector.shape_cast %100 : vector<1x4x8xbf16> to vector<4x8xbf16>
    %cst_90 = arith.constant dense<0.000000e+00> : vector<4x512xf32>
    %102 = tpu.matmul %101, %72, %cst_90 {dimension_numbers = #tpu.dot_dimension_numbers<[1], [0], [0], [1], [0, 0, 1, 1], [], []>} : vector<4x8xbf16>, vector<8x512xbf16>, vector<4x512xf32> -> vector<4x512xf32>
    %103 = arith.truncf %102 : vector<4x512xf32> to vector<4x512xbf16>
    %c2_91 = arith.constant 2 : index
    %c0_92 = arith.constant 0 : index
    %c0_93 = arith.constant 0 : index
    %104 = vector.load %arg29[%c2_91, %c0_92, %c0_93] : memref<3x512x512xbf16, #tpu.memory_space<vmem>>, vector<1x512x512xbf16>
    %105 = vector.shape_cast %104 : vector<1x512x512xbf16> to vector<512x512xbf16>
    %cst_94 = arith.constant dense<0.000000e+00> : vector<4x512xf32>
    %106 = tpu.matmul %103, %105, %cst_94 {dimension_numbers = #tpu.dot_dimension_numbers<[1], [0], [0], [1], [0, 0, 1, 1], [], []>} : vector<4x512xbf16>, vector<512x512xbf16>, vector<4x512xf32> -> vector<4x512xf32>
    %107 = arith.addf %99, %106 : vector<4x512xf32>
    %c0_95 = arith.constant 0 : index
    %c0_96 = arith.constant 0 : index
    %108 = vector.load %arg15[%c0_95, %c0_96] : memref<1x512xf32, #tpu.memory_space<vmem>>, vector<1x512xf32>
    %109 = vector.broadcast %108 : vector<1x512xf32> to vector<4x512xf32>
    %110 = arith.addf %107, %109 : vector<4x512xf32>
    %cst_97 = arith.constant 0.000000e+00 : f32
    %111 = vector.broadcast %cst_97 : f32 to vector<4x512xf32>
    %112 = arith.maximumf %110, %111 : vector<4x512xf32>
    %113 = arith.truncf %112 : vector<4x512xf32> to vector<4x512xbf16>
    %c0_98 = arith.constant 0 : index
    %c0_99 = arith.constant 0 : index
    %114 = vector.load %arg16[%c0_98, %c0_99] : memref<2x4xbf16, #tpu.memory_space<vmem>>, vector<2x4xbf16>
    %cst_100 = arith.constant dense<0.000000e+00> : vector<2x512xf32>
    %115 = tpu.matmul %114, %113, %cst_100 {dimension_numbers = #tpu.dot_dimension_numbers<[1], [0], [0], [1], [0, 0, 1, 1], [], []>} : vector<2x4xbf16>, vector<4x512xbf16>, vector<2x512xf32> -> vector<2x512xf32>
    %116 = arith.truncf %115 : vector<2x512xf32> to vector<2x512xbf16>
    %c0_101 = arith.constant 0 : index
    %c0_102 = arith.constant 0 : index
    %117 = vector.load %arg17[%c0_101, %c0_102] : memref<512x128xbf16, #tpu.memory_space<vmem>>, vector<512x128xbf16>
    %cst_103 = arith.constant dense<0.000000e+00> : vector<2x128xf32>
    %118 = tpu.matmul %116, %117, %cst_103 {dimension_numbers = #tpu.dot_dimension_numbers<[1], [0], [0], [1], [0, 0, 1, 1], [], []>} : vector<2x512xbf16>, vector<512x128xbf16>, vector<2x128xf32> -> vector<2x128xf32>
    %c0_104 = arith.constant 0 : index
    %c0_105 = arith.constant 0 : index
    %119 = vector.load %arg18[%c0_104, %c0_105] : memref<1x128xf32, #tpu.memory_space<vmem>>, vector<1x128xf32>
    %120 = vector.broadcast %119 : vector<1x128xf32> to vector<2x128xf32>
    %121 = arith.addf %118, %120 : vector<2x128xf32>
    %cst_106 = arith.constant 0.000000e+00 : f32
    %122 = vector.broadcast %cst_106 : f32 to vector<2x128xf32>
    %123 = arith.maximumf %121, %122 : vector<2x128xf32>
    %c1_i32_107 = arith.constant 1 : i32
    %124 = tpu.memref_slice %arg31[%c1_i32_107] : memref<2x!tpu.dma_semaphore, #tpu.memory_space<semaphore_mem>> -> memref<1x!tpu.dma_semaphore, #tpu.memory_space<semaphore_mem>>
    %125 = tpu.memref_squeeze %124 : memref<1x!tpu.dma_semaphore, #tpu.memory_space<semaphore_mem>> -> memref<!tpu.dma_semaphore, #tpu.memory_space<semaphore_mem>>
    tpu.wait_dma2 semaphore(%125 : memref<!tpu.dma_semaphore, #tpu.memory_space<semaphore_mem>>) src(%arg20 : memref<2x512x512xbf16, #tpu.memory_space<any>>) dst(%arg30 : memref<2x512x512xbf16, #tpu.memory_space<vmem>>)
    %c0_108 = arith.constant 0 : index
    %c0_109 = arith.constant 0 : index
    %c0_110 = arith.constant 0 : index
    %126 = vector.load %arg19[%c0_108, %c0_109, %c0_110] : memref<2x2x4xbf16, #tpu.memory_space<vmem>>, vector<1x2x4xbf16>
    %127 = vector.shape_cast %126 : vector<1x2x4xbf16> to vector<2x4xbf16>
    %cst_111 = arith.constant dense<0.000000e+00> : vector<2x512xf32>
    %128 = tpu.matmul %127, %113, %cst_111 {dimension_numbers = #tpu.dot_dimension_numbers<[1], [0], [0], [1], [0, 0, 1, 1], [], []>} : vector<2x4xbf16>, vector<4x512xbf16>, vector<2x512xf32> -> vector<2x512xf32>
    %129 = arith.truncf %128 : vector<2x512xf32> to vector<2x512xbf16>
    %c0_112 = arith.constant 0 : index
    %c0_113 = arith.constant 0 : index
    %c0_114 = arith.constant 0 : index
    %130 = vector.load %arg30[%c0_112, %c0_113, %c0_114] : memref<2x512x512xbf16, #tpu.memory_space<vmem>>, vector<1x512x512xbf16>
    %131 = vector.shape_cast %130 : vector<1x512x512xbf16> to vector<512x512xbf16>
    %cst_115 = arith.constant dense<0.000000e+00> : vector<2x512xf32>
    %132 = tpu.matmul %129, %131, %cst_115 {dimension_numbers = #tpu.dot_dimension_numbers<[1], [0], [0], [1], [0, 0, 1, 1], [], []>} : vector<2x512xbf16>, vector<512x512xbf16>, vector<2x512xf32> -> vector<2x512xf32>
    %c1_116 = arith.constant 1 : index
    %c0_117 = arith.constant 0 : index
    %c0_118 = arith.constant 0 : index
    %133 = vector.load %arg19[%c1_116, %c0_117, %c0_118] : memref<2x2x4xbf16, #tpu.memory_space<vmem>>, vector<1x2x4xbf16>
    %134 = vector.shape_cast %133 : vector<1x2x4xbf16> to vector<2x4xbf16>
    %cst_119 = arith.constant dense<0.000000e+00> : vector<2x512xf32>
    %135 = tpu.matmul %134, %113, %cst_119 {dimension_numbers = #tpu.dot_dimension_numbers<[1], [0], [0], [1], [0, 0, 1, 1], [], []>} : vector<2x4xbf16>, vector<4x512xbf16>, vector<2x512xf32> -> vector<2x512xf32>
    %136 = arith.truncf %135 : vector<2x512xf32> to vector<2x512xbf16>
    %c1_120 = arith.constant 1 : index
    %c0_121 = arith.constant 0 : index
    %c0_122 = arith.constant 0 : index
    %137 = vector.load %arg30[%c1_120, %c0_121, %c0_122] : memref<2x512x512xbf16, #tpu.memory_space<vmem>>, vector<1x512x512xbf16>
    %138 = vector.shape_cast %137 : vector<1x512x512xbf16> to vector<512x512xbf16>
    %cst_123 = arith.constant dense<0.000000e+00> : vector<2x512xf32>
    %139 = tpu.matmul %136, %138, %cst_123 {dimension_numbers = #tpu.dot_dimension_numbers<[1], [0], [0], [1], [0, 0, 1, 1], [], []>} : vector<2x512xbf16>, vector<512x512xbf16>, vector<2x512xf32> -> vector<2x512xf32>
    %140 = arith.addf %132, %139 : vector<2x512xf32>
    %c0_124 = arith.constant 0 : index
    %c0_125 = arith.constant 0 : index
    %141 = vector.load %arg21[%c0_124, %c0_125] : memref<1x512xf32, #tpu.memory_space<vmem>>, vector<1x512xf32>
    %142 = vector.broadcast %141 : vector<1x512xf32> to vector<2x512xf32>
    %143 = arith.addf %140, %142 : vector<2x512xf32>
    %cst_126 = arith.constant 0.000000e+00 : f32
    %144 = vector.broadcast %cst_126 : f32 to vector<2x512xf32>
    %145 = arith.maximumf %143, %144 : vector<2x512xf32>
    %146 = arith.truncf %145 : vector<2x512xf32> to vector<2x512xbf16>
    %c0_127 = arith.constant 0 : index
    %c0_128 = arith.constant 0 : index
    %147 = vector.load %arg22[%c0_127, %c0_128] : memref<512x128xbf16, #tpu.memory_space<vmem>>, vector<512x128xbf16>
    %cst_129 = arith.constant dense<0.000000e+00> : vector<2x128xf32>
    %148 = tpu.matmul %146, %147, %cst_129 {dimension_numbers = #tpu.dot_dimension_numbers<[1], [0], [0], [1], [0, 0, 1, 1], [], []>} : vector<2x512xbf16>, vector<512x128xbf16>, vector<2x128xf32> -> vector<2x128xf32>
    %c0_130 = arith.constant 0 : index
    %c0_131 = arith.constant 0 : index
    %149 = vector.load %arg23[%c0_130, %c0_131] : memref<1x128xf32, #tpu.memory_space<vmem>>, vector<1x128xf32>
    %150 = vector.broadcast %149 : vector<1x128xf32> to vector<2x128xf32>
    %151 = arith.addf %148, %150 : vector<2x128xf32>
    %cst_132 = arith.constant 0.000000e+00 : f32
    %152 = vector.broadcast %cst_132 : f32 to vector<2x128xf32>
    %153 = arith.maximumf %151, %152 : vector<2x128xf32>
    %c0_133 = arith.constant 0 : index
    %c0_134 = arith.constant 0 : index
    %154 = vector.load %arg24[%c0_133, %c0_134] : memref<512x128xbf16, #tpu.memory_space<vmem>>, vector<512x128xbf16>
    %cst_135 = arith.constant dense<0.000000e+00> : vector<2x128xf32>
    %155 = tpu.matmul %146, %154, %cst_135 {dimension_numbers = #tpu.dot_dimension_numbers<[1], [0], [0], [1], [0, 0, 1, 1], [], []>} : vector<2x512xbf16>, vector<512x128xbf16>, vector<2x128xf32> -> vector<2x128xf32>
    %c0_136 = arith.constant 0 : index
    %c0_137 = arith.constant 0 : index
    %156 = vector.load %arg25[%c0_136, %c0_137] : memref<1x128xf32, #tpu.memory_space<vmem>>, vector<1x128xf32>
    %157 = vector.broadcast %156 : vector<1x128xf32> to vector<2x128xf32>
    %158 = arith.addf %155, %157 : vector<2x128xf32>
    %159 = tpu.concatenate %43, %82, %123, %153, %158 in 1 : vector<2x128xf32>, vector<2x128xf32>, vector<2x128xf32>, vector<2x128xf32>, vector<2x128xf32> -> vector<2x640xf32>
    %160 = arith.truncf %159 : vector<2x640xf32> to vector<2x640xbf16>
    %c0_138 = arith.constant 0 : index
    %c0_139 = arith.constant 0 : index
    %161 = vector.load %arg26[%c0_138, %c0_139] : memref<640x16xbf16, #tpu.memory_space<vmem>>, vector<640x16xbf16>
    %cst_140 = arith.constant dense<0.000000e+00> : vector<2x16xf32>
    %162 = tpu.matmul %160, %161, %cst_140 {dimension_numbers = #tpu.dot_dimension_numbers<[1], [0], [0], [1], [0, 0, 1, 1], [], []>} : vector<2x640xbf16>, vector<640x16xbf16>, vector<2x16xf32> -> vector<2x16xf32>
    %c0_141 = arith.constant 0 : index
    %c0_142 = arith.constant 0 : index
    %163 = vector.load %arg27[%c0_141, %c0_142] : memref<1x16xf32, #tpu.memory_space<vmem>>, vector<1x16xf32>
    %164 = vector.broadcast %163 : vector<1x16xf32> to vector<2x16xf32>
    %165 = arith.addf %162, %164 : vector<2x16xf32>
    %c0_143 = arith.constant 0 : index
    %c0_144 = arith.constant 0 : index
    %166 = vector.load %arg28[%c0_143, %c0_144] : memref<2x16xf32, #tpu.memory_space<vmem>>, vector<2x16xf32>
    tpu.vector_store %arg28[%c0_143, %c0_144], %165 {strides = array<i32>} : memref<2x16xf32, #tpu.memory_space<vmem>>, vector<2x16xf32>,
    return
  }
}

</mosaic_0001>

<bundles_post_ra>
// kernel: _forward_impl.1
= control target key start
LH: loop header
LB: loop body
LE: loop exit
PB: predicated region body
PF: predicated region fallthrough
CT: control target
= control target key end

     0   :  { %s16618_s0 = inlined_call_operand.vmem [shape: bf16[32,16], index: 0, kind: input, shape index: {}]   ;;  %s16619_s1 = inlined_call_operand.hbm [shape: bf16[3,16,32], index: 1, kind: input, shape index: {}]   ;;  %s16620_s2 = inlined_call_operand.hbm [shape: bf16[3,16,512], index: 2, kind: input, shape index: {}]   ;;  %s16621_s3 = inlined_call_operand.hbm [shape: f32[1,512], index: 3, kind: input, shape index: {}]   ;;  %s16622_s4 = inlined_call_operand.hbm [shape: bf16[2,16], index: 4, kind: input, shape index: {}]   ;;  %s16623_s5 = inlined_call_operand.hbm [shape: bf16[512,128], index: 5, kind: input, shape index: {}]   ;;  %s16624_s6 = inlined_call_operand.hbm [shape: f32[1,128], index: 6, kind: input, shape index: {}]   ;;  %s16625_s7 = inlined_call_operand.hbm [shape: bf16[3,8,16], index: 7, kind: input, shape index: {}]   ;;  %s16626_s8 = inlined_call_operand.hbm [shape: bf16[3,512,512], index: 8, kind: input, shape index: {}]   ;;  %s16627_s9 = inlined_call_operand.hbm [shape: f32[1,512], index: 9, kind: input, shape index: {}]   ;;  %s16628_s10 = inlined_call_operand.hbm [shape: bf16[2,8], index: 10, kind: input, shape index: {}]   ;;  %s16629_s11 = inlined_call_operand.hbm [shape: bf16[512,128], index: 11, kind: input, shape index: {}]   ;;  %s16630_s12 = inlined_call_operand.hbm [shape: f32[1,128], index: 12, kind: input, shape index: {}]   ;;  %s16631_s13 = inlined_call_operand.hbm [shape: bf16[3,4,8], index: 13, kind: input, shape index: {}]   ;;  %s16632_s14 = inlined_call_operand.hbm [shape: bf16[3,512,512], index: 14, kind: input, shape index: {}]   ;;  %s16633_s15 = inlined_call_operand.hbm [shape: f32[1,512], index: 15, kind: input, shape index: {}]   ;;  %s16634_s16 = inlined_call_operand.hbm [shape: bf16[2,4], index: 16, kind: input, shape index: {}]   ;;  %s16635_s17 = inlined_call_operand.hbm [shape: bf16[512,128], index: 17, kind: input, shape index: {}]   ;;  %s16636_s18 = inlined_call_operand.hbm [shape: f32[1,128], index: 18, kind: input, shape index: {}]   ;;  %s16637_s19 = inlined_call_operand.hbm [shape: bf16[2,2,4], index: 19, kind: input, shape index: {}]   ;;  %s16638_s20 = inlined_call_operand.hbm [shape: bf16[2,512,512], index: 20, kind: input, shape index: {}]   ;;  %s16639_s21 = inlined_call_operand.hbm [shape: f32[1,512], index: 21, kind: input, shape index: {}]   ;;  %s16640_s22 = inlined_call_operand.hbm [shape: bf16[512,128], index: 22, kind: input, shape index: {}]   ;;  %s16641_s23 = inlined_call_operand.hbm [shape: f32[1,128], index: 23, kind: input, shape index: {}]   ;;  %s16642_s24 = inlined_call_operand.hbm [shape: bf16[512,128], index: 24, kind: input, shape index: {}]   ;;  %s16643_s25 = inlined_call_operand.hbm [shape: f32[1,128], index: 25, kind: input, shape index: {}]   ;;  %s16644_s26 = inlined_call_operand.vmem [shape: bf16[640,16], index: 26, kind: input, shape index: {}]   ;;  %s16645_s27 = inlined_call_operand.hbm [shape: f32[1,16], index: 27, kind: input, shape index: {}]   ;;  %s16646_s28 = inlined_call_operand.hbm [shape: f32[2,16], index: 28, kind: output, shape index: {}]  }
   0x1   :  { %16649 = sst [smem:[#allocation66_spill]] %s16618_s0 }
   0x2   :  { %16650 = sst [smem:[#allocation67_spill]] %s16619_s1 }
   0x3   :  { %16651 = sst [smem:[#allocation68_spill]] %s16620_s2 }
   0x4   :  { %16652 = sst [smem:[#allocation69_spill]] %s16621_s3 }
   0x5   :  { %16653 = sst [smem:[#allocation70_spill]] %s16622_s4 }
   0x6   :  { %16654 = sst [smem:[#allocation71_spill]] %s16623_s5 }
   0x7   :  { %16655 = sst [smem:[#allocation72_spill]] %s16624_s6 }
   0x8   :  { %16656 = sst [smem:[#allocation73_spill]] %s16625_s7 }
   0x9   :  { %16657 = sst [smem:[#allocation74_spill]] %s16626_s8 }
   0xa   :  { %16658 = sst [smem:[#allocation75_spill]] %s16627_s9 }
   0xb   :  { %16659 = sst [smem:[#allocation76_spill]] %s16628_s10 }
   0xc   :  { %16660 = sst [smem:[#allocation77_spill]] %s16629_s11 }
   0xd   :  { %16661 = sst [smem:[#allocation78_spill]] %s16630_s12 }
   0xe   :  { %16662 = sst [smem:[#allocation79_spill]] %s16646_s28 }
   0xf   :  { %33 = vsyncpa [#allocation6], 0 }
  0x10   :  { %34 = vsyncpa [#allocation9], 0 }
  0x11   :  { %35 = vsyncpa [#allocation12], 0 }
  0x12   :  { %36 = vsyncpa [#allocation15], 0 }
  0x13   :  { %37 = vsyncpa [#allocation18], 0 }
  0x14   :  { %38 = vsyncpa [#allocation21], 0 }
  0x15   :  { %39 = vsyncpa [#allocation24], 0 }
  0x16   :  { %40 = vsyncpa [#allocation27], 0 }
  0x17   :  { %41 = vsyncpa [#allocation30], 0 }
  0x18   :  { %42 = vsyncpa [#allocation33], 0 }
  0x19   :  { %43 = vsyncpa [#allocation36], 0 }
  0x1a   :  { %44 = vsyncpa [#allocation39], 0 }
  0x1b   :  { %45 = vsyncpa [#allocation42], 0 }
  0x1c   :  { %46 = vsyncpa [#allocation7], 0  ;;  %s15783_s8 = smov [#allocation8]  }
  0x1d   :  { %s66_s5 = sshll.u32 %s15783_s8, 4  ;;  %s67_s5 = int_to_ptr.vmem [resolvable:$true] %s66_s5 }
  0x1e   :  { %s15219_s9 = scalar_lea.vmem %s67_s5, 1536  ;;  %p15224_p1 = scmp.lt.s32.totalorder %s67_s5, %s67_s5 }
  0x1f   :  { %p15220_p0 = scmp.ne.s32.totalorder %s67_s5, %s15219_s9  ;;  %p15225_p2 = scmp.lt.s32.totalorder %s15219_s9, %s15219_s9 }
  0x21   :  { %p15226_p3 = por %p15225_p2, %p15224_p1 }
  0x23   :  { %p15227_p4 = pnand %p15226_p3, %p15220_p0 }
  0x25   :  { %15230 = shalt.err (!%p15227_p4)
}
  0x26   :  { %s16648_s30 = smov 256   ;;  %s15785_s3 = smov 16  }
  0x27   :  { %s16663_s0 = sld [smem:[#allocation68_spill]]  ;;  %s15786_s11 = smov [#allocation11]  }
  0x28   :  { %s89_s29 = sshll.u32 %s15786_s11, 4  ;;  %s15787_s2 = smov [#allocation14]   ;;  %s90_s29 = int_to_ptr.vmem [resolvable:$true] %s89_s29 }
  0x29   :  { %s111_s7 = sshll.u32 %s15787_s2, 4  ;;  %s15239_s12 = scalar_lea.vmem %s90_s29, 16  ;;  %s112_s7 = int_to_ptr.vmem [resolvable:$true] %s111_s7 }
  0x2a   :  { %p15240_p5 = scmp.ne.s32.totalorder %s90_s29, %s15239_s12  ;;  %s15243_s1 = scalar_lea.vmem %s90_s29, 32 }
  0x2b   :  { %p15244_p6 = scmp.lt.s32.totalorder %s90_s29, %s90_s29  ;;  %p15245_p7 = scmp.lt.s32.totalorder %s15243_s1, %s15239_s12 }
  0x2d   :  { %72 = dma.hbm_to_vmem [thread:$0]  %s16663_s0, 1536, %s67_s5, [#allocation9], %s16648_s30, %s16648_s30, %s15785_s3  }
  0x2e   :  { %p15246_p8 = por %p15245_p7, %p15244_p6 }
  0x30   :  { %p15247_p9 = pnand %p15246_p8, %p15240_p5 }
  0x32   :  { %15250 = shalt.err (!%p15247_p9)
}
  0x33   :  { %s16664_s9 = sld [smem:[#allocation70_spill]]  ;;  %s15259_s6 = scalar_lea.vmem %s112_s7, 16 }
  0x34   :  { %p15260_p10 = scmp.ne.s32.totalorder %s112_s7, %s15259_s6  ;;  %s15263_s5 = scalar_lea.vmem %s112_s7, 32 }
  0x35   :  { %p15264_p11 = scmp.lt.s32.totalorder %s112_s7, %s112_s7  ;;  %p15265_p12 = scmp.lt.s32.totalorder %s15263_s5, %s15259_s6 }
  0x37   :  { %p15266_p13 = por %p15265_p12, %p15264_p11 }
  0x39   :  { %92 = dma.hbm_to_vmem [thread:$0]  %s16664_s9, 16, %s90_s29, [#allocation12]  }
  0x3a   :  { %p15267_p0 = pnand %p15266_p13, %p15260_p10 }
  0x3c   :  { %15270 = shalt.err (!%p15267_p0)
}
  0x3d   :  { %s16665_s11 = sld [smem:[#allocation72_spill]]  ;;  %s15788_s2 = smov [#allocation17]  }
  0x3e   :  { %s132_s12 = sshll.u32 %s15788_s2, 4  ;;  %s15789_s1 = smov [#allocation20]   ;;  %s133_s12 = int_to_ptr.vmem [resolvable:$true] %s132_s12 }
  0x3f   :  { %s155_s30 = sshll.u32 %s15789_s1, 4  ;;  %s15279_s4 = scalar_lea.vmem %s133_s12, 49152  ;;  %s156_s30 = int_to_ptr.vmem [resolvable:$true] %s155_s30 }
  0x40   :  { %p15280_p1 = scmp.ne.s32.totalorder %s133_s12, %s15279_s4  ;;  %p15284_p2 = scmp.lt.s32.totalorder %s133_s12, %s133_s12 }
  0x41   :  { %p15285_p3 = scmp.lt.s32.totalorder %s15279_s4, %s15279_s4 }
  0x43   :  { %114 = dma.hbm_to_vmem [thread:$0]  %s16665_s11, 16, %s112_s7, [#allocation15]  }
  0x44   :  { %p15286_p4 = por %p15285_p3, %p15284_p2 }
  0x46   :  { %p15287_p5 = pnand %p15286_p4, %p15280_p1 }
  0x48   :  { %15290 = shalt.err (!%p15287_p5)
}
  0x49   :  { %s16666_s29 = smov 256   ;;  %s16667_s6 = sld [smem:[#allocation74_spill]] }
  0x4a   :  { %s15299_s7 = scalar_lea.vmem %s156_s30, 16  ;;  %s15303_s5 = scalar_lea.vmem %s156_s30, 32 }
  0x4b   :  { %p15300_p6 = scmp.ne.s32.totalorder %s156_s30, %s15299_s7  ;;  %p15304_p7 = scmp.lt.s32.totalorder %s156_s30, %s156_s30 }
  0x4c   :  { %p15305_p8 = scmp.lt.s32.totalorder %s15303_s5, %s15299_s7 }
  0x4e   :  { %p15306_p9 = por %p15305_p8, %p15304_p7 }
  0x4f   :  { %138 = dma.hbm_to_vmem [thread:$0]  %s16667_s6, 49152, %s133_s12, [#allocation18], %s16666_s29, %s16666_s29, %s15785_s3  }
  0x50   :  { %p15307_p10 = pnand %p15306_p9, %p15300_p6 }
  0x52   :  { %15310 = shalt.err (!%p15307_p10)
}
  0x53   :  { %s16668_s11 = sld [smem:[#allocation76_spill]]  ;;  %s15790_s2 = smov [#allocation23]  }
  0x54   :  { %s177_s1 = sshll.u32 %s15790_s2, 4  ;;  %s15791_s4 = smov [#allocation26]   ;;  %s178_s1 = int_to_ptr.vmem [resolvable:$true] %s177_s1 }
  0x55   :  { %s199_s28 = sshll.u32 %s15791_s4, 4  ;;  %s15319_s8 = scalar_lea.vmem %s178_s1, 16  ;;  %s200_s28 = int_to_ptr.vmem [resolvable:$true] %s199_s28 }
  0x56   :  { %p15320_p11 = scmp.ne.s32.totalorder %s178_s1, %s15319_s8  ;;  %s15323_s12 = scalar_lea.vmem %s178_s1, 32 }
  0x57   :  { %p15324_p12 = scmp.lt.s32.totalorder %s178_s1, %s178_s1  ;;  %p15325_p13 = scmp.lt.s32.totalorder %s15323_s12, %s15319_s8 }
  0x59   :  { %158 = dma.hbm_to_vmem [thread:$0]  %s16668_s11, 16, %s156_s30, [#allocation21]  }
  0x5a   :  { %p15326_p0 = por %p15325_p13, %p15324_p12 }
  0x5c   :  { %p15327_p1 = pnand %p15326_p0, %p15320_p11 }
  0x5e   :  { %15330 = shalt.err (!%p15327_p1)
}
  0x5f   :  { %s16669_s6 = sld [smem:[#allocation78_spill]]  ;;  %s15339_s7 = scalar_lea.vmem %s200_s28, 64 }
  0x60   :  { %p15340_p2 = scmp.ne.s32.totalorder %s200_s28, %s15339_s7  ;;  %p15344_p3 = scmp.lt.s32.totalorder %s200_s28, %s200_s28 }
  0x61   :  { %p15345_p4 = scmp.lt.s32.totalorder %s15339_s7, %s15339_s7 }
  0x63   :  { %p15346_p5 = por %p15345_p4, %p15344_p3 }
  0x65   :  { %180 = dma.hbm_to_vmem [thread:$0]  %s16669_s6, 16, %s178_s1, [#allocation24]  }
  0x66   :  { %p15347_p6 = pnand %p15346_p5, %p15340_p2 }
  0x68   :  { %15350 = shalt.err (!%p15347_p6)
}
  0x69   :  { %202 = dma.hbm_to_vmem [thread:$0]  %s16633_s15, 64, %s200_s28, [#allocation27]  }
  0x6a   :  { %s15792_s10 = smov [#allocation29]   ;;  %s15793_s11 = smov [#allocation32]  }
  0x6b   :  { %s218_s0 = sshll.u32 %s15792_s10, 4  ;;  %s240_s2 = sshll.u32 %s15793_s11, 4  ;;  %s219_s0 = int_to_ptr.vmem [resolvable:$true] %s218_s0  ;;  %s241_s2 = int_to_ptr.vmem [resolvable:$true] %s240_s2 }
  0x6c   :  { %s15359_s4 = scalar_lea.vmem %s219_s0, 4096  ;;  %p15364_p8 = scmp.lt.s32.totalorder %s219_s0, %s219_s0 }
  0x6d   :  { %p15360_p7 = scmp.ne.s32.totalorder %s219_s0, %s15359_s4  ;;  %p15365_p9 = scmp.lt.s32.totalorder %s15359_s4, %s15359_s4 }
  0x6f   :  { %p15366_p10 = por %p15365_p9, %p15364_p8 }
  0x71   :  { %p15367_p11 = pnand %p15366_p10, %p15360_p7 }
  0x73   :  { %15370 = shalt.err (!%p15367_p11)
}
  0x74   :  { %s15794_s1 = smov 64   ;;  %s15795_s8 = smov 4  }
  0x75   :  { %224 = dma.hbm_to_vmem [thread:$0]  %s16635_s17, 4096, %s219_s0, [#allocation30], %s15794_s1, %s15794_s1, %s15795_s8  }
  0x76   :  { %s15379_s15 = scalar_lea.vmem %s241_s2, 32  ;;  %p15384_p13 = scmp.lt.s32.totalorder %s241_s2, %s241_s2 }
  0x77   :  { %p15380_p12 = scmp.ne.s32.totalorder %s241_s2, %s15379_s15  ;;  %p15385_p0 = scmp.lt.s32.totalorder %s15379_s15, %s15379_s15 }
  0x79   :  { %p15386_p1 = por %p15385_p0, %p15384_p13 }
  0x7b   :  { %p15387_p2 = pnand %p15386_p1, %p15380_p12 }
  0x7d   :  { %15390 = shalt.err (!%p15387_p2)
}
  0x7e   :  { %s15796_s28 = smov 1   ;;  %s15797_s7 = smov [#allocation35]  }
  0x7f   :  { %246 = dma.hbm_to_vmem [thread:$0]  %s16637_s19, 32, %s241_s2, [#allocation33], %s15785_s3, %s15785_s3, %s15796_s28  }
  0x80   :  { %s262_s30 = sshll.u32 %s15797_s7, 4  ;;  %s15798_s5 = smov [#allocation38]   ;;  %s263_s30 = int_to_ptr.vmem [resolvable:$true] %s262_s30 }
  0x81   :  { %s284_s10 = sshll.u32 %s15798_s5, 4  ;;  %s15399_s17 = scalar_lea.vmem %s263_s30, 4096  ;;  %s285_s10 = int_to_ptr.vmem [resolvable:$true] %s284_s10 }
  0x82   :  { %p15400_p3 = scmp.ne.s32.totalorder %s263_s30, %s15399_s17  ;;  %p15404_p4 = scmp.lt.s32.totalorder %s263_s30, %s263_s30 }
  0x83   :  { %p15405_p5 = scmp.lt.s32.totalorder %s15399_s17, %s15399_s17 }
  0x85   :  { %p15406_p6 = por %p15405_p5, %p15404_p4 }
  0x87   :  { %p15407_p7 = pnand %p15406_p6, %p15400_p3 }
  0x89   :  { %15410 = shalt.err (!%p15407_p7)
}
  0x8a   :  { %268 = dma.hbm_to_vmem [thread:$0]  %s16640_s22, 4096, %s263_s30, [#allocation36], %s15794_s1, %s15794_s1, %s15795_s8  }
  0x8b   :  { %s15419_s19 = scalar_lea.vmem %s285_s10, 4096  ;;  %p15424_p9 = scmp.lt.s32.totalorder %s285_s10, %s285_s10 }
  0x8c   :  { %p15420_p8 = scmp.ne.s32.totalorder %s285_s10, %s15419_s19  ;;  %p15425_p10 = scmp.lt.s32.totalorder %s15419_s19, %s15419_s19 }
  0x8e   :  { %p15426_p11 = por %p15425_p10, %p15424_p9 }
  0x90   :  { %p15427_p12 = pnand %p15426_p11, %p15420_p8 }
  0x92   :  { %15430 = shalt.err (!%p15427_p12)
}
  0x93   :  { %290 = dma.hbm_to_vmem [thread:$0]  %s16642_s24, 4096, %s285_s10, [#allocation39], %s15794_s1, %s15794_s1, %s15795_s8  }
  0x94   :  { %s15799_s4 = smov [#allocation5]   ;;  %s15800_s29 = smov [#allocation10]  }
  0x95   :  { %s54_s12 = sshll.u32 %s15799_s4, 4  ;;  %s79_s15 = sshll.u32 %s15800_s29, 4  ;;  %s55_s12 = int_to_ptr.vmem [resolvable:$true] %s54_s12  ;;  %s80_s15 = int_to_ptr.vmem [resolvable:$true] %s79_s15 }
  0x96   :  { %s15439_s22 = scalar_lea.vmem %s55_s12, 384  ;;  %p15444_p0 = scmp.lt.s32.totalorder %s55_s12, %s55_s12 }
  0x97   :  { %p15440_p13 = scmp.ne.s32.totalorder %s55_s12, %s15439_s22  ;;  %p15445_p1 = scmp.lt.s32.totalorder %s15439_s22, %s15439_s22 }
  0x99   :  { %p15446_p2 = por %p15445_p1, %p15444_p0 }
  0x9b   :  { %p15447_p3 = pnand %p15446_p2, %p15440_p13 }
  0x9d   :  { %15450 = shalt.err (!%p15447_p3)
}
  0x9e   :  { %s16670_s6 = sld [smem:[#allocation67_spill]]  ;;  %s15459_s24 = scalar_lea.vmem %s80_s15, 64 }
  0x9f   :  { %p15460_p4 = scmp.ne.s32.totalorder %s80_s15, %s15459_s24  ;;  %p15464_p5 = scmp.lt.s32.totalorder %s80_s15, %s80_s15 }
  0xa0   :  { %p15465_p6 = scmp.lt.s32.totalorder %s15459_s24, %s15459_s24 }
  0xa2   :  { %p15466_p7 = por %p15465_p6, %p15464_p5 }
  0xa4   :  { %60 = dma.hbm_to_vmem [thread:$0]  %s16670_s6, 384, %s55_s12, [#allocation6], %s15794_s1, %s15794_s1, %s15795_s8  }
  0xa5   :  { %p15467_p8 = pnand %p15466_p7, %p15460_p4 }
  0xa7   :  { %15470 = shalt.err (!%p15467_p8)
}
  0xa8   :  { %s16671_s5 = sld [smem:[#allocation69_spill]]  ;;  %s15801_s10 = smov [#allocation13]  }
  0xa9   :  { %s98_s17 = sshll.u32 %s15801_s10, 4  ;;  %s15802_s0 = smov [#allocation16]   ;;  %s99_s17 = int_to_ptr.vmem [resolvable:$true] %s98_s17 }
  0xaa   :  { %s120_s11 = sshll.u32 %s15802_s0, 4  ;;  %s15479_s19 = scalar_lea.vmem %s99_s17, 4096  ;;  %s121_s11 = int_to_ptr.vmem [resolvable:$true] %s120_s11 }
  0xab   :  { %p15480_p9 = scmp.ne.s32.totalorder %s99_s17, %s15479_s19  ;;  %p15484_p10 = scmp.lt.s32.totalorder %s99_s17, %s99_s17 }
  0xac   :  { %p15485_p11 = scmp.lt.s32.totalorder %s15479_s19, %s15479_s19 }
  0xae   :  { %82 = dma.hbm_to_vmem [thread:$0]  %s16671_s5, 64, %s80_s15, [#allocation9]  }
  0xaf   :  { %p15486_p12 = por %p15485_p11, %p15484_p10 }
  0xb1   :  { %p15487_p13 = pnand %p15486_p12, %p15480_p9 }
  0xb3   :  { %15490 = shalt.err (!%p15487_p13)
}
  0xb4   :  { %s16672_s4 = sld [smem:[#allocation71_spill]]  ;;  %s15499_s12 = scalar_lea.vmem %s121_s11, 192 }
  0xb5   :  { %p15500_p0 = scmp.ne.s32.totalorder %s121_s11, %s15499_s12  ;;  %p15504_p1 = scmp.lt.s32.totalorder %s121_s11, %s121_s11 }
  0xb6   :  { %p15505_p2 = scmp.lt.s32.totalorder %s15499_s12, %s15499_s12 }
  0xb8   :  { %p15506_p3 = por %p15505_p2, %p15504_p1 }
  0xba   :  { %104 = dma.hbm_to_vmem [thread:$0]  %s16672_s4, 4096, %s99_s17, [#allocation12], %s15794_s1, %s15794_s1, %s15795_s8  }
  0xbb   :  { %p15507_p4 = pnand %p15506_p3, %p15500_p0 }
  0xbd   :  { %15510 = shalt.err (!%p15507_p4)
}
  0xbe   :  { %s16673_s22 = sld [smem:[#allocation73_spill]]  ;;  %s15803_s28 = smov [#allocation19]  }
  0xbf   :  { %s145_s9 = sshll.u32 %s15803_s28, 4  ;;  %s15804_s6 = smov [#allocation22]   ;;  %s146_s9 = int_to_ptr.vmem [resolvable:$true] %s145_s9 }
  0xc0   :  { %s164_s24 = sshll.u32 %s15804_s6, 4  ;;  %s15519_s7 = scalar_lea.vmem %s146_s9, 64  ;;  %s165_s24 = int_to_ptr.vmem [resolvable:$true] %s164_s24 }
  0xc1   :  { %p15520_p5 = scmp.ne.s32.totalorder %s146_s9, %s15519_s7  ;;  %p15524_p6 = scmp.lt.s32.totalorder %s146_s9, %s146_s9 }
  0xc2   :  { %p15525_p7 = scmp.lt.s32.totalorder %s15519_s7, %s15519_s7 }
  0xc4   :  { %126 = dma.hbm_to_vmem [thread:$0]  %s16673_s22, 192, %s121_s11, [#allocation15], %s15794_s1, %s15794_s1, %s15795_s8  }
  0xc5   :  { %p15526_p8 = por %p15525_p7, %p15524_p6 }
  0xc7   :  { %p15527_p9 = pnand %p15526_p8, %p15520_p5 }
  0xc9   :  { %15530 = shalt.err (!%p15527_p9)
}
  0xca   :  { %s16674_s10 = sld [smem:[#allocation75_spill]]  ;;  %s15539_s17 = scalar_lea.vmem %s165_s24, 4096 }
  0xcb   :  { %p15540_p10 = scmp.ne.s32.totalorder %s165_s24, %s15539_s17  ;;  %p15544_p11 = scmp.lt.s32.totalorder %s165_s24, %s165_s24 }
  0xcc   :  { %p15545_p12 = scmp.lt.s32.totalorder %s15539_s17, %s15539_s17 }
  0xce   :  { %p15546_p13 = por %p15545_p12, %p15544_p11 }
  0xd0   :  { %148 = dma.hbm_to_vmem [thread:$0]  %s16674_s10, 64, %s146_s9, [#allocation18]  }
  0xd1   :  { %p15547_p0 = pnand %p15546_p13, %p15540_p10 }
  0xd3   :  { %15550 = shalt.err (!%p15547_p0)
}
  0xd4   :  { %s16675_s19 = sld [smem:[#allocation77_spill]]  ;;  %s15805_s3 = smov [#allocation25]  }
  0xd5   :  { %s186_s2 = sshll.u32 %s15805_s3, 4  ;;  %s187_s2 = int_to_ptr.vmem [resolvable:$true] %s186_s2 }
  0xd6   :  { %s15559_s4 = scalar_lea.vmem %s187_s2, 96  ;;  %p15564_p2 = scmp.lt.s32.totalorder %s187_s2, %s187_s2 }
  0xd7   :  { %p15560_p1 = scmp.ne.s32.totalorder %s187_s2, %s15559_s4  ;;  %p15565_p3 = scmp.lt.s32.totalorder %s15559_s4, %s15559_s4 }
  0xd9   :  { %p15566_p4 = por %p15565_p3, %p15564_p2 }
  0xda   :  { %170 = dma.hbm_to_vmem [thread:$0]  %s16675_s19, 4096, %s165_s24, [#allocation21], %s15794_s1, %s15794_s1, %s15795_s8  }
  0xdb   :  { %p15567_p5 = pnand %p15566_p4, %p15560_p1 }
  0xdd   :  { %15570 = shalt.err (!%p15567_p5)
}
  0xde   :  { %s15806_s12 = smov 32   ;;  %s15807_s29 = smov 2  }
  0xdf   :  { %192 = dma.hbm_to_vmem [thread:$0]  %s16631_s13, 96, %s187_s2, [#allocation24], %s15806_s12, %s15806_s12, %s15807_s29  }
  0xe0   :  { %s15808_s28 = smov [#allocation28]   ;;  %s15809_s1 = smov [#allocation31]  }
  0xe1   :  { %s209_s9 = sshll.u32 %s15808_s28, 4  ;;  %s231_s8 = sshll.u32 %s15809_s1, 4  ;;  %s210_s9 = int_to_ptr.vmem [resolvable:$true] %s209_s9  ;;  %s232_s8 = int_to_ptr.vmem [resolvable:$true] %s231_s8 }
  0xe2   :  { %s15579_s6 = scalar_lea.vmem %s210_s9, 16  ;;  %s15583_s24 = scalar_lea.vmem %s210_s9, 32 }
  0xe3   :  { %p15580_p6 = scmp.ne.s32.totalorder %s210_s9, %s15579_s6  ;;  %p15584_p7 = scmp.lt.s32.totalorder %s210_s9, %s210_s9 }
  0xe4   :  { %p15585_p8 = scmp.lt.s32.totalorder %s15583_s24, %s15579_s6 }
  0xe6   :  { %p15586_p9 = por %p15585_p8, %p15584_p7 }
  0xe8   :  { %p15587_p10 = pnand %p15586_p9, %p15580_p6 }
  0xea   :  { %15590 = shalt.err (!%p15587_p10)
}
  0xeb   :  { %212 = dma.hbm_to_vmem [thread:$0]  %s16634_s16, 16, %s210_s9, [#allocation27]  }
  0xec   :  { %s15599_s5 = scalar_lea.vmem %s232_s8, 16  ;;  %s15603_s13 = scalar_lea.vmem %s232_s8, 32 }
  0xed   :  { %p15600_p11 = scmp.ne.s32.totalorder %s232_s8, %s15599_s5  ;;  %p15604_p12 = scmp.lt.s32.totalorder %s232_s8, %s232_s8 }
  0xee   :  { %p15605_p13 = scmp.lt.s32.totalorder %s15603_s13, %s15599_s5 }
  0xf0   :  { %p15606_p0 = por %p15605_p13, %p15604_p12 }
  0xf2   :  { %p15607_p1 = pnand %p15606_p0, %p15600_p11 }
  0xf4   :  { %15610 = shalt.err (!%p15607_p1)
}
  0xf5   :  { %234 = dma.hbm_to_vmem [thread:$0]  %s16636_s18, 16, %s232_s8, [#allocation30]  }
  0xf6   :  { %s15810_s0 = smov [#allocation34]   ;;  %s15811_s19 = smov [#allocation37]  }
  0xf7   :  { %s253_s11 = sshll.u32 %s15810_s0, 4  ;;  %s275_s3 = sshll.u32 %s15811_s19, 4  ;;  %s254_s11 = int_to_ptr.vmem [resolvable:$true] %s253_s11  ;;  %s276_s3 = int_to_ptr.vmem [resolvable:$true] %s275_s3 }
  0xf8   :  { %s15619_s2 = scalar_lea.vmem %s254_s11, 64  ;;  %p15624_p3 = scmp.lt.s32.totalorder %s254_s11, %s254_s11 }
  0xf9   :  { %p15620_p2 = scmp.ne.s32.totalorder %s254_s11, %s15619_s2  ;;  %p15625_p4 = scmp.lt.s32.totalorder %s15619_s2, %s15619_s2 }
  0xfb   :  { %p15626_p5 = por %p15625_p4, %p15624_p3 }
  0xfd   :  { %p15627_p6 = pnand %p15626_p5, %p15620_p2 }
  0xff   :  { %15630 = shalt.err (!%p15627_p6)
}
 0x100   :  { %256 = dma.hbm_to_vmem [thread:$0]  %s16639_s21, 64, %s254_s11, [#allocation33]  }
 0x101   :  { %s15639_s12 = scalar_lea.vmem %s276_s3, 16  ;;  %s15643_s18 = scalar_lea.vmem %s276_s3, 32 }
 0x102   :  { %p15640_p7 = scmp.ne.s32.totalorder %s276_s3, %s15639_s12  ;;  %p15644_p8 = scmp.lt.s32.totalorder %s276_s3, %s276_s3 }
 0x103   :  { %p15645_p9 = scmp.lt.s32.totalorder %s15643_s18, %s15639_s12 }
 0x105   :  { %p15646_p10 = por %p15645_p9, %p15644_p8 }
 0x107   :  { %p15647_p11 = pnand %p15646_p10, %p15640_p7 }
 0x109   :  { %15650 = shalt.err (!%p15647_p11)
}
 0x10a   :  { %278 = dma.hbm_to_vmem [thread:$0]  %s16641_s23, 16, %s276_s3, [#allocation36]  }
 0x10b   :  { %s15812_s22 = smov [#allocation40]   ;;  %s15813_s9 = smov [#allocation41]  }
 0x10c   :  { %s297_s28 = sshll.u32 %s15812_s22, 4  ;;  %s309_s1 = sshll.u32 %s15813_s9, 4  ;;  %s298_s28 = int_to_ptr.vmem [resolvable:$true] %s297_s28  ;;  %s310_s1 = int_to_ptr.vmem [resolvable:$true] %s309_s1 }
 0x10d   :  { %s15659_s8 = scalar_lea.vmem %s298_s28, 16  ;;  %s15663_s21 = scalar_lea.vmem %s298_s28, 32 }
 0x10e   :  { %p15660_p12 = scmp.ne.s32.totalorder %s298_s28, %s15659_s8  ;;  %p15664_p13 = scmp.lt.s32.totalorder %s298_s28, %s298_s28 }
 0x10f   :  { %p15665_p0 = scmp.lt.s32.totalorder %s15663_s21, %s15659_s8 }
 0x111   :  { %p15666_p1 = por %p15665_p0, %p15664_p13 }
 0x113   :  { %p15667_p2 = pnand %p15666_p1, %p15660_p12 }
 0x115   :  { %15670 = shalt.err (!%p15667_p2)
}
 0x116   :  { %300 = dma.hbm_to_vmem [thread:$0]  %s16643_s25, 16, %s298_s28, [#allocation39]  }
 0x117   :  { %s15679_s7 = scalar_lea.vmem %s310_s1, 16  ;;  %s15683_s23 = scalar_lea.vmem %s310_s1, 32 }
 0x118   :  { %p15680_p3 = scmp.ne.s32.totalorder %s310_s1, %s15679_s7  ;;  %p15684_p4 = scmp.lt.s32.totalorder %s310_s1, %s310_s1 }
 0x119   :  { %p15685_p5 = scmp.lt.s32.totalorder %s15683_s23, %s15679_s7 }
 0x11b   :  { %p15686_p6 = por %p15685_p5, %p15684_p4 }
 0x11d   :  { %p15687_p7 = pnand %p15686_p6, %p15680_p3 }
 0x11f   :  { %15690 = shalt.err (!%p15687_p7)
}
 0x120   :  { %312 = dma.hbm_to_vmem [thread:$0]  %s16645_s27, 16, %s310_s1, [#allocation42]  }
 0x121   :  { %15751 = dma.done.wait [#allocation6], 384  }
 0x122   :  { %15752 = vsyncadd [#allocation6], 4294966912 }
 0x123   :  { %15753 = dma.done.wait [#allocation9], 1600  }
 0x124   :  { %15754 = vsyncadd [#allocation9], 4294965696 }
 0x125   :  { %15755 = dma.done.wait [#allocation12], 4112  }
 0x126   :  { %15756 = vsyncadd [#allocation12], 4294963184 }
 0x127   :  { %15757 = dma.done.wait [#allocation15], 208  }
 0x128   :  { %15758 = vsyncadd [#allocation15], 4294967088 }
 0x129   :  { %15759 = dma.done.wait [#allocation18], 49216  }
 0x12a   :  { %15760 = vsyncadd [#allocation18], 4294918080 }
 0x12b   :  { %15761 = dma.done.wait [#allocation21], 4112  }
 0x12c   :  { %15762 = vsyncadd [#allocation21], 4294963184 }
 0x12d   :  { %15763 = dma.done.wait [#allocation24], 112  }
 0x12e   :  { %15764 = vsyncadd [#allocation24], 4294967184 }
 0x12f   :  { %15765 = dma.done.wait [#allocation27], 80  }
 0x130   :  { %15766 = vsyncadd [#allocation27], 4294967216 }
 0x131   :  { %15767 = dma.done.wait [#allocation30], 4112  }
 0x132   :  { %15768 = vsyncadd [#allocation30], 4294963184 }
 0x133   :  { %15769 = dma.done.wait [#allocation33], 96  }
 0x134   :  { %15770 = vsyncadd [#allocation33], 4294967200 }
 0x135   :  { %15771 = dma.done.wait [#allocation36], 4112  }
 0x136   :  { %15772 = vsyncadd [#allocation36], 4294963184 }
 0x137   :  { %15773 = dma.done.wait [#allocation39], 4112  }
 0x138   :  { %15774 = vsyncadd [#allocation39], 4294963184 }
 0x139   :  { %15775 = dma.done.wait [#allocation42], 16  }
 0x13a   :  { %15776 = vsyncadd [#allocation42], 4294967280  ;;  %v15814_v0 = vmov 0.0   ;;  %vm15815_vm0 = vmmov 0   ;;  %s16676_s13 = sld [smem:[#allocation66_spill]]  ;;  %v13452_v3 = vld [vmem:[#allocation5] sm:$0xff]   ;;  %v936_v54 = vlaneseq }
 0x13b   :  { %13369 = vmatprep.subr.bf16.mxu0 %v15814_v0  ;;  %13373 = vmatprep.mubr.msk.bf16.mxu0 %vm15815_vm0, %v15814_v0  ;;  %vm432_vm1 = vcmask 261120   ;;  %v13453_v4 = vld [vmem:[#allocation5 + $0x8] sm:$0xff]   ;;  %v13457_v6 = vld [vmem:[#allocation8 + $0x2c] ss:$16 sps:$4 sm:$0xff]   ;;  %v13459_v8 = vld [vmem:[#allocation8 + $0x28] ss:$16 sps:$4 sm:$0xff]  }
 0x13c   :  { %v13456_v5 = vld [vmem:[#allocation8 + $0x24] ss:$16 sps:$4 sm:$0xff]   ;;  %v13454_v7 = vld [vmem:[#allocation8 + $0x20] ss:$16 sps:$4 sm:$0xff]   ;;  %621 = vmatprep.subr.bf16.mxu1 %v13457_v6  ;;  %v15816_v9 = vmov 0   ;;  %vm560_vm2 = vcmask 130048  }
 0x13d   :  { %622 = vmatpush1.bf16.msra.mxu1 %v13459_v8  ;;  %639 = vmatprep.mubr.bf16.mxu1 %v15816_v9  ;;  %v13462_v10 = vld [vmem:[#allocation8 + $0x4] ss:$16 sps:$4 sm:$0xff]   ;;  %v13465_v11 = vld [vmem:[#allocation8 + $0xc] ss:$16 sps:$4 sm:$0xff]   ;;  %v13460_v19 = vld [vmem:[#allocation8] ss:$16 sps:$4 sm:$0xff]  }
 0x13e   :  { %730 = vmatprep.subr.bf16.mxu1 %v13465_v11  ;;  %v13463_v20 = vld [vmem:[#allocation8 + $0x8] ss:$16 sps:$4 sm:$0xff]   ;;  %v13469_v27 = vld [vmem:[#allocation8 + $0x44] ss:$16 sps:$4 sm:$0xff]   ;;  %v13472_v28 = vld [vmem:[#allocation8 + $0x4c] ss:$16 sps:$4 sm:$0xff]  }
 0x13f   :  { %v13466_v25 = vld [vmem:[#allocation5 + $0x10] sm:$0xff]   ;;  %v13467_v29 = vld [vmem:[#allocation8 + $0x40] ss:$16 sps:$4 sm:$0xff]   ;;  %v937_v56 = vshrl.u32 %v936_v54, 7  ;;  %vm4523_vm3 = vcmask 1043456   ;;  %vm4519_vm4 = vcmask 64512  }
 0x140   :  { %v13450_v1 = vld [vmem:[%s16676_s13 + $0x8] sm:$0xff]   ;;  %v13451_v2 = vld [vmem:[%s16676_s13] sm:$0xff]   ;;  %v934_v59 = vld [vmem:[#allocation10] sm:$0xf]  ;;  %s15817_s2 = smov [#allocation2]   ;;  %s15818_s4 = smov [#allocation3]  }
 0x141   :  { %13370 = vmatpush3.bf16.msra.mxu0 %v13450_v1  ;;  %v14113_v24 = vld [vmem:[%s16676_s13 + $0x8] sm:$0xff]   ;;  %v14114_v26 = vld [vmem:[%s16676_s13] sm:$0xff]   ;;  %v16107_v58 = vsub.s32 0, %v937_v56  ;;  %v16109_v60 = vsub.s32 1, %v937_v56  ;;  %v16111_v61 = vsub.s32 3, %v937_v56  ;;  %s393_s16 = sshll.u32 %s15817_s2, 4  ;;  %s394_s16 = int_to_ptr.vmem [resolvable:$true] %s393_s16 }
 0x142   :  { %13371 = vmatprep.subr.bf16.mxu0 %v15814_v0  ;;  %v13470_v30 = vld [vmem:[#allocation8 + $0x48] ss:$16 sps:$4 sm:$0xff]   ;;  %v13481_v54 = vld [vmem:[#allocation13 + $0x68] sm:$0xff]   ;;  %s405_s12 = sshll.u32 %s15818_s4, 4  ;;  %s15699_s18 = scalar_lea.vmem %s394_s16, 49152  ;;  %s406_s12 = int_to_ptr.vmem [resolvable:$true] %s405_s12 }
 0x143   :  { %p15700_p8 = scmp.ne.s32.totalorder %s394_s16, %s15699_s18  ;;  %p15704_p9 = scmp.lt.s32.totalorder %s394_s16, %s394_s16 }
 0x144   :  { %p15705_p10 = scmp.lt.s32.totalorder %s15699_s18, %s15699_s18 }
 0x145   :  { %13372 = vmatpush3.bf16.msra.mxu0 %v13451_v2 }
 0x146   :  { %13377 = vmatprep.subr.bf16.mxu0 %v15814_v0  ;;  %p15706_p11 = por %p15705_p10, %p15704_p9 }
 0x148   :  { %13374 = vmatmul.mubr.msk.bf16.vlgmr.msra.gmra.mxu0 %vm432_vm1, %v13452_v3  ;;  %p15707_p12 = pnand %p15706_p11, %p15700_p8 }
 0x149   :  { %13378 = vmatpush3.bf16.msra.mxu0 %v13450_v1  ;;  %13381 = vmatprep.mubr.msk.bf16.mxu0 %vm15815_vm0, %v15814_v0  ;;  %v16113_v1 = vsub.s32 2, %v937_v56  ;;  %v13483_v56 = vld [vmem:[#allocation13 + $0x28] sm:$0xff]  }
 0x14a   :  { %13379 = vmatprep.subr.bf16.mxu0 %v15814_v0 }
 0x14d   :  { %13380 = vmatpush3.bf16.msra.mxu0 %v13451_v2 }
 0x14e   :  { %578 = vmatprep.subr.bf16.mxu0 %v13456_v5  ;;  %v939_v5 = vrot.slane %v934_v59, %v16107_v58 }
 0x150   :  { %13382 = vmatmul.mubr.msk.bf16.vlgmr.msra.gmra.mxu0 %vm432_vm1, %v13453_v4 }
 0x151   :  { %579 = vmatpush1.bf16.msra.mxu0 %v13454_v7  ;;  %596 = vmatprep.mubr.bf16.mxu0 %v15816_v9 }
 0x152   :  { %687 = vmatprep.subr.bf16.mxu0 %v13462_v10  ;;  %v943_v10 = vrot.slane %v934_v59, %v16109_v60 }
 0x208   :  { %v470_v12 = vpop.f32.mrf.mxu0 }
 0x20a   :  { %v13375_v13 = vpop.f32.mrf.mxu0 }
 0x20c   :  { %v473_v14 = vpop.f32.mrf.mxu0 }
 0x20d   :  { %v477_v23 = vpack.c.bf16 %v473_v14, %v470_v12  ;;  %v951_v12 = vrot.slane %v934_v59, %v16111_v61 }
 0x20e   :  { %v13376_v15 = vpop.f32.mrf.mxu0 }
 0x20f   :  { %v947_v15 = vrot.slane %v934_v59, %v16113_v1  ;;  %v13485_v59 = vld [vmem:[#allocation13 + $0x60] sm:$0xff]  }
 0x210   :  { %v527_v16 = vpop.f32.mrf.mxu0 }
 0x212   :  { %v13383_v17 = vpop.f32.mrf.mxu0 }
 0x214   :  { %v530_v18 = vpop.f32.mrf.mxu0 }
 0x215   :  { %v534_v21 = vpack.c.bf16 %v530_v18, %v527_v16 }
 0x216   :  { %v13384_v22 = vpop.f32.mrf.mxu0 }
 0x217   :  { %11803 = vmatmul.mubr.msk.bf16.vlgmr.msra.gmra.mxu0 %vm560_vm2, %v534_v21  ;;  %11804 = vmatmul.mubr.msk.bf16.vlgmr.msra.gmra.mxu1 %vm560_vm2, %v534_v21 }
 0x218   :  { %688 = vmatpush1.bf16.msra.mxu0 %v13460_v19  ;;  %731 = vmatpush1.bf16.msra.mxu1 %v13463_v20 }
 0x219   :  { %705 = vmatprep.mubr.bf16.mxu0 %v15816_v9  ;;  %748 = vmatprep.mubr.bf16.mxu1 %v15816_v9 }
 0x21a   :  { %13385 = vmatprep.subr.bf16.mxu0 %v15814_v0  ;;  %854 = vmatprep.subr.bf16.mxu1 %v13469_v27 }
 0x21f   :  { %11809 = vmatmul.mubr.msk.bf16.vlgmr.msra.gmra.mxu0 %vm560_vm2, %v477_v23  ;;  %11810 = vmatmul.mubr.msk.bf16.vlgmr.msra.gmra.mxu1 %vm560_vm2, %v477_v23 }
 0x220   :  { %13386 = vmatpush3.bf16.msra.mxu0 %v14113_v24  ;;  %13389 = vmatprep.mubr.msk.bf16.mxu0 %vm15815_vm0, %v15814_v0 }
 0x221   :  { %13387 = vmatprep.subr.bf16.mxu0 %v15814_v0  ;;  %872 = vmatprep.mubr.bf16.mxu1 %v15816_v9 }
 0x222   :  { %855 = vmatpush1.bf16.msra.mxu1 %v13467_v29 }
 0x224   :  { %13388 = vmatpush3.bf16.msra.mxu0 %v14114_v26 }
 0x225   :  { %897 = vmatprep.subr.bf16.mxu0 %v13472_v28 }
 0x227   :  { %13390 = vmatmul.mubr.msk.bf16.vlgmr.msra.gmra.mxu0 %vm432_vm1, %v13466_v25 }
 0x228   :  { %915 = vmatprep.mubr.bf16.mxu0 %v15816_v9  ;;  %898 = vmatpush1.bf16.msra.mxu0 %v13470_v30 }
 0x2d7   :  { %v598_v31 = vpop.f32.mrf.mxu0  ;;  %v641_v48 = vpop.f32.mrf.mxu1 }
 0x2d9   :  { %v600_v32 = vpop.f32.mrf.mxu0  ;;  %v643_v49 = vpop.f32.mrf.mxu1 }
 0x2db   :  { %v602_v33 = vpop.f32.mrf.mxu0  ;;  %v645_v50 = vpop.f32.mrf.mxu1 }
 0x2dd   :  { %v604_v34 = vpop.f32.mrf.mxu0  ;;  %v647_v51 = vpop.f32.mrf.mxu1 }
 0x2df   :  { %v707_v35 = vpop.f32.mrf.mxu0  ;;  %v750_v52 = vpop.f32.mrf.mxu1 }
 0x2e0   :  { %v708_v36 = vadd.f32 %v707_v35, %v598_v31  ;;  %v751_v3 = vadd.f32 %v750_v52, %v641_v48  ;;  %v13475_v48 = vld [vmem:[#allocation13 + $0x38] sm:$0xff]   ;;  %v13479_v52 = vld [vmem:[#allocation13 + $0x30] sm:$0xff]  }
 0x2e1   :  { %v709_v37 = vpop.f32.mrf.mxu0  ;;  %v752_v53 = vpop.f32.mrf.mxu1 }
 0x2e2   :  { %v710_v38 = vadd.f32 %v709_v37, %v600_v32  ;;  %v753_v2 = vadd.f32 %v752_v53, %v643_v49  ;;  %v13476_v49 = vld [vmem:[#allocation13 + $0xb8] sm:$0xff]   ;;  %v13480_v53 = vld [vmem:[#allocation13 + $0xb0] sm:$0xff]  }
 0x2e3   :  { %v711_v39 = vpop.f32.mrf.mxu0  ;;  %v754_v55 = vpop.f32.mrf.mxu1 }
 0x2e4   :  { %v712_v40 = vadd.f32 %v711_v39, %v602_v33  ;;  %v755_v13 = vadd.f32 %v754_v55, %v645_v50  ;;  %v13477_v50 = vld [vmem:[#allocation13 + $0x70] sm:$0xff]   ;;  %v13482_v55 = vld [vmem:[#allocation13 + $0xe8] sm:$0xff]  }
 0x2e5   :  { %v713_v41 = vpop.f32.mrf.mxu0  ;;  %v756_v57 = vpop.f32.mrf.mxu1 }
 0x2e6   :  { %v714_v42 = vadd.f32 %v713_v41, %v604_v34  ;;  %v757_v18 = vadd.f32 %v756_v57, %v647_v51  ;;  %v13478_v51 = vld [vmem:[#allocation13 + $0xf0] sm:$0xff]   ;;  %v13484_v57 = vld [vmem:[#allocation13 + $0xa8] sm:$0xff]  }
 0x2e7   :  { %v804_v43 = vpop.f32.mrf.mxu0 }
 0x2e9   :  { %v13391_v44 = vpop.f32.mrf.mxu0 }
 0x2eb   :  { %v807_v45 = vpop.f32.mrf.mxu0 }
 0x2ec   :  { %v811_v46 = vpack.c.bf16 %v807_v45, %v804_v43  ;;  %v13474_v45 = vld [vmem:[#allocation13 + $0xf8] sm:$0xff]  }
 0x2ed   :  { %v13392_v47 = vpop.f32.mrf.mxu0 }
 0x2ee   :  { %11817 = vmatmul.mubr.msk.bf16.vlgmr.msra.gmra.mxu1 %vm560_vm2, %v811_v46  ;;  %11818 = vmatmul.mubr.msk.bf16.vlgmr.msra.gmra.mxu0 %vm560_vm2, %v811_v46  ;;  %v976_v47 = vld [vmem:[#allocation11] sm:$0x1] }
 0x2ef   :  { %1012 = vmatprep.mubr.bf16.mxu1 %v15816_v9  ;;  %1053 = vmatprep.mubr.bf16.mxu0 %v15816_v9 }
 0x3ae   :  { %v874_v62 = vpop.f32.mrf.mxu1  ;;  %v917_v63 = vpop.f32.mrf.mxu0 }
 0x3af   :  { %v926_v4 = vadd.f32 %v874_v62, %v708_v36  ;;  %v928_v14 = vadd.f32 %v917_v63, %v751_v3  ;;  %v13486_v62 = vld [vmem:[#allocation13 + $0xe0] sm:$0xff]   ;;  %v13489_v3 = vld [vmem:[#allocation13 + $0x58] sm:$0xff]  }
 0x3b0   :  { %v876_v6 = vpop.f32.mrf.mxu1  ;;  %v919_v7 = vpop.f32.mrf.mxu0  ;;  %v13487_v63 = vld [vmem:[#allocation13 + $0x20] sm:$0xff]  }
 0x3b1   :  { %v927_v8 = vadd.f32 %v876_v6, %v710_v38  ;;  %v929_v11 = vadd.f32 %v919_v7, %v753_v2  ;;  %v956_v19 = vadd.f32 %v939_v5, %v926_v4  ;;  %v958_v28 = vadd.f32 %v947_v15, %v928_v14  ;;  %v13488_v2 = vld [vmem:[#allocation13 + $0xa0] sm:$0xff]   ;;  %v13490_v4 = vld [vmem:[#allocation13 + $0xd8] sm:$0xff]   ;;  %v13493_v7 = vld [vmem:[#allocation13 + $0x50] sm:$0xff]  }
 0x3b2   :  { %v878_v16 = vpop.f32.mrf.mxu1  ;;  %v921_v17 = vpop.f32.mrf.mxu0  ;;  %v13492_v6 = vld [vmem:[#allocation13 + $0x98] sm:$0xff]   ;;  %v13499_v14 = vld [vmem:[#allocation13 + $0x8] sm:$0xff]  }
 0x3b3   :  { %v930_v20 = vadd.f32 %v878_v16, %v712_v40  ;;  %v932_v21 = vadd.f32 %v921_v17, %v755_v13  ;;  %v957_v24 = vadd.f32 %v943_v10, %v927_v8  ;;  %v959_v25 = vadd.f32 %v951_v12, %v929_v11  ;;  %v13494_v8 = vld [vmem:[#allocation13 + $0xd0] sm:$0xff]   ;;  %v13498_v13 = vld [vmem:[#allocation13 + $0xc8] sm:$0xff]   ;;  %v13501_v16 = vld [vmem:[#allocation13 + $0x40] sm:$0xff]  }
 0x3b4   :  { %v880_v22 = vpop.f32.mrf.mxu1  ;;  %v923_v23 = vpop.f32.mrf.mxu0  ;;  %v964_v33 = vmax.f32 %v956_v19, 0.0  ;;  %v966_v40 = vmax.f32 %v958_v28, 0.0  ;;  %v13496_v11 = vld [vmem:[#allocation13 + $0x90] sm:$0xff]   ;;  %v13502_v17 = vld [vmem:[#allocation13 + $0xc0] sm:$0xff]  }
 0x3b5   :  { %v931_v26 = vadd.f32 %v880_v22, %v714_v42  ;;  %v933_v27 = vadd.f32 %v923_v23, %v757_v18  ;;  %v960_v29 = vadd.f32 %v939_v5, %v930_v20  ;;  %v962_v30 = vadd.f32 %v947_v15, %v932_v21  ;;  %v13473_v42 = vld [vmem:[#allocation13 + $0x78] sm:$0xff]   ;;  %v13500_v15 = vld [vmem:[#allocation13 + $0x88] sm:$0xff]   ;;  %v13503_v18 = vld [vmem:[#allocation13] sm:$0xff]  }
 0x3b6   :  { %v965_v36 = vmax.f32 %v957_v24, 0.0  ;;  %v967_v37 = vmax.f32 %v959_v25, 0.0  ;;  %v13491_v5 = vld [vmem:[#allocation13 + $0x18] sm:$0xff]   ;;  %v13504_v19 = vld [vmem:[#allocation13 + $0x80] sm:$0xff]  }
 0x3b7   :  { %v961_v31 = vadd.f32 %v943_v10, %v931_v26  ;;  %v963_v32 = vadd.f32 %v951_v12, %v933_v27  ;;  %v968_v34 = vmax.f32 %v960_v29, 0.0  ;;  %v970_v35 = vmax.f32 %v962_v30, 0.0  ;;  %v13495_v10 = vld [vmem:[#allocation13 + $0x10] sm:$0xff]   ;;  %v13497_v12 = vld [vmem:[#allocation13 + $0x48] sm:$0xff]  }
 0x3b9   :  { %v969_v38 = vmax.f32 %v961_v31, 0.0  ;;  %v971_v39 = vmax.f32 %v963_v32, 0.0  ;;  %v16119_v41 = vpack.c.bf16 %v968_v34, %v964_v33  ;;  %v16125_v46 = vpack.c.bf16 %v970_v35, %v966_v40  ;;  %v1410_v32 = vld [vmem:[#allocation16] sm:$0xf]  ;;  %v1629_v35 = vld [vmem:[#allocation16 + $0x4] sm:$0xf] }
 0x3ba   :  { %v13507_v33 = vld [vmem:[#allocation17 + $0x4e4] ss:$16 sps:$4 sm:$0xff]   ;;  %v13511_v40 = vld [vmem:[#allocation17 + $0x4c0] ss:$16 sps:$4 sm:$0xff]  }
 0x3bb   :  { %v16121_v43 = vpack.c.bf16 %v969_v38, %v965_v36  ;;  %v16123_v44 = vpack.c.bf16 %v971_v39, %v967_v37  ;;  %v13510_v34 = vld [vmem:[#allocation17 + $0x6e4] ss:$16 sps:$4 sm:$0xff]   ;;  %v13505_v36 = vld [vmem:[#allocation17 + $0x4e0] ss:$16 sps:$4 sm:$0xff]  }
 0x3bc   :  { %v13508_v37 = vld [vmem:[#allocation17 + $0x6e0] ss:$16 sps:$4 sm:$0xff]   ;;  %v13513_v38 = vld [vmem:[#allocation17 + $0x4c4] ss:$16 sps:$4 sm:$0xff]  }
 0x3bd   :  { %994 = vmatprep.subr.bf16.mxu1 %v16121_v43  ;;  %1035 = vmatprep.subr.bf16.mxu0 %v16123_v44  ;;  %v13516_v39 = vld [vmem:[#allocation17 + $0x6c4] ss:$16 sps:$4 sm:$0xff]  }
 0x3be   :  { %995 = vmatpush1.bf16.msra.mxu1 %v16119_v41  ;;  %1036 = vmatpush1.bf16.msra.mxu0 %v16125_v46 }
 0x3bf   :  { %13096 = vmatprep.subr.bf16.mxu1 %v13473_v42  ;;  %13118 = vmatprep.subr.bf16.mxu0 %v13474_v45  ;;  %v13514_v42 = vld [vmem:[#allocation17 + $0x6c0] ss:$16 sps:$4 sm:$0xff]   ;;  %v13519_v45 = vld [vmem:[#allocation17 + $0x4a4] ss:$16 sps:$4 sm:$0xff]  }
 0x3c1   :  { %11819 = vmatmul.mubr.msk.bf16.vlgmr.msra.gmra.mxu1 %vm560_vm2, %v976_v47  ;;  %11820 = vmatmul.mubr.msk.bf16.vlgmr.msra.gmra.mxu0 %vm560_vm2, %v976_v47  ;;  %v13522_v47 = vld [vmem:[#allocation17 + $0x6a4] ss:$16 sps:$4 sm:$0xff]  }
 0x3c2   :  { %13097 = vmatpush3.bf16.msra.mxu1 %v13475_v48  ;;  %13119 = vmatpush3.bf16.msra.mxu0 %v13476_v49  ;;  %v13517_v48 = vld [vmem:[#allocation17 + $0x4a0] ss:$16 sps:$4 sm:$0xff]  }
 0x3c3   :  { %13098 = vmatprep.subr.bf16.mxu1 %v13477_v50  ;;  %13120 = vmatprep.subr.bf16.mxu0 %v13478_v51  ;;  %v13520_v49 = vld [vmem:[#allocation17 + $0x6a0] ss:$16 sps:$4 sm:$0xff]   ;;  %v13525_v50 = vld [vmem:[#allocation17 + $0x484] ss:$16 sps:$4 sm:$0xff]  }
 0x3c4   :  { %v13528_v51 = vld [vmem:[#allocation17 + $0x684] ss:$16 sps:$4 sm:$0xff]  }
 0x3c6   :  { %13099 = vmatpush3.bf16.msra.mxu1 %v13479_v52  ;;  %13121 = vmatpush3.bf16.msra.mxu0 %v13480_v53  ;;  %v13523_v52 = vld [vmem:[#allocation17 + $0x480] ss:$16 sps:$4 sm:$0xff]  }
 0x3c7   :  { %13100 = vmatprep.subr.bf16.mxu1 %v13481_v54  ;;  %13122 = vmatprep.subr.bf16.mxu0 %v13482_v55  ;;  %v13526_v53 = vld [vmem:[#allocation17 + $0x680] ss:$16 sps:$4 sm:$0xff]   ;;  %v13531_v54 = vld [vmem:[#allocation17 + $0x464] ss:$16 sps:$4 sm:$0xff]  }
 0x3c8   :  { %v13534_v55 = vld [vmem:[#allocation17 + $0x664] ss:$16 sps:$4 sm:$0xff]  }
 0x3ca   :  { %13101 = vmatpush3.bf16.msra.mxu1 %v13483_v56  ;;  %13123 = vmatpush3.bf16.msra.mxu0 %v13484_v57  ;;  %v13529_v56 = vld [vmem:[#allocation17 + $0x460] ss:$16 sps:$4 sm:$0xff]  }
 0x3cb   :  { %13102 = vmatprep.subr.bf16.mxu1 %v13485_v59  ;;  %13124 = vmatprep.subr.bf16.mxu0 %v13486_v62  ;;  %v13532_v57 = vld [vmem:[#allocation17 + $0x660] ss:$16 sps:$4 sm:$0xff]   ;;  %v13537_v59 = vld [vmem:[#allocation17 + $0x444] ss:$16 sps:$4 sm:$0xff]  }
 0x3cc   :  { %v13540_v62 = vld [vmem:[#allocation17 + $0x644] ss:$16 sps:$4 sm:$0xff]  }
 0x3ce   :  { %13103 = vmatpush3.bf16.msra.mxu1 %v13487_v63  ;;  %13125 = vmatpush3.bf16.msra.mxu0 %v13488_v2  ;;  %v13535_v63 = vld [vmem:[#allocation17 + $0x440] ss:$16 sps:$4 sm:$0xff]  }
 0x3cf   :  { %13104 = vmatprep.subr.bf16.mxu1 %v13489_v3  ;;  %13126 = vmatprep.subr.bf16.mxu0 %v13490_v4  ;;  %v13538_v2 = vld [vmem:[#allocation17 + $0x640] ss:$16 sps:$4 sm:$0xff]   ;;  %v13543_v3 = vld [vmem:[#allocation17 + $0x424] ss:$16 sps:$4 sm:$0xff]  }
 0x3d0   :  { %v13546_v4 = vld [vmem:[#allocation17 + $0x624] ss:$16 sps:$4 sm:$0xff]  }
 0x3d2   :  { %13105 = vmatpush3.bf16.msra.mxu1 %v13491_v5  ;;  %13127 = vmatpush3.bf16.msra.mxu0 %v13492_v6  ;;  %v13541_v5 = vld [vmem:[#allocation17 + $0x420] ss:$16 sps:$4 sm:$0xff]  }
 0x3d3   :  { %13106 = vmatprep.subr.bf16.mxu1 %v13493_v7  ;;  %13128 = vmatprep.subr.bf16.mxu0 %v13494_v8  ;;  %v13544_v6 = vld [vmem:[#allocation17 + $0x620] ss:$16 sps:$4 sm:$0xff]   ;;  %v13549_v7 = vld [vmem:[#allocation17 + $0x404] ss:$16 sps:$4 sm:$0xff]  }
 0x3d4   :  { %v13552_v8 = vld [vmem:[#allocation17 + $0x604] ss:$16 sps:$4 sm:$0xff]  }
 0x3d6   :  { %13107 = vmatpush3.bf16.msra.mxu1 %v13495_v10  ;;  %13129 = vmatpush3.bf16.msra.mxu0 %v13496_v11  ;;  %v13547_v10 = vld [vmem:[#allocation17 + $0x400] ss:$16 sps:$4 sm:$0xff]  }
 0x3d7   :  { %13108 = vmatprep.subr.bf16.mxu1 %v13497_v12  ;;  %13130 = vmatprep.subr.bf16.mxu0 %v13498_v13  ;;  %v13550_v11 = vld [vmem:[#allocation17 + $0x600] ss:$16 sps:$4 sm:$0xff]   ;;  %v13555_v12 = vld [vmem:[#allocation17 + $0x5e4] ss:$16 sps:$4 sm:$0xff]  }
 0x3d8   :  { %v13558_v13 = vld [vmem:[#allocation17 + $0x7e4] ss:$16 sps:$4 sm:$0xff]  }
 0x3da   :  { %13109 = vmatpush3.bf16.msra.mxu1 %v13499_v14  ;;  %13131 = vmatpush3.bf16.msra.mxu0 %v13500_v15  ;;  %v13553_v14 = vld [vmem:[#allocation17 + $0x5e0] ss:$16 sps:$4 sm:$0xff]  }
 0x3db   :  { %13110 = vmatprep.subr.bf16.mxu1 %v13501_v16  ;;  %13132 = vmatprep.subr.bf16.mxu0 %v13502_v17  ;;  %v13556_v15 = vld [vmem:[#allocation17 + $0x7e0] ss:$16 sps:$4 sm:$0xff]   ;;  %v13561_v16 = vld [vmem:[#allocation17 + $0x5c4] ss:$16 sps:$4 sm:$0xff]  }
 0x3dc   :  { %v13564_v17 = vld [vmem:[#allocation17 + $0x7c4] ss:$16 sps:$4 sm:$0xff]  }
 0x3de   :  { %13111 = vmatpush3.bf16.msra.mxu1 %v13503_v18  ;;  %13133 = vmatpush3.bf16.msra.mxu0 %v13504_v19  ;;  %v13559_v18 = vld [vmem:[#allocation17 + $0x5c0] ss:$16 sps:$4 sm:$0xff]  }
 0x3df   :  { %1428 = vmatprep.subr.bf16.mxu1 %v16121_v43  ;;  %1469 = vmatprep.subr.bf16.mxu0 %v16123_v44  ;;  %v13562_v19 = vld [vmem:[#allocation17 + $0x7c0] ss:$16 sps:$4 sm:$0xff]  }
 0x481   :  { %v1014_v20 = vpop.f32.mrf.mxu1  ;;  %v1055_v21 = vpop.f32.mrf.mxu0 }
 0x482   :  { %v1062_v26 = vpack.c.bf16 %v1014_v20, %v1014_v20  ;;  %v1064_v27 = vpack.c.bf16 %v1055_v21, %v1055_v21  ;;  %v13567_v20 = vld [vmem:[#allocation17 + $0x5a4] ss:$16 sps:$4 sm:$0xff]  }
 0x483   :  { %v1016_v22 = vpop.f32.mrf.mxu1  ;;  %v1057_v23 = vpop.f32.mrf.mxu0  ;;  %v13570_v21 = vld [vmem:[#allocation17 + $0x7a4] ss:$16 sps:$4 sm:$0xff]  }
 0x484   :  { %v1063_v24 = vpack.c.bf16 %v1016_v22, %v1016_v22  ;;  %v1065_v25 = vpack.c.bf16 %v1057_v23, %v1057_v23  ;;  %v13565_v22 = vld [vmem:[#allocation17 + $0x5a0] ss:$16 sps:$4 sm:$0xff]  }
 0x485   :  { %v1018_v28 = vpop.f32.mrf.mxu1  ;;  %v1059_v29 = vpop.f32.mrf.mxu0  ;;  %v13568_v23 = vld [vmem:[#allocation17 + $0x7a0] ss:$16 sps:$4 sm:$0xff]  }
 0x486   :  { %1361 = vmatprep.mubr.bf16.mxu1 %v1063_v24  ;;  %1401 = vmatprep.mubr.bf16.mxu0 %v1065_v25  ;;  %v13571_v24 = vld [vmem:[#allocation17 + $0x580] ss:$16 sps:$4 sm:$0xff]   ;;  %v13573_v25 = vld [vmem:[#allocation17 + $0x584] ss:$16 sps:$4 sm:$0xff]  }
 0x487   :  { %v1019_v30 = vpop.f32.mrf.mxu1  ;;  %v1060_v31 = vpop.f32.mrf.mxu0  ;;  %1362 = vmatmul.mubr.bf16.vlgmr.msra.gmra.mxu1 %v1062_v26  ;;  %1402 = vmatmul.mubr.bf16.vlgmr.msra.gmra.mxu0 %v1064_v27  ;;  %v13574_v26 = vld [vmem:[#allocation17 + $0x780] ss:$16 sps:$4 sm:$0xff]   ;;  %v13576_v27 = vld [vmem:[#allocation17 + $0x784] ss:$16 sps:$4 sm:$0xff]  }
 0x488   :  { %1429 = vmatpush1.bf16.msra.mxu1 %v16119_v41  ;;  %1470 = vmatpush1.bf16.msra.mxu0 %v16125_v46  ;;  %v13579_v28 = vld [vmem:[#allocation17 + $0x564] ss:$16 sps:$4 sm:$0xff]   ;;  %v13577_v30 = vld [vmem:[#allocation17 + $0x560] ss:$16 sps:$4 sm:$0xff]  }
 0x489   :  { %1647 = vmatprep.subr.bf16.mxu1 %v16121_v43  ;;  %1688 = vmatprep.subr.bf16.mxu0 %v16123_v44  ;;  %v13582_v29 = vld [vmem:[#allocation17 + $0x764] ss:$16 sps:$4 sm:$0xff]   ;;  %v13580_v31 = vld [vmem:[#allocation17 + $0x760] ss:$16 sps:$4 sm:$0xff]  }
 0x48a   :  { %1446 = vmatprep.mubr.bf16.mxu1 %v15816_v9  ;;  %1487 = vmatprep.mubr.bf16.mxu0 %v15816_v9 }
 0x48f   :  { %11854 = vmatmul.mubr.msk.bf16.vlgmr.msra.gmra.mxu1 %vm560_vm2, %v1410_v32  ;;  %11855 = vmatmul.mubr.msk.bf16.vlgmr.msra.gmra.mxu0 %vm560_vm2, %v1410_v32  ;;  %v13585_v32 = vld [vmem:[#allocation17 + $0x544] ss:$16 sps:$4 sm:$0xff]  }
 0x490   :  { %1648 = vmatpush1.bf16.msra.mxu1 %v16119_v41  ;;  %1689 = vmatpush1.bf16.msra.mxu0 %v16125_v46 }
 0x491   :  { %1665 = vmatprep.mubr.bf16.mxu1 %v15816_v9  ;;  %1706 = vmatprep.mubr.bf16.mxu0 %v15816_v9 }
 0x492   :  { %2488 = vmatprep.subr.bf16.mxu1 %v13507_v33  ;;  %2529 = vmatprep.subr.bf16.mxu0 %v13510_v34  ;;  %v13588_v33 = vld [vmem:[#allocation17 + $0x744] ss:$16 sps:$4 sm:$0xff]   ;;  %v13583_v34 = vld [vmem:[#allocation17 + $0x540] ss:$16 sps:$4 sm:$0xff]  }
 0x497   :  { %11856 = vmatmul.mubr.msk.bf16.vlgmr.msra.gmra.mxu1 %vm560_vm2, %v1629_v35  ;;  %11857 = vmatmul.mubr.msk.bf16.vlgmr.msra.gmra.mxu0 %vm560_vm2, %v1629_v35  ;;  %v13586_v35 = vld [vmem:[#allocation17 + $0x740] ss:$16 sps:$4 sm:$0xff]  }
 0x498   :  { %2489 = vmatpush1.bf16.msra.mxu1 %v13505_v36  ;;  %2530 = vmatpush1.bf16.msra.mxu0 %v13508_v37  ;;  %v13589_v36 = vld [vmem:[#allocation17 + $0x520] ss:$16 sps:$4 sm:$0xff]   ;;  %v13591_v37 = vld [vmem:[#allocation17 + $0x524] ss:$16 sps:$4 sm:$0xff]  }
 0x499   :  { %2490 = vmatprep.subr.bf16.mxu1 %v13513_v38  ;;  %2531 = vmatprep.subr.bf16.mxu0 %v13516_v39  ;;  %v13592_v38 = vld [vmem:[#allocation17 + $0x720] ss:$16 sps:$4 sm:$0xff]   ;;  %v13594_v39 = vld [vmem:[#allocation17 + $0x724] ss:$16 sps:$4 sm:$0xff]  }
 0x49c   :  { %2491 = vmatpush1.bf16.msra.mxu1 %v13511_v40  ;;  %2532 = vmatpush1.bf16.msra.mxu0 %v13514_v42  ;;  %v13597_v40 = vld [vmem:[#allocation17 + $0x504] ss:$16 sps:$4 sm:$0xff]  }
 0x49d   :  { %2492 = vmatprep.subr.bf16.mxu1 %v13519_v45  ;;  %2533 = vmatprep.subr.bf16.mxu0 %v13522_v47  ;;  %v13600_v42 = vld [vmem:[#allocation17 + $0x704] ss:$16 sps:$4 sm:$0xff]   ;;  %v13595_v45 = vld [vmem:[#allocation17 + $0x500] ss:$16 sps:$4 sm:$0xff]  }
 0x49e   :  { %v13598_v47 = vld [vmem:[#allocation17 + $0x700] ss:$16 sps:$4 sm:$0xff]  }
 0x4a0   :  { %2493 = vmatpush1.bf16.msra.mxu1 %v13517_v48  ;;  %2534 = vmatpush1.bf16.msra.mxu0 %v13520_v49  ;;  %v13603_v48 = vld [vmem:[#allocation17 + $0x4ec] ss:$16 sps:$4 sm:$0xff]  }
 0x4a1   :  { %2494 = vmatprep.subr.bf16.mxu1 %v13525_v50  ;;  %2535 = vmatprep.subr.bf16.mxu0 %v13528_v51  ;;  %v13606_v49 = vld [vmem:[#allocation17 + $0x6ec] ss:$16 sps:$4 sm:$0xff]  }
 0x4a4   :  { %2495 = vmatpush1.bf16.msra.mxu1 %v13523_v52  ;;  %2536 = vmatpush1.bf16.msra.mxu0 %v13526_v53  ;;  %v11821_v52 = vld [vmem:[#allocation14] ss:$0 sm:$0xff] }
 0x4a5   :  { %2496 = vmatprep.subr.bf16.mxu1 %v13531_v54  ;;  %2537 = vmatprep.subr.bf16.mxu0 %v13534_v55 }
 0x4a8   :  { %2497 = vmatpush1.bf16.msra.mxu1 %v13529_v56  ;;  %2538 = vmatpush1.bf16.msra.mxu0 %v13532_v57 }
 0x4a9   :  { %2498 = vmatprep.subr.bf16.mxu1 %v13537_v59  ;;  %2539 = vmatprep.subr.bf16.mxu0 %v13540_v62 }
 0x4ac   :  { %2499 = vmatpush1.bf16.msra.mxu1 %v13535_v63  ;;  %2540 = vmatpush1.bf16.msra.mxu0 %v13538_v2 }
 0x4ad   :  { %2500 = vmatprep.subr.bf16.mxu1 %v13543_v3  ;;  %2541 = vmatprep.subr.bf16.mxu0 %v13546_v4 }
 0x4b0   :  { %2501 = vmatpush1.bf16.msra.mxu1 %v13541_v5  ;;  %2542 = vmatpush1.bf16.msra.mxu0 %v13544_v6 }
 0x4b1   :  { %2502 = vmatprep.subr.bf16.mxu1 %v13549_v7  ;;  %2543 = vmatprep.subr.bf16.mxu0 %v13552_v8 }
 0x4b4   :  { %2503 = vmatpush1.bf16.msra.mxu1 %v13547_v10  ;;  %2544 = vmatpush1.bf16.msra.mxu0 %v13550_v11 }
 0x4b5   :  { %2504 = vmatprep.subr.bf16.mxu1 %v13555_v12  ;;  %2545 = vmatprep.subr.bf16.mxu0 %v13558_v13 }
 0x4b8   :  { %2505 = vmatpush2.bf16.msra.mxu1 %v13553_v14  ;;  %2546 = vmatpush2.bf16.msra.mxu0 %v13556_v15 }
 0x4b9   :  { %2506 = vmatprep.subr.bf16.mxu1 %v13561_v16  ;;  %2547 = vmatprep.subr.bf16.mxu0 %v13564_v17 }
 0x4bc   :  { %2507 = vmatpush2.bf16.msra.mxu1 %v13559_v18  ;;  %2548 = vmatpush2.bf16.msra.mxu0 %v13562_v19 }
 0x4bd   :  { %2508 = vmatprep.subr.bf16.mxu1 %v13567_v20  ;;  %2549 = vmatprep.subr.bf16.mxu0 %v13570_v21  ;;  %v13601_v20 = vld [vmem:[#allocation17 + $0x4e8] ss:$16 sps:$4 sm:$0xff]  }
 0x4be   :  { %v13604_v21 = vld [vmem:[#allocation17 + $0x6e8] ss:$16 sps:$4 sm:$0xff]  }
 0x4c0   :  { %2509 = vmatpush2.bf16.msra.mxu1 %v13565_v22  ;;  %2550 = vmatpush2.bf16.msra.mxu0 %v13568_v23 }
 0x4c1   :  { %2510 = vmatprep.subr.bf16.mxu1 %v13573_v25  ;;  %2551 = vmatprep.subr.bf16.mxu0 %v13576_v27  ;;  %v13612_v27 = vld [vmem:[#allocation17 + $0x6cc] ss:$16 sps:$4 sm:$0xff]  }
 0x4c4   :  { %2511 = vmatpush2.bf16.msra.mxu1 %v13571_v24  ;;  %2552 = vmatpush2.bf16.msra.mxu0 %v13574_v26  ;;  %v13609_v26 = vld [vmem:[#allocation17 + $0x4cc] ss:$16 sps:$4 sm:$0xff]  }
 0x4c5   :  { %2512 = vmatprep.subr.bf16.mxu1 %v13579_v28  ;;  %2553 = vmatprep.subr.bf16.mxu0 %v13582_v29 }
 0x4c8   :  { %2513 = vmatpush2.bf16.msra.mxu1 %v13577_v30  ;;  %2554 = vmatpush2.bf16.msra.mxu0 %v13580_v31  ;;  %v13607_v30 = vld [vmem:[#allocation17 + $0x4c8] ss:$16 sps:$4 sm:$0xff]  }
 0x4c9   :  { %2514 = vmatprep.subr.bf16.mxu1 %v13585_v32  ;;  %2555 = vmatprep.subr.bf16.mxu0 %v13588_v33  ;;  %v13610_v31 = vld [vmem:[#allocation17 + $0x6c8] ss:$16 sps:$4 sm:$0xff]   ;;  %v13615_v32 = vld [vmem:[#allocation17 + $0x4ac] ss:$16 sps:$4 sm:$0xff]  }
 0x4ca   :  { %v13618_v33 = vld [vmem:[#allocation17 + $0x6ac] ss:$16 sps:$4 sm:$0xff]  }
 0x4cc   :  { %2515 = vmatpush2.bf16.msra.mxu1 %v13583_v34  ;;  %2556 = vmatpush2.bf16.msra.mxu0 %v13586_v35  ;;  %v13613_v34 = vld [vmem:[#allocation17 + $0x4a8] ss:$16 sps:$4 sm:$0xff]  }
 0x4cd   :  { %2516 = vmatprep.subr.bf16.mxu1 %v13591_v37  ;;  %2557 = vmatprep.subr.bf16.mxu0 %v13594_v39  ;;  %v13616_v35 = vld [vmem:[#allocation17 + $0x6a8] ss:$16 sps:$4 sm:$0xff]   ;;  %v13624_v37 = vld [vmem:[#allocation17 + $0x68c] ss:$16 sps:$4 sm:$0xff]  }
 0x4ce   :  { %v13622_v39 = vld [vmem:[#allocation17 + $0x688] ss:$16 sps:$4 sm:$0xff]  }
 0x4d0   :  { %2517 = vmatpush2.bf16.msra.mxu1 %v13589_v36  ;;  %2558 = vmatpush2.bf16.msra.mxu0 %v13592_v38  ;;  %v13621_v36 = vld [vmem:[#allocation17 + $0x48c] ss:$16 sps:$4 sm:$0xff]   ;;  %v13619_v38 = vld [vmem:[#allocation17 + $0x488] ss:$16 sps:$4 sm:$0xff]  }
 0x4d1   :  { %2518 = vmatprep.subr.bf16.mxu1 %v13597_v40  ;;  %2559 = vmatprep.subr.bf16.mxu0 %v13600_v42  ;;  %v13627_v40 = vld [vmem:[#allocation17 + $0x46c] ss:$16 sps:$4 sm:$0xff]  }
 0x4d2   :  { %v13630_v42 = vld [vmem:[#allocation17 + $0x66c] ss:$16 sps:$4 sm:$0xff]  }
 0x4d4   :  { %2519 = vmatpush2.bf16.msra.mxu1 %v13595_v45  ;;  %2560 = vmatpush2.bf16.msra.mxu0 %v13598_v47  ;;  %v13625_v45 = vld [vmem:[#allocation17 + $0x468] ss:$16 sps:$4 sm:$0xff]  }
 0x4d5   :  { %2570 = vmatprep.subr.bf16.mxu1 %v13603_v48  ;;  %2611 = vmatprep.subr.bf16.mxu0 %v13606_v49  ;;  %v13628_v47 = vld [vmem:[#allocation17 + $0x668] ss:$16 sps:$4 sm:$0xff]   ;;  %v13633_v48 = vld [vmem:[#allocation17 + $0x44c] ss:$16 sps:$4 sm:$0xff]  }
 0x4d6   :  { %v13636_v49 = vld [vmem:[#allocation17 + $0x64c] ss:$16 sps:$4 sm:$0xff]  }
 0x547   :  { %v13112_v50 = vpop.f32.mrf.mxu1  ;;  %v13134_v51 = vpop.f32.mrf.mxu0 }
 0x549   :  { %v13113_v53 = vpop.f32.mrf.mxu1  ;;  %v13135_v54 = vpop.f32.mrf.mxu0 }
 0x54a   :  { %v13114_v55 = vadd.f32 %v13113_v53, %v13112_v50  ;;  %v13136_v56 = vadd.f32 %v13135_v54, %v13134_v51  ;;  %v13631_v50 = vld [vmem:[#allocation17 + $0x448] ss:$16 sps:$4 sm:$0xff]   ;;  %v13642_v53 = vld [vmem:[#allocation17 + $0x62c] ss:$16 sps:$4 sm:$0xff]  }
 0x54b   :  { %v13115_v57 = vpop.f32.mrf.mxu1  ;;  %v13137_v59 = vpop.f32.mrf.mxu0  ;;  %v13634_v51 = vld [vmem:[#allocation17 + $0x648] ss:$16 sps:$4 sm:$0xff]  }
 0x54c   :  { %v1364_v62 = vadd.f32 %v13114_v55, %v11821_v52  ;;  %v13639_v52 = vld [vmem:[#allocation17 + $0x42c] ss:$16 sps:$4 sm:$0xff]   ;;  %v13637_v54 = vld [vmem:[#allocation17 + $0x428] ss:$16 sps:$4 sm:$0xff]  }
 0x54d   :  { %v13116_v63 = vpop.f32.mrf.mxu1  ;;  %v13138_v2 = vpop.f32.mrf.mxu0  ;;  %v13640_v55 = vld [vmem:[#allocation17 + $0x628] ss:$16 sps:$4 sm:$0xff]   ;;  %v13648_v57 = vld [vmem:[#allocation17 + $0x60c] ss:$16 sps:$4 sm:$0xff]  }
 0x54e   :  { %v16149_v3 = vadd.f32 %v13136_v56, %v1364_v62  ;;  %v13645_v56 = vld [vmem:[#allocation17 + $0x40c] ss:$16 sps:$4 sm:$0xff]   ;;  %v13643_v59 = vld [vmem:[#allocation17 + $0x408] ss:$16 sps:$4 sm:$0xff]  }
 0x54f   :  { %v16151_v4 = vpop.f32.mrf.mxu1  ;;  %v16153_v5 = vpop.f32.mrf.mxu0  ;;  %v13646_v62 = vld [vmem:[#allocation17 + $0x608] ss:$16 sps:$4 sm:$0xff]   ;;  %v13651_v63 = vld [vmem:[#allocation17 + $0x5ec] ss:$16 sps:$4 sm:$0xff]  }
 0x550   :  { %v1409_v6 = vmax.f32 %v16149_v3, 0.0  ;;  %v13654_v2 = vld [vmem:[#allocation17 + $0x7ec] ss:$16 sps:$4 sm:$0xff]  }
 0x551   :  { %v16156_v7 = vpop.f32.mrf.mxu1  ;;  %v16158_v8 = vpop.f32.mrf.mxu0 }
 0x553   :  { %v1452_v10 = vpop.f32.mrf.mxu1  ;;  %v1493_v11 = vpop.f32.mrf.mxu0 }
 0x554   :  { %v13649_v10 = vld [vmem:[#allocation17 + $0x5e8] ss:$16 sps:$4 sm:$0xff]  }
 0x555   :  { %v1453_v12 = vpop.f32.mrf.mxu1  ;;  %v1494_v13 = vpop.f32.mrf.mxu0  ;;  %v13652_v11 = vld [vmem:[#allocation17 + $0x7e8] ss:$16 sps:$4 sm:$0xff]  }
 0x556   :  { %v13657_v12 = vld [vmem:[#allocation17 + $0x5cc] ss:$16 sps:$4 sm:$0xff]  }
 0x557   :  { %v1667_v14 = vpop.f32.mrf.mxu1  ;;  %v1708_v15 = vpop.f32.mrf.mxu0  ;;  %v13660_v13 = vld [vmem:[#allocation17 + $0x7cc] ss:$16 sps:$4 sm:$0xff]  }
 0x558   :  { %v16160_v22 = vpack.c.bf16 %v1667_v14, %v1667_v14  ;;  %v16162_v23 = vpack.c.bf16 %v1708_v15, %v1708_v15  ;;  %v13655_v14 = vld [vmem:[#allocation17 + $0x5c8] ss:$16 sps:$4 sm:$0xff]  }
 0x559   :  { %v1669_v16 = vpop.f32.mrf.mxu1  ;;  %v1710_v17 = vpop.f32.mrf.mxu0  ;;  %v13658_v15 = vld [vmem:[#allocation17 + $0x7c8] ss:$16 sps:$4 sm:$0xff]  }
 0x55a   :  { %v1716_v18 = vpack.c.bf16 %v1669_v16, %v1669_v16  ;;  %v1718_v19 = vpack.c.bf16 %v1710_v17, %v1710_v17  ;;  %v13663_v16 = vld [vmem:[#allocation17 + $0x5ac] ss:$16 sps:$4 sm:$0xff]  }
 0x55b   :  { %v1671_v24 = vpop.f32.mrf.mxu1  ;;  %v1712_v25 = vpop.f32.mrf.mxu0  ;;  %v13666_v17 = vld [vmem:[#allocation17 + $0x7ac] ss:$16 sps:$4 sm:$0xff]  }
 0x55c   :  { %2520 = vmatprep.mubr.bf16.mxu1 %v1716_v18  ;;  %2561 = vmatprep.mubr.bf16.mxu0 %v1718_v19  ;;  %v13667_v24 = vld [vmem:[#allocation17 + $0x588] ss:$16 sps:$4 sm:$0xff]  }
 0x55d   :  { %v1672_v28 = vpop.f32.mrf.mxu1  ;;  %v1713_v29 = vpop.f32.mrf.mxu0  ;;  %2521 = vmatmul.mubr.bf16.vlgmr.msra.gmra.mxu1 %v16160_v22  ;;  %2562 = vmatmul.mubr.bf16.vlgmr.msra.gmra.mxu0 %v16162_v23  ;;  %v13670_v25 = vld [vmem:[#allocation17 + $0x788] ss:$16 sps:$4 sm:$0xff]  }
 0x55e   :  { %2571 = vmatpush1.bf16.msra.mxu1 %v13601_v20  ;;  %2612 = vmatpush1.bf16.msra.mxu0 %v13604_v21  ;;  %v13669_v20 = vld [vmem:[#allocation17 + $0x58c] ss:$16 sps:$4 sm:$0xff]   ;;  %v13673_v28 = vld [vmem:[#allocation17 + $0x568] ss:$16 sps:$4 sm:$0xff]  }
 0x55f   :  { %2602 = vmatprep.mubr.bf16.mxu1 %v1716_v18  ;;  %2643 = vmatprep.mubr.bf16.mxu0 %v1718_v19  ;;  %v13661_v18 = vld [vmem:[#allocation17 + $0x5a8] ss:$16 sps:$4 sm:$0xff]   ;;  %v13672_v21 = vld [vmem:[#allocation17 + $0x78c] ss:$16 sps:$4 sm:$0xff]  }
 0x560   :  { %2572 = vmatprep.subr.bf16.mxu1 %v13609_v26  ;;  %2613 = vmatprep.subr.bf16.mxu0 %v13612_v27  ;;  %v13664_v19 = vld [vmem:[#allocation17 + $0x7a8] ss:$16 sps:$4 sm:$0xff]   ;;  %v13675_v26 = vld [vmem:[#allocation17 + $0x56c] ss:$16 sps:$4 sm:$0xff]  }
 0x561   :  { %v13678_v27 = vld [vmem:[#allocation17 + $0x76c] ss:$16 sps:$4 sm:$0xff]   ;;  %v13676_v29 = vld [vmem:[#allocation17 + $0x768] ss:$16 sps:$4 sm:$0xff]  }
 0x562   :  { %2573 = vmatpush1.bf16.msra.mxu1 %v13607_v30  ;;  %2614 = vmatpush1.bf16.msra.mxu0 %v13610_v31  ;;  %v13681_v30 = vld [vmem:[#allocation17 + $0x54c] ss:$16 sps:$4 sm:$0xff]  }
 0x563   :  { %2574 = vmatprep.subr.bf16.mxu1 %v13615_v32  ;;  %2615 = vmatprep.subr.bf16.mxu0 %v13618_v33  ;;  %v13684_v31 = vld [vmem:[#allocation17 + $0x74c] ss:$16 sps:$4 sm:$0xff]   ;;  %v13679_v32 = vld [vmem:[#allocation17 + $0x548] ss:$16 sps:$4 sm:$0xff]  }
 0x564   :  { %v13682_v33 = vld [vmem:[#allocation17 + $0x748] ss:$16 sps:$4 sm:$0xff]  }
 0x566   :  { %2575 = vmatpush1.bf16.msra.mxu1 %v13613_v34  ;;  %2616 = vmatpush1.bf16.msra.mxu0 %v13616_v35  ;;  %v13687_v34 = vld [vmem:[#allocation17 + $0x52c] ss:$16 sps:$4 sm:$0xff]  }
 0x567   :  { %2576 = vmatprep.subr.bf16.mxu1 %v13621_v36  ;;  %2617 = vmatprep.subr.bf16.mxu0 %v13624_v37  ;;  %v13690_v35 = vld [vmem:[#allocation17 + $0x72c] ss:$16 sps:$4 sm:$0xff]   ;;  %v13685_v36 = vld [vmem:[#allocation17 + $0x528] ss:$16 sps:$4 sm:$0xff]  }
 0x568   :  { %v13688_v37 = vld [vmem:[#allocation17 + $0x728] ss:$16 sps:$4 sm:$0xff]  }
 0x56a   :  { %2577 = vmatpush1.bf16.msra.mxu1 %v13619_v38  ;;  %2618 = vmatpush1.bf16.msra.mxu0 %v13622_v39  ;;  %v13693_v38 = vld [vmem:[#allocation17 + $0x50c] ss:$16 sps:$4 sm:$0xff]  }
 0x56b   :  { %2578 = vmatprep.subr.bf16.mxu1 %v13627_v40  ;;  %2619 = vmatprep.subr.bf16.mxu0 %v13630_v42  ;;  %v13696_v39 = vld [vmem:[#allocation17 + $0x70c] ss:$16 sps:$4 sm:$0xff]   ;;  %v13691_v40 = vld [vmem:[#allocation17 + $0x508] ss:$16 sps:$4 sm:$0xff]  }
 0x56c   :  { %v13694_v42 = vld [vmem:[#allocation17 + $0x708] ss:$16 sps:$4 sm:$0xff]  }
 0x56e   :  { %2579 = vmatpush1.bf16.msra.mxu1 %v13625_v45  ;;  %2620 = vmatpush1.bf16.msra.mxu0 %v13628_v47  ;;  %v13699_v45 = vld [vmem:[#allocation17 + $0xe4] ss:$16 sps:$4 sm:$0xff]  }
 0x56f   :  { %2580 = vmatprep.subr.bf16.mxu1 %v13633_v48  ;;  %2621 = vmatprep.subr.bf16.mxu0 %v13636_v49  ;;  %v13702_v47 = vld [vmem:[#allocation17 + $0x2e4] ss:$16 sps:$4 sm:$0xff]   ;;  %v13697_v48 = vld [vmem:[#allocation17 + $0xe0] ss:$16 sps:$4 sm:$0xff]  }
 0x570   :  { %v13700_v49 = vld [vmem:[#allocation17 + $0x2e0] ss:$16 sps:$4 sm:$0xff]  }
 0x572   :  { %2581 = vmatpush1.bf16.msra.mxu1 %v13631_v50  ;;  %2622 = vmatpush1.bf16.msra.mxu0 %v13634_v51  ;;  %v16168_v50 = vpack.c.bf16 %v16156_v7, %v16156_v7  ;;  %v13705_v51 = vld [vmem:[#allocation17 + $0xc4] ss:$16 sps:$4 sm:$0xff]  }
 0x573   :  { %2582 = vmatprep.subr.bf16.mxu1 %v13639_v52  ;;  %2623 = vmatprep.subr.bf16.mxu0 %v13642_v53  ;;  %v13708_v52 = vld [vmem:[#allocation17 + $0x2c4] ss:$16 sps:$4 sm:$0xff]   ;;  %v16172_v53 = vpack.c.bf16 %v16158_v8, %v16158_v8  ;;  %v13712_v8 = vld [vmem:[#allocation17 + $0x2a0] ss:$16 sps:$4 sm:$0xff]  }
 0x574   :  { %v13711_v7 = vld [vmem:[#allocation17 + $0xa4] ss:$16 sps:$4 sm:$0xff]  }
 0x576   :  { %2583 = vmatpush1.bf16.msra.mxu1 %v13637_v54  ;;  %2624 = vmatpush1.bf16.msra.mxu0 %v13640_v55  ;;  %v13703_v54 = vld [vmem:[#allocation17 + $0xc0] ss:$16 sps:$4 sm:$0xff]  }
 0x577   :  { %2584 = vmatprep.subr.bf16.mxu1 %v13645_v56  ;;  %2625 = vmatprep.subr.bf16.mxu0 %v13648_v57  ;;  %v13706_v55 = vld [vmem:[#allocation17 + $0x2c0] ss:$16 sps:$4 sm:$0xff]   ;;  %v13714_v56 = vld [vmem:[#allocation17 + $0x2a4] ss:$16 sps:$4 sm:$0xff]  }
 0x578   :  { %v13709_v57 = vld [vmem:[#allocation17 + $0xa0] ss:$16 sps:$4 sm:$0xff]  }
 0x57a   :  { %2585 = vmatpush1.bf16.msra.mxu1 %v13643_v59  ;;  %2626 = vmatpush1.bf16.msra.mxu0 %v13646_v62  ;;  %v13715_v59 = vld [vmem:[#allocation17 + $0x80] ss:$16 sps:$4 sm:$0xff]  }
 0x57b   :  { %2586 = vmatprep.subr.bf16.mxu1 %v13651_v63  ;;  %2627 = vmatprep.subr.bf16.mxu0 %v13654_v2  ;;  %v13718_v62 = vld [vmem:[#allocation17 + $0x280] ss:$16 sps:$4 sm:$0xff]   ;;  %v13723_v63 = vld [vmem:[#allocation17 + $0x64] ss:$16 sps:$4 sm:$0xff]  }
 0x57c   :  { %v13726_v2 = vld [vmem:[#allocation17 + $0x264] ss:$16 sps:$4 sm:$0xff]  }
 0x57e   :  { %2587 = vmatpush2.bf16.msra.mxu1 %v13649_v10  ;;  %2628 = vmatpush2.bf16.msra.mxu0 %v13652_v11  ;;  %v13721_v10 = vld [vmem:[#allocation17 + $0x60] ss:$16 sps:$4 sm:$0xff]  }
 0x57f   :  { %2588 = vmatprep.subr.bf16.mxu1 %v13657_v12  ;;  %2629 = vmatprep.subr.bf16.mxu0 %v13660_v13  ;;  %v13724_v11 = vld [vmem:[#allocation17 + $0x260] ss:$16 sps:$4 sm:$0xff]   ;;  %v13729_v12 = vld [vmem:[#allocation17 + $0x44] ss:$16 sps:$4 sm:$0xff]  }
 0x580   :  { %v13732_v13 = vld [vmem:[#allocation17 + $0x244] ss:$16 sps:$4 sm:$0xff]  }
 0x582   :  { %2589 = vmatpush2.bf16.msra.mxu1 %v13655_v14  ;;  %2630 = vmatpush2.bf16.msra.mxu0 %v13658_v15  ;;  %v13727_v14 = vld [vmem:[#allocation17 + $0x40] ss:$16 sps:$4 sm:$0xff]  }
 0x583   :  { %2590 = vmatprep.subr.bf16.mxu1 %v13663_v16  ;;  %2631 = vmatprep.subr.bf16.mxu0 %v13666_v17  ;;  %v13730_v15 = vld [vmem:[#allocation17 + $0x240] ss:$16 sps:$4 sm:$0xff]   ;;  %v13735_v16 = vld [vmem:[#allocation17 + $0x24] ss:$16 sps:$4 sm:$0xff]  }
 0x584   :  { %v13738_v17 = vld [vmem:[#allocation17 + $0x224] ss:$16 sps:$4 sm:$0xff]  }
 0x586   :  { %2591 = vmatpush2.bf16.msra.mxu1 %v13661_v18  ;;  %2632 = vmatpush2.bf16.msra.mxu0 %v13664_v19  ;;  %v13733_v18 = vld [vmem:[#allocation17 + $0x20] ss:$16 sps:$4 sm:$0xff]  }
 0x587   :  { %2592 = vmatprep.subr.bf16.mxu1 %v13669_v20  ;;  %2633 = vmatprep.subr.bf16.mxu0 %v13672_v21  ;;  %v13736_v19 = vld [vmem:[#allocation17 + $0x220] ss:$16 sps:$4 sm:$0xff]   ;;  %v13741_v20 = vld [vmem:[#allocation17 + $0x4] ss:$16 sps:$4 sm:$0xff]  }
 0x588   :  { %v13744_v21 = vld [vmem:[#allocation17 + $0x204] ss:$16 sps:$4 sm:$0xff]  }
 0x58a   :  { %2593 = vmatpush2.bf16.msra.mxu1 %v13667_v24  ;;  %2634 = vmatpush2.bf16.msra.mxu0 %v13670_v25  ;;  %v13739_v24 = vld [vmem:[#allocation17] ss:$16 sps:$4 sm:$0xff]  }
 0x58b   :  { %2594 = vmatprep.subr.bf16.mxu1 %v13675_v26  ;;  %2635 = vmatprep.subr.bf16.mxu0 %v13678_v27  ;;  %v13742_v25 = vld [vmem:[#allocation17 + $0x200] ss:$16 sps:$4 sm:$0xff]   ;;  %v13747_v26 = vld [vmem:[#allocation17 + $0x1e4] ss:$16 sps:$4 sm:$0xff]  }
 0x58c   :  { %v13750_v27 = vld [vmem:[#allocation17 + $0x3e4] ss:$16 sps:$4 sm:$0xff]  }
 0x58e   :  { %2595 = vmatpush2.bf16.msra.mxu1 %v13673_v28  ;;  %2636 = vmatpush2.bf16.msra.mxu0 %v13676_v29  ;;  %v13745_v28 = vld [vmem:[#allocation17 + $0x1e0] ss:$16 sps:$4 sm:$0xff]  }
 0x58f   :  { %2596 = vmatprep.subr.bf16.mxu1 %v13681_v30  ;;  %2637 = vmatprep.subr.bf16.mxu0 %v13684_v31  ;;  %v13748_v29 = vld [vmem:[#allocation17 + $0x3e0] ss:$16 sps:$4 sm:$0xff]   ;;  %v13753_v30 = vld [vmem:[#allocation17 + $0x1c4] ss:$16 sps:$4 sm:$0xff]  }
 0x590   :  { %v13756_v31 = vld [vmem:[#allocation17 + $0x3c4] ss:$16 sps:$4 sm:$0xff]  }
 0x592   :  { %2597 = vmatpush2.bf16.msra.mxu1 %v13679_v32  ;;  %2638 = vmatpush2.bf16.msra.mxu0 %v13682_v33  ;;  %v13751_v32 = vld [vmem:[#allocation17 + $0x1c0] ss:$16 sps:$4 sm:$0xff]  }
 0x593   :  { %2598 = vmatprep.subr.bf16.mxu1 %v13687_v34  ;;  %2639 = vmatprep.subr.bf16.mxu0 %v13690_v35  ;;  %v13754_v33 = vld [vmem:[#allocation17 + $0x3c0] ss:$16 sps:$4 sm:$0xff]   ;;  %v13759_v34 = vld [vmem:[#allocation17 + $0x1a4] ss:$16 sps:$4 sm:$0xff]  }
 0x594   :  { %v13762_v35 = vld [vmem:[#allocation17 + $0x3a4] ss:$16 sps:$4 sm:$0xff]  }
 0x596   :  { %2599 = vmatpush2.bf16.msra.mxu1 %v13685_v36  ;;  %2640 = vmatpush2.bf16.msra.mxu0 %v13688_v37  ;;  %v13757_v36 = vld [vmem:[#allocation17 + $0x1a0] ss:$16 sps:$4 sm:$0xff]  }
 0x597   :  { %2600 = vmatprep.subr.bf16.mxu1 %v13693_v38  ;;  %2641 = vmatprep.subr.bf16.mxu0 %v13696_v39  ;;  %v13760_v37 = vld [vmem:[#allocation17 + $0x3a0] ss:$16 sps:$4 sm:$0xff]   ;;  %v13765_v38 = vld [vmem:[#allocation17 + $0x184] ss:$16 sps:$4 sm:$0xff]  }
 0x598   :  { %v13768_v39 = vld [vmem:[#allocation17 + $0x384] ss:$16 sps:$4 sm:$0xff]  }
 0x59a   :  { %2601 = vmatpush2.bf16.msra.mxu1 %v13691_v40  ;;  %2642 = vmatpush2.bf16.msra.mxu0 %v13694_v42  ;;  %v13763_v40 = vld [vmem:[#allocation17 + $0x180] ss:$16 sps:$4 sm:$0xff]  }
 0x59b   :  { %3292 = vmatprep.subr.bf16.mxu1 %v13699_v45  ;;  %3333 = vmatprep.subr.bf16.mxu0 %v13702_v47  ;;  %v13766_v42 = vld [vmem:[#allocation17 + $0x380] ss:$16 sps:$4 sm:$0xff]   ;;  %v13771_v45 = vld [vmem:[#allocation17 + $0x164] ss:$16 sps:$4 sm:$0xff]  }
 0x59c   :  { %v13774_v47 = vld [vmem:[#allocation17 + $0x364] ss:$16 sps:$4 sm:$0xff]  }
 0x59d   :  { %2603 = vmatmul.mubr.bf16.vlgmr.msra.gmra.mxu1 %v16160_v22  ;;  %2644 = vmatmul.mubr.bf16.vlgmr.msra.gmra.mxu0 %v16162_v23  ;;  %v13717_v22 = vld [vmem:[#allocation17 + $0x84] ss:$16 sps:$4 sm:$0xff]  }
 0x59e   :  { %3293 = vmatpush1.bf16.msra.mxu1 %v13697_v48  ;;  %3324 = vmatprep.mubr.bf16.mxu1 %v16168_v50  ;;  %v13720_v23 = vld [vmem:[#allocation17 + $0x284] ss:$16 sps:$4 sm:$0xff]   ;;  %v13769_v48 = vld [vmem:[#allocation17 + $0x160] ss:$16 sps:$4 sm:$0xff]  }
 0x59f   :  { %3334 = vmatpush1.bf16.msra.mxu0 %v13700_v49  ;;  %3365 = vmatprep.mubr.bf16.mxu0 %v16172_v53  ;;  %v13772_v49 = vld [vmem:[#allocation17 + $0x360] ss:$16 sps:$4 sm:$0xff]  }
 0x5a0   :  { %3294 = vmatprep.subr.bf16.mxu1 %v13705_v51  ;;  %3335 = vmatprep.subr.bf16.mxu0 %v13708_v52  ;;  %v13777_v51 = vld [vmem:[#allocation17 + $0x144] ss:$16 sps:$4 sm:$0xff]  }
 0x5a1   :  { %v13780_v52 = vld [vmem:[#allocation17 + $0x344] ss:$16 sps:$4 sm:$0xff]  }
 0x5a2   :  { %3295 = vmatpush1.bf16.msra.mxu1 %v13703_v54  ;;  %v13775_v54 = vld [vmem:[#allocation17 + $0x140] ss:$16 sps:$4 sm:$0xff]  }
 0x5a3   :  { %3336 = vmatpush1.bf16.msra.mxu0 %v13706_v55  ;;  %3296 = vmatprep.subr.bf16.mxu1 %v13711_v7  ;;  %v13778_v55 = vld [vmem:[#allocation17 + $0x340] ss:$16 sps:$4 sm:$0xff]   ;;  %v13783_v7 = vld [vmem:[#allocation17 + $0x124] ss:$16 sps:$4 sm:$0xff]  }
 0x5a4   :  { %3337 = vmatprep.subr.bf16.mxu0 %v13714_v56  ;;  %v13786_v56 = vld [vmem:[#allocation17 + $0x324] ss:$16 sps:$4 sm:$0xff]  }
 0x5a6   :  { %3297 = vmatpush1.bf16.msra.mxu1 %v13709_v57  ;;  %v13781_v57 = vld [vmem:[#allocation17 + $0x120] ss:$16 sps:$4 sm:$0xff]  }
 0x5a7   :  { %3338 = vmatpush1.bf16.msra.mxu0 %v13712_v8  ;;  %3298 = vmatprep.subr.bf16.mxu1 %v13717_v22  ;;  %v13784_v8 = vld [vmem:[#allocation17 + $0x320] ss:$16 sps:$4 sm:$0xff]   ;;  %v13789_v22 = vld [vmem:[#allocation17 + $0x104] ss:$16 sps:$4 sm:$0xff]  }
 0x5a8   :  { %3339 = vmatprep.subr.bf16.mxu0 %v13720_v23  ;;  %v13792_v23 = vld [vmem:[#allocation17 + $0x304] ss:$16 sps:$4 sm:$0xff]  }
 0x5aa   :  { %3299 = vmatpush1.bf16.msra.mxu1 %v13715_v59  ;;  %v13787_v59 = vld [vmem:[#allocation17 + $0x100] ss:$16 sps:$4 sm:$0xff]  }
 0x5ab   :  { %3340 = vmatpush1.bf16.msra.mxu0 %v13718_v62  ;;  %3300 = vmatprep.subr.bf16.mxu1 %v13723_v63  ;;  %v13790_v62 = vld [vmem:[#allocation17 + $0x300] ss:$16 sps:$4 sm:$0xff]   ;;  %v13795_v63 = vld [vmem:[#allocation17 + $0xec] ss:$16 sps:$4 sm:$0xff]  }
 0x5ac   :  { %3341 = vmatprep.subr.bf16.mxu0 %v13726_v2  ;;  %v13798_v2 = vld [vmem:[#allocation17 + $0x2ec] ss:$16 sps:$4 sm:$0xff]  }
 0x5ae   :  { %3301 = vmatpush1.bf16.msra.mxu1 %v13721_v10  ;;  %v13793_v10 = vld [vmem:[#allocation17 + $0xe8] ss:$16 sps:$4 sm:$0xff]  }
 0x5af   :  { %3342 = vmatpush1.bf16.msra.mxu0 %v13724_v11  ;;  %3302 = vmatprep.subr.bf16.mxu1 %v13729_v12  ;;  %v16180_v11 = vpack.c.bf16 %v16151_v4, %v16151_v4  ;;  %v13796_v12 = vld [vmem:[#allocation17 + $0x2e8] ss:$16 sps:$4 sm:$0xff]  }
 0x5b0   :  { %3343 = vmatprep.subr.bf16.mxu0 %v13732_v13  ;;  %v16184_v13 = vpack.c.bf16 %v16153_v5, %v16153_v5  ;;  %v13802_v4 = vld [vmem:[#allocation17 + $0x2c8] ss:$16 sps:$4 sm:$0xff]  }
 0x5b1   :  { %v13805_v5 = vld [vmem:[#allocation17 + $0xa8] ss:$16 sps:$4 sm:$0xff]  }
 0x5b2   :  { %3303 = vmatpush1.bf16.msra.mxu1 %v13727_v14  ;;  %v13801_v14 = vld [vmem:[#allocation17 + $0xcc] ss:$16 sps:$4 sm:$0xff]  }
 0x5b3   :  { %3344 = vmatpush1.bf16.msra.mxu0 %v13730_v15  ;;  %3304 = vmatprep.subr.bf16.mxu1 %v13735_v16  ;;  %v13804_v15 = vld [vmem:[#allocation17 + $0x2cc] ss:$16 sps:$4 sm:$0xff]   ;;  %v13799_v16 = vld [vmem:[#allocation17 + $0xc8] ss:$16 sps:$4 sm:$0xff]  }
 0x5b4   :  { %3345 = vmatprep.subr.bf16.mxu0 %v13738_v17  ;;  %v13807_v17 = vld [vmem:[#allocation17 + $0xac] ss:$16 sps:$4 sm:$0xff]  }
 0x5b6   :  { %3305 = vmatpush1.bf16.msra.mxu1 %v13733_v18  ;;  %v13810_v18 = vld [vmem:[#allocation17 + $0x2ac] ss:$16 sps:$4 sm:$0xff]  }
 0x5b7   :  { %3346 = vmatpush1.bf16.msra.mxu0 %v13736_v19  ;;  %3306 = vmatprep.subr.bf16.mxu1 %v13741_v20  ;;  %v13808_v19 = vld [vmem:[#allocation17 + $0x2a8] ss:$16 sps:$4 sm:$0xff]   ;;  %v13813_v20 = vld [vmem:[#allocation17 + $0x8c] ss:$16 sps:$4 sm:$0xff]  }
 0x5b8   :  { %3347 = vmatprep.subr.bf16.mxu0 %v13744_v21  ;;  %v13816_v21 = vld [vmem:[#allocation17 + $0x28c] ss:$16 sps:$4 sm:$0xff]  }
 0x5ba   :  { %3307 = vmatpush1.bf16.msra.mxu1 %v13739_v24  ;;  %v13811_v24 = vld [vmem:[#allocation17 + $0x88] ss:$16 sps:$4 sm:$0xff]  }
 0x5bb   :  { %3348 = vmatpush1.bf16.msra.mxu0 %v13742_v25  ;;  %3308 = vmatprep.subr.bf16.mxu1 %v13747_v26  ;;  %v13819_v25 = vld [vmem:[#allocation17 + $0x6c] ss:$16 sps:$4 sm:$0xff]  }
 0x5bc   :  { %3349 = vmatprep.subr.bf16.mxu0 %v13750_v27  ;;  %v13822_v26 = vld [vmem:[#allocation17 + $0x26c] ss:$16 sps:$4 sm:$0xff]   ;;  %v13820_v27 = vld [vmem:[#allocation17 + $0x268] ss:$16 sps:$4 sm:$0xff]  }
 0x5be   :  { %3309 = vmatpush2.bf16.msra.mxu1 %v13745_v28  ;;  %v13825_v28 = vld [vmem:[#allocation17 + $0x4c] ss:$16 sps:$4 sm:$0xff]  }
 0x5bf   :  { %3350 = vmatpush2.bf16.msra.mxu0 %v13748_v29  ;;  %3310 = vmatprep.subr.bf16.mxu1 %v13753_v30  ;;  %v13828_v29 = vld [vmem:[#allocation17 + $0x24c] ss:$16 sps:$4 sm:$0xff]   ;;  %v13823_v30 = vld [vmem:[#allocation17 + $0x48] ss:$16 sps:$4 sm:$0xff]  }
 0x5c0   :  { %3351 = vmatprep.subr.bf16.mxu0 %v13756_v31  ;;  %v13826_v31 = vld [vmem:[#allocation17 + $0x248] ss:$16 sps:$4 sm:$0xff]  }
 0x5c2   :  { %3311 = vmatpush2.bf16.msra.mxu1 %v13751_v32  ;;  %v13831_v32 = vld [vmem:[#allocation17 + $0x2c] ss:$16 sps:$4 sm:$0xff]  }
 0x5c3   :  { %3352 = vmatpush2.bf16.msra.mxu0 %v13754_v33  ;;  %3312 = vmatprep.subr.bf16.mxu1 %v13759_v34  ;;  %v13834_v33 = vld [vmem:[#allocation17 + $0x22c] ss:$16 sps:$4 sm:$0xff]   ;;  %v13829_v34 = vld [vmem:[#allocation17 + $0x28] ss:$16 sps:$4 sm:$0xff]  }
 0x5c4   :  { %3353 = vmatprep.subr.bf16.mxu0 %v13762_v35  ;;  %v13832_v35 = vld [vmem:[#allocation17 + $0x228] ss:$16 sps:$4 sm:$0xff]  }
 0x5c6   :  { %3313 = vmatpush2.bf16.msra.mxu1 %v13757_v36  ;;  %v13837_v36 = vld [vmem:[#allocation17 + $0xc] ss:$16 sps:$4 sm:$0xff]  }
 0x5c7   :  { %3354 = vmatpush2.bf16.msra.mxu0 %v13760_v37  ;;  %3314 = vmatprep.subr.bf16.mxu1 %v13765_v38  ;;  %v13840_v37 = vld [vmem:[#allocation17 + $0x20c] ss:$16 sps:$4 sm:$0xff]   ;;  %v13835_v38 = vld [vmem:[#allocation17 + $0x8] ss:$16 sps:$4 sm:$0xff]  }
 0x5c8   :  { %3355 = vmatprep.subr.bf16.mxu0 %v13768_v39  ;;  %v13838_v39 = vld [vmem:[#allocation17 + $0x208] ss:$16 sps:$4 sm:$0xff]  }
 0x5ca   :  { %3315 = vmatpush2.bf16.msra.mxu1 %v13763_v40  ;;  %v13843_v40 = vld [vmem:[#allocation17 + $0x1ec] ss:$16 sps:$4 sm:$0xff]  }
 0x5cb   :  { %3356 = vmatpush2.bf16.msra.mxu0 %v13766_v42  ;;  %3316 = vmatprep.subr.bf16.mxu1 %v13771_v45  ;;  %v13846_v42 = vld [vmem:[#allocation17 + $0x3ec] ss:$16 sps:$4 sm:$0xff]   ;;  %v13841_v45 = vld [vmem:[#allocation17 + $0x1e8] ss:$16 sps:$4 sm:$0xff]  }
 0x5cc   :  { %3357 = vmatprep.subr.bf16.mxu0 %v13774_v47  ;;  %v13844_v47 = vld [vmem:[#allocation17 + $0x3e8] ss:$16 sps:$4 sm:$0xff]  }
 0x5ce   :  { %3317 = vmatpush2.bf16.msra.mxu1 %v13769_v48  ;;  %v13849_v48 = vld [vmem:[#allocation17 + $0x1cc] ss:$16 sps:$4 sm:$0xff]  }
 0x5cf   :  { %3358 = vmatpush2.bf16.msra.mxu0 %v13772_v49  ;;  %3318 = vmatprep.subr.bf16.mxu1 %v13777_v51  ;;  %v13852_v49 = vld [vmem:[#allocation17 + $0x3cc] ss:$16 sps:$4 sm:$0xff]   ;;  %v13847_v51 = vld [vmem:[#allocation17 + $0x1c8] ss:$16 sps:$4 sm:$0xff]  }
 0x5d0   :  { %3359 = vmatprep.subr.bf16.mxu0 %v13780_v52  ;;  %v13850_v52 = vld [vmem:[#allocation17 + $0x3c8] ss:$16 sps:$4 sm:$0xff]  }
 0x5d2   :  { %3319 = vmatpush2.bf16.msra.mxu1 %v13775_v54  ;;  %v13855_v54 = vld [vmem:[#allocation17 + $0x1ac] ss:$16 sps:$4 sm:$0xff]  }
 0x5d3   :  { %3360 = vmatpush2.bf16.msra.mxu0 %v13778_v55  ;;  %3320 = vmatprep.subr.bf16.mxu1 %v13783_v7  ;;  %v13858_v55 = vld [vmem:[#allocation17 + $0x3ac] ss:$16 sps:$4 sm:$0xff]   ;;  %v13853_v7 = vld [vmem:[#allocation17 + $0x1a8] ss:$16 sps:$4 sm:$0xff]  }
 0x5d4   :  { %3361 = vmatprep.subr.bf16.mxu0 %v13786_v56  ;;  %v13856_v56 = vld [vmem:[#allocation17 + $0x3a8] ss:$16 sps:$4 sm:$0xff]  }
 0x5d6   :  { %3321 = vmatpush2.bf16.msra.mxu1 %v13781_v57  ;;  %v13861_v57 = vld [vmem:[#allocation17 + $0x18c] ss:$16 sps:$4 sm:$0xff]  }
 0x5d7   :  { %3362 = vmatpush2.bf16.msra.mxu0 %v13784_v8  ;;  %3322 = vmatprep.subr.bf16.mxu1 %v13789_v22  ;;  %v13864_v8 = vld [vmem:[#allocation17 + $0x38c] ss:$16 sps:$4 sm:$0xff]   ;;  %v13859_v22 = vld [vmem:[#allocation17 + $0x188] ss:$16 sps:$4 sm:$0xff]  }
 0x5d8   :  { %3363 = vmatprep.subr.bf16.mxu0 %v13792_v23  ;;  %v13862_v23 = vld [vmem:[#allocation17 + $0x388] ss:$16 sps:$4 sm:$0xff]  }
 0x5da   :  { %3323 = vmatpush2.bf16.msra.mxu1 %v13787_v59  ;;  %v13867_v59 = vld [vmem:[#allocation17 + $0x16c] ss:$16 sps:$4 sm:$0xff]  }
 0x5db   :  { %3364 = vmatpush2.bf16.msra.mxu0 %v13790_v62  ;;  %3374 = vmatprep.subr.bf16.mxu1 %v13795_v63  ;;  %v13870_v62 = vld [vmem:[#allocation17 + $0x36c] ss:$16 sps:$4 sm:$0xff]   ;;  %v13865_v63 = vld [vmem:[#allocation17 + $0x168] ss:$16 sps:$4 sm:$0xff]  }
 0x5dc   :  { %3415 = vmatprep.subr.bf16.mxu0 %v13798_v2  ;;  %v13868_v2 = vld [vmem:[#allocation17 + $0x368] ss:$16 sps:$4 sm:$0xff]  }
 0x5dd   :  { %3325 = vmatmul.mubr.bf16.vlgmr.msra.gmra.mxu1 %v16180_v11 }
 0x5de   :  { %3366 = vmatmul.mubr.bf16.vlgmr.msra.gmra.mxu0 %v16184_v13  ;;  %3375 = vmatpush1.bf16.msra.mxu1 %v13793_v10  ;;  %v13873_v10 = vld [vmem:[#allocation17 + $0x14c] ss:$16 sps:$4 sm:$0xff]  }
 0x5df   :  { %3406 = vmatprep.mubr.bf16.mxu1 %v16168_v50  ;;  %3416 = vmatpush1.bf16.msra.mxu0 %v13796_v12  ;;  %v13814_v50 = vld [vmem:[#allocation17 + $0x288] ss:$16 sps:$4 sm:$0xff]   ;;  %v13876_v12 = vld [vmem:[#allocation17 + $0x34c] ss:$16 sps:$4 sm:$0xff]  }
 0x5e0   :  { %3447 = vmatprep.mubr.bf16.mxu0 %v16172_v53  ;;  %3376 = vmatprep.subr.bf16.mxu1 %v13801_v14  ;;  %v13817_v53 = vld [vmem:[#allocation17 + $0x68] ss:$16 sps:$4 sm:$0xff]  }
 0x5e1   :  { %3417 = vmatprep.subr.bf16.mxu0 %v13804_v15  ;;  %v13871_v14 = vld [vmem:[#allocation17 + $0x148] ss:$16 sps:$4 sm:$0xff]  }
 0x5e2   :  { %3377 = vmatpush1.bf16.msra.mxu1 %v13799_v16  ;;  %v13874_v15 = vld [vmem:[#allocation17 + $0x348] ss:$16 sps:$4 sm:$0xff]   ;;  %v13879_v16 = vld [vmem:[#allocation17 + $0x12c] ss:$16 sps:$4 sm:$0xff]  }
 0x5e3   :  { %3418 = vmatpush1.bf16.msra.mxu0 %v13802_v4  ;;  %3378 = vmatprep.subr.bf16.mxu1 %v13807_v17  ;;  %v13882_v4 = vld [vmem:[#allocation17 + $0x32c] ss:$16 sps:$4 sm:$0xff]   ;;  %v13877_v17 = vld [vmem:[#allocation17 + $0x128] ss:$16 sps:$4 sm:$0xff]  }
 0x5e4   :  { %3419 = vmatprep.subr.bf16.mxu0 %v13810_v18  ;;  %v13880_v18 = vld [vmem:[#allocation17 + $0x328] ss:$16 sps:$4 sm:$0xff]  }
 0x5e6   :  { %3379 = vmatpush1.bf16.msra.mxu1 %v13805_v5  ;;  %v13885_v5 = vld [vmem:[#allocation17 + $0x10c] ss:$16 sps:$4 sm:$0xff]  }
 0x5e7   :  { %3420 = vmatpush1.bf16.msra.mxu0 %v13808_v19  ;;  %3380 = vmatprep.subr.bf16.mxu1 %v13813_v20  ;;  %v13888_v19 = vld [vmem:[#allocation17 + $0x30c] ss:$16 sps:$4 sm:$0xff]   ;;  %v13883_v20 = vld [vmem:[#allocation17 + $0x108] ss:$16 sps:$4 sm:$0xff]  }
 0x5e8   :  { %3421 = vmatprep.subr.bf16.mxu0 %v13816_v21  ;;  %v13886_v21 = vld [vmem:[#allocation17 + $0x308] ss:$16 sps:$4 sm:$0xff]  }
 0x5ea   :  { %3381 = vmatpush1.bf16.msra.mxu1 %v13811_v24 }
 0x5eb   :  { %3422 = vmatpush1.bf16.msra.mxu0 %v13814_v50  ;;  %3382 = vmatprep.subr.bf16.mxu1 %v13819_v25 }
 0x5ec   :  { %3423 = vmatprep.subr.bf16.mxu0 %v13822_v26 }
 0x5ee   :  { %3383 = vmatpush1.bf16.msra.mxu1 %v13817_v53 }
 0x5ef   :  { %3424 = vmatpush1.bf16.msra.mxu0 %v13820_v27  ;;  %3384 = vmatprep.subr.bf16.mxu1 %v13825_v28 }
 0x5f0   :  { %3425 = vmatprep.subr.bf16.mxu0 %v13828_v29 }
 0x5f2   :  { %3385 = vmatpush1.bf16.msra.mxu1 %v13823_v30  ;;  %v13891_v30 = vld [vmem:[#allocation17 + $0x8e4] ss:$16 sps:$4 sm:$0xff]  }
 0x5f3   :  { %3426 = vmatpush1.bf16.msra.mxu0 %v13826_v31  ;;  %3386 = vmatprep.subr.bf16.mxu1 %v13831_v32  ;;  %v13892_v31 = vld [vmem:[#allocation17 + $0xae0] ss:$16 sps:$4 sm:$0xff]   ;;  %v13900_v32 = vld [vmem:[#allocation17 + $0xac4] ss:$16 sps:$4 sm:$0xff]  }
 0x5f4   :  { %3427 = vmatprep.subr.bf16.mxu0 %v13834_v33  ;;  %v13895_v33 = vld [vmem:[#allocation17 + $0x8c0] ss:$16 sps:$4 sm:$0xff]  }
 0x5f6   :  { %3387 = vmatpush1.bf16.msra.mxu1 %v13829_v34  ;;  %v13898_v34 = vld [vmem:[#allocation17 + $0xac0] ss:$16 sps:$4 sm:$0xff]  }
 0x5f7   :  { %3428 = vmatpush1.bf16.msra.mxu0 %v13832_v35  ;;  %3388 = vmatprep.subr.bf16.mxu1 %v13837_v36  ;;  %v13903_v35 = vld [vmem:[#allocation17 + $0x8a4] ss:$16 sps:$4 sm:$0xff]  }
 0x5f8   :  { %3429 = vmatprep.subr.bf16.mxu0 %v13840_v37  ;;  %v13906_v36 = vld [vmem:[#allocation17 + $0xaa4] ss:$16 sps:$4 sm:$0xff]   ;;  %v13901_v37 = vld [vmem:[#allocation17 + $0x8a0] ss:$16 sps:$4 sm:$0xff]  }
 0x5fa   :  { %3389 = vmatpush1.bf16.msra.mxu1 %v13835_v38  ;;  %v13904_v38 = vld [vmem:[#allocation17 + $0xaa0] ss:$16 sps:$4 sm:$0xff]  }
 0x5fb   :  { %3430 = vmatpush1.bf16.msra.mxu0 %v13838_v39  ;;  %3390 = vmatprep.subr.bf16.mxu1 %v13843_v40  ;;  %v13909_v39 = vld [vmem:[#allocation17 + $0x884] ss:$16 sps:$4 sm:$0xff]  }
 0x5fc   :  { %3431 = vmatprep.subr.bf16.mxu0 %v13846_v42  ;;  %v13912_v40 = vld [vmem:[#allocation17 + $0xa84] ss:$16 sps:$4 sm:$0xff]   ;;  %v13907_v42 = vld [vmem:[#allocation17 + $0x880] ss:$16 sps:$4 sm:$0xff]  }
 0x5fe   :  { %3391 = vmatpush2.bf16.msra.mxu1 %v13841_v45  ;;  %v13910_v45 = vld [vmem:[#allocation17 + $0xa80] ss:$16 sps:$4 sm:$0xff]  }
 0x5ff   :  { %3432 = vmatpush2.bf16.msra.mxu0 %v13844_v47  ;;  %3392 = vmatprep.subr.bf16.mxu1 %v13849_v48  ;;  %v13915_v47 = vld [vmem:[#allocation17 + $0x864] ss:$16 sps:$4 sm:$0xff]  }
 0x600   :  { %3433 = vmatprep.subr.bf16.mxu0 %v13852_v49  ;;  %v13918_v48 = vld [vmem:[#allocation17 + $0xa64] ss:$16 sps:$4 sm:$0xff]   ;;  %v13913_v49 = vld [vmem:[#allocation17 + $0x860] ss:$16 sps:$4 sm:$0xff]  }
 0x602   :  { %3393 = vmatpush2.bf16.msra.mxu1 %v13847_v51  ;;  %v13916_v51 = vld [vmem:[#allocation17 + $0xa60] ss:$16 sps:$4 sm:$0xff]  }
 0x603   :  { %3434 = vmatpush2.bf16.msra.mxu0 %v13850_v52  ;;  %3394 = vmatprep.subr.bf16.mxu1 %v13855_v54  ;;  %v13921_v52 = vld [vmem:[#allocation17 + $0x844] ss:$16 sps:$4 sm:$0xff]  }
 0x604   :  { %3435 = vmatprep.subr.bf16.mxu0 %v13858_v55  ;;  %v13924_v54 = vld [vmem:[#allocation17 + $0xa44] ss:$16 sps:$4 sm:$0xff]   ;;  %v13919_v55 = vld [vmem:[#allocation17 + $0x840] ss:$16 sps:$4 sm:$0xff]  }
 0x606   :  { %3395 = vmatpush2.bf16.msra.mxu1 %v13853_v7  ;;  %v13922_v7 = vld [vmem:[#allocation17 + $0xa40] ss:$16 sps:$4 sm:$0xff]  }
 0x607   :  { %3436 = vmatpush2.bf16.msra.mxu0 %v13856_v56  ;;  %3396 = vmatprep.subr.bf16.mxu1 %v13861_v57  ;;  %v13927_v56 = vld [vmem:[#allocation17 + $0x824] ss:$16 sps:$4 sm:$0xff]  }
 0x608   :  { %3437 = vmatprep.subr.bf16.mxu0 %v13864_v8  ;;  %v13930_v57 = vld [vmem:[#allocation17 + $0xa24] ss:$16 sps:$4 sm:$0xff]   ;;  %v13925_v8 = vld [vmem:[#allocation17 + $0x820] ss:$16 sps:$4 sm:$0xff]  }
 0x60a   :  { %3397 = vmatpush2.bf16.msra.mxu1 %v13859_v22  ;;  %v13928_v22 = vld [vmem:[#allocation17 + $0xa20] ss:$16 sps:$4 sm:$0xff]  }
 0x60b   :  { %3438 = vmatpush2.bf16.msra.mxu0 %v13862_v23  ;;  %3398 = vmatprep.subr.bf16.mxu1 %v13867_v59  ;;  %v13933_v23 = vld [vmem:[#allocation17 + $0x804] ss:$16 sps:$4 sm:$0xff]  }
 0x60c   :  { %3439 = vmatprep.subr.bf16.mxu0 %v13870_v62  ;;  %v13936_v59 = vld [vmem:[#allocation17 + $0xa04] ss:$16 sps:$4 sm:$0xff]   ;;  %v13931_v62 = vld [vmem:[#allocation17 + $0x800] ss:$16 sps:$4 sm:$0xff]  }
 0x60e   :  { %3399 = vmatpush2.bf16.msra.mxu1 %v13865_v63  ;;  %v13934_v63 = vld [vmem:[#allocation17 + $0xa00] ss:$16 sps:$4 sm:$0xff]  }
 0x60f   :  { %3440 = vmatpush2.bf16.msra.mxu0 %v13868_v2  ;;  %3400 = vmatprep.subr.bf16.mxu1 %v13873_v10  ;;  %v13939_v2 = vld [vmem:[#allocation17 + $0x9e4] ss:$16 sps:$4 sm:$0xff]  }
 0x610   :  { %3441 = vmatprep.subr.bf16.mxu0 %v13876_v12  ;;  %v13942_v10 = vld [vmem:[#allocation17 + $0xbe4] ss:$16 sps:$4 sm:$0xff]   ;;  %v13937_v12 = vld [vmem:[#allocation17 + $0x9e0] ss:$16 sps:$4 sm:$0xff]  }
 0x612   :  { %3401 = vmatpush2.bf16.msra.mxu1 %v13871_v14  ;;  %v13940_v14 = vld [vmem:[#allocation17 + $0xbe0] ss:$16 sps:$4 sm:$0xff]  }
 0x613   :  { %3442 = vmatpush2.bf16.msra.mxu0 %v13874_v15  ;;  %3402 = vmatprep.subr.bf16.mxu1 %v13879_v16  ;;  %v13945_v15 = vld [vmem:[#allocation17 + $0x9c4] ss:$16 sps:$4 sm:$0xff]  }
 0x614   :  { %3443 = vmatprep.subr.bf16.mxu0 %v13882_v4  ;;  %v13948_v16 = vld [vmem:[#allocation17 + $0xbc4] ss:$16 sps:$4 sm:$0xff]   ;;  %v13943_v4 = vld [vmem:[#allocation17 + $0x9c0] ss:$16 sps:$4 sm:$0xff]  }
 0x616   :  { %3403 = vmatpush2.bf16.msra.mxu1 %v13877_v17  ;;  %v13946_v17 = vld [vmem:[#allocation17 + $0xbc0] ss:$16 sps:$4 sm:$0xff]  }
 0x617   :  { %3444 = vmatpush2.bf16.msra.mxu0 %v13880_v18  ;;  %3404 = vmatprep.subr.bf16.mxu1 %v13885_v5  ;;  %v13951_v18 = vld [vmem:[#allocation17 + $0x9a4] ss:$16 sps:$4 sm:$0xff]  }
 0x618   :  { %3445 = vmatprep.subr.bf16.mxu0 %v13888_v19  ;;  %v13954_v5 = vld [vmem:[#allocation17 + $0xba4] ss:$16 sps:$4 sm:$0xff]   ;;  %v13949_v19 = vld [vmem:[#allocation17 + $0x9a0] ss:$16 sps:$4 sm:$0xff]  }
 0x61a   :  { %3405 = vmatpush2.bf16.msra.mxu1 %v13883_v20  ;;  %v13952_v20 = vld [vmem:[#allocation17 + $0xba0] ss:$16 sps:$4 sm:$0xff]  }
 0x61b   :  { %3446 = vmatpush2.bf16.msra.mxu0 %v13886_v21  ;;  %3475 = vmatprep.subr.bf16.mxu1 %v16121_v43  ;;  %v13957_v21 = vld [vmem:[#allocation17 + $0x984] ss:$16 sps:$4 sm:$0xff]  }
 0x61c   :  { %3516 = vmatprep.subr.bf16.mxu0 %v16123_v44 }
 0x61d   :  { %3407 = vmatmul.mubr.bf16.vlgmr.msra.gmra.mxu1 %v16180_v11  ;;  %v2522_v24 = vpop.f32.mrf.mxu1  ;;  %v2563_v50 = vpop.f32.mrf.mxu0  ;;  %v3457_v11 = vld [vmem:[#allocation16 + $0x8] sm:$0xf] }
 0x61e   :  { %3448 = vmatmul.mubr.bf16.vlgmr.msra.gmra.mxu0 %v16184_v13  ;;  %v16194_v25 = vadd.f32 %v2563_v50, %v2522_v24  ;;  %3476 = vmatpush1.bf16.msra.mxu1 %v16119_v41  ;;  %v13889_v13 = vld [vmem:[#allocation17 + $0x8e0] ss:$16 sps:$4 sm:$0xff]   ;;  %v13894_v41 = vld [vmem:[#allocation17 + $0xae4] ss:$16 sps:$4 sm:$0xff]  }
 0x61f   :  { %3517 = vmatpush1.bf16.msra.mxu0 %v16125_v46  ;;  %v2524_v26 = vpop.f32.mrf.mxu1  ;;  %v2565_v53 = vpop.f32.mrf.mxu0  ;;  %3493 = vmatprep.mubr.bf16.mxu1 %v15816_v9  ;;  %v13897_v46 = vld [vmem:[#allocation17 + $0x8c4] ss:$16 sps:$4 sm:$0xff]   ;;  %v13955_v50 = vld [vmem:[#allocation17 + $0x980] ss:$16 sps:$4 sm:$0xff]  }
 0x620   :  { %v16199_v27 = vadd.f32 %v2565_v53, %v2524_v26  ;;  %3534 = vmatprep.mubr.bf16.mxu0 %v15816_v9  ;;  %4316 = vmatprep.subr.bf16.mxu1 %v13891_v30  ;;  %v13960_v24 = vld [vmem:[#allocation17 + $0xb84] ss:$16 sps:$4 sm:$0xff]   ;;  %v13958_v26 = vld [vmem:[#allocation17 + $0xb80] ss:$16 sps:$4 sm:$0xff]  }
 0x621   :  { %v2526_v43 = vpop.f32.mrf.mxu1  ;;  %v2567_v44 = vpop.f32.mrf.mxu0  ;;  %4357 = vmatprep.subr.bf16.mxu0 %v13894_v41  ;;  %v13963_v53 = vld [vmem:[#allocation17 + $0x964] ss:$16 sps:$4 sm:$0xff]  }
 0x622   :  { %v13966_v43 = vld [vmem:[#allocation17 + $0xb64] ss:$16 sps:$4 sm:$0xff]   ;;  %v13961_v44 = vld [vmem:[#allocation17 + $0x960] ss:$16 sps:$4 sm:$0xff]  }
 0x623   :  { %v2527_v28 = vpop.f32.mrf.mxu1  ;;  %v2568_v29 = vpop.f32.mrf.mxu0  ;;  %v13969_v30 = vld [vmem:[#allocation17 + $0x944] ss:$16 sps:$4 sm:$0xff]  }
 0x625   :  { %12114 = vmatmul.mubr.msk.bf16.vlgmr.msra.gmra.mxu1 %vm560_vm2, %v3457_v11 }
 0x626   :  { %12115 = vmatmul.mubr.msk.bf16.vlgmr.msra.gmra.mxu0 %vm560_vm2, %v3457_v11  ;;  %4317 = vmatpush1.bf16.msra.mxu1 %v13889_v13  ;;  %v13964_v11 = vld [vmem:[#allocation17 + $0xb60] ss:$16 sps:$4 sm:$0xff]  }
 0x627   :  { %4358 = vmatpush1.bf16.msra.mxu0 %v13892_v31  ;;  %4318 = vmatprep.subr.bf16.mxu1 %v13897_v46  ;;  %v13972_v31 = vld [vmem:[#allocation17 + $0xb44] ss:$16 sps:$4 sm:$0xff]  }
 0x628   :  { %4359 = vmatprep.subr.bf16.mxu0 %v13900_v32  ;;  %v13967_v32 = vld [vmem:[#allocation17 + $0x940] ss:$16 sps:$4 sm:$0xff]  }
 0x62a   :  { %4319 = vmatpush1.bf16.msra.mxu1 %v13895_v33  ;;  %v13970_v33 = vld [vmem:[#allocation17 + $0xb40] ss:$16 sps:$4 sm:$0xff]  }
 0x62b   :  { %4360 = vmatpush1.bf16.msra.mxu0 %v13898_v34  ;;  %4320 = vmatprep.subr.bf16.mxu1 %v13903_v35 }
 0x62c   :  { %4361 = vmatprep.subr.bf16.mxu0 %v13906_v36 }
 0x62e   :  { %4321 = vmatpush1.bf16.msra.mxu1 %v13901_v37  ;;  %v13973_v37 = vld [vmem:[#allocation17 + $0x920] ss:$16 sps:$4 sm:$0xff]  }
 0x62f   :  { %4362 = vmatpush1.bf16.msra.mxu0 %v13904_v38  ;;  %4322 = vmatprep.subr.bf16.mxu1 %v13909_v39  ;;  %v13975_v38 = vld [vmem:[#allocation17 + $0x924] ss:$16 sps:$4 sm:$0xff]   ;;  %v13976_v39 = vld [vmem:[#allocation17 + $0xb20] ss:$16 sps:$4 sm:$0xff]  }
 0x630   :  { %4363 = vmatprep.subr.bf16.mxu0 %v13912_v40 }
 0x632   :  { %4323 = vmatpush1.bf16.msra.mxu1 %v13907_v42 }
 0x633   :  { %4364 = vmatpush1.bf16.msra.mxu0 %v13910_v45  ;;  %4324 = vmatprep.subr.bf16.mxu1 %v13915_v47  ;;  %v13978_v45 = vld [vmem:[#allocation17 + $0xb24] ss:$16 sps:$4 sm:$0xff]  }
 0x634   :  { %4365 = vmatprep.subr.bf16.mxu0 %v13918_v48  ;;  %v13981_v47 = vld [vmem:[#allocation17 + $0x904] ss:$16 sps:$4 sm:$0xff]  }
 0x635   :  { %v13984_v48 = vld [vmem:[#allocation17 + $0xb04] ss:$16 sps:$4 sm:$0xff]  }
 0x636   :  { %4325 = vmatpush1.bf16.msra.mxu1 %v13913_v49  ;;  %v13979_v49 = vld [vmem:[#allocation17 + $0x900] ss:$16 sps:$4 sm:$0xff]  }
 0x637   :  { %4366 = vmatpush1.bf16.msra.mxu0 %v13916_v51  ;;  %4326 = vmatprep.subr.bf16.mxu1 %v13921_v52  ;;  %v13982_v51 = vld [vmem:[#allocation17 + $0xb00] ss:$16 sps:$4 sm:$0xff]   ;;  %v13987_v52 = vld [vmem:[#allocation17 + $0x8ec] ss:$16 sps:$4 sm:$0xff]  }
 0x638   :  { %4367 = vmatprep.subr.bf16.mxu0 %v13924_v54  ;;  %v13990_v54 = vld [vmem:[#allocation17 + $0xaec] ss:$16 sps:$4 sm:$0xff]  }
 0x63a   :  { %4327 = vmatpush1.bf16.msra.mxu1 %v13919_v55 }
 0x63b   :  { %4368 = vmatpush1.bf16.msra.mxu0 %v13922_v7  ;;  %4328 = vmatprep.subr.bf16.mxu1 %v13927_v56 }
 0x63c   :  { %4369 = vmatprep.subr.bf16.mxu0 %v13930_v57 }
 0x63e   :  { %4329 = vmatpush1.bf16.msra.mxu1 %v13925_v8 }
 0x63f   :  { %4370 = vmatpush1.bf16.msra.mxu0 %v13928_v22  ;;  %4330 = vmatprep.subr.bf16.mxu1 %v13933_v23 }
 0x640   :  { %4371 = vmatprep.subr.bf16.mxu0 %v13936_v59 }
 0x642   :  { %4331 = vmatpush1.bf16.msra.mxu1 %v13931_v62 }
 0x643   :  { %4372 = vmatpush1.bf16.msra.mxu0 %v13934_v63  ;;  %4332 = vmatprep.subr.bf16.mxu1 %v13939_v2 }
 0x644   :  { %4373 = vmatprep.subr.bf16.mxu0 %v13942_v10 }
 0x646   :  { %4333 = vmatpush2.bf16.msra.mxu1 %v13937_v12 }
 0x647   :  { %4374 = vmatpush2.bf16.msra.mxu0 %v13940_v14  ;;  %4334 = vmatprep.subr.bf16.mxu1 %v13945_v15 }
 0x648   :  { %4375 = vmatprep.subr.bf16.mxu0 %v13948_v16 }
 0x64a   :  { %4335 = vmatpush2.bf16.msra.mxu1 %v13943_v4 }
 0x64b   :  { %4376 = vmatpush2.bf16.msra.mxu0 %v13946_v17  ;;  %4336 = vmatprep.subr.bf16.mxu1 %v13951_v18 }
 0x64c   :  { %4377 = vmatprep.subr.bf16.mxu0 %v13954_v5 }
 0x64e   :  { %4337 = vmatpush2.bf16.msra.mxu1 %v13949_v19 }
 0x64f   :  { %4378 = vmatpush2.bf16.msra.mxu0 %v13952_v20  ;;  %4338 = vmatprep.subr.bf16.mxu1 %v13957_v21 }
 0x650   :  { %4379 = vmatprep.subr.bf16.mxu0 %v13960_v24 }
 0x652   :  { %4339 = vmatpush2.bf16.msra.mxu1 %v13955_v50 }
 0x653   :  { %4380 = vmatpush2.bf16.msra.mxu0 %v13958_v26  ;;  %4340 = vmatprep.subr.bf16.mxu1 %v13963_v53 }
 0x654   :  { %4381 = vmatprep.subr.bf16.mxu0 %v13966_v43  ;;  %v13985_v43 = vld [vmem:[#allocation17 + $0x8e8] ss:$16 sps:$4 sm:$0xff]  }
 0x656   :  { %4341 = vmatpush2.bf16.msra.mxu1 %v13961_v44 }
 0x657   :  { %4382 = vmatpush2.bf16.msra.mxu0 %v13964_v11  ;;  %4342 = vmatprep.subr.bf16.mxu1 %v13969_v30 }
 0x658   :  { %4383 = vmatprep.subr.bf16.mxu0 %v13972_v31  ;;  %v13993_v31 = vld [vmem:[#allocation17 + $0x8cc] ss:$16 sps:$4 sm:$0xff]  }
 0x65a   :  { %4343 = vmatpush2.bf16.msra.mxu1 %v13967_v32 }
 0x65b   :  { %4384 = vmatpush2.bf16.msra.mxu0 %v13970_v33  ;;  %4344 = vmatprep.subr.bf16.mxu1 %v13975_v38  ;;  %v13991_v33 = vld [vmem:[#allocation17 + $0x8c8] ss:$16 sps:$4 sm:$0xff]  }
 0x65c   :  { %4385 = vmatprep.subr.bf16.mxu0 %v13978_v45  ;;  %v14000_v38 = vld [vmem:[#allocation17 + $0xaa8] ss:$16 sps:$4 sm:$0xff]  }
 0x65d   :  { %v2604_v28 = vpop.f32.mrf.mxu1  ;;  %v2645_v29 = vpop.f32.mrf.mxu0  ;;  %v14006_v45 = vld [vmem:[#allocation17 + $0xa88] ss:$16 sps:$4 sm:$0xff]  }
 0x65e   :  { %v2646_v13 = vadd.f32 %v2645_v29, %v2604_v28  ;;  %4345 = vmatpush2.bf16.msra.mxu1 %v13973_v37  ;;  %v13988_v29 = vld [vmem:[#allocation17 + $0xae8] ss:$16 sps:$4 sm:$0xff]  }
 0x65f   :  { %v2606_v41 = vpop.f32.mrf.mxu1  ;;  %v2647_v46 = vpop.f32.mrf.mxu0  ;;  %4386 = vmatpush2.bf16.msra.mxu0 %v13976_v39  ;;  %4346 = vmatprep.subr.bf16.mxu1 %v13981_v47  ;;  %v13997_v37 = vld [vmem:[#allocation17 + $0x8a8] ss:$16 sps:$4 sm:$0xff]   ;;  %v14005_v39 = vld [vmem:[#allocation17 + $0x88c] ss:$16 sps:$4 sm:$0xff]  }
 0x660   :  { %v2648_v34 = vadd.f32 %v2647_v46, %v2606_v41  ;;  %4387 = vmatprep.subr.bf16.mxu0 %v13984_v48  ;;  %v13996_v46 = vld [vmem:[#allocation17 + $0xacc] ss:$16 sps:$4 sm:$0xff]  }
 0x661   :  { %v2608_v35 = vpop.f32.mrf.mxu1  ;;  %v2649_v36 = vpop.f32.mrf.mxu0  ;;  %v14011_v47 = vld [vmem:[#allocation17 + $0x86c] ss:$16 sps:$4 sm:$0xff]  }
 0x662   :  { %4347 = vmatpush2.bf16.msra.mxu1 %v13979_v49  ;;  %v13999_v35 = vld [vmem:[#allocation17 + $0x8ac] ss:$16 sps:$4 sm:$0xff]   ;;  %v14009_v49 = vld [vmem:[#allocation17 + $0x868] ss:$16 sps:$4 sm:$0xff]  }
 0x663   :  { %v2609_v40 = vpop.f32.mrf.mxu1  ;;  %v2650_v42 = vpop.f32.mrf.mxu0  ;;  %4388 = vmatpush2.bf16.msra.mxu0 %v13982_v51  ;;  %4398 = vmatprep.subr.bf16.mxu1 %v13987_v52  ;;  %v14002_v36 = vld [vmem:[#allocation17 + $0xaac] ss:$16 sps:$4 sm:$0xff]   ;;  %v14012_v51 = vld [vmem:[#allocation17 + $0xa68] ss:$16 sps:$4 sm:$0xff]  }
 0x664   :  { %4439 = vmatprep.subr.bf16.mxu0 %v13990_v54  ;;  %v14008_v40 = vld [vmem:[#allocation17 + $0xa8c] ss:$16 sps:$4 sm:$0xff]   ;;  %v14003_v42 = vld [vmem:[#allocation17 + $0x888] ss:$16 sps:$4 sm:$0xff]  }
 0x665   :  { %v14014_v48 = vld [vmem:[#allocation17 + $0xa6c] ss:$16 sps:$4 sm:$0xff]  }
 0x666   :  { %v14017_v52 = vld [vmem:[#allocation17 + $0x84c] ss:$16 sps:$4 sm:$0xff]  }
 0x667   :  { %v14020_v54 = vld [vmem:[#allocation17 + $0xa4c] ss:$16 sps:$4 sm:$0xff]  }
 0x69d   :  { %v3326_v55 = vpop.f32.mrf.mxu1 }
 0x69e   :  { %v3327_v7 = vadd.f32 %v3326_v55, %v16194_v25  ;;  %v3367_v56 = vpop.f32.mrf.mxu0  ;;  %v14015_v55 = vld [vmem:[#allocation17 + $0x848] ss:$16 sps:$4 sm:$0xff]  }
 0x69f   :  { %v3328_v57 = vpop.f32.mrf.mxu1 }
 0x6a0   :  { %v16205_v8 = vadd.f32 %v3367_v56, %v3327_v7  ;;  %v3329_v22 = vadd.f32 %v3328_v57, %v16199_v27  ;;  %v3369_v23 = vpop.f32.mrf.mxu0  ;;  %v14018_v7 = vld [vmem:[#allocation17 + $0xa48] ss:$16 sps:$4 sm:$0xff]   ;;  %v14023_v56 = vld [vmem:[#allocation17 + $0x82c] ss:$16 sps:$4 sm:$0xff]  }
 0x6a1   :  { %v3330_v59 = vpop.f32.mrf.mxu1  ;;  %v14026_v57 = vld [vmem:[#allocation17 + $0xa2c] ss:$16 sps:$4 sm:$0xff]  }
 0x6a2   :  { %v16208_v62 = vadd.f32 %v3369_v23, %v3329_v22  ;;  %v3371_v63 = vpop.f32.mrf.mxu0  ;;  %v14021_v22 = vld [vmem:[#allocation17 + $0x828] ss:$16 sps:$4 sm:$0xff]   ;;  %v14029_v59 = vld [vmem:[#allocation17 + $0x80c] ss:$16 sps:$4 sm:$0xff]  }
 0x6a3   :  { %v3331_v2 = vpop.f32.mrf.mxu1  ;;  %v14024_v23 = vld [vmem:[#allocation17 + $0xa28] ss:$16 sps:$4 sm:$0xff]   ;;  %v14032_v63 = vld [vmem:[#allocation17 + $0xa0c] ss:$16 sps:$4 sm:$0xff]  }
 0x6a4   :  { %v3372_v10 = vpop.f32.mrf.mxu0  ;;  %v14027_v2 = vld [vmem:[#allocation17 + $0x808] ss:$16 sps:$4 sm:$0xff]  }
 0x6a5   :  { %v14030_v10 = vld [vmem:[#allocation17 + $0xa08] ss:$16 sps:$4 sm:$0xff]  }
 0x6dd   :  { %v3408_v12 = vpop.f32.mrf.mxu1 }
 0x6de   :  { %v3409_v14 = vadd.f32 %v3408_v12, %v2646_v13  ;;  %v3449_v15 = vpop.f32.mrf.mxu0  ;;  %v14035_v12 = vld [vmem:[#allocation17 + $0x9ec] ss:$16 sps:$4 sm:$0xff]  }
 0x6df   :  { %v3410_v16 = vpop.f32.mrf.mxu1 }
 0x6e0   :  { %v16210_v4 = vadd.f32 %v3449_v15, %v3409_v14  ;;  %v3411_v25 = vadd.f32 %v3410_v16, %v2648_v34  ;;  %v3451_v17 = vpop.f32.mrf.mxu0  ;;  %v13994_v34 = vld [vmem:[#allocation17 + $0xac8] ss:$16 sps:$4 sm:$0xff]   ;;  %v14038_v14 = vld [vmem:[#allocation17 + $0xbec] ss:$16 sps:$4 sm:$0xff]  }
 0x6e1   :  { %v3412_v18 = vpop.f32.mrf.mxu1  ;;  %v14033_v15 = vld [vmem:[#allocation17 + $0x9e8] ss:$16 sps:$4 sm:$0xff]  }
 0x6e2   :  { %v16212_v5 = vadd.f32 %v3451_v17, %v3411_v25  ;;  %v3453_v19 = vpop.f32.mrf.mxu0  ;;  %v14036_v16 = vld [vmem:[#allocation17 + $0xbe8] ss:$16 sps:$4 sm:$0xff]   ;;  %v14041_v25 = vld [vmem:[#allocation17 + $0x9cc] ss:$16 sps:$4 sm:$0xff]  }
 0x6e3   :  { %v3413_v27 = vpop.f32.mrf.mxu1  ;;  %v14044_v17 = vld [vmem:[#allocation17 + $0xbcc] ss:$16 sps:$4 sm:$0xff]   ;;  %v14039_v18 = vld [vmem:[#allocation17 + $0x9c8] ss:$16 sps:$4 sm:$0xff]  }
 0x6e4   :  { %v3454_v20 = vpop.f32.mrf.mxu0  ;;  %v14042_v19 = vld [vmem:[#allocation17 + $0xbc8] ss:$16 sps:$4 sm:$0xff]   ;;  %v14047_v27 = vld [vmem:[#allocation17 + $0x9ac] ss:$16 sps:$4 sm:$0xff]  }
 0x6e5   :  { %v3495_v21 = vpop.f32.mrf.mxu1  ;;  %v14050_v20 = vld [vmem:[#allocation17 + $0xbac] ss:$16 sps:$4 sm:$0xff]  }
 0x6e6   :  { %v3536_v24 = vpop.f32.mrf.mxu0  ;;  %v16214_v44 = vpack.c.bf16 %v3495_v21, %v3495_v21  ;;  %v14045_v21 = vld [vmem:[#allocation17 + $0x9a8] ss:$16 sps:$4 sm:$0xff]  }
 0x6e7   :  { %v3497_v50 = vpop.f32.mrf.mxu1  ;;  %v16216_v13 = vpack.c.bf16 %v3536_v24, %v3536_v24  ;;  %v14048_v24 = vld [vmem:[#allocation17 + $0xba8] ss:$16 sps:$4 sm:$0xff]  }
 0x6e8   :  { %v3544_v26 = vpack.c.bf16 %v3497_v50, %v3497_v50  ;;  %v3538_v53 = vpop.f32.mrf.mxu0  ;;  %v14053_v50 = vld [vmem:[#allocation17 + $0x98c] ss:$16 sps:$4 sm:$0xff]  }
 0x6e9   :  { %v3546_v11 = vpack.c.bf16 %v3538_v53, %v3538_v53  ;;  %v3499_v28 = vpop.f32.mrf.mxu1  ;;  %v14051_v53 = vld [vmem:[#allocation17 + $0x988] ss:$16 sps:$4 sm:$0xff]  }
 0x6ea   :  { %v3540_v30 = vpop.f32.mrf.mxu0  ;;  %4348 = vmatprep.mubr.bf16.mxu1 %v3544_v26  ;;  %v14062_v28 = vld [vmem:[#allocation17 + $0xb6c] ss:$16 sps:$4 sm:$0xff]  }
 0x6eb   :  { %4389 = vmatprep.mubr.bf16.mxu0 %v3546_v11  ;;  %v3500_v41 = vpop.f32.mrf.mxu1  ;;  %4349 = vmatmul.mubr.bf16.vlgmr.msra.gmra.mxu1 %v16214_v44  ;;  %v14060_v30 = vld [vmem:[#allocation17 + $0xb68] ss:$16 sps:$4 sm:$0xff]  }
 0x6ec   :  { %v3541_v32 = vpop.f32.mrf.mxu0  ;;  %4390 = vmatmul.mubr.bf16.vlgmr.msra.gmra.mxu0 %v16216_v13  ;;  %4399 = vmatpush1.bf16.msra.mxu1 %v13985_v43  ;;  %v14054_v43 = vld [vmem:[#allocation17 + $0xb88] ss:$16 sps:$4 sm:$0xff]   ;;  %v14068_v41 = vld [vmem:[#allocation17 + $0xb4c] ss:$16 sps:$4 sm:$0xff]  }
 0x6ed   :  { %4440 = vmatpush1.bf16.msra.mxu0 %v13988_v29  ;;  %4430 = vmatprep.mubr.bf16.mxu1 %v3544_v26  ;;  %v14056_v26 = vld [vmem:[#allocation17 + $0xb8c] ss:$16 sps:$4 sm:$0xff]   ;;  %v14057_v29 = vld [vmem:[#allocation17 + $0x968] ss:$16 sps:$4 sm:$0xff]  }
 0x6ee   :  { %4471 = vmatprep.mubr.bf16.mxu0 %v3546_v11  ;;  %4400 = vmatprep.subr.bf16.mxu1 %v13993_v31  ;;  %v14059_v11 = vld [vmem:[#allocation17 + $0x96c] ss:$16 sps:$4 sm:$0xff]   ;;  %v14066_v32 = vld [vmem:[#allocation17 + $0xb48] ss:$16 sps:$4 sm:$0xff]  }
 0x6ef   :  { %4441 = vmatprep.subr.bf16.mxu0 %v13996_v46  ;;  %v14065_v31 = vld [vmem:[#allocation17 + $0x94c] ss:$16 sps:$4 sm:$0xff]   ;;  %v14063_v46 = vld [vmem:[#allocation17 + $0x948] ss:$16 sps:$4 sm:$0xff]  }
 0x6f0   :  { %4401 = vmatpush1.bf16.msra.mxu1 %v13991_v33  ;;  %v14071_v33 = vld [vmem:[#allocation17 + $0x92c] ss:$16 sps:$4 sm:$0xff]  }
 0x6f1   :  { %4442 = vmatpush1.bf16.msra.mxu0 %v13994_v34  ;;  %4402 = vmatprep.subr.bf16.mxu1 %v13999_v35  ;;  %v14074_v34 = vld [vmem:[#allocation17 + $0xb2c] ss:$16 sps:$4 sm:$0xff]   ;;  %v14069_v35 = vld [vmem:[#allocation17 + $0x928] ss:$16 sps:$4 sm:$0xff]  }
 0x6f2   :  { %4443 = vmatprep.subr.bf16.mxu0 %v14002_v36  ;;  %v14072_v36 = vld [vmem:[#allocation17 + $0xb28] ss:$16 sps:$4 sm:$0xff]  }
 0x6f4   :  { %4403 = vmatpush1.bf16.msra.mxu1 %v13997_v37  ;;  %v14077_v37 = vld [vmem:[#allocation17 + $0x90c] ss:$16 sps:$4 sm:$0xff]  }
 0x6f5   :  { %4444 = vmatpush1.bf16.msra.mxu0 %v14000_v38  ;;  %4404 = vmatprep.subr.bf16.mxu1 %v14005_v39  ;;  %v14080_v38 = vld [vmem:[#allocation17 + $0xb0c] ss:$16 sps:$4 sm:$0xff]   ;;  %v14075_v39 = vld [vmem:[#allocation17 + $0x908] ss:$16 sps:$4 sm:$0xff]  }
 0x6f6   :  { %4445 = vmatprep.subr.bf16.mxu0 %v14008_v40  ;;  %v14078_v40 = vld [vmem:[#allocation17 + $0xb08] ss:$16 sps:$4 sm:$0xff]  }
 0x6f8   :  { %4405 = vmatpush1.bf16.msra.mxu1 %v14003_v42  ;;  %v16224_v42 = vld [vmem:[#allocation19] sm:$0xf] }
 0x6f9   :  { %4446 = vmatpush1.bf16.msra.mxu0 %v14006_v45  ;;  %4406 = vmatprep.subr.bf16.mxu1 %v14011_v47 }
 0x6fa   :  { %4447 = vmatprep.subr.bf16.mxu0 %v14014_v48 }
 0x6fc   :  { %4407 = vmatpush1.bf16.msra.mxu1 %v14009_v49  ;;  %v4489_v49 = vrot.slane %v16224_v42, %v16107_v58 }
 0x6fd   :  { %4448 = vmatpush1.bf16.msra.mxu0 %v14012_v51  ;;  %4408 = vmatprep.subr.bf16.mxu1 %v14017_v52 }
 0x6fe   :  { %4449 = vmatprep.subr.bf16.mxu0 %v14020_v54 }
 0x700   :  { %4409 = vmatpush1.bf16.msra.mxu1 %v14015_v55 }
 0x701   :  { %4450 = vmatpush1.bf16.msra.mxu0 %v14018_v7  ;;  %4410 = vmatprep.subr.bf16.mxu1 %v14023_v56 }
 0x702   :  { %4451 = vmatprep.subr.bf16.mxu0 %v14026_v57 }
 0x704   :  { %4411 = vmatpush1.bf16.msra.mxu1 %v14021_v22 }
 0x705   :  { %4452 = vmatpush1.bf16.msra.mxu0 %v14024_v23  ;;  %4412 = vmatprep.subr.bf16.mxu1 %v14029_v59 }
 0x706   :  { %4453 = vmatprep.subr.bf16.mxu0 %v14032_v63 }
 0x708   :  { %4413 = vmatpush1.bf16.msra.mxu1 %v14027_v2 }
 0x709   :  { %4454 = vmatpush1.bf16.msra.mxu0 %v14030_v10  ;;  %4414 = vmatprep.subr.bf16.mxu1 %v14035_v12 }
 0x70a   :  { %4455 = vmatprep.subr.bf16.mxu0 %v14038_v14  ;;  %v14081_v14 = vld [vmem:[#allocation22 + $0x78] sm:$0xff]  }
 0x70c   :  { %4415 = vmatpush2.bf16.msra.mxu1 %v14033_v15  ;;  %v4518_v15 = vld [vmem:[#allocation20] sm:$0x1] }
 0x70d   :  { %4456 = vmatpush2.bf16.msra.mxu0 %v14036_v16  ;;  %4416 = vmatprep.subr.bf16.mxu1 %v14041_v25  ;;  %v14083_v16 = vld [vmem:[#allocation22 + $0x70] sm:$0xff]  }
 0x70e   :  { %4457 = vmatprep.subr.bf16.mxu0 %v14044_v17  ;;  %v14084_v25 = vld [vmem:[#allocation22 + $0x30] sm:$0xff]   ;;  %v14087_v17 = vld [vmem:[#allocation22 + $0x68] sm:$0xff]  }
 0x710   :  { %4417 = vmatpush2.bf16.msra.mxu1 %v14039_v18  ;;  %v14088_v18 = vld [vmem:[#allocation22 + $0x28] sm:$0xff]  }
 0x711   :  { %4458 = vmatpush2.bf16.msra.mxu0 %v14042_v19  ;;  %4418 = vmatprep.subr.bf16.mxu1 %v14047_v27  ;;  %v14091_v19 = vld [vmem:[#allocation22 + $0x60] sm:$0xff]  }
 0x712   :  { %4459 = vmatprep.subr.bf16.mxu0 %v14050_v20  ;;  %v14092_v27 = vld [vmem:[#allocation22 + $0x20] sm:$0xff]   ;;  %v14095_v20 = vld [vmem:[#allocation22 + $0x58] sm:$0xff]  }
 0x714   :  { %4419 = vmatpush2.bf16.msra.mxu1 %v14045_v21  ;;  %v14096_v21 = vld [vmem:[#allocation22 + $0x18] sm:$0xff]  }
 0x715   :  { %4460 = vmatpush2.bf16.msra.mxu0 %v14048_v24  ;;  %4420 = vmatprep.subr.bf16.mxu1 %v14053_v50  ;;  %v14099_v24 = vld [vmem:[#allocation22 + $0x50] sm:$0xff]  }
 0x716   :  { %4461 = vmatprep.subr.bf16.mxu0 %v14056_v26  ;;  %v14100_v50 = vld [vmem:[#allocation22 + $0x10] sm:$0xff]   ;;  %v14103_v26 = vld [vmem:[#allocation22 + $0x48] sm:$0xff]  }
 0x718   :  { %4421 = vmatpush2.bf16.msra.mxu1 %v14051_v53  ;;  %v14104_v53 = vld [vmem:[#allocation22 + $0x8] sm:$0xff]  }
 0x719   :  { %4462 = vmatpush2.bf16.msra.mxu0 %v14054_v43  ;;  %4422 = vmatprep.subr.bf16.mxu1 %v14059_v11 }
 0x71a   :  { %4463 = vmatprep.subr.bf16.mxu0 %v14062_v28 }
 0x71c   :  { %4423 = vmatpush2.bf16.msra.mxu1 %v14057_v29  ;;  %v4497_v29 = vrot.slane %v16224_v42, %v16113_v1 }
 0x71d   :  { %4464 = vmatpush2.bf16.msra.mxu0 %v14060_v30  ;;  %4424 = vmatprep.subr.bf16.mxu1 %v14065_v31 }
 0x71e   :  { %4465 = vmatprep.subr.bf16.mxu0 %v14068_v41 }
 0x720   :  { %4425 = vmatpush2.bf16.msra.mxu1 %v14063_v46 }
 0x721   :  { %4466 = vmatpush2.bf16.msra.mxu0 %v14066_v32  ;;  %4426 = vmatprep.subr.bf16.mxu1 %v14071_v33  ;;  %v4501_v32 = vrot.slane %v16224_v42, %v16111_v61 }
 0x722   :  { %4467 = vmatprep.subr.bf16.mxu0 %v14074_v34 }
 0x724   :  { %4427 = vmatpush2.bf16.msra.mxu1 %v14069_v35 }
 0x725   :  { %4468 = vmatpush2.bf16.msra.mxu0 %v14072_v36  ;;  %4428 = vmatprep.subr.bf16.mxu1 %v14077_v37 }
 0x726   :  { %4469 = vmatprep.subr.bf16.mxu0 %v14080_v38 }
 0x728   :  { %4429 = vmatpush2.bf16.msra.mxu1 %v14075_v39 }
 0x729   :  { %4470 = vmatpush2.bf16.msra.mxu0 %v14078_v40 }
 0x72b   :  { %4431 = vmatmul.mubr.bf16.vlgmr.msra.gmra.mxu1 %v16214_v44  ;;  %v4493_v44 = vrot.slane %v16224_v42, %v16109_v60  ;;  %v14086_v42 = vld [vmem:[#allocation22 + $0xb8] sm:$0xff]  }
 0x72c   :  { %4472 = vmatmul.mubr.bf16.vlgmr.msra.gmra.mxu0 %v16216_v13  ;;  %4568 = vmatprep.mubr.bf16.mxu1 %v15816_v9 }
 0x72d   :  { %4609 = vmatprep.mubr.bf16.mxu0 %v15816_v9 }
 0x7ab   :  { %v4350_v45 = vpop.f32.mrf.mxu1 }
 0x7ac   :  { %v4391_v47 = vpop.f32.mrf.mxu0 }
 0x7ad   :  { %v4392_v48 = vadd.f32 %v4391_v47, %v4350_v45  ;;  %v4352_v51 = vpop.f32.mrf.mxu1 }
 0x7ae   :  { %v4393_v52 = vpop.f32.mrf.mxu0 }
 0x7af   :  { %v4480_v54 = vadd.f32 %v4392_v48, %v16205_v8  ;;  %v4394_v55 = vadd.f32 %v4393_v52, %v4352_v51  ;;  %v4354_v13 = vpop.f32.mrf.mxu1  ;;  %v14090_v51 = vld [vmem:[#allocation22 + $0xb0] sm:$0xff]   ;;  %v14093_v52 = vld [vmem:[#allocation22 + $0xe8] sm:$0xff]  }
 0x7b0   :  { %v4395_v7 = vpop.f32.mrf.mxu0  ;;  %v14097_v13 = vld [vmem:[#allocation22 + $0xe0] sm:$0xff]  }
 0x7b1   :  { %v4506_v56 = vadd.f32 %v4489_v49, %v4480_v54  ;;  %v4481_v57 = vadd.f32 %v4394_v55, %v16208_v62  ;;  %v4355_v22 = vpop.f32.mrf.mxu1  ;;  %v14082_v62 = vld [vmem:[#allocation22 + $0x38] sm:$0xff]   ;;  %v14107_v54 = vld [vmem:[#allocation22 + $0x40] sm:$0xff]  }
 0x7b2   :  { %v4396_v23 = vpop.f32.mrf.mxu0  ;;  %v14108_v55 = vld [vmem:[#allocation22] sm:$0xff]   ;;  %v14105_v22 = vld [vmem:[#allocation22 + $0xd0] sm:$0xff]  }
 0x7b3   :  { %v4510_v59 = vmax.f32 %v4506_v56, 0.0  ;;  %v4507_v63 = vadd.f32 %v4493_v44, %v4481_v57  ;;  %v14094_v44 = vld [vmem:[#allocation22 + $0xa8] sm:$0xff]   ;;  %v14098_v7 = vld [vmem:[#allocation22 + $0xa0] sm:$0xff]   ;;  %v14101_v56 = vld [vmem:[#allocation22 + $0xd8] sm:$0xff]  }
 0x7b4   :  { %v14102_v57 = vld [vmem:[#allocation22 + $0x98] sm:$0xff]   ;;  %v14106_v23 = vld [vmem:[#allocation22 + $0x90] sm:$0xff]  }
 0x7b5   :  { %v4511_v2 = vmax.f32 %v4507_v63, 0.0  ;;  %v4514_v10 = vpack.c.bf16 %v4510_v59, %v4510_v59  ;;  %v14109_v59 = vld [vmem:[#allocation22 + $0xc8] sm:$0xff]  }
 0x7b6   :  { %v14110_v63 = vld [vmem:[#allocation22 + $0x88] sm:$0xff]  }
 0x7b7   :  { %v16232_v12 = vpack.c.bf16 %v4511_v2, %v4511_v2  ;;  %v16237_v8 = vsel %vm4523_vm3, %v4514_v10, 0  ;;  %v14111_v2 = vld [vmem:[#allocation22 + $0xc0] sm:$0xff]  }
 0x7b8   :  { %v14112_v10 = vld [vmem:[#allocation22 + $0x80] sm:$0xff]  }
 0x7b9   :  { %12244 = vmatprep.subr.msk.bf16.mxu1 %vm4523_vm3, %v16232_v12 }
 0x7ba   :  { %4551 = vmatpush1.bf16.msra.mxu1 %v16237_v8 }
 0x7bb   :  { %13140 = vmatprep.subr.bf16.mxu1 %v14081_v14 }
 0x7bd   :  { %12245 = vmatmul.mubr.msk.bf16.vlgmr.msra.gmra.mxu1 %vm4519_vm4, %v4518_v15 }
 0x7be   :  { %13141 = vmatpush3.bf16.msra.mxu1 %v14082_v62 }
 0x7bf   :  { %13142 = vmatprep.subr.bf16.mxu1 %v14083_v16 }
 0x7c2   :  { %13143 = vmatpush3.bf16.msra.mxu1 %v14084_v25 }
 0x7c3   :  { %13144 = vmatprep.subr.bf16.mxu1 %v14087_v17 }
 0x7c6   :  { %13145 = vmatpush3.bf16.msra.mxu1 %v14088_v18 }
 0x7c7   :  { %13146 = vmatprep.subr.bf16.mxu1 %v14091_v19 }
 0x7ca   :  { %13147 = vmatpush3.bf16.msra.mxu1 %v14092_v27 }
 0x7cb   :  { %13148 = vmatprep.subr.bf16.mxu1 %v14095_v20 }
 0x7ce   :  { %13149 = vmatpush3.bf16.msra.mxu1 %v14096_v21 }
 0x7cf   :  { %13150 = vmatprep.subr.bf16.mxu1 %v14099_v24 }
 0x7d2   :  { %13151 = vmatpush3.bf16.msra.mxu1 %v14100_v50 }
 0x7d3   :  { %13152 = vmatprep.subr.bf16.mxu1 %v14103_v26 }
 0x7d6   :  { %13153 = vmatpush3.bf16.msra.mxu1 %v14104_v53 }
 0x7d7   :  { %13154 = vmatprep.subr.bf16.mxu1 %v14107_v54 }
 0x7da   :  { %13155 = vmatpush3.bf16.msra.mxu1 %v14108_v55 }
 0x7eb   :  { %v4432_v43 = vpop.f32.mrf.mxu1 }
 0x7ec   :  { %v4473_v11 = vpop.f32.mrf.mxu0 }
 0x7ed   :  { %v4474_v28 = vadd.f32 %v4473_v11, %v4432_v43  ;;  %v4434_v30 = vpop.f32.mrf.mxu1 }
 0x7ee   :  { %v4475_v31 = vpop.f32.mrf.mxu0 }
 0x7ef   :  { %v4482_v41 = vadd.f32 %v4474_v28, %v16210_v4  ;;  %v4476_v46 = vadd.f32 %v4475_v31, %v4434_v30  ;;  %v4436_v33 = vpop.f32.mrf.mxu1  ;;  %v14085_v4 = vld [vmem:[#allocation22 + $0xf8] sm:$0xff]  }
 0x7f0   :  { %v4477_v34 = vpop.f32.mrf.mxu0 }
 0x7f1   :  { %v4508_v35 = vadd.f32 %v4497_v29, %v4482_v41  ;;  %v4483_v36 = vadd.f32 %v4476_v46, %v16212_v5  ;;  %v4437_v37 = vpop.f32.mrf.mxu1  ;;  %v14089_v5 = vld [vmem:[#allocation22 + $0xf0] sm:$0xff]  }
 0x7f2   :  { %v4478_v38 = vpop.f32.mrf.mxu0 }
 0x7f3   :  { %v4512_v39 = vmax.f32 %v4508_v35, 0.0  ;;  %v4509_v40 = vadd.f32 %v4501_v32, %v4483_v36 }
 0x7f5   :  { %v4513_v45 = vmax.f32 %v4509_v40, 0.0  ;;  %v4516_v47 = vpack.c.bf16 %v4512_v39, %v4512_v39 }
 0x7f7   :  { %v16247_v48 = vpack.c.bf16 %v4513_v45, %v4513_v45  ;;  %v16250_v49 = vsel %vm4523_vm3, %v4516_v47, 0 }
 0x7f9   :  { %12246 = vmatprep.subr.msk.bf16.mxu0 %vm4523_vm3, %v16247_v48 }
 0x7fa   :  { %4592 = vmatpush1.bf16.msra.mxu0 %v16250_v49 }
 0x7fb   :  { %13162 = vmatprep.subr.bf16.mxu0 %v14085_v4 }
 0x7fd   :  { %12247 = vmatmul.mubr.msk.bf16.vlgmr.msra.gmra.mxu0 %vm4519_vm4, %v4518_v15 }
 0x7fe   :  { %13163 = vmatpush3.bf16.msra.mxu0 %v14086_v42 }
 0x7ff   :  { %13164 = vmatprep.subr.bf16.mxu0 %v14089_v5 }
 0x802   :  { %13165 = vmatpush3.bf16.msra.mxu0 %v14090_v51 }
 0x803   :  { %13166 = vmatprep.subr.bf16.mxu0 %v14093_v52 }
 0x806   :  { %13167 = vmatpush3.bf16.msra.mxu0 %v14094_v44 }
 0x807   :  { %13168 = vmatprep.subr.bf16.mxu0 %v14097_v13 }
 0x80a   :  { %13169 = vmatpush3.bf16.msra.mxu0 %v14098_v7 }
 0x80b   :  { %13170 = vmatprep.subr.bf16.mxu0 %v14101_v56 }
 0x80e   :  { %13171 = vmatpush3.bf16.msra.mxu0 %v14102_v57 }
 0x80f   :  { %13172 = vmatprep.subr.bf16.mxu0 %v14105_v22 }
 0x812   :  { %13173 = vmatpush3.bf16.msra.mxu0 %v14106_v23 }
 0x813   :  { %13174 = vmatprep.subr.bf16.mxu0 %v14109_v59 }
 0x816   :  { %13175 = vmatpush3.bf16.msra.mxu0 %v14110_v63 }
 0x817   :  { %13176 = vmatprep.subr.bf16.mxu0 %v14111_v2 }
 0x81a   :  { %13177 = vmatpush3.bf16.msra.mxu0 %v14112_v10 }
 0x87d   :  { %v4570_v14 = vpop.f32.mrf.mxu1 }
 0x87e   :  { %v4618_v15 = vpack.c.bf16 %v4570_v14, %v4570_v14 }
 0x87f   :  { %v4572_v62 = vpop.f32.mrf.mxu1 }
 0x880   :  { %v4619_v16 = vpack.c.bf16 %v4572_v62, %v4572_v62 }
 0x881   :  { %v4574_v25 = vpop.f32.mrf.mxu1 }
 0x882   :  { %4917 = vmatprep.mubr.bf16.mxu1 %v4619_v16 }
 0x883   :  { %4918 = vmatmul.mubr.bf16.vlgmr.msra.gmra.mxu1 %v4618_v15  ;;  %v4575_v17 = vpop.f32.mrf.mxu1 }
 0x8bd   :  { %v4611_v18 = vpop.f32.mrf.mxu0 }
 0x8be   :  { %v4620_v20 = vpack.c.bf16 %v4611_v18, %v4611_v18 }
 0x8bf   :  { %v4613_v19 = vpop.f32.mrf.mxu0 }
 0x8c0   :  { %v4621_v27 = vpack.c.bf16 %v4613_v19, %v4613_v19 }
 0x8c1   :  { %v4615_v21 = vpop.f32.mrf.mxu0 }
 0x8c2   :  { %4957 = vmatprep.mubr.bf16.mxu0 %v4621_v27 }
 0x8c3   :  { %v4616_v24 = vpop.f32.mrf.mxu0  ;;  %4958 = vmatmul.mubr.bf16.vlgmr.msra.gmra.mxu0 %v4620_v20 }
 0x8c4   :  { %15710 = shalt.err (!%p15707_p12)  }
 0x8c5   :  { %396 = dma.hbm_to_vmem [thread:$0]  %s16632_s14, 49152, %s394_s16, [#allocation4] }
 0x8c6   :  { %s15719_s22 = scalar_lea.vmem %s406_s12, 32768  ;;  %p15724_p0 = scmp.lt.s32.totalorder %s406_s12, %s406_s12 }
 0x8c7   :  { %p15720_p13 = scmp.ne.s32.totalorder %s406_s12, %s15719_s22  ;;  %p15725_p1 = scmp.lt.s32.totalorder %s15719_s22, %s15719_s22 }
 0x8c9   :  { %p15726_p2 = por %p15725_p1, %p15724_p0 }
 0x8cb   :  { %p15727_p3 = pnand %p15726_p2, %p15720_p13 }
 0x8cd   :  { %15730 = shalt.err (!%p15727_p3)  }
 0x8ce   :  { %408 = dma.hbm_to_vmem [thread:$0]  %s16638_s20, 32768, %s406_s12, [#allocation4 + $0x1]  ;;  %v12248_v28 = vld [vmem:[#allocation23] ss:$0 sm:$0xff] }
 0x943   :  { %v13156_v50 = vpop.f32.mrf.mxu1 }
 0x945   :  { %v13157_v26 = vpop.f32.mrf.mxu1 }
 0x946   :  { %v13158_v11 = vadd.f32 %v13157_v26, %v13156_v50 }
 0x947   :  { %v13159_v53 = vpop.f32.mrf.mxu1 }
 0x948   :  { %v4920_v31 = vadd.f32 %v13158_v11, %v12248_v28 }
 0x949   :  { %v13160_v43 = vpop.f32.mrf.mxu1 }
 0x983   :  { %v13178_v29 = vpop.f32.mrf.mxu0 }
 0x985   :  { %v13179_v30 = vpop.f32.mrf.mxu0 }
 0x986   :  { %v13180_v41 = vadd.f32 %v13179_v30, %v13178_v29 }
 0x987   :  { %v13181_v46 = vpop.f32.mrf.mxu0 }
 0x988   :  { %v16262_v32 = vadd.f32 %v13180_v41, %v4920_v31 }
 0x989   :  { %v13182_v33 = vpop.f32.mrf.mxu0 }
 0x98a   :  { %v4965_v34 = vmax.f32 %v16262_v32, 0.0 }
 0x98b   :  { %15777 = dma.done.wait [#allocation4], 49152 }
 0x98c   :  { %15778 = vsyncadd [#allocation4], 4294918144  ;;  %12281 = vmatprep.subr.msk.bf16.mxu1 %vm4523_vm3, %v16232_v12  ;;  %12283 = vmatprep.subr.msk.bf16.mxu0 %vm4523_vm3, %v16247_v48  ;;  %v4971_v35 = vld [vmem:[#allocation25] sm:$0x3]  ;;  %v5190_v38 = vld [vmem:[#allocation25 + $0x2] sm:$0x3] }
 0x98d   :  { %4990 = vmatpush1.bf16.msra.mxu1 %v16237_v8  ;;  %5031 = vmatpush1.bf16.msra.mxu0 %v16250_v49  ;;  %v14117_v36 = vld [vmem:[#allocation2 + $0x4e4] ss:$16 sps:$4 sm:$0xff]   ;;  %v14115_v39 = vld [vmem:[#allocation2 + $0x4e0] ss:$16 sps:$4 sm:$0xff]   ;;  %vm8084_vm5 = vcmask 1041408   ;;  %vm8080_vm6 = vcmask 31744  }
 0x98e   :  { %5007 = vmatprep.mubr.bf16.mxu1 %v15816_v9  ;;  %5048 = vmatprep.mubr.bf16.mxu0 %v15816_v9  ;;  %v14120_v37 = vld [vmem:[#allocation2 + $0x6e4] ss:$16 sps:$4 sm:$0xff]   ;;  %v14118_v40 = vld [vmem:[#allocation2 + $0x6e0] ss:$16 sps:$4 sm:$0xff]  }
 0x98f   :  { %12285 = vmatprep.subr.msk.bf16.mxu1 %vm4523_vm3, %v16232_v12  ;;  %12287 = vmatprep.subr.msk.bf16.mxu0 %vm4523_vm3, %v16247_v48  ;;  %v14123_v45 = vld [vmem:[#allocation2 + $0x4c4] ss:$16 sps:$4 sm:$0xff]   ;;  %v14121_v4 = vld [vmem:[#allocation2 + $0x4c0] ss:$16 sps:$4 sm:$0xff]  }
 0x990   :  { %12282 = vmatmul.mubr.msk.bf16.vlgmr.msra.gmra.mxu1 %vm4519_vm4, %v4971_v35  ;;  %12284 = vmatmul.mubr.msk.bf16.vlgmr.msra.gmra.mxu0 %vm4519_vm4, %v4971_v35  ;;  %v14126_v47 = vld [vmem:[#allocation2 + $0x6c4] ss:$16 sps:$4 sm:$0xff]   ;;  %v14124_v42 = vld [vmem:[#allocation2 + $0x6c0] ss:$16 sps:$4 sm:$0xff]  }
 0x991   :  { %5209 = vmatpush1.bf16.msra.mxu1 %v16237_v8  ;;  %5250 = vmatpush1.bf16.msra.mxu0 %v16250_v49  ;;  %v14129_v5 = vld [vmem:[#allocation2 + $0x4a4] ss:$16 sps:$4 sm:$0xff]   ;;  %v14127_v52 = vld [vmem:[#allocation2 + $0x4a0] ss:$16 sps:$4 sm:$0xff]  }
 0x992   :  { %5226 = vmatprep.mubr.bf16.mxu1 %v15816_v9  ;;  %5267 = vmatprep.mubr.bf16.mxu0 %v15816_v9  ;;  %v14132_v51 = vld [vmem:[#allocation2 + $0x6a4] ss:$16 sps:$4 sm:$0xff]   ;;  %v14130_v54 = vld [vmem:[#allocation2 + $0x6a0] ss:$16 sps:$4 sm:$0xff]  }
 0x993   :  { %6049 = vmatprep.subr.bf16.mxu1 %v14117_v36  ;;  %6090 = vmatprep.subr.bf16.mxu0 %v14120_v37  ;;  %v14135_v55 = vld [vmem:[#allocation2 + $0x484] ss:$16 sps:$4 sm:$0xff]   ;;  %v14133_v13 = vld [vmem:[#allocation2 + $0x480] ss:$16 sps:$4 sm:$0xff]  }
 0x994   :  { %v14138_v44 = vld [vmem:[#allocation2 + $0x684] ss:$16 sps:$4 sm:$0xff]   ;;  %v14136_v7 = vld [vmem:[#allocation2 + $0x680] ss:$16 sps:$4 sm:$0xff]  }
 0x995   :  { %v14141_v56 = vld [vmem:[#allocation2 + $0x464] ss:$16 sps:$4 sm:$0xff]   ;;  %v14139_v22 = vld [vmem:[#allocation2 + $0x460] ss:$16 sps:$4 sm:$0xff]  }
 0x996   :  { %v14144_v57 = vld [vmem:[#allocation2 + $0x664] ss:$16 sps:$4 sm:$0xff]   ;;  %v14142_v23 = vld [vmem:[#allocation2 + $0x660] ss:$16 sps:$4 sm:$0xff]  }
 0x997   :  { %v14147_v59 = vld [vmem:[#allocation2 + $0x444] ss:$16 sps:$4 sm:$0xff]   ;;  %v14145_v2 = vld [vmem:[#allocation2 + $0x440] ss:$16 sps:$4 sm:$0xff]  }
 0x998   :  { %12286 = vmatmul.mubr.msk.bf16.vlgmr.msra.gmra.mxu1 %vm4519_vm4, %v5190_v38  ;;  %12288 = vmatmul.mubr.msk.bf16.vlgmr.msra.gmra.mxu0 %vm4519_vm4, %v5190_v38  ;;  %v14150_v63 = vld [vmem:[#allocation2 + $0x644] ss:$16 sps:$4 sm:$0xff]   ;;  %v14148_v10 = vld [vmem:[#allocation2 + $0x640] ss:$16 sps:$4 sm:$0xff]  }
 0x999   :  { %6050 = vmatpush1.bf16.msra.mxu1 %v14115_v39  ;;  %6091 = vmatpush1.bf16.msra.mxu0 %v14118_v40  ;;  %v14153_v14 = vld [vmem:[#allocation2 + $0x424] ss:$16 sps:$4 sm:$0xff]   ;;  %v14151_v62 = vld [vmem:[#allocation2 + $0x420] ss:$16 sps:$4 sm:$0xff]  }
 0x99a   :  { %6051 = vmatprep.subr.bf16.mxu1 %v14123_v45  ;;  %6092 = vmatprep.subr.bf16.mxu0 %v14126_v47  ;;  %v14156_v15 = vld [vmem:[#allocation2 + $0x624] ss:$16 sps:$4 sm:$0xff]   ;;  %v14154_v16 = vld [vmem:[#allocation2 + $0x620] ss:$16 sps:$4 sm:$0xff]  }
 0x99b   :  { %v14159_v25 = vld [vmem:[#allocation2 + $0x404] ss:$16 sps:$4 sm:$0xff]   ;;  %v14157_v18 = vld [vmem:[#allocation2 + $0x400] ss:$16 sps:$4 sm:$0xff]  }
 0x99c   :  { %v14162_v17 = vld [vmem:[#allocation2 + $0x604] ss:$16 sps:$4 sm:$0xff]   ;;  %v14160_v19 = vld [vmem:[#allocation2 + $0x600] ss:$16 sps:$4 sm:$0xff]  }
 0x99d   :  { %6052 = vmatpush1.bf16.msra.mxu1 %v14121_v4  ;;  %6093 = vmatpush1.bf16.msra.mxu0 %v14124_v42  ;;  %v14165_v27 = vld [vmem:[#allocation2 + $0x5e4] ss:$16 sps:$4 sm:$0xff]   ;;  %v14163_v21 = vld [vmem:[#allocation2 + $0x5e0] ss:$16 sps:$4 sm:$0xff]  }
 0x99e   :  { %6053 = vmatprep.subr.bf16.mxu1 %v14129_v5  ;;  %6094 = vmatprep.subr.bf16.mxu0 %v14132_v51  ;;  %v14168_v20 = vld [vmem:[#allocation2 + $0x7e4] ss:$16 sps:$4 sm:$0xff]   ;;  %v14166_v24 = vld [vmem:[#allocation2 + $0x7e0] ss:$16 sps:$4 sm:$0xff]  }
 0x99f   :  { %v14171_v50 = vld [vmem:[#allocation2 + $0x5c4] ss:$16 sps:$4 sm:$0xff]   ;;  %v14169_v53 = vld [vmem:[#allocation2 + $0x5c0] ss:$16 sps:$4 sm:$0xff]  }
 0x9a0   :  { %v14174_v26 = vld [vmem:[#allocation2 + $0x7c4] ss:$16 sps:$4 sm:$0xff]   ;;  %v14172_v43 = vld [vmem:[#allocation2 + $0x7c0] ss:$16 sps:$4 sm:$0xff]  }
 0x9a1   :  { %6054 = vmatpush1.bf16.msra.mxu1 %v14127_v52  ;;  %6095 = vmatpush1.bf16.msra.mxu0 %v14130_v54  ;;  %v14177_v11 = vld [vmem:[#allocation2 + $0x5a4] ss:$16 sps:$4 sm:$0xff]   ;;  %v14175_v29 = vld [vmem:[#allocation2 + $0x5a0] ss:$16 sps:$4 sm:$0xff]  }
 0x9a2   :  { %6055 = vmatprep.subr.bf16.mxu1 %v14135_v55  ;;  %6096 = vmatprep.subr.bf16.mxu0 %v14138_v44  ;;  %v14180_v28 = vld [vmem:[#allocation2 + $0x7a4] ss:$16 sps:$4 sm:$0xff]   ;;  %v14178_v30 = vld [vmem:[#allocation2 + $0x7a0] ss:$16 sps:$4 sm:$0xff]  }
 0x9a3   :  { %v14183_v31 = vld [vmem:[#allocation2 + $0x584] ss:$16 sps:$4 sm:$0xff]   ;;  %v14181_v46 = vld [vmem:[#allocation2 + $0x580] ss:$16 sps:$4 sm:$0xff]  }
 0x9a4   :  { %v14186_v41 = vld [vmem:[#allocation2 + $0x784] ss:$16 sps:$4 sm:$0xff]   ;;  %v14184_v33 = vld [vmem:[#allocation2 + $0x780] ss:$16 sps:$4 sm:$0xff]  }
 0x9a5   :  { %6056 = vmatpush1.bf16.msra.mxu1 %v14133_v13  ;;  %6097 = vmatpush1.bf16.msra.mxu0 %v14136_v7  ;;  %v14189_v35 = vld [vmem:[#allocation2 + $0x564] ss:$16 sps:$4 sm:$0xff]   ;;  %v14187_v37 = vld [vmem:[#allocation2 + $0x560] ss:$16 sps:$4 sm:$0xff]   ;;  %v14213_v13 = vld [vmem:[#allocation2 + $0x4ec] ss:$16 sps:$4 sm:$0xff]  }
 0x9a6   :  { %6057 = vmatprep.subr.bf16.mxu1 %v14141_v56  ;;  %6098 = vmatprep.subr.bf16.mxu0 %v14144_v57  ;;  %v14192_v36 = vld [vmem:[#allocation2 + $0x764] ss:$16 sps:$4 sm:$0xff]   ;;  %v14190_v38 = vld [vmem:[#allocation2 + $0x760] ss:$16 sps:$4 sm:$0xff]   ;;  %v14216_v7 = vld [vmem:[#allocation2 + $0x6ec] ss:$16 sps:$4 sm:$0xff]  }
 0x9a7   :  { %v14195_v39 = vld [vmem:[#allocation2 + $0x544] ss:$16 sps:$4 sm:$0xff]   ;;  %v14193_v45 = vld [vmem:[#allocation2 + $0x540] ss:$16 sps:$4 sm:$0xff]  }
 0x9a8   :  { %v14198_v40 = vld [vmem:[#allocation2 + $0x744] ss:$16 sps:$4 sm:$0xff]   ;;  %v14196_v47 = vld [vmem:[#allocation2 + $0x740] ss:$16 sps:$4 sm:$0xff]  }
 0x9a9   :  { %6058 = vmatpush1.bf16.msra.mxu1 %v14139_v22  ;;  %6099 = vmatpush1.bf16.msra.mxu0 %v14142_v23  ;;  %v14201_v4 = vld [vmem:[#allocation2 + $0x524] ss:$16 sps:$4 sm:$0xff]   ;;  %v14199_v5 = vld [vmem:[#allocation2 + $0x520] ss:$16 sps:$4 sm:$0xff]  }
 0x9aa   :  { %6059 = vmatprep.subr.bf16.mxu1 %v14147_v59  ;;  %6100 = vmatprep.subr.bf16.mxu0 %v14150_v63  ;;  %v14204_v42 = vld [vmem:[#allocation2 + $0x724] ss:$16 sps:$4 sm:$0xff]   ;;  %v14202_v51 = vld [vmem:[#allocation2 + $0x720] ss:$16 sps:$4 sm:$0xff]  }
 0x9ab   :  { %v14207_v52 = vld [vmem:[#allocation2 + $0x504] ss:$16 sps:$4 sm:$0xff]   ;;  %v14205_v55 = vld [vmem:[#allocation2 + $0x500] ss:$16 sps:$4 sm:$0xff]  }
 0x9ac   :  { %v14210_v54 = vld [vmem:[#allocation2 + $0x704] ss:$16 sps:$4 sm:$0xff]   ;;  %v14208_v44 = vld [vmem:[#allocation2 + $0x700] ss:$16 sps:$4 sm:$0xff]  }
 0x9ad   :  { %6060 = vmatpush1.bf16.msra.mxu1 %v14145_v2  ;;  %6101 = vmatpush1.bf16.msra.mxu0 %v14148_v10 }
 0x9ae   :  { %6061 = vmatprep.subr.bf16.mxu1 %v14153_v14  ;;  %6102 = vmatprep.subr.bf16.mxu0 %v14156_v15 }
 0x9b1   :  { %6062 = vmatpush1.bf16.msra.mxu1 %v14151_v62  ;;  %6103 = vmatpush1.bf16.msra.mxu0 %v14154_v16  ;;  %v14211_v62 = vld [vmem:[#allocation2 + $0x4e8] ss:$16 sps:$4 sm:$0xff]  }
 0x9b2   :  { %6063 = vmatprep.subr.bf16.mxu1 %v14159_v25  ;;  %6104 = vmatprep.subr.bf16.mxu0 %v14162_v17  ;;  %v14214_v16 = vld [vmem:[#allocation2 + $0x6e8] ss:$16 sps:$4 sm:$0xff]  }
 0x9b5   :  { %6064 = vmatpush1.bf16.msra.mxu1 %v14157_v18  ;;  %6105 = vmatpush1.bf16.msra.mxu0 %v14160_v19 }
 0x9b6   :  { %6065 = vmatprep.subr.bf16.mxu1 %v14165_v27  ;;  %6106 = vmatprep.subr.bf16.mxu0 %v14168_v20  ;;  %v14219_v27 = vld [vmem:[#allocation2 + $0x4cc] ss:$16 sps:$4 sm:$0xff]  }
 0x9b9   :  { %6066 = vmatpush2.bf16.msra.mxu1 %v14163_v21  ;;  %6107 = vmatpush2.bf16.msra.mxu0 %v14166_v24 }
 0x9ba   :  { %6067 = vmatprep.subr.bf16.mxu1 %v14171_v50  ;;  %6108 = vmatprep.subr.bf16.mxu0 %v14174_v26  ;;  %v14217_v26 = vld [vmem:[#allocation2 + $0x4c8] ss:$16 sps:$4 sm:$0xff]  }
 0x9bd   :  { %6068 = vmatpush2.bf16.msra.mxu1 %v14169_v53  ;;  %6109 = vmatpush2.bf16.msra.mxu0 %v14172_v43  ;;  %v14220_v53 = vld [vmem:[#allocation2 + $0x6c8] ss:$16 sps:$4 sm:$0xff]   ;;  %v14222_v43 = vld [vmem:[#allocation2 + $0x6cc] ss:$16 sps:$4 sm:$0xff]  }
 0x9be   :  { %6069 = vmatprep.subr.bf16.mxu1 %v14177_v11  ;;  %6110 = vmatprep.subr.bf16.mxu0 %v14180_v28 }
 0x9c1   :  { %6070 = vmatpush2.bf16.msra.mxu1 %v14175_v29  ;;  %6111 = vmatpush2.bf16.msra.mxu0 %v14178_v30  ;;  %v14225_v29 = vld [vmem:[#allocation2 + $0x4ac] ss:$16 sps:$4 sm:$0xff]  }
 0x9c2   :  { %6071 = vmatprep.subr.bf16.mxu1 %v14183_v31  ;;  %6112 = vmatprep.subr.bf16.mxu0 %v14186_v41  ;;  %v14228_v30 = vld [vmem:[#allocation2 + $0x6ac] ss:$16 sps:$4 sm:$0xff]   ;;  %v14223_v31 = vld [vmem:[#allocation2 + $0x4a8] ss:$16 sps:$4 sm:$0xff]  }
 0x9c3   :  { %v14226_v41 = vld [vmem:[#allocation2 + $0x6a8] ss:$16 sps:$4 sm:$0xff]  }
 0x9c5   :  { %6072 = vmatpush2.bf16.msra.mxu1 %v14181_v46  ;;  %6113 = vmatpush2.bf16.msra.mxu0 %v14184_v33  ;;  %v14231_v46 = vld [vmem:[#allocation2 + $0x48c] ss:$16 sps:$4 sm:$0xff]  }
 0x9c6   :  { %6073 = vmatprep.subr.bf16.mxu1 %v14189_v35  ;;  %6114 = vmatprep.subr.bf16.mxu0 %v14192_v36  ;;  %v14234_v33 = vld [vmem:[#allocation2 + $0x68c] ss:$16 sps:$4 sm:$0xff]   ;;  %v14229_v35 = vld [vmem:[#allocation2 + $0x488] ss:$16 sps:$4 sm:$0xff]  }
 0x9c7   :  { %v14232_v36 = vld [vmem:[#allocation2 + $0x688] ss:$16 sps:$4 sm:$0xff]  }
 0x9c9   :  { %6074 = vmatpush2.bf16.msra.mxu1 %v14187_v37  ;;  %6115 = vmatpush2.bf16.msra.mxu0 %v14190_v38  ;;  %v14237_v37 = vld [vmem:[#allocation2 + $0x46c] ss:$16 sps:$4 sm:$0xff]  }
 0x9ca   :  { %6075 = vmatprep.subr.bf16.mxu1 %v14195_v39  ;;  %6116 = vmatprep.subr.bf16.mxu0 %v14198_v40  ;;  %v14240_v38 = vld [vmem:[#allocation2 + $0x66c] ss:$16 sps:$4 sm:$0xff]   ;;  %v14235_v39 = vld [vmem:[#allocation2 + $0x468] ss:$16 sps:$4 sm:$0xff]  }
 0x9cb   :  { %v14238_v40 = vld [vmem:[#allocation2 + $0x668] ss:$16 sps:$4 sm:$0xff]  }
 0x9cd   :  { %6076 = vmatpush2.bf16.msra.mxu1 %v14193_v45  ;;  %6117 = vmatpush2.bf16.msra.mxu0 %v14196_v47  ;;  %v14243_v45 = vld [vmem:[#allocation2 + $0x44c] ss:$16 sps:$4 sm:$0xff]  }
 0x9ce   :  { %6077 = vmatprep.subr.bf16.mxu1 %v14201_v4  ;;  %6118 = vmatprep.subr.bf16.mxu0 %v14204_v42  ;;  %v14246_v47 = vld [vmem:[#allocation2 + $0x64c] ss:$16 sps:$4 sm:$0xff]   ;;  %v14241_v4 = vld [vmem:[#allocation2 + $0x448] ss:$16 sps:$4 sm:$0xff]  }
 0x9cf   :  { %v14244_v42 = vld [vmem:[#allocation2 + $0x648] ss:$16 sps:$4 sm:$0xff]  }
 0x9d1   :  { %6078 = vmatpush2.bf16.msra.mxu1 %v14199_v5  ;;  %6119 = vmatpush2.bf16.msra.mxu0 %v14202_v51  ;;  %v14249_v5 = vld [vmem:[#allocation2 + $0x42c] ss:$16 sps:$4 sm:$0xff]  }
 0x9d2   :  { %6079 = vmatprep.subr.bf16.mxu1 %v14207_v52  ;;  %6120 = vmatprep.subr.bf16.mxu0 %v14210_v54  ;;  %v14252_v51 = vld [vmem:[#allocation2 + $0x62c] ss:$16 sps:$4 sm:$0xff]   ;;  %v14247_v52 = vld [vmem:[#allocation2 + $0x428] ss:$16 sps:$4 sm:$0xff]  }
 0x9d3   :  { %v14250_v54 = vld [vmem:[#allocation2 + $0x628] ss:$16 sps:$4 sm:$0xff]  }
 0x9d5   :  { %6080 = vmatpush2.bf16.msra.mxu1 %v14205_v55  ;;  %6121 = vmatpush2.bf16.msra.mxu0 %v14208_v44  ;;  %v14255_v55 = vld [vmem:[#allocation2 + $0x40c] ss:$16 sps:$4 sm:$0xff]  }
 0x9d6   :  { %6131 = vmatprep.subr.bf16.mxu1 %v14213_v13  ;;  %6172 = vmatprep.subr.bf16.mxu0 %v14216_v7  ;;  %v14258_v44 = vld [vmem:[#allocation2 + $0x60c] ss:$16 sps:$4 sm:$0xff]   ;;  %v14253_v13 = vld [vmem:[#allocation2 + $0x408] ss:$16 sps:$4 sm:$0xff]  }
 0x9d7   :  { %v14256_v7 = vld [vmem:[#allocation2 + $0x608] ss:$16 sps:$4 sm:$0xff]  }
 0xa50   :  { %v16285_v56 = vpop.f32.mrf.mxu1  ;;  %v16287_v57 = vpop.f32.mrf.mxu0 }
 0xa52   :  { %v16289_v22 = vpop.f32.mrf.mxu1  ;;  %v16291_v23 = vpop.f32.mrf.mxu0 }
 0xa54   :  { %v5013_v59 = vpop.f32.mrf.mxu1  ;;  %v5054_v63 = vpop.f32.mrf.mxu0 }
 0xa55   :  { %v14261_v59 = vld [vmem:[#allocation2 + $0x5ec] ss:$16 sps:$4 sm:$0xff]  }
 0xa56   :  { %v5014_v2 = vpop.f32.mrf.mxu1  ;;  %v5055_v10 = vpop.f32.mrf.mxu0  ;;  %v14264_v63 = vld [vmem:[#allocation2 + $0x7ec] ss:$16 sps:$4 sm:$0xff]  }
 0xa57   :  { %v14259_v2 = vld [vmem:[#allocation2 + $0x5e8] ss:$16 sps:$4 sm:$0xff]  }
 0xa58   :  { %v5228_v14 = vpop.f32.mrf.mxu1  ;;  %v5269_v15 = vpop.f32.mrf.mxu0  ;;  %v14262_v10 = vld [vmem:[#allocation2 + $0x7e8] ss:$16 sps:$4 sm:$0xff]  }
 0xa59   :  { %v16293_v20 = vpack.c.bf16 %v5228_v14, %v5228_v14  ;;  %v16295_v21 = vpack.c.bf16 %v5269_v15, %v5269_v15  ;;  %v14267_v14 = vld [vmem:[#allocation2 + $0x5cc] ss:$16 sps:$4 sm:$0xff]  }
 0xa5a   :  { %v5230_v25 = vpop.f32.mrf.mxu1  ;;  %v5271_v17 = vpop.f32.mrf.mxu0  ;;  %v14270_v15 = vld [vmem:[#allocation2 + $0x7cc] ss:$16 sps:$4 sm:$0xff]  }
 0xa5b   :  { %v5277_v18 = vpack.c.bf16 %v5230_v25, %v5230_v25  ;;  %v5279_v19 = vpack.c.bf16 %v5271_v17, %v5271_v17  ;;  %v14273_v25 = vld [vmem:[#allocation2 + $0x5ac] ss:$16 sps:$4 sm:$0xff]  }
 0xa5c   :  { %v5232_v24 = vpop.f32.mrf.mxu1  ;;  %v5273_v50 = vpop.f32.mrf.mxu0  ;;  %v14276_v17 = vld [vmem:[#allocation2 + $0x7ac] ss:$16 sps:$4 sm:$0xff]  }
 0xa5d   :  { %6081 = vmatprep.mubr.bf16.mxu1 %v5277_v18  ;;  %6122 = vmatprep.mubr.bf16.mxu0 %v5279_v19  ;;  %v14282_v24 = vld [vmem:[#allocation2 + $0x78c] ss:$16 sps:$4 sm:$0xff]   ;;  %v14277_v50 = vld [vmem:[#allocation2 + $0x588] ss:$16 sps:$4 sm:$0xff]  }
 0xa5e   :  { %v5233_v11 = vpop.f32.mrf.mxu1  ;;  %v5274_v28 = vpop.f32.mrf.mxu0  ;;  %6082 = vmatmul.mubr.bf16.vlgmr.msra.gmra.mxu1 %v16293_v20  ;;  %6123 = vmatmul.mubr.bf16.vlgmr.msra.gmra.mxu0 %v16295_v21 }
 0xa5f   :  { %6132 = vmatpush1.bf16.msra.mxu1 %v14211_v62  ;;  %6173 = vmatpush1.bf16.msra.mxu0 %v14214_v16  ;;  %v14265_v62 = vld [vmem:[#allocation2 + $0x5c8] ss:$16 sps:$4 sm:$0xff]  }
 0xa60   :  { %6163 = vmatprep.mubr.bf16.mxu1 %v5277_v18  ;;  %6204 = vmatprep.mubr.bf16.mxu0 %v5279_v19  ;;  %v14268_v16 = vld [vmem:[#allocation2 + $0x7c8] ss:$16 sps:$4 sm:$0xff]  }
 0xa61   :  { %6133 = vmatprep.subr.bf16.mxu1 %v14219_v27  ;;  %6174 = vmatprep.subr.bf16.mxu0 %v14222_v43  ;;  %v14271_v18 = vld [vmem:[#allocation2 + $0x5a8] ss:$16 sps:$4 sm:$0xff]   ;;  %v14279_v27 = vld [vmem:[#allocation2 + $0x58c] ss:$16 sps:$4 sm:$0xff]  }
 0xa62   :  { %v14274_v19 = vld [vmem:[#allocation2 + $0x7a8] ss:$16 sps:$4 sm:$0xff]   ;;  %v14288_v43 = vld [vmem:[#allocation2 + $0x76c] ss:$16 sps:$4 sm:$0xff]  }
 0xa63   :  { %6134 = vmatpush1.bf16.msra.mxu1 %v14217_v26  ;;  %6175 = vmatpush1.bf16.msra.mxu0 %v14220_v53  ;;  %v14280_v26 = vld [vmem:[#allocation2 + $0x788] ss:$16 sps:$4 sm:$0xff]   ;;  %v14285_v53 = vld [vmem:[#allocation2 + $0x56c] ss:$16 sps:$4 sm:$0xff]  }
 0xa64   :  { %6135 = vmatprep.subr.bf16.mxu1 %v14225_v29  ;;  %6176 = vmatprep.subr.bf16.mxu0 %v14228_v30  ;;  %v14283_v11 = vld [vmem:[#allocation2 + $0x568] ss:$16 sps:$4 sm:$0xff]   ;;  %v14291_v29 = vld [vmem:[#allocation2 + $0x54c] ss:$16 sps:$4 sm:$0xff]  }
 0xa65   :  { %v14286_v28 = vld [vmem:[#allocation2 + $0x768] ss:$16 sps:$4 sm:$0xff]   ;;  %v14294_v30 = vld [vmem:[#allocation2 + $0x74c] ss:$16 sps:$4 sm:$0xff]  }
 0xa67   :  { %6136 = vmatpush1.bf16.msra.mxu1 %v14223_v31  ;;  %6177 = vmatpush1.bf16.msra.mxu0 %v14226_v41  ;;  %v14289_v31 = vld [vmem:[#allocation2 + $0x548] ss:$16 sps:$4 sm:$0xff]  }
 0xa68   :  { %6137 = vmatprep.subr.bf16.mxu1 %v14231_v46  ;;  %6178 = vmatprep.subr.bf16.mxu0 %v14234_v33  ;;  %v14292_v41 = vld [vmem:[#allocation2 + $0x748] ss:$16 sps:$4 sm:$0xff]   ;;  %v14297_v46 = vld [vmem:[#allocation2 + $0x52c] ss:$16 sps:$4 sm:$0xff]  }
 0xa69   :  { %v14300_v33 = vld [vmem:[#allocation2 + $0x72c] ss:$16 sps:$4 sm:$0xff]  }
 0xa6b   :  { %6138 = vmatpush1.bf16.msra.mxu1 %v14229_v35  ;;  %6179 = vmatpush1.bf16.msra.mxu0 %v14232_v36  ;;  %v14295_v35 = vld [vmem:[#allocation2 + $0x528] ss:$16 sps:$4 sm:$0xff]  }
 0xa6c   :  { %6139 = vmatprep.subr.bf16.mxu1 %v14237_v37  ;;  %6180 = vmatprep.subr.bf16.mxu0 %v14240_v38  ;;  %v14298_v36 = vld [vmem:[#allocation2 + $0x728] ss:$16 sps:$4 sm:$0xff]   ;;  %v14303_v37 = vld [vmem:[#allocation2 + $0x50c] ss:$16 sps:$4 sm:$0xff]  }
 0xa6d   :  { %v14306_v38 = vld [vmem:[#allocation2 + $0x70c] ss:$16 sps:$4 sm:$0xff]  }
 0xa6f   :  { %6140 = vmatpush1.bf16.msra.mxu1 %v14235_v39  ;;  %6181 = vmatpush1.bf16.msra.mxu0 %v14238_v40  ;;  %v14301_v39 = vld [vmem:[#allocation2 + $0x508] ss:$16 sps:$4 sm:$0xff]  }
 0xa70   :  { %6141 = vmatprep.subr.bf16.mxu1 %v14243_v45  ;;  %6182 = vmatprep.subr.bf16.mxu0 %v14246_v47  ;;  %v14304_v40 = vld [vmem:[#allocation2 + $0x708] ss:$16 sps:$4 sm:$0xff]   ;;  %v14309_v45 = vld [vmem:[#allocation2 + $0xe4] ss:$16 sps:$4 sm:$0xff]  }
 0xa71   :  { %v14312_v47 = vld [vmem:[#allocation2 + $0x2e4] ss:$16 sps:$4 sm:$0xff]  }
 0xa73   :  { %6142 = vmatpush1.bf16.msra.mxu1 %v14241_v4  ;;  %6183 = vmatpush1.bf16.msra.mxu0 %v14244_v42  ;;  %v14307_v4 = vld [vmem:[#allocation2 + $0xe0] ss:$16 sps:$4 sm:$0xff]  }
 0xa74   :  { %6143 = vmatprep.subr.bf16.mxu1 %v14249_v5  ;;  %6184 = vmatprep.subr.bf16.mxu0 %v14252_v51  ;;  %v14310_v42 = vld [vmem:[#allocation2 + $0x2e0] ss:$16 sps:$4 sm:$0xff]   ;;  %v16301_v5 = vpack.c.bf16 %v16289_v22, %v16289_v22  ;;  %v14315_v51 = vld [vmem:[#allocation2 + $0xc4] ss:$16 sps:$4 sm:$0xff]  }
 0xa75   :  { %v14321_v22 = vld [vmem:[#allocation2 + $0xa4] ss:$16 sps:$4 sm:$0xff]  }
 0xa77   :  { %6144 = vmatpush1.bf16.msra.mxu1 %v14247_v52  ;;  %6185 = vmatpush1.bf16.msra.mxu0 %v14250_v54  ;;  %v14318_v52 = vld [vmem:[#allocation2 + $0x2c4] ss:$16 sps:$4 sm:$0xff]   ;;  %v16305_v54 = vpack.c.bf16 %v16291_v23, %v16291_v23  ;;  %v14322_v23 = vld [vmem:[#allocation2 + $0x2a0] ss:$16 sps:$4 sm:$0xff]  }
 0xa78   :  { %6145 = vmatprep.subr.bf16.mxu1 %v14255_v55  ;;  %6186 = vmatprep.subr.bf16.mxu0 %v14258_v44  ;;  %v14313_v55 = vld [vmem:[#allocation2 + $0xc0] ss:$16 sps:$4 sm:$0xff]  }
 0xa79   :  { %v14316_v44 = vld [vmem:[#allocation2 + $0x2c0] ss:$16 sps:$4 sm:$0xff]  }
 0xa7b   :  { %6146 = vmatpush1.bf16.msra.mxu1 %v14253_v13  ;;  %6187 = vmatpush1.bf16.msra.mxu0 %v14256_v7  ;;  %v14324_v13 = vld [vmem:[#allocation2 + $0x2a4] ss:$16 sps:$4 sm:$0xff]   ;;  %v14319_v7 = vld [vmem:[#allocation2 + $0xa0] ss:$16 sps:$4 sm:$0xff]  }
 0xa7c   :  { %6147 = vmatprep.subr.bf16.mxu1 %v14261_v59  ;;  %6188 = vmatprep.subr.bf16.mxu0 %v14264_v63  ;;  %v14325_v59 = vld [vmem:[#allocation2 + $0x80] ss:$16 sps:$4 sm:$0xff]  }
 0xa7d   :  { %v14328_v63 = vld [vmem:[#allocation2 + $0x280] ss:$16 sps:$4 sm:$0xff]  }
 0xa7f   :  { %6148 = vmatpush2.bf16.msra.mxu1 %v14259_v2  ;;  %6189 = vmatpush2.bf16.msra.mxu0 %v14262_v10  ;;  %v14333_v2 = vld [vmem:[#allocation2 + $0x64] ss:$16 sps:$4 sm:$0xff]  }
 0xa80   :  { %6149 = vmatprep.subr.bf16.mxu1 %v14267_v14  ;;  %6190 = vmatprep.subr.bf16.mxu0 %v14270_v15  ;;  %v14336_v10 = vld [vmem:[#allocation2 + $0x264] ss:$16 sps:$4 sm:$0xff]   ;;  %v14331_v14 = vld [vmem:[#allocation2 + $0x60] ss:$16 sps:$4 sm:$0xff]  }
 0xa81   :  { %v14334_v15 = vld [vmem:[#allocation2 + $0x260] ss:$16 sps:$4 sm:$0xff]  }
 0xa83   :  { %6150 = vmatpush2.bf16.msra.mxu1 %v14265_v62  ;;  %6191 = vmatpush2.bf16.msra.mxu0 %v14268_v16  ;;  %v14339_v62 = vld [vmem:[#allocation2 + $0x44] ss:$16 sps:$4 sm:$0xff]  }
 0xa84   :  { %6151 = vmatprep.subr.bf16.mxu1 %v14273_v25  ;;  %6192 = vmatprep.subr.bf16.mxu0 %v14276_v17  ;;  %v14342_v16 = vld [vmem:[#allocation2 + $0x244] ss:$16 sps:$4 sm:$0xff]   ;;  %v14337_v25 = vld [vmem:[#allocation2 + $0x40] ss:$16 sps:$4 sm:$0xff]  }
 0xa85   :  { %v14340_v17 = vld [vmem:[#allocation2 + $0x240] ss:$16 sps:$4 sm:$0xff]  }
 0xa87   :  { %6152 = vmatpush2.bf16.msra.mxu1 %v14271_v18  ;;  %6193 = vmatpush2.bf16.msra.mxu0 %v14274_v19  ;;  %v14345_v18 = vld [vmem:[#allocation2 + $0x24] ss:$16 sps:$4 sm:$0xff]  }
 0xa88   :  { %6153 = vmatprep.subr.bf16.mxu1 %v14279_v27  ;;  %6194 = vmatprep.subr.bf16.mxu0 %v14282_v24  ;;  %v14348_v19 = vld [vmem:[#allocation2 + $0x224] ss:$16 sps:$4 sm:$0xff]   ;;  %v14343_v27 = vld [vmem:[#allocation2 + $0x20] ss:$16 sps:$4 sm:$0xff]  }
 0xa89   :  { %v14346_v24 = vld [vmem:[#allocation2 + $0x220] ss:$16 sps:$4 sm:$0xff]  }
 0xa8b   :  { %6154 = vmatpush2.bf16.msra.mxu1 %v14277_v50  ;;  %6195 = vmatpush2.bf16.msra.mxu0 %v14280_v26  ;;  %v14351_v50 = vld [vmem:[#allocation2 + $0x4] ss:$16 sps:$4 sm:$0xff]  }
 0xa8c   :  { %6155 = vmatprep.subr.bf16.mxu1 %v14285_v53  ;;  %6196 = vmatprep.subr.bf16.mxu0 %v14288_v43  ;;  %v14354_v26 = vld [vmem:[#allocation2 + $0x204] ss:$16 sps:$4 sm:$0xff]   ;;  %v14349_v53 = vld [vmem:[#allocation2] ss:$16 sps:$4 sm:$0xff]  }
 0xa8d   :  { %v14352_v43 = vld [vmem:[#allocation2 + $0x200] ss:$16 sps:$4 sm:$0xff]  }
 0xa8f   :  { %6156 = vmatpush2.bf16.msra.mxu1 %v14283_v11  ;;  %6197 = vmatpush2.bf16.msra.mxu0 %v14286_v28  ;;  %v14357_v11 = vld [vmem:[#allocation2 + $0x1e4] ss:$16 sps:$4 sm:$0xff]  }
 0xa90   :  { %6157 = vmatprep.subr.bf16.mxu1 %v14291_v29  ;;  %6198 = vmatprep.subr.bf16.mxu0 %v14294_v30  ;;  %v14360_v28 = vld [vmem:[#allocation2 + $0x3e4] ss:$16 sps:$4 sm:$0xff]   ;;  %v14355_v29 = vld [vmem:[#allocation2 + $0x1e0] ss:$16 sps:$4 sm:$0xff]  }
 0xa91   :  { %v14358_v30 = vld [vmem:[#allocation2 + $0x3e0] ss:$16 sps:$4 sm:$0xff]  }
 0xa93   :  { %6158 = vmatpush2.bf16.msra.mxu1 %v14289_v31  ;;  %6199 = vmatpush2.bf16.msra.mxu0 %v14292_v41  ;;  %v14363_v31 = vld [vmem:[#allocation2 + $0x1c4] ss:$16 sps:$4 sm:$0xff]  }
 0xa94   :  { %6159 = vmatprep.subr.bf16.mxu1 %v14297_v46  ;;  %6200 = vmatprep.subr.bf16.mxu0 %v14300_v33  ;;  %v14366_v41 = vld [vmem:[#allocation2 + $0x3c4] ss:$16 sps:$4 sm:$0xff]   ;;  %v14361_v46 = vld [vmem:[#allocation2 + $0x1c0] ss:$16 sps:$4 sm:$0xff]  }
 0xa95   :  { %v14364_v33 = vld [vmem:[#allocation2 + $0x3c0] ss:$16 sps:$4 sm:$0xff]  }
 0xa97   :  { %6160 = vmatpush2.bf16.msra.mxu1 %v14295_v35  ;;  %6201 = vmatpush2.bf16.msra.mxu0 %v14298_v36  ;;  %v14369_v35 = vld [vmem:[#allocation2 + $0x1a4] ss:$16 sps:$4 sm:$0xff]  }
 0xa98   :  { %6161 = vmatprep.subr.bf16.mxu1 %v14303_v37  ;;  %6202 = vmatprep.subr.bf16.mxu0 %v14306_v38  ;;  %v14372_v36 = vld [vmem:[#allocation2 + $0x3a4] ss:$16 sps:$4 sm:$0xff]   ;;  %v14367_v37 = vld [vmem:[#allocation2 + $0x1a0] ss:$16 sps:$4 sm:$0xff]  }
 0xa99   :  { %v14370_v38 = vld [vmem:[#allocation2 + $0x3a0] ss:$16 sps:$4 sm:$0xff]  }
 0xa9b   :  { %6162 = vmatpush2.bf16.msra.mxu1 %v14301_v39  ;;  %6203 = vmatpush2.bf16.msra.mxu0 %v14304_v40  ;;  %v14375_v39 = vld [vmem:[#allocation2 + $0x184] ss:$16 sps:$4 sm:$0xff]  }
 0xa9c   :  { %6853 = vmatprep.subr.bf16.mxu1 %v14309_v45  ;;  %6894 = vmatprep.subr.bf16.mxu0 %v14312_v47  ;;  %v14378_v40 = vld [vmem:[#allocation2 + $0x384] ss:$16 sps:$4 sm:$0xff]   ;;  %v14373_v45 = vld [vmem:[#allocation2 + $0x180] ss:$16 sps:$4 sm:$0xff]  }
 0xa9d   :  { %v14376_v47 = vld [vmem:[#allocation2 + $0x380] ss:$16 sps:$4 sm:$0xff]  }
 0xa9e   :  { %6164 = vmatmul.mubr.bf16.vlgmr.msra.gmra.mxu1 %v16293_v20  ;;  %6205 = vmatmul.mubr.bf16.vlgmr.msra.gmra.mxu0 %v16295_v21  ;;  %v14327_v20 = vld [vmem:[#allocation2 + $0x84] ss:$16 sps:$4 sm:$0xff]  }
 0xa9f   :  { %6854 = vmatpush1.bf16.msra.mxu1 %v14307_v4  ;;  %6885 = vmatprep.mubr.bf16.mxu1 %v16301_v5  ;;  %v14330_v21 = vld [vmem:[#allocation2 + $0x284] ss:$16 sps:$4 sm:$0xff]  }
 0xaa0   :  { %6895 = vmatpush1.bf16.msra.mxu0 %v14310_v42  ;;  %6926 = vmatprep.mubr.bf16.mxu0 %v16305_v54  ;;  %v14381_v4 = vld [vmem:[#allocation2 + $0x164] ss:$16 sps:$4 sm:$0xff]  }
 0xaa1   :  { %6855 = vmatprep.subr.bf16.mxu1 %v14315_v51  ;;  %6896 = vmatprep.subr.bf16.mxu0 %v14318_v52  ;;  %v14384_v42 = vld [vmem:[#allocation2 + $0x364] ss:$16 sps:$4 sm:$0xff]   ;;  %v14379_v51 = vld [vmem:[#allocation2 + $0x160] ss:$16 sps:$4 sm:$0xff]  }
 0xaa2   :  { %v14382_v52 = vld [vmem:[#allocation2 + $0x360] ss:$16 sps:$4 sm:$0xff]  }
 0xaa3   :  { %6856 = vmatpush1.bf16.msra.mxu1 %v14313_v55  ;;  %v14387_v55 = vld [vmem:[#allocation2 + $0x144] ss:$16 sps:$4 sm:$0xff]  }
 0xaa4   :  { %6897 = vmatpush1.bf16.msra.mxu0 %v14316_v44  ;;  %6857 = vmatprep.subr.bf16.mxu1 %v14321_v22  ;;  %v14390_v44 = vld [vmem:[#allocation2 + $0x344] ss:$16 sps:$4 sm:$0xff]   ;;  %v14385_v22 = vld [vmem:[#allocation2 + $0x140] ss:$16 sps:$4 sm:$0xff]  }
 0xaa5   :  { %6898 = vmatprep.subr.bf16.mxu0 %v14324_v13  ;;  %v14388_v13 = vld [vmem:[#allocation2 + $0x340] ss:$16 sps:$4 sm:$0xff]  }
 0xaa7   :  { %6858 = vmatpush1.bf16.msra.mxu1 %v14319_v7  ;;  %v14393_v7 = vld [vmem:[#allocation2 + $0x124] ss:$16 sps:$4 sm:$0xff]  }
 0xaa8   :  { %6899 = vmatpush1.bf16.msra.mxu0 %v14322_v23  ;;  %6859 = vmatprep.subr.bf16.mxu1 %v14327_v20  ;;  %v14396_v23 = vld [vmem:[#allocation2 + $0x324] ss:$16 sps:$4 sm:$0xff]   ;;  %v14391_v20 = vld [vmem:[#allocation2 + $0x120] ss:$16 sps:$4 sm:$0xff]  }
 0xaa9   :  { %6900 = vmatprep.subr.bf16.mxu0 %v14330_v21  ;;  %v14394_v21 = vld [vmem:[#allocation2 + $0x320] ss:$16 sps:$4 sm:$0xff]  }
 0xaab   :  { %6860 = vmatpush1.bf16.msra.mxu1 %v14325_v59  ;;  %v14399_v59 = vld [vmem:[#allocation2 + $0x104] ss:$16 sps:$4 sm:$0xff]  }
 0xaac   :  { %6901 = vmatpush1.bf16.msra.mxu0 %v14328_v63  ;;  %6861 = vmatprep.subr.bf16.mxu1 %v14333_v2  ;;  %v14402_v63 = vld [vmem:[#allocation2 + $0x304] ss:$16 sps:$4 sm:$0xff]   ;;  %v14397_v2 = vld [vmem:[#allocation2 + $0x100] ss:$16 sps:$4 sm:$0xff]  }
 0xaad   :  { %6902 = vmatprep.subr.bf16.mxu0 %v14336_v10  ;;  %v14400_v10 = vld [vmem:[#allocation2 + $0x300] ss:$16 sps:$4 sm:$0xff]  }
 0xaaf   :  { %6862 = vmatpush1.bf16.msra.mxu1 %v14331_v14  ;;  %v14405_v14 = vld [vmem:[#allocation2 + $0xec] ss:$16 sps:$4 sm:$0xff]  }
 0xab0   :  { %6903 = vmatpush1.bf16.msra.mxu0 %v14334_v15  ;;  %6863 = vmatprep.subr.bf16.mxu1 %v14339_v62  ;;  %v14408_v15 = vld [vmem:[#allocation2 + $0x2ec] ss:$16 sps:$4 sm:$0xff]   ;;  %v14403_v62 = vld [vmem:[#allocation2 + $0xe8] ss:$16 sps:$4 sm:$0xff]  }
 0xab1   :  { %6904 = vmatprep.subr.bf16.mxu0 %v14342_v16  ;;  %v16313_v16 = vpack.c.bf16 %v16285_v56, %v16285_v56  ;;  %v14412_v56 = vld [vmem:[#allocation2 + $0x2c8] ss:$16 sps:$4 sm:$0xff]  }
 0xab3   :  { %6864 = vmatpush1.bf16.msra.mxu1 %v14337_v25  ;;  %v14406_v25 = vld [vmem:[#allocation2 + $0x2e8] ss:$16 sps:$4 sm:$0xff]  }
 0xab4   :  { %6905 = vmatpush1.bf16.msra.mxu0 %v14340_v17  ;;  %6865 = vmatprep.subr.bf16.mxu1 %v14345_v18  ;;  %v16317_v17 = vpack.c.bf16 %v16287_v57, %v16287_v57  ;;  %v14411_v18 = vld [vmem:[#allocation2 + $0xcc] ss:$16 sps:$4 sm:$0xff]   ;;  %v14415_v57 = vld [vmem:[#allocation2 + $0xa8] ss:$16 sps:$4 sm:$0xff]  }
 0xab5   :  { %6906 = vmatprep.subr.bf16.mxu0 %v14348_v19  ;;  %v14414_v19 = vld [vmem:[#allocation2 + $0x2cc] ss:$16 sps:$4 sm:$0xff]  }
 0xab7   :  { %6866 = vmatpush1.bf16.msra.mxu1 %v14343_v27  ;;  %v14409_v27 = vld [vmem:[#allocation2 + $0xc8] ss:$16 sps:$4 sm:$0xff]  }
 0xab8   :  { %6907 = vmatpush1.bf16.msra.mxu0 %v14346_v24  ;;  %6867 = vmatprep.subr.bf16.mxu1 %v14351_v50  ;;  %v14417_v24 = vld [vmem:[#allocation2 + $0xac] ss:$16 sps:$4 sm:$0xff]  }
 0xab9   :  { %6908 = vmatprep.subr.bf16.mxu0 %v14354_v26  ;;  %v14420_v50 = vld [vmem:[#allocation2 + $0x2ac] ss:$16 sps:$4 sm:$0xff]   ;;  %v14418_v26 = vld [vmem:[#allocation2 + $0x2a8] ss:$16 sps:$4 sm:$0xff]  }
 0xabb   :  { %6868 = vmatpush1.bf16.msra.mxu1 %v14349_v53  ;;  %v14423_v53 = vld [vmem:[#allocation2 + $0x8c] ss:$16 sps:$4 sm:$0xff]  }
 0xabc   :  { %6909 = vmatpush1.bf16.msra.mxu0 %v14352_v43  ;;  %6869 = vmatprep.subr.bf16.mxu1 %v14357_v11  ;;  %v14426_v43 = vld [vmem:[#allocation2 + $0x28c] ss:$16 sps:$4 sm:$0xff]   ;;  %v14421_v11 = vld [vmem:[#allocation2 + $0x88] ss:$16 sps:$4 sm:$0xff]  }
 0xabd   :  { %6910 = vmatprep.subr.bf16.mxu0 %v14360_v28  ;;  %v14429_v28 = vld [vmem:[#allocation2 + $0x6c] ss:$16 sps:$4 sm:$0xff]  }
 0xabf   :  { %6870 = vmatpush2.bf16.msra.mxu1 %v14355_v29  ;;  %v14432_v29 = vld [vmem:[#allocation2 + $0x26c] ss:$16 sps:$4 sm:$0xff]  }
 0xac0   :  { %6911 = vmatpush2.bf16.msra.mxu0 %v14358_v30  ;;  %6871 = vmatprep.subr.bf16.mxu1 %v14363_v31  ;;  %v14430_v30 = vld [vmem:[#allocation2 + $0x268] ss:$16 sps:$4 sm:$0xff]   ;;  %v14435_v31 = vld [vmem:[#allocation2 + $0x4c] ss:$16 sps:$4 sm:$0xff]  }
 0xac1   :  { %6912 = vmatprep.subr.bf16.mxu0 %v14366_v41  ;;  %v14438_v41 = vld [vmem:[#allocation2 + $0x24c] ss:$16 sps:$4 sm:$0xff]  }
 0xac3   :  { %6872 = vmatpush2.bf16.msra.mxu1 %v14361_v46  ;;  %v14433_v46 = vld [vmem:[#allocation2 + $0x48] ss:$16 sps:$4 sm:$0xff]  }
 0xac4   :  { %6913 = vmatpush2.bf16.msra.mxu0 %v14364_v33  ;;  %6873 = vmatprep.subr.bf16.mxu1 %v14369_v35  ;;  %v14436_v33 = vld [vmem:[#allocation2 + $0x248] ss:$16 sps:$4 sm:$0xff]   ;;  %v14441_v35 = vld [vmem:[#allocation2 + $0x2c] ss:$16 sps:$4 sm:$0xff]  }
 0xac5   :  { %6914 = vmatprep.subr.bf16.mxu0 %v14372_v36  ;;  %v14444_v36 = vld [vmem:[#allocation2 + $0x22c] ss:$16 sps:$4 sm:$0xff]  }
 0xac7   :  { %6874 = vmatpush2.bf16.msra.mxu1 %v14367_v37  ;;  %v14439_v37 = vld [vmem:[#allocation2 + $0x28] ss:$16 sps:$4 sm:$0xff]  }
 0xac8   :  { %6915 = vmatpush2.bf16.msra.mxu0 %v14370_v38  ;;  %6875 = vmatprep.subr.bf16.mxu1 %v14375_v39  ;;  %v14442_v38 = vld [vmem:[#allocation2 + $0x228] ss:$16 sps:$4 sm:$0xff]   ;;  %v14447_v39 = vld [vmem:[#allocation2 + $0xc] ss:$16 sps:$4 sm:$0xff]  }
 0xac9   :  { %6916 = vmatprep.subr.bf16.mxu0 %v14378_v40  ;;  %v14450_v40 = vld [vmem:[#allocation2 + $0x20c] ss:$16 sps:$4 sm:$0xff]  }
 0xacb   :  { %6876 = vmatpush2.bf16.msra.mxu1 %v14373_v45  ;;  %v14445_v45 = vld [vmem:[#allocation2 + $0x8] ss:$16 sps:$4 sm:$0xff]  }
 0xacc   :  { %6917 = vmatpush2.bf16.msra.mxu0 %v14376_v47  ;;  %6877 = vmatprep.subr.bf16.mxu1 %v14381_v4  ;;  %v14448_v47 = vld [vmem:[#allocation2 + $0x208] ss:$16 sps:$4 sm:$0xff]   ;;  %v14453_v4 = vld [vmem:[#allocation2 + $0x1ec] ss:$16 sps:$4 sm:$0xff]  }
 0xacd   :  { %6918 = vmatprep.subr.bf16.mxu0 %v14384_v42  ;;  %v14456_v42 = vld [vmem:[#allocation2 + $0x3ec] ss:$16 sps:$4 sm:$0xff]  }
 0xacf   :  { %6878 = vmatpush2.bf16.msra.mxu1 %v14379_v51  ;;  %v14451_v51 = vld [vmem:[#allocation2 + $0x1e8] ss:$16 sps:$4 sm:$0xff]  }
 0xad0   :  { %6919 = vmatpush2.bf16.msra.mxu0 %v14382_v52  ;;  %6879 = vmatprep.subr.bf16.mxu1 %v14387_v55  ;;  %v14454_v52 = vld [vmem:[#allocation2 + $0x3e8] ss:$16 sps:$4 sm:$0xff]   ;;  %v14459_v55 = vld [vmem:[#allocation2 + $0x1cc] ss:$16 sps:$4 sm:$0xff]  }
 0xad1   :  { %6920 = vmatprep.subr.bf16.mxu0 %v14390_v44  ;;  %v14462_v44 = vld [vmem:[#allocation2 + $0x3cc] ss:$16 sps:$4 sm:$0xff]  }
 0xad3   :  { %6880 = vmatpush2.bf16.msra.mxu1 %v14385_v22  ;;  %v14457_v22 = vld [vmem:[#allocation2 + $0x1c8] ss:$16 sps:$4 sm:$0xff]  }
 0xad4   :  { %6921 = vmatpush2.bf16.msra.mxu0 %v14388_v13  ;;  %6881 = vmatprep.subr.bf16.mxu1 %v14393_v7  ;;  %v14460_v13 = vld [vmem:[#allocation2 + $0x3c8] ss:$16 sps:$4 sm:$0xff]   ;;  %v14465_v7 = vld [vmem:[#allocation2 + $0x1ac] ss:$16 sps:$4 sm:$0xff]  }
 0xad5   :  { %6922 = vmatprep.subr.bf16.mxu0 %v14396_v23  ;;  %v14468_v23 = vld [vmem:[#allocation2 + $0x3ac] ss:$16 sps:$4 sm:$0xff]  }
 0xad7   :  { %6882 = vmatpush2.bf16.msra.mxu1 %v14391_v20  ;;  %v14463_v20 = vld [vmem:[#allocation2 + $0x1a8] ss:$16 sps:$4 sm:$0xff]  }
 0xad8   :  { %6923 = vmatpush2.bf16.msra.mxu0 %v14394_v21  ;;  %6883 = vmatprep.subr.bf16.mxu1 %v14399_v59  ;;  %v14466_v21 = vld [vmem:[#allocation2 + $0x3a8] ss:$16 sps:$4 sm:$0xff]   ;;  %v14471_v59 = vld [vmem:[#allocation2 + $0x18c] ss:$16 sps:$4 sm:$0xff]  }
 0xad9   :  { %6924 = vmatprep.subr.bf16.mxu0 %v14402_v63  ;;  %v14474_v63 = vld [vmem:[#allocation2 + $0x38c] ss:$16 sps:$4 sm:$0xff]  }
 0xadb   :  { %6884 = vmatpush2.bf16.msra.mxu1 %v14397_v2  ;;  %v14469_v2 = vld [vmem:[#allocation2 + $0x188] ss:$16 sps:$4 sm:$0xff]  }
 0xadc   :  { %6925 = vmatpush2.bf16.msra.mxu0 %v14400_v10  ;;  %6935 = vmatprep.subr.bf16.mxu1 %v14405_v14  ;;  %v14472_v10 = vld [vmem:[#allocation2 + $0x388] ss:$16 sps:$4 sm:$0xff]   ;;  %v14477_v14 = vld [vmem:[#allocation2 + $0x16c] ss:$16 sps:$4 sm:$0xff]  }
 0xadd   :  { %6976 = vmatprep.subr.bf16.mxu0 %v14408_v15  ;;  %v14480_v15 = vld [vmem:[#allocation2 + $0x36c] ss:$16 sps:$4 sm:$0xff]  }
 0xade   :  { %6886 = vmatmul.mubr.bf16.vlgmr.msra.gmra.mxu1 %v16313_v16 }
 0xadf   :  { %6927 = vmatmul.mubr.bf16.vlgmr.msra.gmra.mxu0 %v16317_v17  ;;  %6936 = vmatpush1.bf16.msra.mxu1 %v14403_v62  ;;  %v14475_v62 = vld [vmem:[#allocation2 + $0x168] ss:$16 sps:$4 sm:$0xff]  }
 0xae0   :  { %6967 = vmatprep.mubr.bf16.mxu1 %v16301_v5  ;;  %6977 = vmatpush1.bf16.msra.mxu0 %v14406_v25  ;;  %v14424_v5 = vld [vmem:[#allocation2 + $0x288] ss:$16 sps:$4 sm:$0xff]  }
 0xae1   :  { %7008 = vmatprep.mubr.bf16.mxu0 %v16305_v54  ;;  %6937 = vmatprep.subr.bf16.mxu1 %v14411_v18  ;;  %v14427_v54 = vld [vmem:[#allocation2 + $0x68] ss:$16 sps:$4 sm:$0xff]   ;;  %v14483_v18 = vld [vmem:[#allocation2 + $0x14c] ss:$16 sps:$4 sm:$0xff]  }
 0xae2   :  { %6978 = vmatprep.subr.bf16.mxu0 %v14414_v19  ;;  %v14478_v25 = vld [vmem:[#allocation2 + $0x368] ss:$16 sps:$4 sm:$0xff]   ;;  %v14486_v19 = vld [vmem:[#allocation2 + $0x34c] ss:$16 sps:$4 sm:$0xff]  }
 0xae3   :  { %6938 = vmatpush1.bf16.msra.mxu1 %v14409_v27  ;;  %v14481_v27 = vld [vmem:[#allocation2 + $0x148] ss:$16 sps:$4 sm:$0xff]  }
 0xae4   :  { %6979 = vmatpush1.bf16.msra.mxu0 %v14412_v56  ;;  %6939 = vmatprep.subr.bf16.mxu1 %v14417_v24  ;;  %v14484_v56 = vld [vmem:[#allocation2 + $0x348] ss:$16 sps:$4 sm:$0xff]   ;;  %v14489_v24 = vld [vmem:[#allocation2 + $0x12c] ss:$16 sps:$4 sm:$0xff]  }
 0xae5   :  { %6980 = vmatprep.subr.bf16.mxu0 %v14420_v50  ;;  %v14492_v50 = vld [vmem:[#allocation2 + $0x32c] ss:$16 sps:$4 sm:$0xff]  }
 0xae7   :  { %6940 = vmatpush1.bf16.msra.mxu1 %v14415_v57  ;;  %v14487_v57 = vld [vmem:[#allocation2 + $0x128] ss:$16 sps:$4 sm:$0xff]  }
 0xae8   :  { %6981 = vmatpush1.bf16.msra.mxu0 %v14418_v26  ;;  %6941 = vmatprep.subr.bf16.mxu1 %v14423_v53  ;;  %v14490_v26 = vld [vmem:[#allocation2 + $0x328] ss:$16 sps:$4 sm:$0xff]   ;;  %v14495_v53 = vld [vmem:[#allocation2 + $0x10c] ss:$16 sps:$4 sm:$0xff]  }
 0xae9   :  { %6982 = vmatprep.subr.bf16.mxu0 %v14426_v43  ;;  %v14498_v43 = vld [vmem:[#allocation2 + $0x30c] ss:$16 sps:$4 sm:$0xff]  }
 0xaeb   :  { %6942 = vmatpush1.bf16.msra.mxu1 %v14421_v11  ;;  %v14493_v11 = vld [vmem:[#allocation2 + $0x108] ss:$16 sps:$4 sm:$0xff]  }
 0xaec   :  { %6983 = vmatpush1.bf16.msra.mxu0 %v14424_v5  ;;  %6943 = vmatprep.subr.bf16.mxu1 %v14429_v28  ;;  %v14496_v5 = vld [vmem:[#allocation2 + $0x308] ss:$16 sps:$4 sm:$0xff]  }
 0xaed   :  { %6984 = vmatprep.subr.bf16.mxu0 %v14432_v29 }
 0xaef   :  { %6944 = vmatpush1.bf16.msra.mxu1 %v14427_v54 }
 0xaf0   :  { %6985 = vmatpush1.bf16.msra.mxu0 %v14430_v30  ;;  %6945 = vmatprep.subr.bf16.mxu1 %v14435_v31 }
 0xaf1   :  { %6986 = vmatprep.subr.bf16.mxu0 %v14438_v41  ;;  %v7018_v41 = vld [vmem:[#allocation25 + $0x4] sm:$0x3] }
 0xaf3   :  { %6946 = vmatpush1.bf16.msra.mxu1 %v14433_v46 }
 0xaf4   :  { %6987 = vmatpush1.bf16.msra.mxu0 %v14436_v33  ;;  %6947 = vmatprep.subr.bf16.mxu1 %v14441_v35  ;;  %v14501_v35 = vld [vmem:[#allocation2 + $0x8e4] ss:$16 sps:$4 sm:$0xff]  }
 0xaf5   :  { %6988 = vmatprep.subr.bf16.mxu0 %v14444_v36  ;;  %v14502_v36 = vld [vmem:[#allocation2 + $0xae0] ss:$16 sps:$4 sm:$0xff]  }
 0xaf7   :  { %6948 = vmatpush1.bf16.msra.mxu1 %v14439_v37  ;;  %v14507_v37 = vld [vmem:[#allocation2 + $0x8c4] ss:$16 sps:$4 sm:$0xff]  }
 0xaf8   :  { %6989 = vmatpush1.bf16.msra.mxu0 %v14442_v38  ;;  %6949 = vmatprep.subr.bf16.mxu1 %v14447_v39  ;;  %v14505_v38 = vld [vmem:[#allocation2 + $0x8c0] ss:$16 sps:$4 sm:$0xff]  }
 0xaf9   :  { %6990 = vmatprep.subr.bf16.mxu0 %v14450_v40  ;;  %v14508_v39 = vld [vmem:[#allocation2 + $0xac0] ss:$16 sps:$4 sm:$0xff]   ;;  %v14513_v40 = vld [vmem:[#allocation2 + $0x8a4] ss:$16 sps:$4 sm:$0xff]  }
 0xafb   :  { %6950 = vmatpush1.bf16.msra.mxu1 %v14445_v45  ;;  %v14516_v45 = vld [vmem:[#allocation2 + $0xaa4] ss:$16 sps:$4 sm:$0xff]  }
 0xafc   :  { %6991 = vmatpush1.bf16.msra.mxu0 %v14448_v47  ;;  %6951 = vmatprep.subr.bf16.mxu1 %v14453_v4  ;;  %v14511_v47 = vld [vmem:[#allocation2 + $0x8a0] ss:$16 sps:$4 sm:$0xff]  }
 0xafd   :  { %6992 = vmatprep.subr.bf16.mxu0 %v14456_v42  ;;  %v14514_v4 = vld [vmem:[#allocation2 + $0xaa0] ss:$16 sps:$4 sm:$0xff]   ;;  %v14519_v42 = vld [vmem:[#allocation2 + $0x884] ss:$16 sps:$4 sm:$0xff]  }
 0xaff   :  { %6952 = vmatpush2.bf16.msra.mxu1 %v14451_v51  ;;  %v14522_v51 = vld [vmem:[#allocation2 + $0xa84] ss:$16 sps:$4 sm:$0xff]  }
 0xb00   :  { %6993 = vmatpush2.bf16.msra.mxu0 %v14454_v52  ;;  %6953 = vmatprep.subr.bf16.mxu1 %v14459_v55  ;;  %v14517_v52 = vld [vmem:[#allocation2 + $0x880] ss:$16 sps:$4 sm:$0xff]  }
 0xb01   :  { %6994 = vmatprep.subr.bf16.mxu0 %v14462_v44  ;;  %v14520_v55 = vld [vmem:[#allocation2 + $0xa80] ss:$16 sps:$4 sm:$0xff]   ;;  %v14525_v44 = vld [vmem:[#allocation2 + $0x864] ss:$16 sps:$4 sm:$0xff]  }
 0xb03   :  { %6954 = vmatpush2.bf16.msra.mxu1 %v14457_v22  ;;  %v14528_v22 = vld [vmem:[#allocation2 + $0xa64] ss:$16 sps:$4 sm:$0xff]  }
 0xb04   :  { %6995 = vmatpush2.bf16.msra.mxu0 %v14460_v13  ;;  %6955 = vmatprep.subr.bf16.mxu1 %v14465_v7  ;;  %v14523_v13 = vld [vmem:[#allocation2 + $0x860] ss:$16 sps:$4 sm:$0xff]  }
 0xb05   :  { %6996 = vmatprep.subr.bf16.mxu0 %v14468_v23  ;;  %v14526_v7 = vld [vmem:[#allocation2 + $0xa60] ss:$16 sps:$4 sm:$0xff]   ;;  %v14531_v23 = vld [vmem:[#allocation2 + $0x844] ss:$16 sps:$4 sm:$0xff]  }
 0xb07   :  { %6956 = vmatpush2.bf16.msra.mxu1 %v14463_v20  ;;  %v14534_v20 = vld [vmem:[#allocation2 + $0xa44] ss:$16 sps:$4 sm:$0xff]  }
 0xb08   :  { %6997 = vmatpush2.bf16.msra.mxu0 %v14466_v21  ;;  %6957 = vmatprep.subr.bf16.mxu1 %v14471_v59  ;;  %v14529_v21 = vld [vmem:[#allocation2 + $0x840] ss:$16 sps:$4 sm:$0xff]  }
 0xb09   :  { %6998 = vmatprep.subr.bf16.mxu0 %v14474_v63  ;;  %v14532_v59 = vld [vmem:[#allocation2 + $0xa40] ss:$16 sps:$4 sm:$0xff]   ;;  %v14537_v63 = vld [vmem:[#allocation2 + $0x824] ss:$16 sps:$4 sm:$0xff]  }
 0xb0b   :  { %6958 = vmatpush2.bf16.msra.mxu1 %v14469_v2  ;;  %v14540_v2 = vld [vmem:[#allocation2 + $0xa24] ss:$16 sps:$4 sm:$0xff]  }
 0xb0c   :  { %6999 = vmatpush2.bf16.msra.mxu0 %v14472_v10  ;;  %6959 = vmatprep.subr.bf16.mxu1 %v14477_v14  ;;  %v14535_v10 = vld [vmem:[#allocation2 + $0x820] ss:$16 sps:$4 sm:$0xff]  }
 0xb0d   :  { %7000 = vmatprep.subr.bf16.mxu0 %v14480_v15  ;;  %v14538_v14 = vld [vmem:[#allocation2 + $0xa20] ss:$16 sps:$4 sm:$0xff]   ;;  %v14543_v15 = vld [vmem:[#allocation2 + $0x804] ss:$16 sps:$4 sm:$0xff]  }
 0xb0f   :  { %6960 = vmatpush2.bf16.msra.mxu1 %v14475_v62  ;;  %v14546_v62 = vld [vmem:[#allocation2 + $0xa04] ss:$16 sps:$4 sm:$0xff]  }
 0xb10   :  { %7001 = vmatpush2.bf16.msra.mxu0 %v14478_v25  ;;  %6961 = vmatprep.subr.bf16.mxu1 %v14483_v18  ;;  %v14541_v25 = vld [vmem:[#allocation2 + $0x800] ss:$16 sps:$4 sm:$0xff]  }
 0xb11   :  { %7002 = vmatprep.subr.bf16.mxu0 %v14486_v19  ;;  %v14544_v18 = vld [vmem:[#allocation2 + $0xa00] ss:$16 sps:$4 sm:$0xff]   ;;  %v14549_v19 = vld [vmem:[#allocation2 + $0x9e4] ss:$16 sps:$4 sm:$0xff]  }
 0xb13   :  { %6962 = vmatpush2.bf16.msra.mxu1 %v14481_v27  ;;  %v14552_v27 = vld [vmem:[#allocation2 + $0xbe4] ss:$16 sps:$4 sm:$0xff]  }
 0xb14   :  { %7003 = vmatpush2.bf16.msra.mxu0 %v14484_v56  ;;  %6963 = vmatprep.subr.bf16.mxu1 %v14489_v24  ;;  %v14547_v56 = vld [vmem:[#allocation2 + $0x9e0] ss:$16 sps:$4 sm:$0xff]  }
 0xb15   :  { %7004 = vmatprep.subr.bf16.mxu0 %v14492_v50  ;;  %v14550_v24 = vld [vmem:[#allocation2 + $0xbe0] ss:$16 sps:$4 sm:$0xff]   ;;  %v14555_v50 = vld [vmem:[#allocation2 + $0x9c4] ss:$16 sps:$4 sm:$0xff]  }
 0xb17   :  { %6964 = vmatpush2.bf16.msra.mxu1 %v14487_v57  ;;  %v14558_v57 = vld [vmem:[#allocation2 + $0xbc4] ss:$16 sps:$4 sm:$0xff]  }
 0xb18   :  { %7005 = vmatpush2.bf16.msra.mxu0 %v14490_v26  ;;  %6965 = vmatprep.subr.bf16.mxu1 %v14495_v53  ;;  %v14553_v26 = vld [vmem:[#allocation2 + $0x9c0] ss:$16 sps:$4 sm:$0xff]  }
 0xb19   :  { %7006 = vmatprep.subr.bf16.mxu0 %v14498_v43  ;;  %v14556_v53 = vld [vmem:[#allocation2 + $0xbc0] ss:$16 sps:$4 sm:$0xff]   ;;  %v14561_v43 = vld [vmem:[#allocation2 + $0x9a4] ss:$16 sps:$4 sm:$0xff]  }
 0xb1b   :  { %6966 = vmatpush2.bf16.msra.mxu1 %v14493_v11  ;;  %v14564_v11 = vld [vmem:[#allocation2 + $0xba4] ss:$16 sps:$4 sm:$0xff]  }
 0xb1c   :  { %7007 = vmatpush2.bf16.msra.mxu0 %v14496_v5  ;;  %12545 = vmatprep.subr.msk.bf16.mxu1 %vm4523_vm3, %v16232_v12  ;;  %v14559_v5 = vld [vmem:[#allocation2 + $0x9a0] ss:$16 sps:$4 sm:$0xff]  }
 0xb1d   :  { %12547 = vmatprep.subr.msk.bf16.mxu0 %vm4523_vm3, %v16247_v48 }
 0xb1e   :  { %6968 = vmatmul.mubr.bf16.vlgmr.msra.gmra.mxu1 %v16313_v16  ;;  %v6083_v28 = vpop.f32.mrf.mxu1  ;;  %v6124_v29 = vpop.f32.mrf.mxu0 }
 0xb1f   :  { %7009 = vmatmul.mubr.bf16.vlgmr.msra.gmra.mxu0 %v16317_v17  ;;  %v16329_v54 = vadd.f32 %v6124_v29, %v6083_v28  ;;  %7037 = vmatpush1.bf16.msra.mxu1 %v16237_v8  ;;  %v14499_v17 = vld [vmem:[#allocation2 + $0x8e0] ss:$16 sps:$4 sm:$0xff]   ;;  %v14504_v8 = vld [vmem:[#allocation2 + $0xae4] ss:$16 sps:$4 sm:$0xff]  }
 0xb20   :  { %v6085_v30 = vpop.f32.mrf.mxu1  ;;  %v6126_v31 = vpop.f32.mrf.mxu0  ;;  %7078 = vmatpush1.bf16.msra.mxu0 %v16250_v49  ;;  %7054 = vmatprep.mubr.bf16.mxu1 %v15816_v9  ;;  %v14510_v49 = vld [vmem:[#allocation2 + $0xac4] ss:$16 sps:$4 sm:$0xff]   ;;  %v14562_v28 = vld [vmem:[#allocation2 + $0xba0] ss:$16 sps:$4 sm:$0xff]  }
 0xb21   :  { %v16334_v12 = vadd.f32 %v6126_v31, %v6085_v30  ;;  %7095 = vmatprep.mubr.bf16.mxu0 %v15816_v9  ;;  %7877 = vmatprep.subr.bf16.mxu1 %v14501_v35  ;;  %v14567_v29 = vld [vmem:[#allocation2 + $0x984] ss:$16 sps:$4 sm:$0xff]   ;;  %v14565_v31 = vld [vmem:[#allocation2 + $0x980] ss:$16 sps:$4 sm:$0xff]  }
 0xb22   :  { %v6087_v48 = vpop.f32.mrf.mxu1  ;;  %v6128_v16 = vpop.f32.mrf.mxu0  ;;  %7918 = vmatprep.subr.bf16.mxu0 %v14504_v8  ;;  %v14570_v30 = vld [vmem:[#allocation2 + $0xb84] ss:$16 sps:$4 sm:$0xff]  }
 0xb23   :  { %v14568_v48 = vld [vmem:[#allocation2 + $0xb80] ss:$16 sps:$4 sm:$0xff]   ;;  %v14573_v16 = vld [vmem:[#allocation2 + $0x964] ss:$16 sps:$4 sm:$0xff]  }
 0xb24   :  { %v6088_v46 = vpop.f32.mrf.mxu1  ;;  %v6129_v33 = vpop.f32.mrf.mxu0  ;;  %v14579_v8 = vld [vmem:[#allocation2 + $0x944] ss:$16 sps:$4 sm:$0xff]  }
 0xb25   :  { %v14571_v46 = vld [vmem:[#allocation2 + $0x960] ss:$16 sps:$4 sm:$0xff]  }
 0xb26   :  { %12546 = vmatmul.mubr.msk.bf16.vlgmr.msra.gmra.mxu1 %vm4519_vm4, %v7018_v41  ;;  %v14574_v33 = vld [vmem:[#allocation2 + $0xb60] ss:$16 sps:$4 sm:$0xff]  }
 0xb27   :  { %12548 = vmatmul.mubr.msk.bf16.vlgmr.msra.gmra.mxu0 %vm4519_vm4, %v7018_v41  ;;  %7878 = vmatpush1.bf16.msra.mxu1 %v14499_v17  ;;  %v14576_v41 = vld [vmem:[#allocation2 + $0xb64] ss:$16 sps:$4 sm:$0xff]  }
 0xb28   :  { %7919 = vmatpush1.bf16.msra.mxu0 %v14502_v36  ;;  %7879 = vmatprep.subr.bf16.mxu1 %v14507_v37  ;;  %v14582_v37 = vld [vmem:[#allocation2 + $0xb44] ss:$16 sps:$4 sm:$0xff]  }
 0xb29   :  { %7920 = vmatprep.subr.bf16.mxu0 %v14510_v49 }
 0xb2b   :  { %7880 = vmatpush1.bf16.msra.mxu1 %v14505_v38 }
 0xb2c   :  { %7921 = vmatpush1.bf16.msra.mxu0 %v14508_v39  ;;  %7881 = vmatprep.subr.bf16.mxu1 %v14513_v40  ;;  %v14577_v39 = vld [vmem:[#allocation2 + $0x940] ss:$16 sps:$4 sm:$0xff]  }
 0xb2d   :  { %7922 = vmatprep.subr.bf16.mxu0 %v14516_v45  ;;  %v14580_v40 = vld [vmem:[#allocation2 + $0xb40] ss:$16 sps:$4 sm:$0xff]  }
 0xb2f   :  { %7882 = vmatpush1.bf16.msra.mxu1 %v14511_v47 }
 0xb30   :  { %7923 = vmatpush1.bf16.msra.mxu0 %v14514_v4  ;;  %7883 = vmatprep.subr.bf16.mxu1 %v14519_v42  ;;  %v14583_v42 = vld [vmem:[#allocation2 + $0x920] ss:$16 sps:$4 sm:$0xff]  }
 0xb31   :  { %7924 = vmatprep.subr.bf16.mxu0 %v14522_v51  ;;  %v14585_v51 = vld [vmem:[#allocation2 + $0x924] ss:$16 sps:$4 sm:$0xff]  }
 0xb33   :  { %7884 = vmatpush1.bf16.msra.mxu1 %v14517_v52  ;;  %v14586_v52 = vld [vmem:[#allocation2 + $0xb20] ss:$16 sps:$4 sm:$0xff]  }
 0xb34   :  { %7925 = vmatpush1.bf16.msra.mxu0 %v14520_v55  ;;  %7885 = vmatprep.subr.bf16.mxu1 %v14525_v44 }
 0xb35   :  { %7926 = vmatprep.subr.bf16.mxu0 %v14528_v22  ;;  %v14588_v22 = vld [vmem:[#allocation2 + $0xb24] ss:$16 sps:$4 sm:$0xff]  }
 0xb37   :  { %7886 = vmatpush1.bf16.msra.mxu1 %v14523_v13  ;;  %v14591_v13 = vld [vmem:[#allocation2 + $0x904] ss:$16 sps:$4 sm:$0xff]  }
 0xb38   :  { %7927 = vmatpush1.bf16.msra.mxu0 %v14526_v7  ;;  %7887 = vmatprep.subr.bf16.mxu1 %v14531_v23  ;;  %v14594_v7 = vld [vmem:[#allocation2 + $0xb04] ss:$16 sps:$4 sm:$0xff]   ;;  %v14589_v23 = vld [vmem:[#allocation2 + $0x900] ss:$16 sps:$4 sm:$0xff]  }
 0xb39   :  { %7928 = vmatprep.subr.bf16.mxu0 %v14534_v20  ;;  %v14592_v20 = vld [vmem:[#allocation2 + $0xb00] ss:$16 sps:$4 sm:$0xff]  }
 0xb3b   :  { %7888 = vmatpush1.bf16.msra.mxu1 %v14529_v21  ;;  %v14597_v21 = vld [vmem:[#allocation2 + $0x8ec] ss:$16 sps:$4 sm:$0xff]  }
 0xb3c   :  { %7929 = vmatpush1.bf16.msra.mxu0 %v14532_v59  ;;  %7889 = vmatprep.subr.bf16.mxu1 %v14537_v63  ;;  %v14600_v59 = vld [vmem:[#allocation2 + $0xaec] ss:$16 sps:$4 sm:$0xff]  }
 0xb3d   :  { %7930 = vmatprep.subr.bf16.mxu0 %v14540_v2 }
 0xb3f   :  { %7890 = vmatpush1.bf16.msra.mxu1 %v14535_v10 }
 0xb40   :  { %7931 = vmatpush1.bf16.msra.mxu0 %v14538_v14  ;;  %7891 = vmatprep.subr.bf16.mxu1 %v14543_v15 }
 0xb41   :  { %7932 = vmatprep.subr.bf16.mxu0 %v14546_v62 }
 0xb43   :  { %7892 = vmatpush1.bf16.msra.mxu1 %v14541_v25 }
 0xb44   :  { %7933 = vmatpush1.bf16.msra.mxu0 %v14544_v18  ;;  %7893 = vmatprep.subr.bf16.mxu1 %v14549_v19 }
 0xb45   :  { %7934 = vmatprep.subr.bf16.mxu0 %v14552_v27 }
 0xb47   :  { %7894 = vmatpush2.bf16.msra.mxu1 %v14547_v56 }
 0xb48   :  { %7935 = vmatpush2.bf16.msra.mxu0 %v14550_v24  ;;  %7895 = vmatprep.subr.bf16.mxu1 %v14555_v50 }
 0xb49   :  { %7936 = vmatprep.subr.bf16.mxu0 %v14558_v57 }
 0xb4b   :  { %7896 = vmatpush2.bf16.msra.mxu1 %v14553_v26 }
 0xb4c   :  { %7937 = vmatpush2.bf16.msra.mxu0 %v14556_v53  ;;  %7897 = vmatprep.subr.bf16.mxu1 %v14561_v43 }
 0xb4d   :  { %7938 = vmatprep.subr.bf16.mxu0 %v14564_v11 }
 0xb4f   :  { %7898 = vmatpush2.bf16.msra.mxu1 %v14559_v5 }
 0xb50   :  { %7939 = vmatpush2.bf16.msra.mxu0 %v14562_v28  ;;  %7899 = vmatprep.subr.bf16.mxu1 %v14567_v29 }
 0xb51   :  { %7940 = vmatprep.subr.bf16.mxu0 %v14570_v30 }
 0xb53   :  { %7900 = vmatpush2.bf16.msra.mxu1 %v14565_v31 }
 0xb54   :  { %7941 = vmatpush2.bf16.msra.mxu0 %v14568_v48  ;;  %7901 = vmatprep.subr.bf16.mxu1 %v14573_v16 }
 0xb55   :  { %7942 = vmatprep.subr.bf16.mxu0 %v14576_v41 }
 0xb57   :  { %7902 = vmatpush2.bf16.msra.mxu1 %v14571_v46 }
 0xb58   :  { %7943 = vmatpush2.bf16.msra.mxu0 %v14574_v33  ;;  %7903 = vmatprep.subr.bf16.mxu1 %v14579_v8  ;;  %v14595_v33 = vld [vmem:[#allocation2 + $0x8e8] ss:$16 sps:$4 sm:$0xff]  }
 0xb59   :  { %7944 = vmatprep.subr.bf16.mxu0 %v14582_v37  ;;  %v14598_v8 = vld [vmem:[#allocation2 + $0xae8] ss:$16 sps:$4 sm:$0xff]  }
 0xb5b   :  { %7904 = vmatpush2.bf16.msra.mxu1 %v14577_v39 }
 0xb5c   :  { %7945 = vmatpush2.bf16.msra.mxu0 %v14580_v40  ;;  %7905 = vmatprep.subr.bf16.mxu1 %v14585_v51  ;;  %v14606_v40 = vld [vmem:[#allocation2 + $0xacc] ss:$16 sps:$4 sm:$0xff]  }
 0xb5d   :  { %7946 = vmatprep.subr.bf16.mxu0 %v14588_v22  ;;  %v14612_v51 = vld [vmem:[#allocation2 + $0xaac] ss:$16 sps:$4 sm:$0xff]  }
 0xb5e   :  { %v6165_v17 = vpop.f32.mrf.mxu1  ;;  %v6206_v35 = vpop.f32.mrf.mxu0  ;;  %v14618_v22 = vld [vmem:[#allocation2 + $0xa8c] ss:$16 sps:$4 sm:$0xff]  }
 0xb5f   :  { %v6207_v36 = vadd.f32 %v6206_v35, %v6165_v17  ;;  %7906 = vmatpush2.bf16.msra.mxu1 %v14583_v42  ;;  %v14609_v42 = vld [vmem:[#allocation2 + $0x8ac] ss:$16 sps:$4 sm:$0xff]  }
 0xb60   :  { %v6167_v49 = vpop.f32.mrf.mxu1  ;;  %v6208_v38 = vpop.f32.mrf.mxu0  ;;  %7947 = vmatpush2.bf16.msra.mxu0 %v14586_v52  ;;  %7907 = vmatprep.subr.bf16.mxu1 %v14591_v13  ;;  %v14607_v52 = vld [vmem:[#allocation2 + $0x8a8] ss:$16 sps:$4 sm:$0xff]  }
 0xb61   :  { %v6209_v45 = vadd.f32 %v6208_v38, %v6167_v49  ;;  %7948 = vmatprep.subr.bf16.mxu0 %v14594_v7  ;;  %v14603_v38 = vld [vmem:[#allocation2 + $0x8cc] ss:$16 sps:$4 sm:$0xff]   ;;  %v14613_v13 = vld [vmem:[#allocation2 + $0x888] ss:$16 sps:$4 sm:$0xff]  }
 0xb62   :  { %v6169_v47 = vpop.f32.mrf.mxu1  ;;  %v6210_v4 = vpop.f32.mrf.mxu0  ;;  %v14616_v7 = vld [vmem:[#allocation2 + $0xa88] ss:$16 sps:$4 sm:$0xff]  }
 0xb63   :  { %7908 = vmatpush2.bf16.msra.mxu1 %v14589_v23  ;;  %v14601_v47 = vld [vmem:[#allocation2 + $0x8c8] ss:$16 sps:$4 sm:$0xff]   ;;  %v14621_v23 = vld [vmem:[#allocation2 + $0x86c] ss:$16 sps:$4 sm:$0xff]  }
 0xb64   :  { %v6170_v55 = vpop.f32.mrf.mxu1  ;;  %v6211_v44 = vpop.f32.mrf.mxu0  ;;  %7949 = vmatpush2.bf16.msra.mxu0 %v14592_v20  ;;  %7959 = vmatprep.subr.bf16.mxu1 %v14597_v21  ;;  %v14604_v4 = vld [vmem:[#allocation2 + $0xac8] ss:$16 sps:$4 sm:$0xff]   ;;  %v14624_v20 = vld [vmem:[#allocation2 + $0xa6c] ss:$16 sps:$4 sm:$0xff]  }
 0xb65   :  { %8000 = vmatprep.subr.bf16.mxu0 %v14600_v59  ;;  %v14610_v55 = vld [vmem:[#allocation2 + $0xaa8] ss:$16 sps:$4 sm:$0xff]   ;;  %v14615_v44 = vld [vmem:[#allocation2 + $0x88c] ss:$16 sps:$4 sm:$0xff]  }
 0xb66   :  { %v14619_v21 = vld [vmem:[#allocation2 + $0x868] ss:$16 sps:$4 sm:$0xff]  }
 0xb67   :  { %v14622_v59 = vld [vmem:[#allocation2 + $0xa68] ss:$16 sps:$4 sm:$0xff]  }
 0xb9e   :  { %v6887_v63 = vpop.f32.mrf.mxu1 }
 0xb9f   :  { %v6888_v2 = vadd.f32 %v6887_v63, %v16329_v54  ;;  %v6928_v10 = vpop.f32.mrf.mxu0  ;;  %v14627_v63 = vld [vmem:[#allocation2 + $0x84c] ss:$16 sps:$4 sm:$0xff]  }
 0xba0   :  { %v6889_v14 = vpop.f32.mrf.mxu1 }
 0xba1   :  { %v16340_v15 = vadd.f32 %v6928_v10, %v6888_v2  ;;  %v6890_v62 = vadd.f32 %v6889_v14, %v16334_v12  ;;  %v6930_v25 = vpop.f32.mrf.mxu0  ;;  %v14630_v2 = vld [vmem:[#allocation2 + $0xa4c] ss:$16 sps:$4 sm:$0xff]   ;;  %v14625_v10 = vld [vmem:[#allocation2 + $0x848] ss:$16 sps:$4 sm:$0xff]  }
 0xba2   :  { %v6891_v18 = vpop.f32.mrf.mxu1  ;;  %v14628_v14 = vld [vmem:[#allocation2 + $0xa48] ss:$16 sps:$4 sm:$0xff]  }
 0xba3   :  { %v16343_v19 = vadd.f32 %v6930_v25, %v6890_v62  ;;  %v6932_v27 = vpop.f32.mrf.mxu0  ;;  %v14633_v62 = vld [vmem:[#allocation2 + $0x82c] ss:$16 sps:$4 sm:$0xff]   ;;  %v14631_v18 = vld [vmem:[#allocation2 + $0x828] ss:$16 sps:$4 sm:$0xff]  }
 0xba4   :  { %v6892_v56 = vpop.f32.mrf.mxu1  ;;  %v14636_v25 = vld [vmem:[#allocation2 + $0xa2c] ss:$16 sps:$4 sm:$0xff]   ;;  %v14634_v27 = vld [vmem:[#allocation2 + $0xa28] ss:$16 sps:$4 sm:$0xff]  }
 0xba5   :  { %v6933_v24 = vpop.f32.mrf.mxu0  ;;  %v14639_v56 = vld [vmem:[#allocation2 + $0x80c] ss:$16 sps:$4 sm:$0xff]  }
 0xba6   :  { %v14642_v24 = vld [vmem:[#allocation2 + $0xa0c] ss:$16 sps:$4 sm:$0xff]  }
 0xbde   :  { %v6969_v50 = vpop.f32.mrf.mxu1 }
 0xbdf   :  { %v6970_v57 = vadd.f32 %v6969_v50, %v6207_v36  ;;  %v7010_v26 = vpop.f32.mrf.mxu0  ;;  %v14637_v50 = vld [vmem:[#allocation2 + $0x808] ss:$16 sps:$4 sm:$0xff]  }
 0xbe0   :  { %v6971_v53 = vpop.f32.mrf.mxu1 }
 0xbe1   :  { %v16345_v43 = vadd.f32 %v7010_v26, %v6970_v57  ;;  %v6972_v54 = vadd.f32 %v6971_v53, %v6209_v45  ;;  %v7012_v11 = vpop.f32.mrf.mxu0  ;;  %v14640_v57 = vld [vmem:[#allocation2 + $0xa08] ss:$16 sps:$4 sm:$0xff]   ;;  %v14645_v26 = vld [vmem:[#allocation2 + $0x9ec] ss:$16 sps:$4 sm:$0xff]  }
 0xbe2   :  { %v6973_v5 = vpop.f32.mrf.mxu1  ;;  %v14648_v53 = vld [vmem:[#allocation2 + $0xbec] ss:$16 sps:$4 sm:$0xff]  }
 0xbe3   :  { %v16347_v28 = vadd.f32 %v7012_v11, %v6972_v54  ;;  %v7014_v29 = vpop.f32.mrf.mxu0  ;;  %v14643_v54 = vld [vmem:[#allocation2 + $0x9e8] ss:$16 sps:$4 sm:$0xff]   ;;  %v14651_v5 = vld [vmem:[#allocation2 + $0x9cc] ss:$16 sps:$4 sm:$0xff]  }
 0xbe4   :  { %v6974_v12 = vpop.f32.mrf.mxu1  ;;  %v14646_v11 = vld [vmem:[#allocation2 + $0xbe8] ss:$16 sps:$4 sm:$0xff]   ;;  %v14654_v29 = vld [vmem:[#allocation2 + $0xbcc] ss:$16 sps:$4 sm:$0xff]  }
 0xbe5   :  { %v7015_v30 = vpop.f32.mrf.mxu0  ;;  %v14649_v12 = vld [vmem:[#allocation2 + $0x9c8] ss:$16 sps:$4 sm:$0xff]  }
 0xbe6   :  { %v7056_v31 = vpop.f32.mrf.mxu1  ;;  %v14652_v30 = vld [vmem:[#allocation2 + $0xbc8] ss:$16 sps:$4 sm:$0xff]  }
 0xbe7   :  { %v7097_v48 = vpop.f32.mrf.mxu0  ;;  %v16349_v17 = vpack.c.bf16 %v7056_v31, %v7056_v31  ;;  %v14657_v31 = vld [vmem:[#allocation2 + $0x9ac] ss:$16 sps:$4 sm:$0xff]  }
 0xbe8   :  { %v7058_v16 = vpop.f32.mrf.mxu1  ;;  %v16351_v37 = vpack.c.bf16 %v7097_v48, %v7097_v48  ;;  %v14660_v48 = vld [vmem:[#allocation2 + $0xbac] ss:$16 sps:$4 sm:$0xff]  }
 0xbe9   :  { %v7105_v41 = vpack.c.bf16 %v7058_v16, %v7058_v16  ;;  %v7099_v46 = vpop.f32.mrf.mxu0  ;;  %v14655_v16 = vld [vmem:[#allocation2 + $0x9a8] ss:$16 sps:$4 sm:$0xff]  }
 0xbea   :  { %v7107_v35 = vpack.c.bf16 %v7099_v46, %v7099_v46  ;;  %v7060_v36 = vpop.f32.mrf.mxu1  ;;  %v14663_v46 = vld [vmem:[#allocation2 + $0x98c] ss:$16 sps:$4 sm:$0xff]  }
 0xbeb   :  { %v7101_v49 = vpop.f32.mrf.mxu0  ;;  %7909 = vmatprep.mubr.bf16.mxu1 %v7105_v41  ;;  %v14664_v36 = vld [vmem:[#allocation2 + $0xb88] ss:$16 sps:$4 sm:$0xff]  }
 0xbec   :  { %7950 = vmatprep.mubr.bf16.mxu0 %v7107_v35  ;;  %v7061_v39 = vpop.f32.mrf.mxu1  ;;  %7910 = vmatmul.mubr.bf16.vlgmr.msra.gmra.mxu1 %v16349_v17  ;;  %v14672_v49 = vld [vmem:[#allocation2 + $0xb6c] ss:$16 sps:$4 sm:$0xff]  }
 0xbed   :  { %v7102_v45 = vpop.f32.mrf.mxu0  ;;  %7951 = vmatmul.mubr.bf16.vlgmr.msra.gmra.mxu0 %v16351_v37  ;;  %7960 = vmatpush1.bf16.msra.mxu1 %v14595_v33  ;;  %v14666_v33 = vld [vmem:[#allocation2 + $0xb8c] ss:$16 sps:$4 sm:$0xff]   ;;  %v14670_v39 = vld [vmem:[#allocation2 + $0xb68] ss:$16 sps:$4 sm:$0xff]  }
 0xbee   :  { %8001 = vmatpush1.bf16.msra.mxu0 %v14598_v8  ;;  %7991 = vmatprep.mubr.bf16.mxu1 %v7105_v41  ;;  %v14658_v41 = vld [vmem:[#allocation2 + $0xba8] ss:$16 sps:$4 sm:$0xff]   ;;  %v14669_v8 = vld [vmem:[#allocation2 + $0x96c] ss:$16 sps:$4 sm:$0xff]  }
 0xbef   :  { %8032 = vmatprep.mubr.bf16.mxu0 %v7107_v35  ;;  %7961 = vmatprep.subr.bf16.mxu1 %v14603_v38  ;;  %v14661_v35 = vld [vmem:[#allocation2 + $0x988] ss:$16 sps:$4 sm:$0xff]   ;;  %v14678_v45 = vld [vmem:[#allocation2 + $0xb4c] ss:$16 sps:$4 sm:$0xff]  }
 0xbf0   :  { %8002 = vmatprep.subr.bf16.mxu0 %v14606_v40  ;;  %v14667_v38 = vld [vmem:[#allocation2 + $0x968] ss:$16 sps:$4 sm:$0xff]   ;;  %v14675_v40 = vld [vmem:[#allocation2 + $0x94c] ss:$16 sps:$4 sm:$0xff]  }
 0xbf1   :  { %7962 = vmatpush1.bf16.msra.mxu1 %v14601_v47  ;;  %v14673_v47 = vld [vmem:[#allocation2 + $0x948] ss:$16 sps:$4 sm:$0xff]  }
 0xbf2   :  { %8003 = vmatpush1.bf16.msra.mxu0 %v14604_v4  ;;  %7963 = vmatprep.subr.bf16.mxu1 %v14609_v42  ;;  %v14676_v4 = vld [vmem:[#allocation2 + $0xb48] ss:$16 sps:$4 sm:$0xff]   ;;  %v14681_v42 = vld [vmem:[#allocation2 + $0x92c] ss:$16 sps:$4 sm:$0xff]  }
 0xbf3   :  { %8004 = vmatprep.subr.bf16.mxu0 %v14612_v51  ;;  %v14684_v51 = vld [vmem:[#allocation2 + $0xb2c] ss:$16 sps:$4 sm:$0xff]  }
 0xbf5   :  { %7964 = vmatpush1.bf16.msra.mxu1 %v14607_v52  ;;  %v14679_v52 = vld [vmem:[#allocation2 + $0x928] ss:$16 sps:$4 sm:$0xff]  }
 0xbf6   :  { %8005 = vmatpush1.bf16.msra.mxu0 %v14610_v55  ;;  %7965 = vmatprep.subr.bf16.mxu1 %v14615_v44  ;;  %v14682_v55 = vld [vmem:[#allocation2 + $0xb28] ss:$16 sps:$4 sm:$0xff]   ;;  %v14687_v44 = vld [vmem:[#allocation2 + $0x90c] ss:$16 sps:$4 sm:$0xff]  }
 0xbf7   :  { %8006 = vmatprep.subr.bf16.mxu0 %v14618_v22  ;;  %v14690_v22 = vld [vmem:[#allocation2 + $0xb0c] ss:$16 sps:$4 sm:$0xff]  }
 0xbf9   :  { %7966 = vmatpush1.bf16.msra.mxu1 %v14613_v13  ;;  %v14685_v13 = vld [vmem:[#allocation2 + $0x908] ss:$16 sps:$4 sm:$0xff]  }
 0xbfa   :  { %8007 = vmatpush1.bf16.msra.mxu0 %v14616_v7  ;;  %7967 = vmatprep.subr.bf16.mxu1 %v14621_v23  ;;  %v14688_v7 = vld [vmem:[#allocation2 + $0xb08] ss:$16 sps:$4 sm:$0xff]  }
 0xbfb   :  { %8008 = vmatprep.subr.bf16.mxu0 %v14624_v20  ;;  %v16359_v23 = vld [vmem:[#allocation26] sm:$0xf] }
 0xbfd   :  { %7968 = vmatpush1.bf16.msra.mxu1 %v14619_v21 }
 0xbfe   :  { %8009 = vmatpush1.bf16.msra.mxu0 %v14622_v59  ;;  %7969 = vmatprep.subr.bf16.mxu1 %v14627_v63  ;;  %v8050_v63 = vrot.slane %v16359_v23, %v16107_v58 }
 0xbff   :  { %8010 = vmatprep.subr.bf16.mxu0 %v14630_v2 }
 0xc01   :  { %7970 = vmatpush1.bf16.msra.mxu1 %v14625_v10 }
 0xc02   :  { %8011 = vmatpush1.bf16.msra.mxu0 %v14628_v14  ;;  %7971 = vmatprep.subr.bf16.mxu1 %v14633_v62 }
 0xc03   :  { %8012 = vmatprep.subr.bf16.mxu0 %v14636_v25 }
 0xc05   :  { %7972 = vmatpush1.bf16.msra.mxu1 %v14631_v18 }
 0xc06   :  { %8013 = vmatpush1.bf16.msra.mxu0 %v14634_v27  ;;  %7973 = vmatprep.subr.bf16.mxu1 %v14639_v56 }
 0xc07   :  { %8014 = vmatprep.subr.bf16.mxu0 %v14642_v24 }
 0xc09   :  { %7974 = vmatpush1.bf16.msra.mxu1 %v14637_v50 }
 0xc0a   :  { %8015 = vmatpush1.bf16.msra.mxu0 %v14640_v57  ;;  %7975 = vmatprep.subr.bf16.mxu1 %v14645_v26 }
 0xc0b   :  { %8016 = vmatprep.subr.bf16.mxu0 %v14648_v53 }
 0xc0d   :  { %7976 = vmatpush2.bf16.msra.mxu1 %v14643_v54 }
 0xc0e   :  { %8017 = vmatpush2.bf16.msra.mxu0 %v14646_v11  ;;  %7977 = vmatprep.subr.bf16.mxu1 %v14651_v5  ;;  %v14691_v11 = vld [vmem:[#allocation29 + $0x78] sm:$0xff]  }
 0xc0f   :  { %8018 = vmatprep.subr.bf16.mxu0 %v14654_v29  ;;  %v8079_v5 = vld [vmem:[#allocation28] sm:$0x1]  ;;  %v14693_v29 = vld [vmem:[#allocation29 + $0x70] sm:$0xff]  }
 0xc11   :  { %7978 = vmatpush2.bf16.msra.mxu1 %v14649_v12  ;;  %v14694_v12 = vld [vmem:[#allocation29 + $0x30] sm:$0xff]  }
 0xc12   :  { %8019 = vmatpush2.bf16.msra.mxu0 %v14652_v30  ;;  %7979 = vmatprep.subr.bf16.mxu1 %v14657_v31  ;;  %v14697_v30 = vld [vmem:[#allocation29 + $0x68] sm:$0xff]  }
 0xc13   :  { %8020 = vmatprep.subr.bf16.mxu0 %v14660_v48  ;;  %v14698_v31 = vld [vmem:[#allocation29 + $0x28] sm:$0xff]   ;;  %v14701_v48 = vld [vmem:[#allocation29 + $0x60] sm:$0xff]  }
 0xc15   :  { %7980 = vmatpush2.bf16.msra.mxu1 %v14655_v16  ;;  %v14702_v16 = vld [vmem:[#allocation29 + $0x20] sm:$0xff]  }
 0xc16   :  { %8021 = vmatpush2.bf16.msra.mxu0 %v14658_v41  ;;  %7981 = vmatprep.subr.bf16.mxu1 %v14663_v46  ;;  %v14705_v41 = vld [vmem:[#allocation29 + $0x58] sm:$0xff]  }
 0xc17   :  { %8022 = vmatprep.subr.bf16.mxu0 %v14666_v33  ;;  %v14706_v46 = vld [vmem:[#allocation29 + $0x18] sm:$0xff]   ;;  %v14709_v33 = vld [vmem:[#allocation29 + $0x50] sm:$0xff]  }
 0xc19   :  { %7982 = vmatpush2.bf16.msra.mxu1 %v14661_v35  ;;  %v14710_v35 = vld [vmem:[#allocation29 + $0x10] sm:$0xff]  }
 0xc1a   :  { %8023 = vmatpush2.bf16.msra.mxu0 %v14664_v36  ;;  %7983 = vmatprep.subr.bf16.mxu1 %v14669_v8  ;;  %v14713_v36 = vld [vmem:[#allocation29 + $0x48] sm:$0xff]  }
 0xc1b   :  { %8024 = vmatprep.subr.bf16.mxu0 %v14672_v49  ;;  %v14714_v8 = vld [vmem:[#allocation29 + $0x8] sm:$0xff]  }
 0xc1d   :  { %7984 = vmatpush2.bf16.msra.mxu1 %v14667_v38 }
 0xc1e   :  { %8025 = vmatpush2.bf16.msra.mxu0 %v14670_v39  ;;  %7985 = vmatprep.subr.bf16.mxu1 %v14675_v40  ;;  %v8058_v40 = vrot.slane %v16359_v23, %v16113_v1 }
 0xc1f   :  { %8026 = vmatprep.subr.bf16.mxu0 %v14678_v45 }
 0xc21   :  { %7986 = vmatpush2.bf16.msra.mxu1 %v14673_v47 }
 0xc22   :  { %8027 = vmatpush2.bf16.msra.mxu0 %v14676_v4  ;;  %7987 = vmatprep.subr.bf16.mxu1 %v14681_v42 }
 0xc23   :  { %8028 = vmatprep.subr.bf16.mxu0 %v14684_v51  ;;  %v8062_v51 = vrot.slane %v16359_v23, %v16111_v61 }
 0xc25   :  { %7988 = vmatpush2.bf16.msra.mxu1 %v14679_v52 }
 0xc26   :  { %8029 = vmatpush2.bf16.msra.mxu0 %v14682_v55  ;;  %7989 = vmatprep.subr.bf16.mxu1 %v14687_v44 }
 0xc27   :  { %8030 = vmatprep.subr.bf16.mxu0 %v14690_v22 }
 0xc29   :  { %7990 = vmatpush2.bf16.msra.mxu1 %v14685_v13 }
 0xc2a   :  { %8031 = vmatpush2.bf16.msra.mxu0 %v14688_v7 }
 0xc2c   :  { %7992 = vmatmul.mubr.bf16.vlgmr.msra.gmra.mxu1 %v16349_v17  ;;  %v8054_v17 = vrot.slane %v16359_v23, %v16109_v60  ;;  %v14696_v23 = vld [vmem:[#allocation29 + $0xb8] sm:$0xff]  }
 0xc2d   :  { %8033 = vmatmul.mubr.bf16.vlgmr.msra.gmra.mxu0 %v16351_v37  ;;  %8129 = vmatprep.mubr.bf16.mxu1 %v15816_v9 }
 0xc2e   :  { %8170 = vmatprep.mubr.bf16.mxu0 %v15816_v9 }
 0xcac   :  { %v7911_v20 = vpop.f32.mrf.mxu1 }
 0xcad   :  { %v7952_v21 = vpop.f32.mrf.mxu0 }
 0xcae   :  { %v7953_v59 = vadd.f32 %v7952_v21, %v7911_v20  ;;  %v7913_v2 = vpop.f32.mrf.mxu1 }
 0xcaf   :  { %v7954_v10 = vpop.f32.mrf.mxu0 }
 0xcb0   :  { %v8041_v14 = vadd.f32 %v7953_v59, %v16340_v15  ;;  %v7955_v62 = vadd.f32 %v7954_v10, %v7913_v2  ;;  %v7915_v37 = vpop.f32.mrf.mxu1 }
 0xcb1   :  { %v7956_v25 = vpop.f32.mrf.mxu0  ;;  %v14718_v37 = vld [vmem:[#allocation29] sm:$0xff]  }
 0xcb2   :  { %v8067_v18 = vadd.f32 %v8050_v63, %v8041_v14  ;;  %v8042_v27 = vadd.f32 %v7955_v62, %v16343_v19  ;;  %v7916_v56 = vpop.f32.mrf.mxu1  ;;  %v14692_v19 = vld [vmem:[#allocation29 + $0x38] sm:$0xff]   ;;  %v14700_v14 = vld [vmem:[#allocation29 + $0xb0] sm:$0xff]   ;;  %v14703_v62 = vld [vmem:[#allocation29 + $0xe8] sm:$0xff]  }
 0xcb3   :  { %v7957_v24 = vpop.f32.mrf.mxu0  ;;  %v14704_v25 = vld [vmem:[#allocation29 + $0xa8] sm:$0xff]   ;;  %v14711_v56 = vld [vmem:[#allocation29 + $0xd8] sm:$0xff]  }
 0xcb4   :  { %v8071_v50 = vmax.f32 %v8067_v18, 0.0  ;;  %v8068_v57 = vadd.f32 %v8054_v17, %v8042_v27  ;;  %v14717_v17 = vld [vmem:[#allocation29 + $0x40] sm:$0xff]   ;;  %v14712_v24 = vld [vmem:[#allocation29 + $0x98] sm:$0xff]  }
 0xcb5   :  { %v14707_v18 = vld [vmem:[#allocation29 + $0xe0] sm:$0xff]  }
 0xcb6   :  { %v8072_v26 = vmax.f32 %v8068_v57, 0.0  ;;  %v8075_v53 = vpack.c.bf16 %v8071_v50, %v8071_v50  ;;  %v14708_v27 = vld [vmem:[#allocation29 + $0xa0] sm:$0xff]   ;;  %v14715_v50 = vld [vmem:[#allocation29 + $0xd0] sm:$0xff]  }
 0xcb7   :  { %v14716_v57 = vld [vmem:[#allocation29 + $0x90] sm:$0xff]  }
 0xcb8   :  { %v16367_v54 = vpack.c.bf16 %v8072_v26, %v8072_v26  ;;  %v16372_v15 = vsel %vm8084_vm5, %v8075_v53, 0  ;;  %v14719_v26 = vld [vmem:[#allocation29 + $0xc8] sm:$0xff]  }
 0xcb9   :  { %v14720_v53 = vld [vmem:[#allocation29 + $0x88] sm:$0xff]  }
 0xcba   :  { %12677 = vmatprep.subr.msk.bf16.mxu1 %vm8084_vm5, %v16367_v54 }
 0xcbb   :  { %8112 = vmatpush1.bf16.msra.mxu1 %v16372_v15 }
 0xcbc   :  { %13184 = vmatprep.subr.bf16.mxu1 %v14691_v11  ;;  %v14721_v11 = vld [vmem:[#allocation29 + $0xc0] sm:$0xff]  }
 0xcbe   :  { %12678 = vmatmul.mubr.msk.bf16.vlgmr.msra.gmra.mxu1 %vm8080_vm6, %v8079_v5 }
 0xcbf   :  { %13185 = vmatpush3.bf16.msra.mxu1 %v14692_v19 }
 0xcc0   :  { %13186 = vmatprep.subr.bf16.mxu1 %v14693_v29 }
 0xcc3   :  { %13187 = vmatpush3.bf16.msra.mxu1 %v14694_v12 }
 0xcc4   :  { %13188 = vmatprep.subr.bf16.mxu1 %v14697_v30 }
 0xcc7   :  { %13189 = vmatpush3.bf16.msra.mxu1 %v14698_v31 }
 0xcc8   :  { %13190 = vmatprep.subr.bf16.mxu1 %v14701_v48 }
 0xccb   :  { %13191 = vmatpush3.bf16.msra.mxu1 %v14702_v16 }
 0xccc   :  { %13192 = vmatprep.subr.bf16.mxu1 %v14705_v41 }
 0xccf   :  { %13193 = vmatpush3.bf16.msra.mxu1 %v14706_v46 }
 0xcd0   :  { %13194 = vmatprep.subr.bf16.mxu1 %v14709_v33 }
 0xcd3   :  { %13195 = vmatpush3.bf16.msra.mxu1 %v14710_v35 }
 0xcd4   :  { %13196 = vmatprep.subr.bf16.mxu1 %v14713_v36 }
 0xcd7   :  { %13197 = vmatpush3.bf16.msra.mxu1 %v14714_v8 }
 0xcd8   :  { %13198 = vmatprep.subr.bf16.mxu1 %v14717_v17 }
 0xcdb   :  { %13199 = vmatpush3.bf16.msra.mxu1 %v14718_v37 }
 0xcec   :  { %v7993_v49 = vpop.f32.mrf.mxu1 }
 0xced   :  { %v8034_v38 = vpop.f32.mrf.mxu0 }
 0xcee   :  { %v8035_v39 = vadd.f32 %v8034_v38, %v7993_v49  ;;  %v7995_v45 = vpop.f32.mrf.mxu1 }
 0xcef   :  { %v8036_v47 = vpop.f32.mrf.mxu0 }
 0xcf0   :  { %v8043_v4 = vadd.f32 %v8035_v39, %v16345_v43  ;;  %v8037_v42 = vadd.f32 %v8036_v47, %v7995_v45  ;;  %v7997_v52 = vpop.f32.mrf.mxu1  ;;  %v14695_v43 = vld [vmem:[#allocation29 + $0xf8] sm:$0xff]   ;;  %v12681_v45 = vld [vmem:[#allocation31] ss:$0 sm:$0xff] }
 0xcf1   :  { %v8038_v55 = vpop.f32.mrf.mxu0 }
 0xcf2   :  { %v8069_v44 = vadd.f32 %v8058_v40, %v8043_v4  ;;  %v8044_v22 = vadd.f32 %v8037_v42, %v16347_v28  ;;  %v7998_v13 = vpop.f32.mrf.mxu1  ;;  %v14699_v28 = vld [vmem:[#allocation29 + $0xf0] sm:$0xff]  }
 0xcf3   :  { %v8039_v7 = vpop.f32.mrf.mxu0 }
 0xcf4   :  { %v8073_v20 = vmax.f32 %v8069_v44, 0.0  ;;  %v8070_v21 = vadd.f32 %v8062_v51, %v8044_v22 }
 0xcf6   :  { %v8074_v59 = vmax.f32 %v8070_v21, 0.0  ;;  %v8077_v63 = vpack.c.bf16 %v8073_v20, %v8073_v20 }
 0xcf8   :  { %v16382_v2 = vpack.c.bf16 %v8074_v59, %v8074_v59  ;;  %v16385_v10 = vsel %vm8084_vm5, %v8077_v63, 0 }
 0xcfa   :  { %12679 = vmatprep.subr.msk.bf16.mxu0 %vm8084_vm5, %v16382_v2 }
 0xcfb   :  { %8153 = vmatpush1.bf16.msra.mxu0 %v16385_v10 }
 0xcfc   :  { %13206 = vmatprep.subr.bf16.mxu0 %v14695_v43 }
 0xcfe   :  { %12680 = vmatmul.mubr.msk.bf16.vlgmr.msra.gmra.mxu0 %vm8080_vm6, %v8079_v5  ;;  %v14722_v5 = vld [vmem:[#allocation29 + $0x80] sm:$0xff]  }
 0xcff   :  { %13207 = vmatpush3.bf16.msra.mxu0 %v14696_v23 }
 0xd00   :  { %13208 = vmatprep.subr.bf16.mxu0 %v14699_v28 }
 0xd03   :  { %13209 = vmatpush3.bf16.msra.mxu0 %v14700_v14 }
 0xd04   :  { %13210 = vmatprep.subr.bf16.mxu0 %v14703_v62 }
 0xd07   :  { %13211 = vmatpush3.bf16.msra.mxu0 %v14704_v25 }
 0xd08   :  { %13212 = vmatprep.subr.bf16.mxu0 %v14707_v18 }
 0xd0b   :  { %13213 = vmatpush3.bf16.msra.mxu0 %v14708_v27 }
 0xd0c   :  { %13214 = vmatprep.subr.bf16.mxu0 %v14711_v56 }
 0xd0f   :  { %13215 = vmatpush3.bf16.msra.mxu0 %v14712_v24 }
 0xd10   :  { %13216 = vmatprep.subr.bf16.mxu0 %v14715_v50 }
 0xd13   :  { %13217 = vmatpush3.bf16.msra.mxu0 %v14716_v57 }
 0xd14   :  { %13218 = vmatprep.subr.bf16.mxu0 %v14719_v26 }
 0xd17   :  { %13219 = vmatpush3.bf16.msra.mxu0 %v14720_v53 }
 0xd18   :  { %13220 = vmatprep.subr.bf16.mxu0 %v14721_v11 }
 0xd1b   :  { %13221 = vmatpush3.bf16.msra.mxu0 %v14722_v5 }
 0xd7e   :  { %v8131_v19 = vpop.f32.mrf.mxu1 }
 0xd7f   :  { %v8179_v29 = vpack.c.bf16 %v8131_v19, %v8131_v19 }
 0xd80   :  { %v8133_v12 = vpop.f32.mrf.mxu1 }
 0xd81   :  { %v8180_v30 = vpack.c.bf16 %v8133_v12, %v8133_v12 }
 0xd82   :  { %v8135_v31 = vpop.f32.mrf.mxu1 }
 0xd83   :  { %8478 = vmatprep.mubr.bf16.mxu1 %v8180_v30 }
 0xd84   :  { %8479 = vmatmul.mubr.bf16.vlgmr.msra.gmra.mxu1 %v8179_v29  ;;  %v8136_v48 = vpop.f32.mrf.mxu1 }
 0xdbe   :  { %v8172_v16 = vpop.f32.mrf.mxu0 }
 0xdbf   :  { %v8181_v33 = vpack.c.bf16 %v8172_v16, %v8172_v16 }
 0xdc0   :  { %v8174_v41 = vpop.f32.mrf.mxu0 }
 0xdc1   :  { %v8182_v46 = vpack.c.bf16 %v8174_v41, %v8174_v41 }
 0xdc2   :  { %v8176_v35 = vpop.f32.mrf.mxu0 }
 0xdc3   :  { %8518 = vmatprep.mubr.bf16.mxu0 %v8182_v46 }
 0xdc4   :  { %v8177_v36 = vpop.f32.mrf.mxu0  ;;  %8519 = vmatmul.mubr.bf16.vlgmr.msra.gmra.mxu0 %v8181_v33 }
 0xe44   :  { %v13200_v8 = vpop.f32.mrf.mxu1 }
 0xe46   :  { %v13201_v49 = vpop.f32.mrf.mxu1 }
 0xe47   :  { %v13202_v40 = vadd.f32 %v13201_v49, %v13200_v8 }
 0xe48   :  { %v13203_v38 = vpop.f32.mrf.mxu1 }
 0xe49   :  { %v8481_v42 = vadd.f32 %v13202_v40, %v12681_v45 }
 0xe4a   :  { %v13204_v39 = vpop.f32.mrf.mxu1 }
 0xe84   :  { %v13222_v47 = vpop.f32.mrf.mxu0 }
 0xe86   :  { %v13223_v4 = vpop.f32.mrf.mxu0 }
 0xe87   :  { %v13224_v51 = vadd.f32 %v13223_v4, %v13222_v47 }
 0xe88   :  { %v13225_v52 = vpop.f32.mrf.mxu0 }
 0xe89   :  { %v16391_v55 = vadd.f32 %v13224_v51, %v8481_v42 }
 0xe8a   :  { %v13226_v44 = vpop.f32.mrf.mxu0 }
 0xe8b   :  { %v8526_v22 = vmax.f32 %v16391_v55, 0.0 }
 0xe8c   :  { %15779 = dma.done.wait [#allocation4 + $0x1], 32768 }
 0xe8d   :  { %15780 = vsyncadd [#allocation4 + $0x1], 4294934528  ;;  %12714 = vmatprep.subr.msk.bf16.mxu1 %vm8084_vm5, %v16367_v54  ;;  %12716 = vmatprep.subr.msk.bf16.mxu0 %vm8084_vm5, %v16382_v2  ;;  %v8532_v13 = vld [vmem:[#allocation32] sm:$0x1]  ;;  %v14725_v7 = vld [vmem:[#allocation3 + $0x4e4] ss:$16 sps:$4 sm:$0xff]  }
 0xe8e   :  { %8551 = vmatpush1.bf16.msra.mxu1 %v16372_v15  ;;  %8592 = vmatpush1.bf16.msra.mxu0 %v16385_v10  ;;  %v14728_v20 = vld [vmem:[#allocation3 + $0x6e4] ss:$16 sps:$4 sm:$0xff]   ;;  %v8751_v21 = vld [vmem:[#allocation32 + $0x1] sm:$0x1]  ;;  %v15203_v32 = vld [vmem:[%s16644_s26 + $0x138] sm:$0xff]   ;;  %vm11751_vm7 = vcmask 123904  }
 0xe8f   :  { %8568 = vmatprep.mubr.bf16.mxu1 %v15816_v9  ;;  %8609 = vmatprep.mubr.bf16.mxu0 %v15816_v9  ;;  %v14726_v59 = vld [vmem:[#allocation3 + $0x6e0] ss:$16 sps:$4 sm:$0xff]   ;;  %v14731_v63 = vld [vmem:[#allocation3 + $0x4c4] ss:$16 sps:$4 sm:$0xff]  }
 0xe90   :  { %12718 = vmatprep.subr.msk.bf16.mxu1 %vm8084_vm5, %v16367_v54  ;;  %12720 = vmatprep.subr.msk.bf16.mxu0 %vm8084_vm5, %v16382_v2  ;;  %v14723_v54 = vld [vmem:[#allocation3 + $0x4e0] ss:$16 sps:$4 sm:$0xff]   ;;  %v14734_v2 = vld [vmem:[#allocation3 + $0x6c4] ss:$16 sps:$4 sm:$0xff]  }
 0xe91   :  { %12715 = vmatmul.mubr.msk.bf16.vlgmr.msra.gmra.mxu1 %vm8080_vm6, %v8532_v13  ;;  %12717 = vmatmul.mubr.msk.bf16.vlgmr.msra.gmra.mxu0 %vm8080_vm6, %v8532_v13  ;;  %v14729_v43 = vld [vmem:[#allocation3 + $0x4c0] ss:$16 sps:$4 sm:$0xff]   ;;  %v14743_v14 = vld [vmem:[#allocation3 + $0x484] ss:$16 sps:$4 sm:$0xff]  }
 0xe92   :  { %8770 = vmatpush1.bf16.msra.mxu1 %v16372_v15  ;;  %8811 = vmatpush1.bf16.msra.mxu0 %v16385_v10  ;;  %v14732_v15 = vld [vmem:[#allocation3 + $0x6c0] ss:$16 sps:$4 sm:$0xff]   ;;  %v14737_v10 = vld [vmem:[#allocation3 + $0x4a4] ss:$16 sps:$4 sm:$0xff]  }
 0xe93   :  { %8787 = vmatprep.mubr.bf16.mxu1 %v15816_v9  ;;  %8828 = vmatprep.mubr.bf16.mxu0 %v15816_v9  ;;  %v14740_v9 = vld [vmem:[#allocation3 + $0x6a4] ss:$16 sps:$4 sm:$0xff]   ;;  %v14735_v23 = vld [vmem:[#allocation3 + $0x4a0] ss:$16 sps:$4 sm:$0xff]  }
 0xe94   :  { %9610 = vmatprep.subr.bf16.mxu1 %v14725_v7  ;;  %9651 = vmatprep.subr.bf16.mxu0 %v14728_v20  ;;  %v14738_v28 = vld [vmem:[#allocation3 + $0x6a0] ss:$16 sps:$4 sm:$0xff]   ;;  %v14746_v62 = vld [vmem:[#allocation3 + $0x684] ss:$16 sps:$4 sm:$0xff]  }
 0xe95   :  { %v14741_v17 = vld [vmem:[#allocation3 + $0x480] ss:$16 sps:$4 sm:$0xff]   ;;  %v14749_v25 = vld [vmem:[#allocation3 + $0x464] ss:$16 sps:$4 sm:$0xff]  }
 0xe96   :  { %v14744_v37 = vld [vmem:[#allocation3 + $0x680] ss:$16 sps:$4 sm:$0xff]   ;;  %v14752_v18 = vld [vmem:[#allocation3 + $0x664] ss:$16 sps:$4 sm:$0xff]  }
 0xe97   :  { %v14747_v27 = vld [vmem:[#allocation3 + $0x460] ss:$16 sps:$4 sm:$0xff]   ;;  %v14755_v24 = vld [vmem:[#allocation3 + $0x444] ss:$16 sps:$4 sm:$0xff]  }
 0xe98   :  { %v14750_v56 = vld [vmem:[#allocation3 + $0x660] ss:$16 sps:$4 sm:$0xff]   ;;  %v14758_v50 = vld [vmem:[#allocation3 + $0x644] ss:$16 sps:$4 sm:$0xff]  }
 0xe99   :  { %12719 = vmatmul.mubr.msk.bf16.vlgmr.msra.gmra.mxu1 %vm8080_vm6, %v8751_v21  ;;  %12721 = vmatmul.mubr.msk.bf16.vlgmr.msra.gmra.mxu0 %vm8080_vm6, %v8751_v21  ;;  %v14753_v57 = vld [vmem:[#allocation3 + $0x440] ss:$16 sps:$4 sm:$0xff]   ;;  %v14761_v53 = vld [vmem:[#allocation3 + $0x424] ss:$16 sps:$4 sm:$0xff]  }
 0xe9a   :  { %9611 = vmatpush1.bf16.msra.mxu1 %v14723_v54  ;;  %9652 = vmatpush1.bf16.msra.mxu0 %v14726_v59  ;;  %v14756_v26 = vld [vmem:[#allocation3 + $0x640] ss:$16 sps:$4 sm:$0xff]   ;;  %v14764_v11 = vld [vmem:[#allocation3 + $0x624] ss:$16 sps:$4 sm:$0xff]  }
 0xe9b   :  { %9612 = vmatprep.subr.bf16.mxu1 %v14731_v63  ;;  %9653 = vmatprep.subr.bf16.mxu0 %v14734_v2  ;;  %v14759_v5 = vld [vmem:[#allocation3 + $0x420] ss:$16 sps:$4 sm:$0xff]   ;;  %v14767_v29 = vld [vmem:[#allocation3 + $0x404] ss:$16 sps:$4 sm:$0xff]  }
 0xe9c   :  { %v14762_v19 = vld [vmem:[#allocation3 + $0x620] ss:$16 sps:$4 sm:$0xff]   ;;  %v14770_v12 = vld [vmem:[#allocation3 + $0x604] ss:$16 sps:$4 sm:$0xff]  }
 0xe9d   :  { %v14765_v30 = vld [vmem:[#allocation3 + $0x400] ss:$16 sps:$4 sm:$0xff]   ;;  %v14773_v48 = vld [vmem:[#allocation3 + $0x5e4] ss:$16 sps:$4 sm:$0xff]  }
 0xe9e   :  { %9613 = vmatpush1.bf16.msra.mxu1 %v14729_v43  ;;  %9654 = vmatpush1.bf16.msra.mxu0 %v14732_v15  ;;  %v14768_v31 = vld [vmem:[#allocation3 + $0x600] ss:$16 sps:$4 sm:$0xff]   ;;  %v14776_v16 = vld [vmem:[#allocation3 + $0x7e4] ss:$16 sps:$4 sm:$0xff]  }
 0xe9f   :  { %9614 = vmatprep.subr.bf16.mxu1 %v14737_v10  ;;  %9655 = vmatprep.subr.bf16.mxu0 %v14740_v9  ;;  %v14771_v41 = vld [vmem:[#allocation3 + $0x5e0] ss:$16 sps:$4 sm:$0xff]   ;;  %v14779_v33 = vld [vmem:[#allocation3 + $0x5c4] ss:$16 sps:$4 sm:$0xff]  }
 0xea0   :  { %v14774_v46 = vld [vmem:[#allocation3 + $0x7e0] ss:$16 sps:$4 sm:$0xff]   ;;  %v14782_v35 = vld [vmem:[#allocation3 + $0x7c4] ss:$16 sps:$4 sm:$0xff]  }
 0xea1   :  { %v14777_v36 = vld [vmem:[#allocation3 + $0x5c0] ss:$16 sps:$4 sm:$0xff]   ;;  %v14785_v49 = vld [vmem:[#allocation3 + $0x5a4] ss:$16 sps:$4 sm:$0xff]  }
 0xea2   :  { %9615 = vmatpush1.bf16.msra.mxu1 %v14735_v23  ;;  %9656 = vmatpush1.bf16.msra.mxu0 %v14738_v28  ;;  %v14780_v8 = vld [vmem:[#allocation3 + $0x7c0] ss:$16 sps:$4 sm:$0xff]   ;;  %v14788_v38 = vld [vmem:[#allocation3 + $0x7a4] ss:$16 sps:$4 sm:$0xff]   ;;  %v14821_v28 = vld [vmem:[#allocation3 + $0x4ec] ss:$16 sps:$4 sm:$0xff]  }
 0xea3   :  { %9616 = vmatprep.subr.bf16.mxu1 %v14743_v14  ;;  %9657 = vmatprep.subr.bf16.mxu0 %v14746_v62  ;;  %v14783_v39 = vld [vmem:[#allocation3 + $0x5a0] ss:$16 sps:$4 sm:$0xff]   ;;  %v14791_v45 = vld [vmem:[#allocation3 + $0x584] ss:$16 sps:$4 sm:$0xff]   ;;  %v14824_v14 = vld [vmem:[#allocation3 + $0x6ec] ss:$16 sps:$4 sm:$0xff]  }
 0xea4   :  { %v14786_v40 = vld [vmem:[#allocation3 + $0x7a0] ss:$16 sps:$4 sm:$0xff]   ;;  %v14794_v47 = vld [vmem:[#allocation3 + $0x784] ss:$16 sps:$4 sm:$0xff]  }
 0xea5   :  { %v14789_v4 = vld [vmem:[#allocation3 + $0x580] ss:$16 sps:$4 sm:$0xff]   ;;  %v14797_v51 = vld [vmem:[#allocation3 + $0x564] ss:$16 sps:$4 sm:$0xff]  }
 0xea6   :  { %9617 = vmatpush1.bf16.msra.mxu1 %v14741_v17  ;;  %9658 = vmatpush1.bf16.msra.mxu0 %v14744_v37  ;;  %v14792_v42 = vld [vmem:[#allocation3 + $0x780] ss:$16 sps:$4 sm:$0xff]   ;;  %v14800_v52 = vld [vmem:[#allocation3 + $0x764] ss:$16 sps:$4 sm:$0xff]  }
 0xea7   :  { %9618 = vmatprep.subr.bf16.mxu1 %v14749_v25  ;;  %9659 = vmatprep.subr.bf16.mxu0 %v14752_v18  ;;  %v14795_v44 = vld [vmem:[#allocation3 + $0x560] ss:$16 sps:$4 sm:$0xff]   ;;  %v14803_v7 = vld [vmem:[#allocation3 + $0x544] ss:$16 sps:$4 sm:$0xff]  }
 0xea8   :  { %v14798_v13 = vld [vmem:[#allocation3 + $0x760] ss:$16 sps:$4 sm:$0xff]   ;;  %v14806_v20 = vld [vmem:[#allocation3 + $0x744] ss:$16 sps:$4 sm:$0xff]  }
 0xea9   :  { %v14801_v21 = vld [vmem:[#allocation3 + $0x540] ss:$16 sps:$4 sm:$0xff]   ;;  %v14809_v59 = vld [vmem:[#allocation3 + $0x524] ss:$16 sps:$4 sm:$0xff]  }
 0xeaa   :  { %9619 = vmatpush1.bf16.msra.mxu1 %v14747_v27  ;;  %9660 = vmatpush1.bf16.msra.mxu0 %v14750_v56  ;;  %v14804_v54 = vld [vmem:[#allocation3 + $0x740] ss:$16 sps:$4 sm:$0xff]   ;;  %v14812_v63 = vld [vmem:[#allocation3 + $0x724] ss:$16 sps:$4 sm:$0xff]  }
 0xeab   :  { %9620 = vmatprep.subr.bf16.mxu1 %v14755_v24  ;;  %9661 = vmatprep.subr.bf16.mxu0 %v14758_v50  ;;  %v14807_v2 = vld [vmem:[#allocation3 + $0x520] ss:$16 sps:$4 sm:$0xff]   ;;  %v14815_v15 = vld [vmem:[#allocation3 + $0x504] ss:$16 sps:$4 sm:$0xff]  }
 0xeac   :  { %v14810_v43 = vld [vmem:[#allocation3 + $0x720] ss:$16 sps:$4 sm:$0xff]   ;;  %v14818_v10 = vld [vmem:[#allocation3 + $0x704] ss:$16 sps:$4 sm:$0xff]  }
 0xead   :  { %v14813_v9 = vld [vmem:[#allocation3 + $0x500] ss:$16 sps:$4 sm:$0xff]  }
 0xeae   :  { %9621 = vmatpush1.bf16.msra.mxu1 %v14753_v57  ;;  %9662 = vmatpush1.bf16.msra.mxu0 %v14756_v26  ;;  %v14816_v23 = vld [vmem:[#allocation3 + $0x700] ss:$16 sps:$4 sm:$0xff]   ;;  %v14819_v26 = vld [vmem:[#allocation3 + $0x4e8] ss:$16 sps:$4 sm:$0xff]  }
 0xeaf   :  { %9622 = vmatprep.subr.bf16.mxu1 %v14761_v53  ;;  %9663 = vmatprep.subr.bf16.mxu0 %v14764_v11  ;;  %v14822_v53 = vld [vmem:[#allocation3 + $0x6e8] ss:$16 sps:$4 sm:$0xff]   ;;  %v15201_v3 = vld [vmem:[%s16644_s26 + $0xc0] sm:$0xff]  }
 0xeb2   :  { %9623 = vmatpush1.bf16.msra.mxu1 %v14759_v5  ;;  %9664 = vmatpush1.bf16.msra.mxu0 %v14762_v19 }
 0xeb3   :  { %9624 = vmatprep.subr.bf16.mxu1 %v14767_v29  ;;  %9665 = vmatprep.subr.bf16.mxu0 %v14770_v12 }
 0xeb6   :  { %9625 = vmatpush1.bf16.msra.mxu1 %v14765_v30  ;;  %9666 = vmatpush1.bf16.msra.mxu0 %v14768_v31  ;;  %v14827_v30 = vld [vmem:[#allocation3 + $0x4cc] ss:$16 sps:$4 sm:$0xff]  }
 0xeb7   :  { %9626 = vmatprep.subr.bf16.mxu1 %v14773_v48  ;;  %9667 = vmatprep.subr.bf16.mxu0 %v14776_v16 }
 0xeba   :  { %9627 = vmatpush2.bf16.msra.mxu1 %v14771_v41  ;;  %9668 = vmatpush2.bf16.msra.mxu0 %v14774_v46  ;;  %v14825_v41 = vld [vmem:[#allocation3 + $0x4c8] ss:$16 sps:$4 sm:$0xff]  }
 0xebb   :  { %9628 = vmatprep.subr.bf16.mxu1 %v14779_v33  ;;  %9669 = vmatprep.subr.bf16.mxu0 %v14782_v35  ;;  %v14828_v46 = vld [vmem:[#allocation3 + $0x6c8] ss:$16 sps:$4 sm:$0xff]   ;;  %v14830_v33 = vld [vmem:[#allocation3 + $0x6cc] ss:$16 sps:$4 sm:$0xff]  }
 0xebe   :  { %9629 = vmatpush2.bf16.msra.mxu1 %v14777_v36  ;;  %9670 = vmatpush2.bf16.msra.mxu0 %v14780_v8  ;;  %v14833_v8 = vld [vmem:[#allocation3 + $0x4ac] ss:$16 sps:$4 sm:$0xff]  }
 0xebf   :  { %9630 = vmatprep.subr.bf16.mxu1 %v14785_v49  ;;  %9671 = vmatprep.subr.bf16.mxu0 %v14788_v38  ;;  %v14836_v49 = vld [vmem:[#allocation3 + $0x6ac] ss:$16 sps:$4 sm:$0xff]   ;;  %v14831_v38 = vld [vmem:[#allocation3 + $0x4a8] ss:$16 sps:$4 sm:$0xff]  }
 0xec2   :  { %9631 = vmatpush2.bf16.msra.mxu1 %v14783_v39  ;;  %9672 = vmatpush2.bf16.msra.mxu0 %v14786_v40  ;;  %v14834_v39 = vld [vmem:[#allocation3 + $0x6a8] ss:$16 sps:$4 sm:$0xff]   ;;  %v14839_v40 = vld [vmem:[#allocation3 + $0x48c] ss:$16 sps:$4 sm:$0xff]  }
 0xec3   :  { %9632 = vmatprep.subr.bf16.mxu1 %v14791_v45  ;;  %9673 = vmatprep.subr.bf16.mxu0 %v14794_v47  ;;  %v14842_v45 = vld [vmem:[#allocation3 + $0x68c] ss:$16 sps:$4 sm:$0xff]   ;;  %v14837_v47 = vld [vmem:[#allocation3 + $0x488] ss:$16 sps:$4 sm:$0xff]  }
 0xec6   :  { %9633 = vmatpush2.bf16.msra.mxu1 %v14789_v4  ;;  %9674 = vmatpush2.bf16.msra.mxu0 %v14792_v42  ;;  %v14840_v4 = vld [vmem:[#allocation3 + $0x688] ss:$16 sps:$4 sm:$0xff]   ;;  %v14845_v42 = vld [vmem:[#allocation3 + $0x46c] ss:$16 sps:$4 sm:$0xff]  }
 0xec7   :  { %9634 = vmatprep.subr.bf16.mxu1 %v14797_v51  ;;  %9675 = vmatprep.subr.bf16.mxu0 %v14800_v52  ;;  %v14848_v51 = vld [vmem:[#allocation3 + $0x66c] ss:$16 sps:$4 sm:$0xff]   ;;  %v14843_v52 = vld [vmem:[#allocation3 + $0x468] ss:$16 sps:$4 sm:$0xff]  }
 0xeca   :  { %9635 = vmatpush2.bf16.msra.mxu1 %v14795_v44  ;;  %9676 = vmatpush2.bf16.msra.mxu0 %v14798_v13  ;;  %v14846_v44 = vld [vmem:[#allocation3 + $0x668] ss:$16 sps:$4 sm:$0xff]   ;;  %v14851_v13 = vld [vmem:[#allocation3 + $0x44c] ss:$16 sps:$4 sm:$0xff]  }
 0xecb   :  { %9636 = vmatprep.subr.bf16.mxu1 %v14803_v7  ;;  %9677 = vmatprep.subr.bf16.mxu0 %v14806_v20  ;;  %v14854_v7 = vld [vmem:[#allocation3 + $0x64c] ss:$16 sps:$4 sm:$0xff]   ;;  %v14849_v20 = vld [vmem:[#allocation3 + $0x448] ss:$16 sps:$4 sm:$0xff]  }
 0xece   :  { %9637 = vmatpush2.bf16.msra.mxu1 %v14801_v21  ;;  %9678 = vmatpush2.bf16.msra.mxu0 %v14804_v54  ;;  %v14852_v21 = vld [vmem:[#allocation3 + $0x648] ss:$16 sps:$4 sm:$0xff]   ;;  %v14857_v54 = vld [vmem:[#allocation3 + $0x42c] ss:$16 sps:$4 sm:$0xff]  }
 0xecf   :  { %9638 = vmatprep.subr.bf16.mxu1 %v14809_v59  ;;  %9679 = vmatprep.subr.bf16.mxu0 %v14812_v63  ;;  %v14860_v59 = vld [vmem:[#allocation3 + $0x62c] ss:$16 sps:$4 sm:$0xff]   ;;  %v14855_v63 = vld [vmem:[#allocation3 + $0x428] ss:$16 sps:$4 sm:$0xff]  }
 0xed2   :  { %9639 = vmatpush2.bf16.msra.mxu1 %v14807_v2  ;;  %9680 = vmatpush2.bf16.msra.mxu0 %v14810_v43  ;;  %v14858_v2 = vld [vmem:[#allocation3 + $0x628] ss:$16 sps:$4 sm:$0xff]   ;;  %v14863_v43 = vld [vmem:[#allocation3 + $0x40c] ss:$16 sps:$4 sm:$0xff]  }
 0xed3   :  { %9640 = vmatprep.subr.bf16.mxu1 %v14815_v15  ;;  %9681 = vmatprep.subr.bf16.mxu0 %v14818_v10  ;;  %v14866_v15 = vld [vmem:[#allocation3 + $0x60c] ss:$16 sps:$4 sm:$0xff]   ;;  %v14861_v10 = vld [vmem:[#allocation3 + $0x408] ss:$16 sps:$4 sm:$0xff]  }
 0xed6   :  { %9641 = vmatpush2.bf16.msra.mxu1 %v14813_v9  ;;  %9682 = vmatpush2.bf16.msra.mxu0 %v14816_v23  ;;  %v14864_v9 = vld [vmem:[#allocation3 + $0x608] ss:$16 sps:$4 sm:$0xff]   ;;  %v14869_v23 = vld [vmem:[#allocation3 + $0x5ec] ss:$16 sps:$4 sm:$0xff]  }
 0xed7   :  { %9692 = vmatprep.subr.bf16.mxu1 %v14821_v28  ;;  %9733 = vmatprep.subr.bf16.mxu0 %v14824_v14  ;;  %v14872_v28 = vld [vmem:[#allocation3 + $0x7ec] ss:$16 sps:$4 sm:$0xff]   ;;  %v14867_v14 = vld [vmem:[#allocation3 + $0x5e8] ss:$16 sps:$4 sm:$0xff]  }
 0xf51   :  { %v16414_v62 = vpop.f32.mrf.mxu1  ;;  %v16416_v17 = vpop.f32.mrf.mxu0 }
 0xf53   :  { %v16418_v37 = vpop.f32.mrf.mxu1  ;;  %v16420_v25 = vpop.f32.mrf.mxu0 }
 0xf55   :  { %v8574_v18 = vpop.f32.mrf.mxu1  ;;  %v8615_v27 = vpop.f32.mrf.mxu0 }
 0xf56   :  { %v14870_v18 = vld [vmem:[#allocation3 + $0x7e8] ss:$16 sps:$4 sm:$0xff]   ;;  %v14875_v27 = vld [vmem:[#allocation3 + $0x5cc] ss:$16 sps:$4 sm:$0xff]  }
 0xf57   :  { %v8575_v56 = vpop.f32.mrf.mxu1  ;;  %v8616_v24 = vpop.f32.mrf.mxu0 }
 0xf58   :  { %v14878_v56 = vld [vmem:[#allocation3 + $0x7cc] ss:$16 sps:$4 sm:$0xff]   ;;  %v14873_v24 = vld [vmem:[#allocation3 + $0x5c8] ss:$16 sps:$4 sm:$0xff]  }
 0xf59   :  { %v8789_v50 = vpop.f32.mrf.mxu1  ;;  %v8830_v57 = vpop.f32.mrf.mxu0 }
 0xf5a   :  { %v16422_v11 = vpack.c.bf16 %v8830_v57, %v8830_v57  ;;  %v16424_v31 = vpack.c.bf16 %v8789_v50, %v8789_v50  ;;  %v14876_v50 = vld [vmem:[#allocation3 + $0x7c8] ss:$16 sps:$4 sm:$0xff]   ;;  %v14881_v57 = vld [vmem:[#allocation3 + $0x5ac] ss:$16 sps:$4 sm:$0xff]  }
 0xf5b   :  { %v8791_v5 = vpop.f32.mrf.mxu1  ;;  %v8832_v19 = vpop.f32.mrf.mxu0 }
 0xf5c   :  { %v8838_v29 = vpack.c.bf16 %v8791_v5, %v8791_v5  ;;  %v8840_v12 = vpack.c.bf16 %v8832_v19, %v8832_v19  ;;  %v14882_v5 = vld [vmem:[#allocation3 + $0x7a8] ss:$16 sps:$4 sm:$0xff]   ;;  %v14887_v19 = vld [vmem:[#allocation3 + $0x58c] ss:$16 sps:$4 sm:$0xff]  }
 0xf5d   :  { %v8793_v48 = vpop.f32.mrf.mxu1  ;;  %v8834_v16 = vpop.f32.mrf.mxu0 }
 0xf5e   :  { %9642 = vmatprep.mubr.bf16.mxu1 %v8838_v29  ;;  %9683 = vmatprep.mubr.bf16.mxu0 %v8840_v12  ;;  %v14893_v48 = vld [vmem:[#allocation3 + $0x56c] ss:$16 sps:$4 sm:$0xff]  }
 0xf5f   :  { %v8794_v35 = vpop.f32.mrf.mxu1  ;;  %v8835_v36 = vpop.f32.mrf.mxu0  ;;  %9643 = vmatmul.mubr.bf16.vlgmr.msra.gmra.mxu1 %v16424_v31  ;;  %9684 = vmatmul.mubr.bf16.vlgmr.msra.gmra.mxu0 %v16422_v11  ;;  %v14896_v16 = vld [vmem:[#allocation3 + $0x76c] ss:$16 sps:$4 sm:$0xff]  }
 0xf60   :  { %9693 = vmatpush1.bf16.msra.mxu1 %v14819_v26  ;;  %9734 = vmatpush1.bf16.msra.mxu0 %v14822_v53  ;;  %v14884_v26 = vld [vmem:[#allocation3 + $0x7ac] ss:$16 sps:$4 sm:$0xff]   ;;  %v14879_v53 = vld [vmem:[#allocation3 + $0x5a8] ss:$16 sps:$4 sm:$0xff]  }
 0xf61   :  { %9724 = vmatprep.mubr.bf16.mxu1 %v8838_v29  ;;  %9765 = vmatprep.mubr.bf16.mxu0 %v8840_v12  ;;  %v14890_v29 = vld [vmem:[#allocation3 + $0x78c] ss:$16 sps:$4 sm:$0xff]   ;;  %v14885_v12 = vld [vmem:[#allocation3 + $0x588] ss:$16 sps:$4 sm:$0xff]  }
 0xf62   :  { %9694 = vmatprep.subr.bf16.mxu1 %v14827_v30  ;;  %9735 = vmatprep.subr.bf16.mxu0 %v14830_v33  ;;  %v14888_v30 = vld [vmem:[#allocation3 + $0x788] ss:$16 sps:$4 sm:$0xff]   ;;  %v14899_v33 = vld [vmem:[#allocation3 + $0x54c] ss:$16 sps:$4 sm:$0xff]  }
 0xf63   :  { %v14902_v35 = vld [vmem:[#allocation3 + $0x74c] ss:$16 sps:$4 sm:$0xff]   ;;  %v14897_v36 = vld [vmem:[#allocation3 + $0x548] ss:$16 sps:$4 sm:$0xff]  }
 0xf64   :  { %9695 = vmatpush1.bf16.msra.mxu1 %v14825_v41  ;;  %9736 = vmatpush1.bf16.msra.mxu0 %v14828_v46  ;;  %v14891_v41 = vld [vmem:[#allocation3 + $0x568] ss:$16 sps:$4 sm:$0xff]  }
 0xf65   :  { %9696 = vmatprep.subr.bf16.mxu1 %v14833_v8  ;;  %9737 = vmatprep.subr.bf16.mxu0 %v14836_v49  ;;  %v14894_v46 = vld [vmem:[#allocation3 + $0x768] ss:$16 sps:$4 sm:$0xff]   ;;  %v14905_v49 = vld [vmem:[#allocation3 + $0x52c] ss:$16 sps:$4 sm:$0xff]  }
 0xf66   :  { %v14900_v8 = vld [vmem:[#allocation3 + $0x748] ss:$16 sps:$4 sm:$0xff]  }
 0xf68   :  { %9697 = vmatpush1.bf16.msra.mxu1 %v14831_v38  ;;  %9738 = vmatpush1.bf16.msra.mxu0 %v14834_v39  ;;  %v14908_v38 = vld [vmem:[#allocation3 + $0x72c] ss:$16 sps:$4 sm:$0xff]   ;;  %v14903_v39 = vld [vmem:[#allocation3 + $0x528] ss:$16 sps:$4 sm:$0xff]  }
 0xf69   :  { %9698 = vmatprep.subr.bf16.mxu1 %v14839_v40  ;;  %9739 = vmatprep.subr.bf16.mxu0 %v14842_v45  ;;  %v14906_v40 = vld [vmem:[#allocation3 + $0x728] ss:$16 sps:$4 sm:$0xff]   ;;  %v14911_v45 = vld [vmem:[#allocation3 + $0x50c] ss:$16 sps:$4 sm:$0xff]  }
 0xf6c   :  { %9699 = vmatpush1.bf16.msra.mxu1 %v14837_v47  ;;  %9740 = vmatpush1.bf16.msra.mxu0 %v14840_v4  ;;  %v14914_v47 = vld [vmem:[#allocation3 + $0x70c] ss:$16 sps:$4 sm:$0xff]   ;;  %v14909_v4 = vld [vmem:[#allocation3 + $0x508] ss:$16 sps:$4 sm:$0xff]  }
 0xf6d   :  { %9700 = vmatprep.subr.bf16.mxu1 %v14845_v42  ;;  %9741 = vmatprep.subr.bf16.mxu0 %v14848_v51  ;;  %v14912_v42 = vld [vmem:[#allocation3 + $0x708] ss:$16 sps:$4 sm:$0xff]   ;;  %v14917_v51 = vld [vmem:[#allocation3 + $0xe4] ss:$16 sps:$4 sm:$0xff]  }
 0xf70   :  { %9701 = vmatpush1.bf16.msra.mxu1 %v14843_v52  ;;  %9742 = vmatpush1.bf16.msra.mxu0 %v14846_v44  ;;  %v14920_v52 = vld [vmem:[#allocation3 + $0x2e4] ss:$16 sps:$4 sm:$0xff]   ;;  %v14915_v44 = vld [vmem:[#allocation3 + $0xe0] ss:$16 sps:$4 sm:$0xff]  }
 0xf71   :  { %9702 = vmatprep.subr.bf16.mxu1 %v14851_v13  ;;  %9743 = vmatprep.subr.bf16.mxu0 %v14854_v7  ;;  %v14918_v13 = vld [vmem:[#allocation3 + $0x2e0] ss:$16 sps:$4 sm:$0xff]   ;;  %v16430_v7 = vpack.c.bf16 %v16418_v37, %v16418_v37  ;;  %v14929_v37 = vld [vmem:[#allocation3 + $0xa4] ss:$16 sps:$4 sm:$0xff]  }
 0xf74   :  { %9703 = vmatpush1.bf16.msra.mxu1 %v14849_v20  ;;  %9744 = vmatpush1.bf16.msra.mxu0 %v14852_v21  ;;  %v14923_v20 = vld [vmem:[#allocation3 + $0xc4] ss:$16 sps:$4 sm:$0xff]  }
 0xf75   :  { %9704 = vmatprep.subr.bf16.mxu1 %v14857_v54  ;;  %9745 = vmatprep.subr.bf16.mxu0 %v14860_v59  ;;  %v14926_v21 = vld [vmem:[#allocation3 + $0x2c4] ss:$16 sps:$4 sm:$0xff]   ;;  %v16434_v54 = vpack.c.bf16 %v16420_v25, %v16420_v25  ;;  %v14921_v59 = vld [vmem:[#allocation3 + $0xc0] ss:$16 sps:$4 sm:$0xff]  }
 0xf76   :  { %v14930_v25 = vld [vmem:[#allocation3 + $0x2a0] ss:$16 sps:$4 sm:$0xff]  }
 0xf78   :  { %9705 = vmatpush1.bf16.msra.mxu1 %v14855_v63  ;;  %9746 = vmatpush1.bf16.msra.mxu0 %v14858_v2  ;;  %v14924_v63 = vld [vmem:[#allocation3 + $0x2c0] ss:$16 sps:$4 sm:$0xff]   ;;  %v14932_v2 = vld [vmem:[#allocation3 + $0x2a4] ss:$16 sps:$4 sm:$0xff]  }
 0xf79   :  { %9706 = vmatprep.subr.bf16.mxu1 %v14863_v43  ;;  %9747 = vmatprep.subr.bf16.mxu0 %v14866_v15  ;;  %v14927_v43 = vld [vmem:[#allocation3 + $0xa0] ss:$16 sps:$4 sm:$0xff]  }
 0xf7a   :  { %v14933_v15 = vld [vmem:[#allocation3 + $0x80] ss:$16 sps:$4 sm:$0xff]  }
 0xf7c   :  { %9707 = vmatpush1.bf16.msra.mxu1 %v14861_v10  ;;  %9748 = vmatpush1.bf16.msra.mxu0 %v14864_v9  ;;  %v14936_v10 = vld [vmem:[#allocation3 + $0x280] ss:$16 sps:$4 sm:$0xff]   ;;  %v14941_v9 = vld [vmem:[#allocation3 + $0x64] ss:$16 sps:$4 sm:$0xff]  }
 0xf7d   :  { %9708 = vmatprep.subr.bf16.mxu1 %v14869_v23  ;;  %9749 = vmatprep.subr.bf16.mxu0 %v14872_v28  ;;  %v14944_v23 = vld [vmem:[#allocation3 + $0x264] ss:$16 sps:$4 sm:$0xff]   ;;  %v14939_v28 = vld [vmem:[#allocation3 + $0x60] ss:$16 sps:$4 sm:$0xff]  }
 0xf80   :  { %9709 = vmatpush2.bf16.msra.mxu1 %v14867_v14  ;;  %9750 = vmatpush2.bf16.msra.mxu0 %v14870_v18  ;;  %v14942_v14 = vld [vmem:[#allocation3 + $0x260] ss:$16 sps:$4 sm:$0xff]   ;;  %v14947_v18 = vld [vmem:[#allocation3 + $0x44] ss:$16 sps:$4 sm:$0xff]  }
 0xf81   :  { %9710 = vmatprep.subr.bf16.mxu1 %v14875_v27  ;;  %9751 = vmatprep.subr.bf16.mxu0 %v14878_v56  ;;  %v14950_v27 = vld [vmem:[#allocation3 + $0x244] ss:$16 sps:$4 sm:$0xff]   ;;  %v14945_v56 = vld [vmem:[#allocation3 + $0x40] ss:$16 sps:$4 sm:$0xff]  }
 0xf84   :  { %9711 = vmatpush2.bf16.msra.mxu1 %v14873_v24  ;;  %9752 = vmatpush2.bf16.msra.mxu0 %v14876_v50  ;;  %v14948_v24 = vld [vmem:[#allocation3 + $0x240] ss:$16 sps:$4 sm:$0xff]   ;;  %v14953_v50 = vld [vmem:[#allocation3 + $0x24] ss:$16 sps:$4 sm:$0xff]  }
 0xf85   :  { %9712 = vmatprep.subr.bf16.mxu1 %v14881_v57  ;;  %9753 = vmatprep.subr.bf16.mxu0 %v14884_v26  ;;  %v14956_v57 = vld [vmem:[#allocation3 + $0x224] ss:$16 sps:$4 sm:$0xff]   ;;  %v14951_v26 = vld [vmem:[#allocation3 + $0x20] ss:$16 sps:$4 sm:$0xff]  }
 0xf88   :  { %9713 = vmatpush2.bf16.msra.mxu1 %v14879_v53  ;;  %9754 = vmatpush2.bf16.msra.mxu0 %v14882_v5  ;;  %v14954_v53 = vld [vmem:[#allocation3 + $0x220] ss:$16 sps:$4 sm:$0xff]   ;;  %v14959_v5 = vld [vmem:[#allocation3 + $0x4] ss:$16 sps:$4 sm:$0xff]  }
 0xf89   :  { %9714 = vmatprep.subr.bf16.mxu1 %v14887_v19  ;;  %9755 = vmatprep.subr.bf16.mxu0 %v14890_v29  ;;  %v14962_v19 = vld [vmem:[#allocation3 + $0x204] ss:$16 sps:$4 sm:$0xff]   ;;  %v14957_v29 = vld [vmem:[#allocation3] ss:$16 sps:$4 sm:$0xff]  }
 0xf8c   :  { %9715 = vmatpush2.bf16.msra.mxu1 %v14885_v12  ;;  %9756 = vmatpush2.bf16.msra.mxu0 %v14888_v30  ;;  %v14960_v12 = vld [vmem:[#allocation3 + $0x200] ss:$16 sps:$4 sm:$0xff]   ;;  %v14965_v30 = vld [vmem:[#allocation3 + $0x1e4] ss:$16 sps:$4 sm:$0xff]  }
 0xf8d   :  { %9716 = vmatprep.subr.bf16.mxu1 %v14893_v48  ;;  %9757 = vmatprep.subr.bf16.mxu0 %v14896_v16  ;;  %v14968_v48 = vld [vmem:[#allocation3 + $0x3e4] ss:$16 sps:$4 sm:$0xff]   ;;  %v14963_v16 = vld [vmem:[#allocation3 + $0x1e0] ss:$16 sps:$4 sm:$0xff]  }
 0xf90   :  { %9717 = vmatpush2.bf16.msra.mxu1 %v14891_v41  ;;  %9758 = vmatpush2.bf16.msra.mxu0 %v14894_v46  ;;  %v14966_v41 = vld [vmem:[#allocation3 + $0x3e0] ss:$16 sps:$4 sm:$0xff]   ;;  %v14971_v46 = vld [vmem:[#allocation3 + $0x1c4] ss:$16 sps:$4 sm:$0xff]  }
 0xf91   :  { %9718 = vmatprep.subr.bf16.mxu1 %v14899_v33  ;;  %9759 = vmatprep.subr.bf16.mxu0 %v14902_v35  ;;  %v14974_v33 = vld [vmem:[#allocation3 + $0x3c4] ss:$16 sps:$4 sm:$0xff]   ;;  %v14969_v35 = vld [vmem:[#allocation3 + $0x1c0] ss:$16 sps:$4 sm:$0xff]  }
 0xf94   :  { %9719 = vmatpush2.bf16.msra.mxu1 %v14897_v36  ;;  %9760 = vmatpush2.bf16.msra.mxu0 %v14900_v8  ;;  %v14972_v36 = vld [vmem:[#allocation3 + $0x3c0] ss:$16 sps:$4 sm:$0xff]   ;;  %v14977_v8 = vld [vmem:[#allocation3 + $0x1a4] ss:$16 sps:$4 sm:$0xff]  }
 0xf95   :  { %9720 = vmatprep.subr.bf16.mxu1 %v14905_v49  ;;  %9761 = vmatprep.subr.bf16.mxu0 %v14908_v38  ;;  %v14980_v49 = vld [vmem:[#allocation3 + $0x3a4] ss:$16 sps:$4 sm:$0xff]   ;;  %v14975_v38 = vld [vmem:[#allocation3 + $0x1a0] ss:$16 sps:$4 sm:$0xff]  }
 0xf98   :  { %9721 = vmatpush2.bf16.msra.mxu1 %v14903_v39  ;;  %9762 = vmatpush2.bf16.msra.mxu0 %v14906_v40  ;;  %v14978_v39 = vld [vmem:[#allocation3 + $0x3a0] ss:$16 sps:$4 sm:$0xff]   ;;  %v14983_v40 = vld [vmem:[#allocation3 + $0x184] ss:$16 sps:$4 sm:$0xff]  }
 0xf99   :  { %9722 = vmatprep.subr.bf16.mxu1 %v14911_v45  ;;  %9763 = vmatprep.subr.bf16.mxu0 %v14914_v47  ;;  %v14986_v45 = vld [vmem:[#allocation3 + $0x384] ss:$16 sps:$4 sm:$0xff]   ;;  %v14981_v47 = vld [vmem:[#allocation3 + $0x180] ss:$16 sps:$4 sm:$0xff]  }
 0xf9c   :  { %9723 = vmatpush2.bf16.msra.mxu1 %v14909_v4  ;;  %9764 = vmatpush2.bf16.msra.mxu0 %v14912_v42  ;;  %v14984_v4 = vld [vmem:[#allocation3 + $0x380] ss:$16 sps:$4 sm:$0xff]   ;;  %v14989_v42 = vld [vmem:[#allocation3 + $0x164] ss:$16 sps:$4 sm:$0xff]  }
 0xf9d   :  { %10414 = vmatprep.subr.bf16.mxu1 %v14917_v51  ;;  %10455 = vmatprep.subr.bf16.mxu0 %v14920_v52  ;;  %v14992_v51 = vld [vmem:[#allocation3 + $0x364] ss:$16 sps:$4 sm:$0xff]   ;;  %v14987_v52 = vld [vmem:[#allocation3 + $0x160] ss:$16 sps:$4 sm:$0xff]  }
 0xf9f   :  { %9725 = vmatmul.mubr.bf16.vlgmr.msra.gmra.mxu1 %v16424_v31  ;;  %9766 = vmatmul.mubr.bf16.vlgmr.msra.gmra.mxu0 %v16422_v11  ;;  %v14935_v31 = vld [vmem:[#allocation3 + $0x84] ss:$16 sps:$4 sm:$0xff]  }
 0xfa0   :  { %10415 = vmatpush1.bf16.msra.mxu1 %v14915_v44  ;;  %10446 = vmatprep.mubr.bf16.mxu1 %v16430_v7  ;;  %v14938_v11 = vld [vmem:[#allocation3 + $0x284] ss:$16 sps:$4 sm:$0xff]   ;;  %v14990_v44 = vld [vmem:[#allocation3 + $0x360] ss:$16 sps:$4 sm:$0xff]  }
 0xfa1   :  { %10456 = vmatpush1.bf16.msra.mxu0 %v14918_v13  ;;  %10487 = vmatprep.mubr.bf16.mxu0 %v16434_v54  ;;  %v14995_v13 = vld [vmem:[#allocation3 + $0x144] ss:$16 sps:$4 sm:$0xff]  }
 0xfa2   :  { %10416 = vmatprep.subr.bf16.mxu1 %v14923_v20  ;;  %10457 = vmatprep.subr.bf16.mxu0 %v14926_v21  ;;  %v14998_v20 = vld [vmem:[#allocation3 + $0x344] ss:$16 sps:$4 sm:$0xff]   ;;  %v14993_v21 = vld [vmem:[#allocation3 + $0x140] ss:$16 sps:$4 sm:$0xff]  }
 0xfa4   :  { %10417 = vmatpush1.bf16.msra.mxu1 %v14921_v59  ;;  %v14996_v59 = vld [vmem:[#allocation3 + $0x340] ss:$16 sps:$4 sm:$0xff]  }
 0xfa5   :  { %10458 = vmatpush1.bf16.msra.mxu0 %v14924_v63  ;;  %10418 = vmatprep.subr.bf16.mxu1 %v14929_v37  ;;  %v15001_v63 = vld [vmem:[#allocation3 + $0x124] ss:$16 sps:$4 sm:$0xff]  }
 0xfa6   :  { %10459 = vmatprep.subr.bf16.mxu0 %v14932_v2  ;;  %v15004_v37 = vld [vmem:[#allocation3 + $0x324] ss:$16 sps:$4 sm:$0xff]   ;;  %v14999_v2 = vld [vmem:[#allocation3 + $0x120] ss:$16 sps:$4 sm:$0xff]  }
 0xfa8   :  { %10419 = vmatpush1.bf16.msra.mxu1 %v14927_v43  ;;  %v15002_v43 = vld [vmem:[#allocation3 + $0x320] ss:$16 sps:$4 sm:$0xff]  }
 0xfa9   :  { %10460 = vmatpush1.bf16.msra.mxu0 %v14930_v25  ;;  %10420 = vmatprep.subr.bf16.mxu1 %v14935_v31  ;;  %v15007_v25 = vld [vmem:[#allocation3 + $0x104] ss:$16 sps:$4 sm:$0xff]  }
 0xfaa   :  { %10461 = vmatprep.subr.bf16.mxu0 %v14938_v11  ;;  %v15010_v31 = vld [vmem:[#allocation3 + $0x304] ss:$16 sps:$4 sm:$0xff]   ;;  %v15005_v11 = vld [vmem:[#allocation3 + $0x100] ss:$16 sps:$4 sm:$0xff]  }
 0xfac   :  { %10421 = vmatpush1.bf16.msra.mxu1 %v14933_v15  ;;  %v15008_v15 = vld [vmem:[#allocation3 + $0x300] ss:$16 sps:$4 sm:$0xff]  }
 0xfad   :  { %10462 = vmatpush1.bf16.msra.mxu0 %v14936_v10  ;;  %10422 = vmatprep.subr.bf16.mxu1 %v14941_v9  ;;  %v15013_v10 = vld [vmem:[#allocation3 + $0xec] ss:$16 sps:$4 sm:$0xff]  }
 0xfae   :  { %10463 = vmatprep.subr.bf16.mxu0 %v14944_v23  ;;  %v15016_v9 = vld [vmem:[#allocation3 + $0x2ec] ss:$16 sps:$4 sm:$0xff]   ;;  %v15011_v23 = vld [vmem:[#allocation3 + $0xe8] ss:$16 sps:$4 sm:$0xff]  }
 0xfb0   :  { %10423 = vmatpush1.bf16.msra.mxu1 %v14939_v28  ;;  %v16442_v28 = vpack.c.bf16 %v16414_v62, %v16414_v62  ;;  %v15020_v62 = vld [vmem:[#allocation3 + $0x2c8] ss:$16 sps:$4 sm:$0xff]  }
 0xfb1   :  { %10464 = vmatpush1.bf16.msra.mxu0 %v14942_v14  ;;  %10424 = vmatprep.subr.bf16.mxu1 %v14947_v18  ;;  %v15014_v14 = vld [vmem:[#allocation3 + $0x2e8] ss:$16 sps:$4 sm:$0xff]   ;;  %v16446_v18 = vpack.c.bf16 %v16416_v17, %v16416_v17 }
 0xfb2   :  { %10465 = vmatprep.subr.bf16.mxu0 %v14950_v27  ;;  %v15019_v27 = vld [vmem:[#allocation3 + $0xcc] ss:$16 sps:$4 sm:$0xff]   ;;  %v15023_v17 = vld [vmem:[#allocation3 + $0xa8] ss:$16 sps:$4 sm:$0xff]  }
 0xfb4   :  { %10425 = vmatpush1.bf16.msra.mxu1 %v14945_v56  ;;  %v15022_v56 = vld [vmem:[#allocation3 + $0x2cc] ss:$16 sps:$4 sm:$0xff]  }
 0xfb5   :  { %10466 = vmatpush1.bf16.msra.mxu0 %v14948_v24  ;;  %10426 = vmatprep.subr.bf16.mxu1 %v14953_v50  ;;  %v15017_v24 = vld [vmem:[#allocation3 + $0xc8] ss:$16 sps:$4 sm:$0xff]   ;;  %v15025_v50 = vld [vmem:[#allocation3 + $0xac] ss:$16 sps:$4 sm:$0xff]  }
 0xfb6   :  { %10467 = vmatprep.subr.bf16.mxu0 %v14956_v57  ;;  %v15028_v57 = vld [vmem:[#allocation3 + $0x2ac] ss:$16 sps:$4 sm:$0xff]  }
 0xfb8   :  { %10427 = vmatpush1.bf16.msra.mxu1 %v14951_v26  ;;  %v15026_v26 = vld [vmem:[#allocation3 + $0x2a8] ss:$16 sps:$4 sm:$0xff]  }
 0xfb9   :  { %10468 = vmatpush1.bf16.msra.mxu0 %v14954_v53  ;;  %10428 = vmatprep.subr.bf16.mxu1 %v14959_v5  ;;  %v15031_v53 = vld [vmem:[#allocation3 + $0x8c] ss:$16 sps:$4 sm:$0xff]  }
 0xfba   :  { %10469 = vmatprep.subr.bf16.mxu0 %v14962_v19  ;;  %v15034_v5 = vld [vmem:[#allocation3 + $0x28c] ss:$16 sps:$4 sm:$0xff]   ;;  %v15029_v19 = vld [vmem:[#allocation3 + $0x88] ss:$16 sps:$4 sm:$0xff]  }
 0xfbc   :  { %10429 = vmatpush1.bf16.msra.mxu1 %v14957_v29  ;;  %v15037_v29 = vld [vmem:[#allocation3 + $0x6c] ss:$16 sps:$4 sm:$0xff]  }
 0xfbd   :  { %10470 = vmatpush1.bf16.msra.mxu0 %v14960_v12  ;;  %10430 = vmatprep.subr.bf16.mxu1 %v14965_v30  ;;  %v15040_v12 = vld [vmem:[#allocation3 + $0x26c] ss:$16 sps:$4 sm:$0xff]   ;;  %v15038_v30 = vld [vmem:[#allocation3 + $0x268] ss:$16 sps:$4 sm:$0xff]  }
 0xfbe   :  { %10471 = vmatprep.subr.bf16.mxu0 %v14968_v48  ;;  %v15043_v48 = vld [vmem:[#allocation3 + $0x4c] ss:$16 sps:$4 sm:$0xff]  }
 0xfc0   :  { %10431 = vmatpush2.bf16.msra.mxu1 %v14963_v16  ;;  %v15046_v16 = vld [vmem:[#allocation3 + $0x24c] ss:$16 sps:$4 sm:$0xff]  }
 0xfc1   :  { %10472 = vmatpush2.bf16.msra.mxu0 %v14966_v41  ;;  %10432 = vmatprep.subr.bf16.mxu1 %v14971_v46  ;;  %v15041_v41 = vld [vmem:[#allocation3 + $0x48] ss:$16 sps:$4 sm:$0xff]  }
 0xfc2   :  { %10473 = vmatprep.subr.bf16.mxu0 %v14974_v33  ;;  %v15044_v46 = vld [vmem:[#allocation3 + $0x248] ss:$16 sps:$4 sm:$0xff]   ;;  %v15049_v33 = vld [vmem:[#allocation3 + $0x2c] ss:$16 sps:$4 sm:$0xff]  }
 0xfc4   :  { %10433 = vmatpush2.bf16.msra.mxu1 %v14969_v35  ;;  %v15052_v35 = vld [vmem:[#allocation3 + $0x22c] ss:$16 sps:$4 sm:$0xff]  }
 0xfc5   :  { %10474 = vmatpush2.bf16.msra.mxu0 %v14972_v36  ;;  %10434 = vmatprep.subr.bf16.mxu1 %v14977_v8  ;;  %v15047_v36 = vld [vmem:[#allocation3 + $0x28] ss:$16 sps:$4 sm:$0xff]  }
 0xfc6   :  { %10475 = vmatprep.subr.bf16.mxu0 %v14980_v49  ;;  %v15050_v8 = vld [vmem:[#allocation3 + $0x228] ss:$16 sps:$4 sm:$0xff]   ;;  %v15055_v49 = vld [vmem:[#allocation3 + $0xc] ss:$16 sps:$4 sm:$0xff]  }
 0xfc8   :  { %10435 = vmatpush2.bf16.msra.mxu1 %v14975_v38  ;;  %v15058_v38 = vld [vmem:[#allocation3 + $0x20c] ss:$16 sps:$4 sm:$0xff]  }
 0xfc9   :  { %10476 = vmatpush2.bf16.msra.mxu0 %v14978_v39  ;;  %10436 = vmatprep.subr.bf16.mxu1 %v14983_v40  ;;  %v15053_v39 = vld [vmem:[#allocation3 + $0x8] ss:$16 sps:$4 sm:$0xff]  }
 0xfca   :  { %10477 = vmatprep.subr.bf16.mxu0 %v14986_v45  ;;  %v15056_v40 = vld [vmem:[#allocation3 + $0x208] ss:$16 sps:$4 sm:$0xff]   ;;  %v15061_v45 = vld [vmem:[#allocation3 + $0x1ec] ss:$16 sps:$4 sm:$0xff]  }
 0xfcc   :  { %10437 = vmatpush2.bf16.msra.mxu1 %v14981_v47  ;;  %v15064_v47 = vld [vmem:[#allocation3 + $0x3ec] ss:$16 sps:$4 sm:$0xff]  }
 0xfcd   :  { %10478 = vmatpush2.bf16.msra.mxu0 %v14984_v4  ;;  %10438 = vmatprep.subr.bf16.mxu1 %v14989_v42  ;;  %v15059_v4 = vld [vmem:[#allocation3 + $0x1e8] ss:$16 sps:$4 sm:$0xff]  }
 0xfce   :  { %10479 = vmatprep.subr.bf16.mxu0 %v14992_v51  ;;  %v15062_v42 = vld [vmem:[#allocation3 + $0x3e8] ss:$16 sps:$4 sm:$0xff]   ;;  %v15067_v51 = vld [vmem:[#allocation3 + $0x1cc] ss:$16 sps:$4 sm:$0xff]  }
 0xfd0   :  { %10439 = vmatpush2.bf16.msra.mxu1 %v14987_v52  ;;  %v15070_v52 = vld [vmem:[#allocation3 + $0x3cc] ss:$16 sps:$4 sm:$0xff]  }
 0xfd1   :  { %10480 = vmatpush2.bf16.msra.mxu0 %v14990_v44  ;;  %10440 = vmatprep.subr.bf16.mxu1 %v14995_v13  ;;  %v15065_v44 = vld [vmem:[#allocation3 + $0x1c8] ss:$16 sps:$4 sm:$0xff]  }
 0xfd2   :  { %10481 = vmatprep.subr.bf16.mxu0 %v14998_v20  ;;  %v15068_v13 = vld [vmem:[#allocation3 + $0x3c8] ss:$16 sps:$4 sm:$0xff]   ;;  %v15073_v20 = vld [vmem:[#allocation3 + $0x1ac] ss:$16 sps:$4 sm:$0xff]  }
 0xfd4   :  { %10441 = vmatpush2.bf16.msra.mxu1 %v14993_v21  ;;  %v15076_v21 = vld [vmem:[#allocation3 + $0x3ac] ss:$16 sps:$4 sm:$0xff]  }
 0xfd5   :  { %10482 = vmatpush2.bf16.msra.mxu0 %v14996_v59  ;;  %10442 = vmatprep.subr.bf16.mxu1 %v15001_v63  ;;  %v15071_v59 = vld [vmem:[#allocation3 + $0x1a8] ss:$16 sps:$4 sm:$0xff]  }
 0xfd6   :  { %10483 = vmatprep.subr.bf16.mxu0 %v15004_v37  ;;  %v15074_v63 = vld [vmem:[#allocation3 + $0x3a8] ss:$16 sps:$4 sm:$0xff]   ;;  %v15079_v37 = vld [vmem:[#allocation3 + $0x18c] ss:$16 sps:$4 sm:$0xff]  }
 0xfd8   :  { %10443 = vmatpush2.bf16.msra.mxu1 %v14999_v2  ;;  %v15082_v2 = vld [vmem:[#allocation3 + $0x38c] ss:$16 sps:$4 sm:$0xff]  }
 0xfd9   :  { %10484 = vmatpush2.bf16.msra.mxu0 %v15002_v43  ;;  %10444 = vmatprep.subr.bf16.mxu1 %v15007_v25  ;;  %v15077_v43 = vld [vmem:[#allocation3 + $0x188] ss:$16 sps:$4 sm:$0xff]  }
 0xfda   :  { %10485 = vmatprep.subr.bf16.mxu0 %v15010_v31  ;;  %v15080_v25 = vld [vmem:[#allocation3 + $0x388] ss:$16 sps:$4 sm:$0xff]   ;;  %v15085_v31 = vld [vmem:[#allocation3 + $0x16c] ss:$16 sps:$4 sm:$0xff]  }
 0xfdc   :  { %10445 = vmatpush2.bf16.msra.mxu1 %v15005_v11  ;;  %v15088_v11 = vld [vmem:[#allocation3 + $0x36c] ss:$16 sps:$4 sm:$0xff]  }
 0xfdd   :  { %10486 = vmatpush2.bf16.msra.mxu0 %v15008_v15  ;;  %10496 = vmatprep.subr.bf16.mxu1 %v15013_v10  ;;  %v15083_v15 = vld [vmem:[#allocation3 + $0x168] ss:$16 sps:$4 sm:$0xff]  }
 0xfde   :  { %10537 = vmatprep.subr.bf16.mxu0 %v15016_v9  ;;  %v15086_v10 = vld [vmem:[#allocation3 + $0x368] ss:$16 sps:$4 sm:$0xff]   ;;  %v15091_v9 = vld [vmem:[#allocation3 + $0x14c] ss:$16 sps:$4 sm:$0xff]  }
 0xfdf   :  { %10447 = vmatmul.mubr.bf16.vlgmr.msra.gmra.mxu1 %v16442_v28 }
 0xfe0   :  { %10488 = vmatmul.mubr.bf16.vlgmr.msra.gmra.mxu0 %v16446_v18  ;;  %10497 = vmatpush1.bf16.msra.mxu1 %v15011_v23  ;;  %v15094_v23 = vld [vmem:[#allocation3 + $0x34c] ss:$16 sps:$4 sm:$0xff]  }
 0xfe1   :  { %10528 = vmatprep.mubr.bf16.mxu1 %v16430_v7  ;;  %10538 = vmatpush1.bf16.msra.mxu0 %v15014_v14  ;;  %v15032_v7 = vld [vmem:[#allocation3 + $0x288] ss:$16 sps:$4 sm:$0xff]  }
 0xfe2   :  { %10569 = vmatprep.mubr.bf16.mxu0 %v16434_v54  ;;  %10498 = vmatprep.subr.bf16.mxu1 %v15019_v27  ;;  %v15035_v54 = vld [vmem:[#allocation3 + $0x68] ss:$16 sps:$4 sm:$0xff]  }
 0xfe3   :  { %10539 = vmatprep.subr.bf16.mxu0 %v15022_v56  ;;  %v15089_v14 = vld [vmem:[#allocation3 + $0x148] ss:$16 sps:$4 sm:$0xff]   ;;  %v15097_v56 = vld [vmem:[#allocation3 + $0x12c] ss:$16 sps:$4 sm:$0xff]  }
 0xfe4   :  { %10499 = vmatpush1.bf16.msra.mxu1 %v15017_v24  ;;  %v15092_v27 = vld [vmem:[#allocation3 + $0x348] ss:$16 sps:$4 sm:$0xff]   ;;  %v15100_v24 = vld [vmem:[#allocation3 + $0x32c] ss:$16 sps:$4 sm:$0xff]  }
 0xfe5   :  { %10540 = vmatpush1.bf16.msra.mxu0 %v15020_v62  ;;  %10500 = vmatprep.subr.bf16.mxu1 %v15025_v50  ;;  %v15095_v62 = vld [vmem:[#allocation3 + $0x128] ss:$16 sps:$4 sm:$0xff]  }
 0xfe6   :  { %10541 = vmatprep.subr.bf16.mxu0 %v15028_v57  ;;  %v15098_v50 = vld [vmem:[#allocation3 + $0x328] ss:$16 sps:$4 sm:$0xff]   ;;  %v15103_v57 = vld [vmem:[#allocation3 + $0x10c] ss:$16 sps:$4 sm:$0xff]  }
 0xfe8   :  { %10501 = vmatpush1.bf16.msra.mxu1 %v15023_v17  ;;  %v15106_v17 = vld [vmem:[#allocation3 + $0x30c] ss:$16 sps:$4 sm:$0xff]  }
 0xfe9   :  { %10542 = vmatpush1.bf16.msra.mxu0 %v15026_v26  ;;  %10502 = vmatprep.subr.bf16.mxu1 %v15031_v53  ;;  %v15101_v26 = vld [vmem:[#allocation3 + $0x108] ss:$16 sps:$4 sm:$0xff]  }
 0xfea   :  { %10543 = vmatprep.subr.bf16.mxu0 %v15034_v5  ;;  %v15104_v53 = vld [vmem:[#allocation3 + $0x308] ss:$16 sps:$4 sm:$0xff]   ;;  %v15107_v5 = vld [vmem:[#allocation35 + $0x78] sm:$0xff]  }
 0xfec   :  { %10503 = vmatpush1.bf16.msra.mxu1 %v15029_v19  ;;  %v15108_v19 = vld [vmem:[#allocation35 + $0x38] sm:$0xff]  }
 0xfed   :  { %10544 = vmatpush1.bf16.msra.mxu0 %v15032_v7  ;;  %10504 = vmatprep.subr.bf16.mxu1 %v15037_v29  ;;  %v15109_v7 = vld [vmem:[#allocation35 + $0x70] sm:$0xff]  }
 0xfee   :  { %10545 = vmatprep.subr.bf16.mxu0 %v15040_v12 }
 0xff0   :  { %10505 = vmatpush1.bf16.msra.mxu1 %v15035_v54 }
 0xff1   :  { %10546 = vmatpush1.bf16.msra.mxu0 %v15038_v30  ;;  %10506 = vmatprep.subr.bf16.mxu1 %v15043_v48  ;;  %v15110_v30 = vld [vmem:[#allocation35 + $0x30] sm:$0xff]  }
 0xff2   :  { %10547 = vmatprep.subr.bf16.mxu0 %v15046_v16 }
 0xff4   :  { %10507 = vmatpush1.bf16.msra.mxu1 %v15041_v41  ;;  %v15111_v41 = vld [vmem:[#allocation35 + $0x68] sm:$0xff]  }
 0xff5   :  { %10548 = vmatpush1.bf16.msra.mxu0 %v15044_v46  ;;  %10508 = vmatprep.subr.bf16.mxu1 %v15049_v33 }
 0xff6   :  { %10549 = vmatprep.subr.bf16.mxu0 %v15052_v35 }
 0xff8   :  { %10509 = vmatpush1.bf16.msra.mxu1 %v15047_v36  ;;  %v15112_v36 = vld [vmem:[#allocation35 + $0x28] sm:$0xff]  }
 0xff9   :  { %10550 = vmatpush1.bf16.msra.mxu0 %v15050_v8  ;;  %10510 = vmatprep.subr.bf16.mxu1 %v15055_v49  ;;  %v15113_v49 = vld [vmem:[#allocation35 + $0x60] sm:$0xff]  }
 0xffa   :  { %10551 = vmatprep.subr.bf16.mxu0 %v15058_v38  ;;  %v15115_v38 = vld [vmem:[#allocation35 + $0x58] sm:$0xff]  }
 0xffc   :  { %10511 = vmatpush1.bf16.msra.mxu1 %v15053_v39  ;;  %v15116_v39 = vld [vmem:[#allocation35 + $0x18] sm:$0xff]  }
 0xffd   :  { %10552 = vmatpush1.bf16.msra.mxu0 %v15056_v40  ;;  %10512 = vmatprep.subr.bf16.mxu1 %v15061_v45  ;;  %v15117_v40 = vld [vmem:[#allocation35 + $0x50] sm:$0xff]  }
 0xffe   :  { %10553 = vmatprep.subr.bf16.mxu0 %v15064_v47  ;;  %v15118_v45 = vld [vmem:[#allocation35 + $0x10] sm:$0xff]   ;;  %v15119_v47 = vld [vmem:[#allocation35 + $0x48] sm:$0xff]  }
0x1000   :  { %10513 = vmatpush2.bf16.msra.mxu1 %v15059_v4  ;;  %v15120_v4 = vld [vmem:[#allocation35 + $0x8] sm:$0xff]  }
0x1001   :  { %10554 = vmatpush2.bf16.msra.mxu0 %v15062_v42  ;;  %10514 = vmatprep.subr.bf16.mxu1 %v15067_v51  ;;  %v15121_v42 = vld [vmem:[#allocation35 + $0x40] sm:$0xff]  }
0x1002   :  { %10555 = vmatprep.subr.bf16.mxu0 %v15070_v52  ;;  %v15122_v51 = vld [vmem:[#allocation35] sm:$0xff]  }
0x1003   :  { %v15123_v52 = vld [vmem:[#allocation38 + $0x78] sm:$0xff]  }
0x1004   :  { %10515 = vmatpush2.bf16.msra.mxu1 %v15065_v44  ;;  %v15139_v44 = vld [vmem:[#allocation35 + $0xf8] sm:$0xff]  }
0x1005   :  { %10556 = vmatpush2.bf16.msra.mxu0 %v15068_v13  ;;  %10516 = vmatprep.subr.bf16.mxu1 %v15073_v20  ;;  %v15140_v13 = vld [vmem:[#allocation35 + $0xb8] sm:$0xff]   ;;  %v15141_v20 = vld [vmem:[#allocation35 + $0xf0] sm:$0xff]  }
0x1006   :  { %10557 = vmatprep.subr.bf16.mxu0 %v15076_v21  ;;  %v15142_v21 = vld [vmem:[#allocation35 + $0xb0] sm:$0xff]  }
0x1008   :  { %10517 = vmatpush2.bf16.msra.mxu1 %v15071_v59  ;;  %v15143_v59 = vld [vmem:[#allocation35 + $0xe8] sm:$0xff]  }
0x1009   :  { %10558 = vmatpush2.bf16.msra.mxu0 %v15074_v63  ;;  %10518 = vmatprep.subr.bf16.mxu1 %v15079_v37  ;;  %v15144_v63 = vld [vmem:[#allocation35 + $0xa8] sm:$0xff]   ;;  %v15145_v37 = vld [vmem:[#allocation35 + $0xe0] sm:$0xff]  }
0x100a   :  { %10559 = vmatprep.subr.bf16.mxu0 %v15082_v2  ;;  %v15146_v2 = vld [vmem:[#allocation35 + $0xa0] sm:$0xff]  }
0x100c   :  { %10519 = vmatpush2.bf16.msra.mxu1 %v15077_v43  ;;  %v15147_v43 = vld [vmem:[#allocation35 + $0xd8] sm:$0xff]  }
0x100d   :  { %10560 = vmatpush2.bf16.msra.mxu0 %v15080_v25  ;;  %10520 = vmatprep.subr.bf16.mxu1 %v15085_v31  ;;  %v15148_v25 = vld [vmem:[#allocation35 + $0x98] sm:$0xff]  }
0x100e   :  { %10561 = vmatprep.subr.bf16.mxu0 %v15088_v11 }
0x1010   :  { %10521 = vmatpush2.bf16.msra.mxu1 %v15083_v15 }
0x1011   :  { %10562 = vmatpush2.bf16.msra.mxu0 %v15086_v10  ;;  %10522 = vmatprep.subr.bf16.mxu1 %v15091_v9  ;;  %v15149_v10 = vld [vmem:[#allocation35 + $0xd0] sm:$0xff]  }
0x1012   :  { %10563 = vmatprep.subr.bf16.mxu0 %v15094_v23 }
0x1014   :  { %10523 = vmatpush2.bf16.msra.mxu1 %v15089_v14  ;;  %v15150_v14 = vld [vmem:[#allocation35 + $0x90] sm:$0xff]  }
0x1015   :  { %10564 = vmatpush2.bf16.msra.mxu0 %v15092_v27  ;;  %10524 = vmatprep.subr.bf16.mxu1 %v15097_v56 }
0x1016   :  { %10565 = vmatprep.subr.bf16.mxu0 %v15100_v24 }
0x1018   :  { %10525 = vmatpush2.bf16.msra.mxu1 %v15095_v62  ;;  %v15151_v62 = vld [vmem:[#allocation35 + $0xc8] sm:$0xff]  }
0x1019   :  { %10566 = vmatpush2.bf16.msra.mxu0 %v15098_v50  ;;  %10526 = vmatprep.subr.bf16.mxu1 %v15103_v57 }
0x101a   :  { %10567 = vmatprep.subr.bf16.mxu0 %v15106_v17  ;;  %v15152_v17 = vld [vmem:[#allocation35 + $0x88] sm:$0xff]  }
0x101c   :  { %10527 = vmatpush2.bf16.msra.mxu1 %v15101_v26  ;;  %v15153_v26 = vld [vmem:[#allocation35 + $0xc0] sm:$0xff]  }
0x101d   :  { %10568 = vmatpush2.bf16.msra.mxu0 %v15104_v53  ;;  %13228 = vmatprep.subr.bf16.mxu1 %v15107_v5  ;;  %v15154_v53 = vld [vmem:[#allocation35 + $0x80] sm:$0xff]  }
0x101e   :  { %13250 = vmatprep.subr.bf16.mxu0 %v15139_v44  ;;  %v15155_v5 = vld [vmem:[#allocation38 + $0xf8] sm:$0xff]  }
0x101f   :  { %10529 = vmatmul.mubr.bf16.vlgmr.msra.gmra.mxu1 %v16442_v28  ;;  %v9644_v29 = vpop.f32.mrf.mxu1  ;;  %v9685_v12 = vpop.f32.mrf.mxu0  ;;  %v15131_v44 = vld [vmem:[#allocation38 + $0x58] sm:$0xff]  }
0x1020   :  { %10570 = vmatmul.mubr.bf16.vlgmr.msra.gmra.mxu0 %v16446_v18  ;;  %v16454_v54 = vadd.f32 %v9685_v12, %v9644_v29  ;;  %13229 = vmatpush3.bf16.msra.mxu1 %v15108_v19  ;;  %v15114_v18 = vld [vmem:[#allocation35 + $0x20] sm:$0xff]   ;;  %v16462_v19 = vld [vmem:[#allocation34] sm:$0xf] }
0x1021   :  { %v9646_v48 = vpop.f32.mrf.mxu1  ;;  %v9687_v16 = vpop.f32.mrf.mxu0  ;;  %13230 = vmatprep.subr.bf16.mxu1 %v15109_v7  ;;  %13251 = vmatpush3.bf16.msra.mxu0 %v15140_v13  ;;  %v15132_v13 = vld [vmem:[#allocation38 + $0x18] sm:$0xff]  }
0x1022   :  { %v16456_v46 = vadd.f32 %v9687_v16, %v9646_v48  ;;  %13252 = vmatprep.subr.bf16.mxu0 %v15141_v20  ;;  %v15133_v20 = vld [vmem:[#allocation38 + $0x50] sm:$0xff]  }
0x1023   :  { %v9648_v33 = vpop.f32.mrf.mxu1  ;;  %v9689_v35 = vpop.f32.mrf.mxu0 }
0x1024   :  { %13231 = vmatpush3.bf16.msra.mxu1 %v15110_v30  ;;  %v10583_v30 = vrot.slane %v16462_v19, %v16107_v58  ;;  %v10587_v35 = vrot.slane %v16462_v19, %v16109_v60  ;;  %v15127_v60 = vld [vmem:[#allocation38 + $0x68] sm:$0xff]  }
0x1025   :  { %v9649_v8 = vpop.f32.mrf.mxu1  ;;  %v9690_v28 = vpop.f32.mrf.mxu0  ;;  %13232 = vmatprep.subr.bf16.mxu1 %v15111_v41  ;;  %13253 = vmatpush3.bf16.msra.mxu0 %v15142_v21  ;;  %v15134_v21 = vld [vmem:[#allocation38 + $0x10] sm:$0xff]  }
0x1026   :  { %13254 = vmatprep.subr.bf16.mxu0 %v15143_v59  ;;  %v15135_v59 = vld [vmem:[#allocation38 + $0x48] sm:$0xff]  }
0x1028   :  { %13233 = vmatpush3.bf16.msra.mxu1 %v15112_v36 }
0x1029   :  { %13234 = vmatprep.subr.bf16.mxu1 %v15113_v49  ;;  %13255 = vmatpush3.bf16.msra.mxu0 %v15144_v63  ;;  %v15136_v63 = vld [vmem:[#allocation38 + $0x8] sm:$0xff]  }
0x102a   :  { %13256 = vmatprep.subr.bf16.mxu0 %v15145_v37  ;;  %v15137_v37 = vld [vmem:[#allocation38 + $0x40] sm:$0xff]  }
0x102c   :  { %13235 = vmatpush3.bf16.msra.mxu1 %v15114_v18 }
0x102d   :  { %13236 = vmatprep.subr.bf16.mxu1 %v15115_v38  ;;  %13257 = vmatpush3.bf16.msra.mxu0 %v15146_v2  ;;  %v15138_v2 = vld [vmem:[#allocation38] sm:$0xff]  }
0x102e   :  { %13258 = vmatprep.subr.bf16.mxu0 %v15147_v43 }
0x1030   :  { %13237 = vmatpush3.bf16.msra.mxu1 %v15116_v39 }
0x1031   :  { %13238 = vmatprep.subr.bf16.mxu1 %v15117_v40  ;;  %13259 = vmatpush3.bf16.msra.mxu0 %v15148_v25 }
0x1032   :  { %13260 = vmatprep.subr.bf16.mxu0 %v15149_v10 }
0x1034   :  { %13239 = vmatpush3.bf16.msra.mxu1 %v15118_v45 }
0x1035   :  { %13240 = vmatprep.subr.bf16.mxu1 %v15119_v47  ;;  %13261 = vmatpush3.bf16.msra.mxu0 %v15150_v14  ;;  %v15124_v47 = vld [vmem:[#allocation38 + $0x38] sm:$0xff]  }
0x1036   :  { %13262 = vmatprep.subr.bf16.mxu0 %v15151_v62 }
0x1038   :  { %13241 = vmatpush3.bf16.msra.mxu1 %v15120_v4  ;;  %v15125_v4 = vld [vmem:[#allocation38 + $0x70] sm:$0xff]  }
0x1039   :  { %13242 = vmatprep.subr.bf16.mxu1 %v15121_v42  ;;  %13263 = vmatpush3.bf16.msra.mxu0 %v15152_v17  ;;  %v15128_v42 = vld [vmem:[#allocation38 + $0x28] sm:$0xff]  }
0x103a   :  { %13264 = vmatprep.subr.bf16.mxu0 %v15153_v26 }
0x103c   :  { %13243 = vmatpush3.bf16.msra.mxu1 %v15122_v51  ;;  %v15129_v51 = vld [vmem:[#allocation38 + $0x60] sm:$0xff]  }
0x103d   :  { %13272 = vmatprep.subr.bf16.mxu1 %v15123_v52  ;;  %13265 = vmatpush3.bf16.msra.mxu0 %v15154_v53  ;;  %v15130_v52 = vld [vmem:[#allocation38 + $0x20] sm:$0xff]  }
0x103e   :  { %13294 = vmatprep.subr.bf16.mxu0 %v15155_v5 }
0x105f   :  { %v9726_v31 = vpop.f32.mrf.mxu1  ;;  %v9767_v11 = vpop.f32.mrf.mxu0 }
0x1060   :  { %v16458_v15 = vadd.f32 %v9767_v11, %v9726_v31  ;;  %v10591_v11 = vrot.slane %v16462_v19, %v16113_v1 }
0x1061   :  { %v9728_v9 = vpop.f32.mrf.mxu1  ;;  %v9769_v23 = vpop.f32.mrf.mxu0 }
0x1062   :  { %v16460_v27 = vadd.f32 %v9769_v23, %v9728_v9 }
0x1063   :  { %v9730_v56 = vpop.f32.mrf.mxu1  ;;  %v9771_v24 = vpop.f32.mrf.mxu0 }
0x1064   :  { %v10595_v56 = vrot.slane %v16462_v19, %v16111_v61  ;;  %v15159_v61 = vld [vmem:[#allocation38 + $0xe8] sm:$0xff]  }
0x1065   :  { %v9731_v50 = vpop.f32.mrf.mxu1  ;;  %v9772_v57 = vpop.f32.mrf.mxu0  ;;  %v15160_v19 = vld [vmem:[#allocation38 + $0xa8] sm:$0xff]  }
0x109f   :  { %v10448_v7 = vpop.f32.mrf.mxu1 }
0x10a0   :  { %v10449_v29 = vadd.f32 %v10448_v7, %v16454_v54  ;;  %v10489_v12 = vpop.f32.mrf.mxu0 }
0x10a1   :  { %v10450_v48 = vpop.f32.mrf.mxu1 }
0x10a2   :  { %v10490_v16 = vadd.f32 %v10489_v12, %v10449_v29  ;;  %v10451_v41 = vadd.f32 %v10450_v48, %v16456_v46  ;;  %v10491_v33 = vpop.f32.mrf.mxu0  ;;  %v15126_v46 = vld [vmem:[#allocation38 + $0x30] sm:$0xff]   ;;  %v15156_v29 = vld [vmem:[#allocation38 + $0xb8] sm:$0xff]   ;;  %v15162_v48 = vld [vmem:[#allocation38 + $0xa0] sm:$0xff]  }
0x10a3   :  { %v10452_v36 = vpop.f32.mrf.mxu1  ;;  %v15157_v12 = vld [vmem:[#allocation38 + $0xf0] sm:$0xff]  }
0x10a4   :  { %v10600_v8 = vadd.f32 %v10583_v30, %v10490_v16  ;;  %v10492_v28 = vadd.f32 %v10491_v33, %v10451_v41  ;;  %v10493_v49 = vpop.f32.mrf.mxu0  ;;  %v15161_v30 = vld [vmem:[#allocation38 + $0xe0] sm:$0xff]   ;;  %v15163_v16 = vld [vmem:[#allocation38 + $0xd8] sm:$0xff]   ;;  %v15165_v33 = vld [vmem:[#allocation38 + $0xd0] sm:$0xff]  }
0x10a5   :  { %v10453_v18 = vpop.f32.mrf.mxu1  ;;  %v15164_v41 = vld [vmem:[#allocation38 + $0x98] sm:$0xff]   ;;  %v15167_v36 = vld [vmem:[#allocation38 + $0xc8] sm:$0xff]   ;;  %v15170_v49 = vld [vmem:[#allocation38 + $0x80] sm:$0xff]  }
0x10a6   :  { %v10601_v38 = vadd.f32 %v10587_v35, %v10492_v28  ;;  %v10494_v39 = vpop.f32.mrf.mxu0  ;;  %v10604_v54 = vmax.f32 %v10600_v8, 0.0  ;;  %v15166_v35 = vld [vmem:[#allocation38 + $0x90] sm:$0xff]   ;;  %v15168_v8 = vld [vmem:[#allocation38 + $0x88] sm:$0xff]   ;;  %v15169_v28 = vld [vmem:[#allocation38 + $0xc0] sm:$0xff]  }
0x10a7   :  { %v15171_v18 = vld [vmem:[%s16644_s26 + $0x78] sm:$0xff]   ;;  %v15173_v39 = vld [vmem:[%s16644_s26 + $0x70] sm:$0xff]  }
0x10a8   :  { %v10605_v40 = vmax.f32 %v10601_v38, 0.0  ;;  %v10608_v58 = vpack.c.bf16 %v10604_v54, %v10604_v54  ;;  %v15172_v38 = vld [vmem:[%s16644_s26 + $0x38] sm:$0xff]   ;;  %v15174_v54 = vld [vmem:[%s16644_s26 + $0x30] sm:$0xff]  }
0x10aa   :  { %v10609_v45 = vpack.c.bf16 %v10605_v40, %v10605_v40  ;;  %v15175_v40 = vld [vmem:[%s16644_s26 + $0x68] sm:$0xff]  }
0x10ac   :  { %10907 = vmatprep.mubr.bf16.mxu1 %v10609_v45 }
0x10ad   :  { %10908 = vmatmul.mubr.bf16.vlgmr.msra.gmra.mxu1 %v10608_v58 }
0x10ae   :  { %13273 = vmatpush3.bf16.msra.mxu1 %v15124_v47  ;;  %11251 = vmatprep.mubr.bf16.mxu1 %v10609_v45  ;;  %v15177_v45 = vld [vmem:[%s16644_s26 + $0xf8] sm:$0xff]  }
0x10af   :  { %13274 = vmatprep.subr.bf16.mxu1 %v15125_v4  ;;  %v15178_v47 = vld [vmem:[%s16644_s26 + $0xb8] sm:$0xff]   ;;  %v15176_v4 = vld [vmem:[%s16644_s26 + $0x28] sm:$0xff]  }
0x10b2   :  { %13275 = vmatpush3.bf16.msra.mxu1 %v15126_v46  ;;  %v15182_v46 = vld [vmem:[%s16644_s26 + $0xb0] sm:$0xff]  }
0x10b3   :  { %13276 = vmatprep.subr.bf16.mxu1 %v15127_v60  ;;  %v15179_v60 = vld [vmem:[%s16644_s26 + $0x60] sm:$0xff]  }
0x10b6   :  { %13277 = vmatpush3.bf16.msra.mxu1 %v15128_v42  ;;  %v15185_v42 = vld [vmem:[%s16644_s26 + $0xe8] sm:$0xff]  }
0x10b7   :  { %13278 = vmatprep.subr.bf16.mxu1 %v15129_v51  ;;  %v15180_v51 = vld [vmem:[%s16644_s26 + $0x20] sm:$0xff]  }
0x10ba   :  { %13279 = vmatpush3.bf16.msra.mxu1 %v15130_v52  ;;  %v15186_v52 = vld [vmem:[%s16644_s26 + $0xa8] sm:$0xff]  }
0x10bb   :  { %13280 = vmatprep.subr.bf16.mxu1 %v15131_v44  ;;  %v15183_v44 = vld [vmem:[%s16644_s26 + $0x58] sm:$0xff]  }
0x10be   :  { %13281 = vmatpush3.bf16.msra.mxu1 %v15132_v13  ;;  %v15189_v13 = vld [vmem:[%s16644_s26 + $0xe0] sm:$0xff]  }
0x10bf   :  { %13282 = vmatprep.subr.bf16.mxu1 %v15133_v20  ;;  %v15184_v20 = vld [vmem:[%s16644_s26 + $0x18] sm:$0xff]  }
0x10c2   :  { %13283 = vmatpush3.bf16.msra.mxu1 %v15134_v21  ;;  %v15190_v21 = vld [vmem:[%s16644_s26 + $0xa0] sm:$0xff]  }
0x10c3   :  { %13284 = vmatprep.subr.bf16.mxu1 %v15135_v59  ;;  %v15187_v59 = vld [vmem:[%s16644_s26 + $0x50] sm:$0xff]  }
0x10c6   :  { %13285 = vmatpush3.bf16.msra.mxu1 %v15136_v63  ;;  %v15193_v63 = vld [vmem:[%s16644_s26 + $0xd8] sm:$0xff]  }
0x10c7   :  { %13286 = vmatprep.subr.bf16.mxu1 %v15137_v37  ;;  %v15188_v37 = vld [vmem:[%s16644_s26 + $0x10] sm:$0xff]  }
0x10ca   :  { %13287 = vmatpush3.bf16.msra.mxu1 %v15138_v2  ;;  %v15194_v2 = vld [vmem:[%s16644_s26 + $0x98] sm:$0xff]  }
0x10cb   :  { %13316 = vmatprep.subr.bf16.mxu1 %v15171_v18 }
0x10cd   :  { %11252 = vmatmul.mubr.bf16.vlgmr.msra.gmra.mxu1 %v10608_v58  ;;  %v15181_v58 = vld [vmem:[%s16644_s26 + $0xf0] sm:$0xff]  }
0x10ce   :  { %13317 = vmatpush3.bf16.msra.mxu1 %v15172_v38  ;;  %v13011_v38 = vld [vmem:[#allocation40] ss:$0 sm:$0xff] }
0x10cf   :  { %13318 = vmatprep.subr.bf16.mxu1 %v15173_v39 }
0x10d2   :  { %13319 = vmatpush3.bf16.msra.mxu1 %v15174_v54 }
0x10d3   :  { %13320 = vmatprep.subr.bf16.mxu1 %v15175_v40 }
0x10d6   :  { %13321 = vmatpush3.bf16.msra.mxu1 %v15176_v4 }
0x10d7   :  { %13322 = vmatprep.subr.bf16.mxu1 %v15179_v60 }
0x10da   :  { %13323 = vmatpush3.bf16.msra.mxu1 %v15180_v51 }
0x10db   :  { %13324 = vmatprep.subr.bf16.mxu1 %v15183_v44 }
0x10de   :  { %13325 = vmatpush3.bf16.msra.mxu1 %v15184_v20 }
0x10df   :  { %v10530_v43 = vpop.f32.mrf.mxu1  ;;  %13326 = vmatprep.subr.bf16.mxu1 %v15187_v59 }
0x10e0   :  { %v10531_v25 = vadd.f32 %v10530_v43, %v16458_v15  ;;  %v10571_v31 = vpop.f32.mrf.mxu0  ;;  %v15191_v43 = vld [vmem:[%s16644_s26 + $0x48] sm:$0xff]  }
0x10e1   :  { %v10532_v10 = vpop.f32.mrf.mxu1 }
0x10e2   :  { %v10572_v9 = vadd.f32 %v10571_v31, %v10531_v25  ;;  %v10533_v23 = vadd.f32 %v10532_v10, %v16460_v27  ;;  %v10573_v14 = vpop.f32.mrf.mxu0  ;;  %v15158_v27 = vld [vmem:[#allocation38 + $0xb0] sm:$0xff]   ;;  %13327 = vmatpush3.bf16.msra.mxu1 %v15188_v37  ;;  %v15192_v25 = vld [vmem:[%s16644_s26 + $0x8] sm:$0xff]   ;;  %v15197_v10 = vld [vmem:[%s16644_s26 + $0xd0] sm:$0xff]  }
0x10e3   :  { %v10534_v24 = vpop.f32.mrf.mxu1  ;;  %13328 = vmatprep.subr.bf16.mxu1 %v15191_v43  ;;  %v15195_v31 = vld [vmem:[%s16644_s26 + $0x40] sm:$0xff]  }
0x10e4   :  { %v10602_v62 = vadd.f32 %v10591_v11, %v10572_v9  ;;  %v10574_v50 = vadd.f32 %v10573_v14, %v10533_v23  ;;  %v10575_v57 = vpop.f32.mrf.mxu0  ;;  %v15196_v11 = vld [vmem:[%s16644_s26] sm:$0xff]   ;;  %v15198_v9 = vld [vmem:[%s16644_s26 + $0x90] sm:$0xff]   ;;  %v11300_v23 = vpack.c.bf16 %v4965_v34, %v4965_v34  ;;  %v11299_v14 = vpack.c.bf16 %v1409_v6, %v1409_v6  ;;  %v15200_v24 = vld [vmem:[%s16644_s26 + $0x88] sm:$0xff]  }
0x10e5   :  { %v10535_v17 = vpop.f32.mrf.mxu1  ;;  %v15202_v6 = vld [vmem:[%s16644_s26 + $0x80] sm:$0xff]   ;;  %v15204_v34 = vld [vmem:[%s16644_s26 + $0x130] sm:$0xff]   ;;  %v15207_v57 = vld [vmem:[%s16644_s26 + $0x118] sm:$0xff]  }
0x10e6   :  { %v10603_v26 = vadd.f32 %v10595_v56, %v10574_v50  ;;  %v10576_v53 = vpop.f32.mrf.mxu0  ;;  %v10606_v15 = vmax.f32 %v10602_v62, 0.0  ;;  %13329 = vmatpush3.bf16.msra.mxu1 %v15192_v25  ;;  %11663 = vmatprep.mubr.bf16.mxu1 %v11300_v23  ;;  %v15199_v56 = vld [vmem:[%s16644_s26 + $0xc8] sm:$0xff]   ;;  %v15206_v50 = vld [vmem:[%s16644_s26 + $0x120] sm:$0xff]   ;;  %v15208_v17 = vld [vmem:[%s16644_s26 + $0x110] sm:$0xff]  }
0x10e7   :  { %13330 = vmatprep.subr.bf16.mxu1 %v15195_v31  ;;  %v15205_v62 = vld [vmem:[%s16644_s26 + $0x128] sm:$0xff]   ;;  %v15210_v53 = vld [vmem:[%s16644_s26 + $0x100] sm:$0xff]  }
0x10e8   :  { %v10607_v5 = vmax.f32 %v10603_v26, 0.0  ;;  %v10610_v1 = vpack.c.bf16 %v10606_v15, %v10606_v15  ;;  %v15209_v26 = vld [vmem:[%s16644_s26 + $0x108] sm:$0xff]   ;;  %s15819_s26 = smov [#allocation43]  }
0x10e9   :  { %s11759_s2 = sshll.u32 %s15819_s26, 4  ;;  %s11760_s2 = int_to_ptr.vmem [resolvable:$true] %s11759_s2 }
0x10ea   :  { %v10611_v7 = vpack.c.bf16 %v10607_v5, %v10607_v5  ;;  %13331 = vmatpush3.bf16.msra.mxu1 %v15196_v11  ;;  %s15731_s16 = scalar_lea.vmem %s11760_s2, 32  ;;  %p15736_p5 = scmp.lt.s32.totalorder %s11760_s2, %s11760_s2 }
0x10eb   :  { %13393 = vmatprep.subr.bf16.mxu1 %v15814_v0  ;;  %p15732_p4 = scmp.ne.s32.totalorder %s11760_s2, %s15731_s16  ;;  %p15737_p6 = scmp.lt.s32.totalorder %s15731_s16, %s15731_s16 }
0x10ec   :  { %10947 = vmatprep.mubr.bf16.mxu0 %v10611_v7 }
0x10ed   :  { %10948 = vmatmul.mubr.bf16.vlgmr.msra.gmra.mxu0 %v10610_v1  ;;  %11664 = vmatmul.mubr.bf16.vlgmr.msra.gmra.mxu1 %v11299_v14  ;;  %p15738_p7 = por %p15737_p6, %p15736_p5 }
0x10ee   :  { %13295 = vmatpush3.bf16.msra.mxu0 %v15156_v29  ;;  %11291 = vmatprep.mubr.bf16.mxu0 %v10611_v7 }
0x10ef   :  { %13296 = vmatprep.subr.bf16.mxu0 %v15157_v12  ;;  %13409 = vmatprep.mubr.msk.bf16.mxu1 %vm15815_vm0, %v15814_v0  ;;  %p15739_p8 = pnand %p15738_p7, %p15732_p4 }
0x10f0   :  { %13394 = vmatpush3.bf16.msra.mxu1 %v15203_v32 }
0x10f1   :  { %13395 = vmatprep.subr.bf16.mxu1 %v15814_v0 }
0x10f2   :  { %13297 = vmatpush3.bf16.msra.mxu0 %v15158_v27 }
0x10f3   :  { %13298 = vmatprep.subr.bf16.mxu0 %v15159_v61 }
0x10f4   :  { %13396 = vmatpush3.bf16.msra.mxu1 %v15204_v34 }
0x10f5   :  { %13397 = vmatprep.subr.bf16.mxu1 %v15814_v0 }
0x10f6   :  { %13299 = vmatpush3.bf16.msra.mxu0 %v15160_v19 }
0x10f7   :  { %13300 = vmatprep.subr.bf16.mxu0 %v15161_v30  ;;  %v12978_v30 = vld [vmem:[#allocation37] ss:$0 sm:$0xff] }
0x10f8   :  { %13398 = vmatpush3.bf16.msra.mxu1 %v15205_v62 }
0x10f9   :  { %13399 = vmatprep.subr.bf16.mxu1 %v15814_v0 }
0x10fa   :  { %13301 = vmatpush3.bf16.msra.mxu0 %v15162_v48 }
0x10fb   :  { %13302 = vmatprep.subr.bf16.mxu0 %v15163_v16 }
0x10fc   :  { %13400 = vmatpush3.bf16.msra.mxu1 %v15206_v50 }
0x10fd   :  { %13401 = vmatprep.subr.bf16.mxu1 %v15814_v0 }
0x10fe   :  { %13303 = vmatpush3.bf16.msra.mxu0 %v15164_v41 }
0x10ff   :  { %13304 = vmatprep.subr.bf16.mxu0 %v15165_v33 }
0x1100   :  { %13402 = vmatpush3.bf16.msra.mxu1 %v15207_v57 }
0x1101   :  { %13403 = vmatprep.subr.bf16.mxu1 %v15814_v0 }
0x1102   :  { %13305 = vmatpush3.bf16.msra.mxu0 %v15166_v35 }
0x1103   :  { %13306 = vmatprep.subr.bf16.mxu0 %v15167_v36 }
0x1104   :  { %13404 = vmatpush3.bf16.msra.mxu1 %v15208_v17 }
0x1105   :  { %13405 = vmatprep.subr.bf16.mxu1 %v15814_v0 }
0x1106   :  { %13307 = vmatpush3.bf16.msra.mxu0 %v15168_v8 }
0x1107   :  { %13308 = vmatprep.subr.bf16.mxu0 %v15169_v28  ;;  %v11301_v28 = vpack.c.bf16 %v8526_v22, %v8526_v22 }
0x1108   :  { %13406 = vmatpush3.bf16.msra.mxu1 %v15209_v26 }
0x1109   :  { %13407 = vmatprep.subr.bf16.mxu1 %v15814_v0 }
0x110a   :  { %13309 = vmatpush3.bf16.msra.mxu0 %v15170_v49 }
0x110b   :  { %13338 = vmatprep.subr.bf16.mxu0 %v15177_v45 }
0x110c   :  { %13408 = vmatpush3.bf16.msra.mxu1 %v15210_v53 }
0x110d   :  { %11292 = vmatmul.mubr.bf16.vlgmr.msra.gmra.mxu0 %v10610_v1 }
0x110e   :  { %13339 = vmatpush3.bf16.msra.mxu0 %v15178_v47 }
0x110f   :  { %13340 = vmatprep.subr.bf16.mxu0 %v15181_v58 }
0x1112   :  { %13341 = vmatpush3.bf16.msra.mxu0 %v15182_v46 }
0x1113   :  { %13342 = vmatprep.subr.bf16.mxu0 %v15185_v42 }
0x1116   :  { %13343 = vmatpush3.bf16.msra.mxu0 %v15186_v52 }
0x1117   :  { %13344 = vmatprep.subr.bf16.mxu0 %v15189_v13 }
0x111a   :  { %13345 = vmatpush3.bf16.msra.mxu0 %v15190_v21  ;;  %v13044_v21 = vld [vmem:[#allocation41] ss:$0 sm:$0xff] }
0x111b   :  { %13346 = vmatprep.subr.bf16.mxu0 %v15193_v63 }
0x111e   :  { %13347 = vmatpush3.bf16.msra.mxu0 %v15194_v2 }
0x111f   :  { %13348 = vmatprep.subr.bf16.mxu0 %v15197_v10 }
0x1122   :  { %13349 = vmatpush3.bf16.msra.mxu0 %v15198_v9 }
0x1123   :  { %13350 = vmatprep.subr.bf16.mxu0 %v15199_v56 }
0x1126   :  { %13351 = vmatpush3.bf16.msra.mxu0 %v15200_v24 }
0x1127   :  { %13352 = vmatprep.subr.bf16.mxu0 %v15201_v3 }
0x112a   :  { %13353 = vmatpush3.bf16.msra.mxu0 %v15202_v6 }
0x116d   :  { %v13244_v15 = vpop.f32.mrf.mxu1 }
0x116f   :  { %v13245_v5 = vpop.f32.mrf.mxu1 }
0x1170   :  { %v13246_v19 = vadd.f32 %v13245_v5, %v13244_v15 }
0x1171   :  { %v13247_v7 = vpop.f32.mrf.mxu1 }
0x1172   :  { %v10910_v41 = vadd.f32 %v13246_v19, %v12978_v30 }
0x1173   :  { %v13248_v29 = vpop.f32.mrf.mxu1 }
0x118d   :  { %v13288_v1 = vpop.f32.mrf.mxu1 }
0x118f   :  { %v13289_v12 = vpop.f32.mrf.mxu1 }
0x1190   :  { %v13290_v18 = vadd.f32 %v13289_v12, %v13288_v1 }
0x1191   :  { %v13291_v27 = vpop.f32.mrf.mxu1 }
0x1192   :  { %v11254_v40 = vadd.f32 %v13290_v18, %v13011_v38 }
0x1193   :  { %v13292_v61 = vpop.f32.mrf.mxu1 }
0x11ad   :  { %v13266_v48 = vpop.f32.mrf.mxu0  ;;  %v13332_v60 = vpop.f32.mrf.mxu1 }
0x11af   :  { %v13267_v16 = vpop.f32.mrf.mxu0  ;;  %v13333_v42 = vpop.f32.mrf.mxu1 }
0x11b0   :  { %v13268_v33 = vadd.f32 %v13267_v16, %v13266_v48  ;;  %v13334_v51 = vadd.f32 %v13333_v42, %v13332_v60 }
0x11b1   :  { %v13269_v0 = vpop.f32.mrf.mxu0  ;;  %v13335_v55 = vpop.f32.mrf.mxu1 }
0x11b2   :  { %v10950_v35 = vadd.f32 %v13268_v33, %v10910_v41  ;;  %v11666_v63 = vadd.f32 %v13334_v51, %v13044_v21 }
0x11b3   :  { %v13270_v36 = vpop.f32.mrf.mxu0  ;;  %v13336_v52 = vpop.f32.mrf.mxu1 }
0x11b4   :  { %v10955_v8 = vmax.f32 %v10950_v35, 0.0 }
0x11b6   :  { %v11302_v49 = vpack.c.bf16 %v10955_v8, %v10955_v8 }
0x11b8   :  { %11703 = vmatprep.mubr.bf16.mxu0 %v11302_v49 }
0x11b9   :  { %11704 = vmatmul.mubr.bf16.vlgmr.msra.gmra.mxu0 %v11301_v28 }
0x11cd   :  { %v13310_v39 = vpop.f32.mrf.mxu0 }
0x11cf   :  { %v13311_v54 = vpop.f32.mrf.mxu0 }
0x11d0   :  { %v13312_v45 = vadd.f32 %v13311_v54, %v13310_v39 }
0x11d1   :  { %v13313_v47 = vpop.f32.mrf.mxu0 }
0x11d2   :  { %v11294_v58 = vadd.f32 %v13312_v45, %v11254_v40 }
0x11d3   :  { %v13314_v4 = vpop.f32.mrf.mxu0 }
0x11d4   :  { %v11303_v46 = vpack.c.bf16 %v11294_v58, %v11294_v58 }
0x11d6   :  { %13410 = vmatmul.mubr.bf16.vlgmr.msra.gmra.mxu1 %v11303_v46 }
0x1279   :  { %v13354_v22 = vpop.f32.mrf.mxu0 }
0x127b   :  { %v13355_v44 = vpop.f32.mrf.mxu0 }
0x127c   :  { %v13356_v59 = vadd.f32 %v13355_v44, %v13354_v22 }
0x127d   :  { %v13357_v13 = vpop.f32.mrf.mxu0 }
0x127e   :  { %v11706_v37 = vadd.f32 %v13356_v59, %v11666_v63 }
0x127f   :  { %v13358_v20 = vpop.f32.mrf.mxu0 }
0x1296   :  { %v11745_v2 = vpop.f32.mrf.mxu1 }
0x1297   :  { %v11746_v43 = vadd.f32 %v11745_v2, %v11706_v37 }
0x1298   :  { %v13411_v25 = vpop.f32.mrf.mxu1 }
0x1299   :  { %11752 = vst.msk [vmem:[#allocation43] sm:$0x3] %vm11751_vm7, %v11746_v43 }
0x129a   :  { %v11748_v31 = vpop.f32.mrf.mxu1 }
0x129b   :  { %15742 = shalt.err (!%p15739_p8)
}
0x129c   :  { %s16677_s18 = sld [smem:[#allocation79_spill]]  ;;  %v13412_v11 = vpop.f32.mrf.mxu1 }
0x12a2   :  { %11762 = dma.vmem_to_hbm [thread:$0]  %s11760_s2, 32, %s16677_s18, [#allocation7]  }
0x12a3   :  { %15781 = dma.done.wait [#allocation7], 32  }
0x12a4   :  { %15782 = vsyncadd [#allocation7], 4294967264 }
0x12a5   :  { %11766 = vsyncpa [#allocation6], 1 }
0x12a6   :  { %11767 = vsyncpa [#allocation9], 1 }
0x12a7   :  { %11768 = vsyncpa [#allocation12], 1 }
0x12a8   :  { %11769 = vsyncpa [#allocation15], 1 }
0x12a9   :  { %11770 = vsyncpa [#allocation18], 1 }
0x12aa   :  { %11771 = vsyncpa [#allocation21], 1 }
0x12ab   :  { %11772 = vsyncpa [#allocation24], 1 }
0x12ac   :  { %11773 = vsyncpa [#allocation27], 1 }
0x12ad   :  { %11774 = vsyncpa [#allocation30], 1 }
0x12ae   :  { %11775 = vsyncpa [#allocation33], 1 }
0x12af   :  { %11776 = vsyncpa [#allocation36], 1 }
0x12b0   :  { %11777 = vsyncpa [#allocation39], 1 }
0x12b1   :  { %11778 = vsyncpa [#allocation42], 1 }
0x12b2   :  { %11779 = vsyncpa [#allocation7], 1 }
0x12b3   :  { %11780 = vsyncmov [#allocation4] }
0x12b6   :  { %s11781_s29 = vpop.sfrf %11780 }
0x12b7   :  { %p13085_p9 = scmp.ne.s32.totalorder %s11781_s29, 0 }
0x12b9   :  { %11785 = shalt.err (%p13085_p9)  }
0x12ba   :  { %11787 = vsyncmov [#allocation4 + $0x1] }
0x12bd   :  { %s11788_s15 = vpop.sfrf %11787 }
0x12be   :  { %p13086_p10 = scmp.ne.s32.totalorder %s11788_s15, 0 }
0x12c0   :  { %11792 = shalt.err (%p13086_p10)  }

</bundles_post_ra>
